<compile_context>
chip_gen: v7x
topology: tpu7x:2x2x1
jax: 0.10.0
libtpu: 0.0.40
codegen_flags: <defaults>
</compile_context>

<pallas_src>
import functools

import jax
import jax.numpy as jnp
import numpy as np
from jax import lax
from jax.experimental import pallas as pl
from jax.experimental.pallas import tpu as pltpu


# Interior column offset inside the halo scratch.  16 is a multiple of the
# bf16 sublane tile (16 rows), so the big interior store is tile-aligned.
_WOFF = 16


# ----------------------------------------------------------------------------
# Fused kernel: one batch image per grid step.
#   x_ref:    (1, H*W, Cin)  f32   input image (channels-last, rows flattened)
#   w1_ref:   (Cin, C)       f32   1x1 conv weight
#   s1/b1:    (1, C)         f32   folded BN scale/bias (stage 1)
#   w3_ref:   (3, 3, C, C)   bf16  3x3 conv weight [kh, kw, cin, cout]
#   s3/b3:    (1, C)         f32   folded BN scale/bias (stage 2)
#   p_ref:    (1, H*W, C)    f32   stage-1 output (returned as `p`)
#   out_ref:  (1, H*W, C)    f32   stage-2 output (returned as `out`)
#   ppad_ref: (H+2, W+17, C) bf16  VMEM scratch holding zero-bordered p
# ----------------------------------------------------------------------------
def _fpn_fused_kernel(x_ref, w1_ref, s1_ref, b1_ref, w3_ref, s3_ref, b3_ref,
                      p_ref, out_ref, ppad_ref, *, H, W, TH, Cin_small):
    C = out_ref.shape[-1]

    # ---- stage 1: 1x1 conv (== channel matmul), fused BN + ReLU ------------
    x = x_ref[0]                                           # (H*W, Cin) f32
    if Cin_small:
        # Tiny Cin (e.g. 4): Cin broadcast multiply-adds on the VPU; a K=4
        # MXU matmul would waste >98% of the MXU K dimension.
        acc1 = x[:, 0:1] * w1_ref[0:1, :]
        for c in range(1, x.shape[-1]):
            acc1 = acc1 + x[:, c:c + 1] * w1_ref[c:c + 1, :]
    else:
        acc1 = jnp.dot(x, w1_ref[...], preferred_element_type=jnp.float32)
    p = jnp.maximum(acc1 * s1_ref[...] + b1_ref[...], 0.0)  # (H*W, C) f32
    p_ref[0, :, :] = p.astype(p_ref.dtype)

    # ---- halo: zero ONLY the 1-px border, then store the interior ----------
    # (per-iteration so it is correct under megacore grid sharding)
    zdt = ppad_ref.dtype
    ppad_ref[0, _WOFF - 1:_WOFF + W + 1, :] = jnp.zeros((W + 2, C), zdt)
    ppad_ref[H + 1, _WOFF - 1:_WOFF + W + 1, :] = jnp.zeros((W + 2, C), zdt)
    ppad_ref[1:H + 1, _WOFF - 1:_WOFF, :] = jnp.zeros((H, 1, C), zdt)
    ppad_ref[1:H + 1, _WOFF + W:_WOFF + W + 1, :] = jnp.zeros((H, 1, C), zdt)
    # Interior store: bf16 cast once, column offset 16 -> tile-aligned store.
    ppad_ref[1:H + 1, _WOFF:_WOFF + W, :] = p.astype(zdt).reshape(H, W, C)

    # ---- stage 2: 3x3 conv as 9 bf16 channel-matmuls per row tile ----------
    # f32 register accumulation (TH*W <= 128 rows x 256 ch == 32 vregs),
    # fused BN + ReLU.  Row-tile loop is static (fully unrolled).
    s3 = s3_ref[...]
    b3 = b3_ref[...]
    for r0 in range(0, H, TH):
        acc = None
        for dy in range(3):
            for dx in range(3):
                xs = ppad_ref[r0 + dy:r0 + dy + TH,
                              _WOFF - 1 + dx:_WOFF - 1 + dx + W, :]
                tap = jnp.dot(xs.reshape(TH * W, C), w3_ref[dy, dx],
                              preferred_element_type=jnp.float32)
                acc = tap if acc is None else acc + tap
        y = jnp.maximum(acc * s3 + b3, 0.0)
        out_ref[0, r0 * W:(r0 + TH) * W, :] = y.astype(out_ref.dtype)


def _pick_row_tile(H, W, max_rows=128):
    """Largest divisor th of H with th*W <= max_rows (f32 acc <= 32 vregs).

    Falls back to th=1 when W > max_rows (accumulator may then spill; fine
    for correctness, revisit for very wide images).
    """
    best = 1
    for th in range(1, H + 1):
        if H % th == 0 and th * W <= max_rows:
            best = th
    return best


def fpn_layer_last_fused(x_nhwc, w1, scale1, bias1, w3, scale3, bias3):
    N, H, W, Cin = x_nhwc.shape
    C = w1.shape[1]
    TH = _pick_row_tile(H, W)
    Wpad = W + 17                    # [15]=left halo, [16:16+W]=interior, [16+W]=right halo
    x3 = x_nhwc.reshape(N, H * W, Cin)          # metadata-only reshape
    w3_bf16 = w3.astype(jnp.bfloat16)           # bf16 weights for the MXU fast path

    kernel = functools.partial(_fpn_fused_kernel, H=H, W=W, TH=TH,
                               Cin_small=(Cin <= 8))
    p3, out3 = pl.pallas_call(
        kernel,
        out_shape=(jax.ShapeDtypeStruct((N, H * W, C), x_nhwc.dtype),
                   jax.ShapeDtypeStruct((N, H * W, C), x_nhwc.dtype)),
        grid_spec=pltpu.PrefetchScalarGridSpec(
            num_scalar_prefetch=0,
            grid=(N,),
            in_specs=[
                pl.BlockSpec((1, H * W, Cin), lambda n: (n, 0, 0)),
                pl.BlockSpec((Cin, C), lambda n: (0, 0)),
                pl.BlockSpec((1, C), lambda n: (0, 0)),
                pl.BlockSpec((1, C), lambda n: (0, 0)),
                pl.BlockSpec((3, 3, C, C), lambda n: (0, 0, 0, 0)),
                pl.BlockSpec((1, C), lambda n: (0, 0)),
                pl.BlockSpec((1, C), lambda n: (0, 0)),
            ],
            out_specs=[
                pl.BlockSpec((1, H * W, C), lambda n: (n, 0, 0)),
                pl.BlockSpec((1, H * W, C), lambda n: (n, 0, 0)),
            ],
            scratch_shapes=[pltpu.VMEM((H + 2, Wpad, C), jnp.bfloat16)],
        ),
        compiler_params=pltpu.CompilerParams(
            dimension_semantics=("parallel",),
            vmem_limit_bytes=64 * 1024 * 1024),
    )(x3, w1, scale1.reshape(1, C), bias1.reshape(1, C),
      w3_bf16, scale3.reshape(1, C), bias3.reshape(1, C))

    return p3.reshape(N, H, W, C), out3.reshape(N, H, W, C)


# ----------------------------------------------------------------------------
# Module: parameter init + forward
# ----------------------------------------------------------------------------
def init_fpn_layer_last(key, inc, ouc=256, eps=1e-5):
    ks = jax.random.split(key, 8)
    params = {}
    # ConvFusionOne: Conv2d(inc, ouc, 1) + BN(ouc)
    params["w1"] = jax.random.normal(ks[0], (inc, ouc), jnp.float32) * 0.1
    params["b1"] = jax.random.normal(ks[1], (ouc,), jnp.float32) * 0.1
    g1 = 1.0 + 0.1 * jax.random.normal(ks[2], (ouc,), jnp.float32)
    be1 = 0.1 * jax.random.normal(ks[3], (ouc,), jnp.float32)
    m1 = 0.05 * jax.random.normal(ks[4], (ouc,), jnp.float32)
    v1 = jnp.abs(1.0 + 0.1 * jax.random.normal(ks[5], (ouc,), jnp.float32))
    s1 = g1 / jnp.sqrt(v1 + eps)
    params["scale1"] = s1
    params["bias1"] = be1 + s1 * (params["b1"] - m1)   # fold conv bias + BN

    # ConvFusionThree: Conv2d(256, 256, 3, pad=1) + BN(256)
    params["w3"] = jax.random.normal(ks[6], (3, 3, ouc, ouc), jnp.float32) * 0.05
    params["b3"] = jax.random.normal(ks[7], (ouc,), jnp.float32) * 0.1
    g3 = jnp.ones((ouc,), jnp.float32)
    be3 = jnp.zeros((ouc,), jnp.float32)
    m3 = jnp.zeros((ouc,), jnp.float32)
    v3 = jnp.ones((ouc,), jnp.float32)
    s3 = g3 / jnp.sqrt(v3 + eps)
    params["scale3"] = s3
    params["bias3"] = be3 + s3 * (params["b3"] - m3)
    return params


@jax.jit
def fpn_layer_last_forward(x_nchw, params):
    # NCHW (PyTorch) -> NHWC (kernel layout).  Kept only to match the
    # PyTorch interface; an NHWC consumer could drop both transposes
    # (they are full-tensor HBM round trips).
    x = jnp.transpose(x_nchw, (0, 2, 3, 1))
    p, out = fpn_layer_last_fused(
        x, params["w1"], params["scale1"], params["bias1"],
        params["w3"], params["scale3"], params["bias3"])
    return (jnp.transpose(p, (0, 3, 1, 2)),
            jnp.transpose(out, (0, 3, 1, 2)))


def _reference_forward(x_nchw, params):
    x = jnp.transpose(x_nchw, (0, 2, 3, 1))
    p = jnp.einsum("nhwc,co->nhwo", x, params["w1"])
    p = jnp.maximum(p * params["scale1"] + params["bias1"], 0.0)
    out = lax.conv_general_dilated(
        p, params["w3"], window_strides=(1, 1), padding="SAME",
        dimension_numbers=("NHWC", "HWIO", "NHWC"))
    out = jnp.maximum(out * params["scale3"] + params["bias3"], 0.0)
    return (jnp.transpose(p, (0, 3, 1, 2)),
            jnp.transpose(out, (0, 3, 1, 2)))


if __name__ == "__main__":
    key = jax.random.PRNGKey(0)
    k_x, k_p = jax.random.split(key)

    N, INC, H, W = 2, 4, 16, 16
    x = jax.random.normal(k_x, (N, INC, H, W), jnp.float32)
    params = init_fpn_layer_last(k_p, INC)

    p, out = fpn_layer_last_forward(x, params)
    jax.block_until_ready((p, out))

    p_ref, out_ref = _reference_forward(x, params)
    # p is computed fully in f32 (tight); out uses bf16 MXU operands with
    # f32 accumulation, so allow a small absolute slack.
    np.testing.assert_allclose(np.asarray(p), np.asarray(p_ref),
                               rtol=2e-2, atol=2e-2)
    np.testing.assert_allclose(np.asarray(out), np.asarray(out_ref),
                               rtol=2e-2, atol=3e-2)

    print("KERNEL_OK")
</pallas_src>

<mosaic_0001>
module attributes {stable_mosaic.version = 11 : i64} {
  func.func @_fpn_fused_kernel(%arg0: i32, %arg1: memref<1x256x4xf32, #tpu.memory_space<vmem>>, %arg2: memref<4x256xf32, #tpu.memory_space<vmem>>, %arg3: memref<1x256xf32, #tpu.memory_space<vmem>>, %arg4: memref<1x256xf32, #tpu.memory_space<vmem>>, %arg5: memref<3x3x256x256xbf16, #tpu.memory_space<vmem>>, %arg6: memref<1x256xf32, #tpu.memory_space<vmem>>, %arg7: memref<1x256xf32, #tpu.memory_space<vmem>>, %arg8: memref<1x256x256xf32, #tpu.memory_space<vmem>>, %arg9: memref<1x256x256xf32, #tpu.memory_space<vmem>>, %arg10: memref<18x33x256xbf16, #tpu.memory_space<vmem>>) attributes {dimension_semantics = [#tpu.dimension_semantics<parallel>], iteration_bounds = array<i64: 2>, scalar_prefetch = 0 : i64, scratch_operands = 1 : i64, tpu.core_type = #tpu.core_type<tc>, window_params = [{transform_indices = @transform_0, window_bounds = array<i64: 1, 256, 4>}, {pipeline_mode = #tpu.pipeline_mode<synchronous>, transform_indices = @transform_1, window_bounds = array<i64: 4, 256>}, {pipeline_mode = #tpu.pipeline_mode<synchronous>, transform_indices = @transform_2, window_bounds = array<i64: 1, 256>}, {pipeline_mode = #tpu.pipeline_mode<synchronous>, transform_indices = @transform_3, window_bounds = array<i64: 1, 256>}, {pipeline_mode = #tpu.pipeline_mode<synchronous>, transform_indices = @transform_4, window_bounds = array<i64: 3, 3, 256, 256>}, {pipeline_mode = #tpu.pipeline_mode<synchronous>, transform_indices = @transform_5, window_bounds = array<i64: 1, 256>}, {pipeline_mode = #tpu.pipeline_mode<synchronous>, transform_indices = @transform_6, window_bounds = array<i64: 1, 256>}, {transform_indices = @transform_7, window_bounds = array<i64: 1, 256, 256>}, {transform_indices = @transform_8, window_bounds = array<i64: 1, 256, 256>}]} {
    %c0 = arith.constant 0 : index
    %c0_0 = arith.constant 0 : index
    %c0_1 = arith.constant 0 : index
    %0 = vector.load %arg1[%c0, %c0_0, %c0_1] : memref<1x256x4xf32, #tpu.memory_space<vmem>>, vector<1x256x4xf32>
    %1 = vector.shape_cast %0 : vector<1x256x4xf32> to vector<256x4xf32>
    %2 = vector.extract_strided_slice %1 {offsets = [0, 0], sizes = [256, 1], strides = [1, 1]} : vector<256x4xf32> to vector<256x1xf32>
    %c0_2 = arith.constant 0 : index
    %c0_3 = arith.constant 0 : index
    %3 = vector.load %arg2[%c0_2, %c0_3] : memref<4x256xf32, #tpu.memory_space<vmem>>, vector<1x256xf32>
    %4 = vector.broadcast %2 : vector<256x1xf32> to vector<256x256xf32>
    %5 = vector.broadcast %3 : vector<1x256xf32> to vector<256x256xf32>
    %6 = arith.mulf %4, %5 : vector<256x256xf32>
    %7 = vector.extract_strided_slice %1 {offsets = [0, 1], sizes = [256, 1], strides = [1, 1]} : vector<256x4xf32> to vector<256x1xf32>
    %c1 = arith.constant 1 : index
    %c0_4 = arith.constant 0 : index
    %8 = vector.load %arg2[%c1, %c0_4] : memref<4x256xf32, #tpu.memory_space<vmem>>, vector<1x256xf32>
    %9 = vector.broadcast %7 : vector<256x1xf32> to vector<256x256xf32>
    %10 = vector.broadcast %8 : vector<1x256xf32> to vector<256x256xf32>
    %11 = arith.mulf %9, %10 : vector<256x256xf32>
    %12 = arith.addf %6, %11 : vector<256x256xf32>
    %13 = vector.extract_strided_slice %1 {offsets = [0, 2], sizes = [256, 1], strides = [1, 1]} : vector<256x4xf32> to vector<256x1xf32>
    %c2 = arith.constant 2 : index
    %c0_5 = arith.constant 0 : index
    %14 = vector.load %arg2[%c2, %c0_5] : memref<4x256xf32, #tpu.memory_space<vmem>>, vector<1x256xf32>
    %15 = vector.broadcast %13 : vector<256x1xf32> to vector<256x256xf32>
    %16 = vector.broadcast %14 : vector<1x256xf32> to vector<256x256xf32>
    %17 = arith.mulf %15, %16 : vector<256x256xf32>
    %18 = arith.addf %12, %17 : vector<256x256xf32>
    %19 = vector.extract_strided_slice %1 {offsets = [0, 3], sizes = [256, 1], strides = [1, 1]} : vector<256x4xf32> to vector<256x1xf32>
    %c3 = arith.constant 3 : index
    %c0_6 = arith.constant 0 : index
    %20 = vector.load %arg2[%c3, %c0_6] : memref<4x256xf32, #tpu.memory_space<vmem>>, vector<1x256xf32>
    %21 = vector.broadcast %19 : vector<256x1xf32> to vector<256x256xf32>
    %22 = vector.broadcast %20 : vector<1x256xf32> to vector<256x256xf32>
    %23 = arith.mulf %21, %22 : vector<256x256xf32>
    %24 = arith.addf %18, %23 : vector<256x256xf32>
    %c0_7 = arith.constant 0 : index
    %c0_8 = arith.constant 0 : index
    %25 = vector.load %arg3[%c0_7, %c0_8] : memref<1x256xf32, #tpu.memory_space<vmem>>, vector<1x256xf32>
    %26 = vector.broadcast %25 : vector<1x256xf32> to vector<256x256xf32>
    %27 = arith.mulf %24, %26 : vector<256x256xf32>
    %c0_9 = arith.constant 0 : index
    %c0_10 = arith.constant 0 : index
    %28 = vector.load %arg4[%c0_9, %c0_10] : memref<1x256xf32, #tpu.memory_space<vmem>>, vector<1x256xf32>
    %29 = vector.broadcast %28 : vector<1x256xf32> to vector<256x256xf32>
    %30 = arith.addf %27, %29 : vector<256x256xf32>
    %cst = arith.constant 0.000000e+00 : f32
    %31 = vector.broadcast %cst : f32 to vector<256x256xf32>
    %32 = arith.maximumf %30, %31 : vector<256x256xf32>
    %c0_11 = arith.constant 0 : index
    %c0_12 = arith.constant 0 : index
    %c0_13 = arith.constant 0 : index
    %33 = vector.load %arg8[%c0_11, %c0_12, %c0_13] : memref<1x256x256xf32, #tpu.memory_space<vmem>>, vector<1x256x256xf32>
    %34 = vector.shape_cast %33 : vector<1x256x256xf32> to vector<256x256xf32>
    %35 = vector.shape_cast %32 : vector<256x256xf32> to vector<1x256x256xf32>
    tpu.vector_store %arg8[%c0_11, %c0_12, %c0_13], %35 {strides = array<i32>} : memref<1x256x256xf32, #tpu.memory_space<vmem>>, vector<1x256x256xf32>,
    %cst_14 = arith.constant 0.000000e+00 : bf16
    %36 = vector.broadcast %cst_14 : bf16 to vector<18x256xbf16>
    %c0_15 = arith.constant 0 : index
    %c15 = arith.constant 15 : index
    %c0_16 = arith.constant 0 : index
    %37 = vector.load %arg10[%c0_15, %c15, %c0_16] : memref<18x33x256xbf16, #tpu.memory_space<vmem>>, vector<1x18x256xbf16>
    %38 = vector.shape_cast %37 : vector<1x18x256xbf16> to vector<18x256xbf16>
    %39 = vector.shape_cast %36 : vector<18x256xbf16> to vector<1x18x256xbf16>
    tpu.vector_store %arg10[%c0_15, %c15, %c0_16], %39 {strides = array<i32>} : memref<18x33x256xbf16, #tpu.memory_space<vmem>>, vector<1x18x256xbf16>,
    %cst_17 = arith.constant 0.000000e+00 : bf16
    %40 = vector.broadcast %cst_17 : bf16 to vector<18x256xbf16>
    %c17 = arith.constant 17 : index
    %c15_18 = arith.constant 15 : index
    %c0_19 = arith.constant 0 : index
    %41 = vector.load %arg10[%c17, %c15_18, %c0_19] : memref<18x33x256xbf16, #tpu.memory_space<vmem>>, vector<1x18x256xbf16>
    %42 = vector.shape_cast %41 : vector<1x18x256xbf16> to vector<18x256xbf16>
    %43 = vector.shape_cast %40 : vector<18x256xbf16> to vector<1x18x256xbf16>
    tpu.vector_store %arg10[%c17, %c15_18, %c0_19], %43 {strides = array<i32>} : memref<18x33x256xbf16, #tpu.memory_space<vmem>>, vector<1x18x256xbf16>,
    %cst_20 = arith.constant 0.000000e+00 : bf16
    %44 = vector.broadcast %cst_20 : bf16 to vector<16x1x256xbf16>
    %c1_21 = arith.constant 1 : index
    %c15_22 = arith.constant 15 : index
    %c0_23 = arith.constant 0 : index
    %45 = vector.load %arg10[%c1_21, %c15_22, %c0_23] : memref<18x33x256xbf16, #tpu.memory_space<vmem>>, vector<16x1x256xbf16>
    tpu.vector_store %arg10[%c1_21, %c15_22, %c0_23], %44 {strides = array<i32>} : memref<18x33x256xbf16, #tpu.memory_space<vmem>>, vector<16x1x256xbf16>,
    %cst_24 = arith.constant 0.000000e+00 : bf16
    %46 = vector.broadcast %cst_24 : bf16 to vector<16x1x256xbf16>
    %c1_25 = arith.constant 1 : index
    %c32 = arith.constant 32 : index
    %c0_26 = arith.constant 0 : index
    %47 = vector.load %arg10[%c1_25, %c32, %c0_26] : memref<18x33x256xbf16, #tpu.memory_space<vmem>>, vector<16x1x256xbf16>
    tpu.vector_store %arg10[%c1_25, %c32, %c0_26], %46 {strides = array<i32>} : memref<18x33x256xbf16, #tpu.memory_space<vmem>>, vector<16x1x256xbf16>,
    %48 = arith.truncf %32 : vector<256x256xf32> to vector<256x256xbf16>
    %49 = vector.shape_cast %48 : vector<256x256xbf16> to vector<16x16x256xbf16>
    %c1_27 = arith.constant 1 : index
    %c16 = arith.constant 16 : index
    %c0_28 = arith.constant 0 : index
    %50 = vector.load %arg10[%c1_27, %c16, %c0_28] : memref<18x33x256xbf16, #tpu.memory_space<vmem>>, vector<16x16x256xbf16>
    tpu.vector_store %arg10[%c1_27, %c16, %c0_28], %49 {strides = array<i32>} : memref<18x33x256xbf16, #tpu.memory_space<vmem>>, vector<16x16x256xbf16>,
    %c0_29 = arith.constant 0 : index
    %c0_30 = arith.constant 0 : index
    %51 = vector.load %arg6[%c0_29, %c0_30] : memref<1x256xf32, #tpu.memory_space<vmem>>, vector<1x256xf32>
    %c0_31 = arith.constant 0 : index
    %c0_32 = arith.constant 0 : index
    %52 = vector.load %arg7[%c0_31, %c0_32] : memref<1x256xf32, #tpu.memory_space<vmem>>, vector<1x256xf32>
    %c0_33 = arith.constant 0 : index
    %c15_34 = arith.constant 15 : index
    %c0_35 = arith.constant 0 : index
    %53 = vector.load %arg10[%c0_33, %c15_34, %c0_35] : memref<18x33x256xbf16, #tpu.memory_space<vmem>>, vector<8x16x256xbf16>
    %54 = vector.shape_cast %53 : vector<8x16x256xbf16> to vector<128x256xbf16>
    %c0_36 = arith.constant 0 : index
    %c0_37 = arith.constant 0 : index
    %c0_38 = arith.constant 0 : index
    %c0_39 = arith.constant 0 : index
    %55 = vector.load %arg5[%c0_36, %c0_37, %c0_38, %c0_39] : memref<3x3x256x256xbf16, #tpu.memory_space<vmem>>, vector<1x1x256x256xbf16>
    %56 = vector.shape_cast %55 : vector<1x1x256x256xbf16> to vector<256x256xbf16>
    %cst_40 = arith.constant dense<0.000000e+00> : vector<128x256xf32>
    %57 = tpu.matmul %54, %56, %cst_40 {dimension_numbers = #tpu.dot_dimension_numbers<[1], [0], [0], [1], [0, 0, 1, 1], [], []>} : vector<128x256xbf16>, vector<256x256xbf16>, vector<128x256xf32> -> vector<128x256xf32>
    %c0_41 = arith.constant 0 : index
    %c16_42 = arith.constant 16 : index
    %c0_43 = arith.constant 0 : index
    %58 = vector.load %arg10[%c0_41, %c16_42, %c0_43] : memref<18x33x256xbf16, #tpu.memory_space<vmem>>, vector<8x16x256xbf16>
    %59 = vector.shape_cast %58 : vector<8x16x256xbf16> to vector<128x256xbf16>
    %c0_44 = arith.constant 0 : index
    %c1_45 = arith.constant 1 : index
    %c0_46 = arith.constant 0 : index
    %c0_47 = arith.constant 0 : index
    %60 = vector.load %arg5[%c0_44, %c1_45, %c0_46, %c0_47] : memref<3x3x256x256xbf16, #tpu.memory_space<vmem>>, vector<1x1x256x256xbf16>
    %61 = vector.shape_cast %60 : vector<1x1x256x256xbf16> to vector<256x256xbf16>
    %cst_48 = arith.constant dense<0.000000e+00> : vector<128x256xf32>
    %62 = tpu.matmul %59, %61, %cst_48 {dimension_numbers = #tpu.dot_dimension_numbers<[1], [0], [0], [1], [0, 0, 1, 1], [], []>} : vector<128x256xbf16>, vector<256x256xbf16>, vector<128x256xf32> -> vector<128x256xf32>
    %63 = arith.addf %57, %62 : vector<128x256xf32>
    %c0_49 = arith.constant 0 : index
    %c17_50 = arith.constant 17 : index
    %c0_51 = arith.constant 0 : index
    %64 = vector.load %arg10[%c0_49, %c17_50, %c0_51] : memref<18x33x256xbf16, #tpu.memory_space<vmem>>, vector<8x16x256xbf16>
    %65 = vector.shape_cast %64 : vector<8x16x256xbf16> to vector<128x256xbf16>
    %c0_52 = arith.constant 0 : index
    %c2_53 = arith.constant 2 : index
    %c0_54 = arith.constant 0 : index
    %c0_55 = arith.constant 0 : index
    %66 = vector.load %arg5[%c0_52, %c2_53, %c0_54, %c0_55] : memref<3x3x256x256xbf16, #tpu.memory_space<vmem>>, vector<1x1x256x256xbf16>
    %67 = vector.shape_cast %66 : vector<1x1x256x256xbf16> to vector<256x256xbf16>
    %cst_56 = arith.constant dense<0.000000e+00> : vector<128x256xf32>
    %68 = tpu.matmul %65, %67, %cst_56 {dimension_numbers = #tpu.dot_dimension_numbers<[1], [0], [0], [1], [0, 0, 1, 1], [], []>} : vector<128x256xbf16>, vector<256x256xbf16>, vector<128x256xf32> -> vector<128x256xf32>
    %69 = arith.addf %63, %68 : vector<128x256xf32>
    %c1_57 = arith.constant 1 : index
    %c15_58 = arith.constant 15 : index
    %c0_59 = arith.constant 0 : index
    %70 = vector.load %arg10[%c1_57, %c15_58, %c0_59] : memref<18x33x256xbf16, #tpu.memory_space<vmem>>, vector<8x16x256xbf16>
    %71 = vector.shape_cast %70 : vector<8x16x256xbf16> to vector<128x256xbf16>
    %c1_60 = arith.constant 1 : index
    %c0_61 = arith.constant 0 : index
    %c0_62 = arith.constant 0 : index
    %c0_63 = arith.constant 0 : index
    %72 = vector.load %arg5[%c1_60, %c0_61, %c0_62, %c0_63] : memref<3x3x256x256xbf16, #tpu.memory_space<vmem>>, vector<1x1x256x256xbf16>
    %73 = vector.shape_cast %72 : vector<1x1x256x256xbf16> to vector<256x256xbf16>
    %cst_64 = arith.constant dense<0.000000e+00> : vector<128x256xf32>
    %74 = tpu.matmul %71, %73, %cst_64 {dimension_numbers = #tpu.dot_dimension_numbers<[1], [0], [0], [1], [0, 0, 1, 1], [], []>} : vector<128x256xbf16>, vector<256x256xbf16>, vector<128x256xf32> -> vector<128x256xf32>
    %75 = arith.addf %69, %74 : vector<128x256xf32>
    %c1_65 = arith.constant 1 : index
    %c16_66 = arith.constant 16 : index
    %c0_67 = arith.constant 0 : index
    %76 = vector.load %arg10[%c1_65, %c16_66, %c0_67] : memref<18x33x256xbf16, #tpu.memory_space<vmem>>, vector<8x16x256xbf16>
    %77 = vector.shape_cast %76 : vector<8x16x256xbf16> to vector<128x256xbf16>
    %c1_68 = arith.constant 1 : index
    %c1_69 = arith.constant 1 : index
    %c0_70 = arith.constant 0 : index
    %c0_71 = arith.constant 0 : index
    %78 = vector.load %arg5[%c1_68, %c1_69, %c0_70, %c0_71] : memref<3x3x256x256xbf16, #tpu.memory_space<vmem>>, vector<1x1x256x256xbf16>
    %79 = vector.shape_cast %78 : vector<1x1x256x256xbf16> to vector<256x256xbf16>
    %cst_72 = arith.constant dense<0.000000e+00> : vector<128x256xf32>
    %80 = tpu.matmul %77, %79, %cst_72 {dimension_numbers = #tpu.dot_dimension_numbers<[1], [0], [0], [1], [0, 0, 1, 1], [], []>} : vector<128x256xbf16>, vector<256x256xbf16>, vector<128x256xf32> -> vector<128x256xf32>
    %81 = arith.addf %75, %80 : vector<128x256xf32>
    %c1_73 = arith.constant 1 : index
    %c17_74 = arith.constant 17 : index
    %c0_75 = arith.constant 0 : index
    %82 = vector.load %arg10[%c1_73, %c17_74, %c0_75] : memref<18x33x256xbf16, #tpu.memory_space<vmem>>, vector<8x16x256xbf16>
    %83 = vector.shape_cast %82 : vector<8x16x256xbf16> to vector<128x256xbf16>
    %c1_76 = arith.constant 1 : index
    %c2_77 = arith.constant 2 : index
    %c0_78 = arith.constant 0 : index
    %c0_79 = arith.constant 0 : index
    %84 = vector.load %arg5[%c1_76, %c2_77, %c0_78, %c0_79] : memref<3x3x256x256xbf16, #tpu.memory_space<vmem>>, vector<1x1x256x256xbf16>
    %85 = vector.shape_cast %84 : vector<1x1x256x256xbf16> to vector<256x256xbf16>
    %cst_80 = arith.constant dense<0.000000e+00> : vector<128x256xf32>
    %86 = tpu.matmul %83, %85, %cst_80 {dimension_numbers = #tpu.dot_dimension_numbers<[1], [0], [0], [1], [0, 0, 1, 1], [], []>} : vector<128x256xbf16>, vector<256x256xbf16>, vector<128x256xf32> -> vector<128x256xf32>
    %87 = arith.addf %81, %86 : vector<128x256xf32>
    %c2_81 = arith.constant 2 : index
    %c15_82 = arith.constant 15 : index
    %c0_83 = arith.constant 0 : index
    %88 = vector.load %arg10[%c2_81, %c15_82, %c0_83] : memref<18x33x256xbf16, #tpu.memory_space<vmem>>, vector<8x16x256xbf16>
    %89 = vector.shape_cast %88 : vector<8x16x256xbf16> to vector<128x256xbf16>
    %c2_84 = arith.constant 2 : index
    %c0_85 = arith.constant 0 : index
    %c0_86 = arith.constant 0 : index
    %c0_87 = arith.constant 0 : index
    %90 = vector.load %arg5[%c2_84, %c0_85, %c0_86, %c0_87] : memref<3x3x256x256xbf16, #tpu.memory_space<vmem>>, vector<1x1x256x256xbf16>
    %91 = vector.shape_cast %90 : vector<1x1x256x256xbf16> to vector<256x256xbf16>
    %cst_88 = arith.constant dense<0.000000e+00> : vector<128x256xf32>
    %92 = tpu.matmul %89, %91, %cst_88 {dimension_numbers = #tpu.dot_dimension_numbers<[1], [0], [0], [1], [0, 0, 1, 1], [], []>} : vector<128x256xbf16>, vector<256x256xbf16>, vector<128x256xf32> -> vector<128x256xf32>
    %93 = arith.addf %87, %92 : vector<128x256xf32>
    %c2_89 = arith.constant 2 : index
    %c16_90 = arith.constant 16 : index
    %c0_91 = arith.constant 0 : index
    %94 = vector.load %arg10[%c2_89, %c16_90, %c0_91] : memref<18x33x256xbf16, #tpu.memory_space<vmem>>, vector<8x16x256xbf16>
    %95 = vector.shape_cast %94 : vector<8x16x256xbf16> to vector<128x256xbf16>
    %c2_92 = arith.constant 2 : index
    %c1_93 = arith.constant 1 : index
    %c0_94 = arith.constant 0 : index
    %c0_95 = arith.constant 0 : index
    %96 = vector.load %arg5[%c2_92, %c1_93, %c0_94, %c0_95] : memref<3x3x256x256xbf16, #tpu.memory_space<vmem>>, vector<1x1x256x256xbf16>
    %97 = vector.shape_cast %96 : vector<1x1x256x256xbf16> to vector<256x256xbf16>
    %cst_96 = arith.constant dense<0.000000e+00> : vector<128x256xf32>
    %98 = tpu.matmul %95, %97, %cst_96 {dimension_numbers = #tpu.dot_dimension_numbers<[1], [0], [0], [1], [0, 0, 1, 1], [], []>} : vector<128x256xbf16>, vector<256x256xbf16>, vector<128x256xf32> -> vector<128x256xf32>
    %99 = arith.addf %93, %98 : vector<128x256xf32>
    %c2_97 = arith.constant 2 : index
    %c17_98 = arith.constant 17 : index
    %c0_99 = arith.constant 0 : index
    %100 = vector.load %arg10[%c2_97, %c17_98, %c0_99] : memref<18x33x256xbf16, #tpu.memory_space<vmem>>, vector<8x16x256xbf16>
    %101 = vector.shape_cast %100 : vector<8x16x256xbf16> to vector<128x256xbf16>
    %c2_100 = arith.constant 2 : index
    %c2_101 = arith.constant 2 : index
    %c0_102 = arith.constant 0 : index
    %c0_103 = arith.constant 0 : index
    %102 = vector.load %arg5[%c2_100, %c2_101, %c0_102, %c0_103] : memref<3x3x256x256xbf16, #tpu.memory_space<vmem>>, vector<1x1x256x256xbf16>
    %103 = vector.shape_cast %102 : vector<1x1x256x256xbf16> to vector<256x256xbf16>
    %cst_104 = arith.constant dense<0.000000e+00> : vector<128x256xf32>
    %104 = tpu.matmul %101, %103, %cst_104 {dimension_numbers = #tpu.dot_dimension_numbers<[1], [0], [0], [1], [0, 0, 1, 1], [], []>} : vector<128x256xbf16>, vector<256x256xbf16>, vector<128x256xf32> -> vector<128x256xf32>
    %105 = arith.addf %99, %104 : vector<128x256xf32>
    %106 = vector.broadcast %51 : vector<1x256xf32> to vector<128x256xf32>
    %107 = arith.mulf %105, %106 : vector<128x256xf32>
    %108 = vector.broadcast %52 : vector<1x256xf32> to vector<128x256xf32>
    %109 = arith.addf %107, %108 : vector<128x256xf32>
    %cst_105 = arith.constant 0.000000e+00 : f32
    %110 = vector.broadcast %cst_105 : f32 to vector<128x256xf32>
    %111 = arith.maximumf %109, %110 : vector<128x256xf32>
    %c0_106 = arith.constant 0 : index
    %c0_107 = arith.constant 0 : index
    %c0_108 = arith.constant 0 : index
    %112 = vector.load %arg9[%c0_106, %c0_107, %c0_108] : memref<1x256x256xf32, #tpu.memory_space<vmem>>, vector<1x128x256xf32>
    %113 = vector.shape_cast %112 : vector<1x128x256xf32> to vector<128x256xf32>
    %114 = vector.shape_cast %111 : vector<128x256xf32> to vector<1x128x256xf32>
    tpu.vector_store %arg9[%c0_106, %c0_107, %c0_108], %114 {strides = array<i32>} : memref<1x256x256xf32, #tpu.memory_space<vmem>>, vector<1x128x256xf32>,
    %c8 = arith.constant 8 : index
    %c15_109 = arith.constant 15 : index
    %c0_110 = arith.constant 0 : index
    %115 = vector.load %arg10[%c8, %c15_109, %c0_110] : memref<18x33x256xbf16, #tpu.memory_space<vmem>>, vector<8x16x256xbf16>
    %116 = vector.shape_cast %115 : vector<8x16x256xbf16> to vector<128x256xbf16>
    %c0_111 = arith.constant 0 : index
    %c0_112 = arith.constant 0 : index
    %c0_113 = arith.constant 0 : index
    %c0_114 = arith.constant 0 : index
    %117 = vector.load %arg5[%c0_111, %c0_112, %c0_113, %c0_114] : memref<3x3x256x256xbf16, #tpu.memory_space<vmem>>, vector<1x1x256x256xbf16>
    %118 = vector.shape_cast %117 : vector<1x1x256x256xbf16> to vector<256x256xbf16>
    %cst_115 = arith.constant dense<0.000000e+00> : vector<128x256xf32>
    %119 = tpu.matmul %116, %118, %cst_115 {dimension_numbers = #tpu.dot_dimension_numbers<[1], [0], [0], [1], [0, 0, 1, 1], [], []>} : vector<128x256xbf16>, vector<256x256xbf16>, vector<128x256xf32> -> vector<128x256xf32>
    %c8_116 = arith.constant 8 : index
    %c16_117 = arith.constant 16 : index
    %c0_118 = arith.constant 0 : index
    %120 = vector.load %arg10[%c8_116, %c16_117, %c0_118] : memref<18x33x256xbf16, #tpu.memory_space<vmem>>, vector<8x16x256xbf16>
    %121 = vector.shape_cast %120 : vector<8x16x256xbf16> to vector<128x256xbf16>
    %c0_119 = arith.constant 0 : index
    %c1_120 = arith.constant 1 : index
    %c0_121 = arith.constant 0 : index
    %c0_122 = arith.constant 0 : index
    %122 = vector.load %arg5[%c0_119, %c1_120, %c0_121, %c0_122] : memref<3x3x256x256xbf16, #tpu.memory_space<vmem>>, vector<1x1x256x256xbf16>
    %123 = vector.shape_cast %122 : vector<1x1x256x256xbf16> to vector<256x256xbf16>
    %cst_123 = arith.constant dense<0.000000e+00> : vector<128x256xf32>
    %124 = tpu.matmul %121, %123, %cst_123 {dimension_numbers = #tpu.dot_dimension_numbers<[1], [0], [0], [1], [0, 0, 1, 1], [], []>} : vector<128x256xbf16>, vector<256x256xbf16>, vector<128x256xf32> -> vector<128x256xf32>
    %125 = arith.addf %119, %124 : vector<128x256xf32>
    %c8_124 = arith.constant 8 : index
    %c17_125 = arith.constant 17 : index
    %c0_126 = arith.constant 0 : index
    %126 = vector.load %arg10[%c8_124, %c17_125, %c0_126] : memref<18x33x256xbf16, #tpu.memory_space<vmem>>, vector<8x16x256xbf16>
    %127 = vector.shape_cast %126 : vector<8x16x256xbf16> to vector<128x256xbf16>
    %c0_127 = arith.constant 0 : index
    %c2_128 = arith.constant 2 : index
    %c0_129 = arith.constant 0 : index
    %c0_130 = arith.constant 0 : index
    %128 = vector.load %arg5[%c0_127, %c2_128, %c0_129, %c0_130] : memref<3x3x256x256xbf16, #tpu.memory_space<vmem>>, vector<1x1x256x256xbf16>
    %129 = vector.shape_cast %128 : vector<1x1x256x256xbf16> to vector<256x256xbf16>
    %cst_131 = arith.constant dense<0.000000e+00> : vector<128x256xf32>
    %130 = tpu.matmul %127, %129, %cst_131 {dimension_numbers = #tpu.dot_dimension_numbers<[1], [0], [0], [1], [0, 0, 1, 1], [], []>} : vector<128x256xbf16>, vector<256x256xbf16>, vector<128x256xf32> -> vector<128x256xf32>
    %131 = arith.addf %125, %130 : vector<128x256xf32>
    %c9 = arith.constant 9 : index
    %c15_132 = arith.constant 15 : index
    %c0_133 = arith.constant 0 : index
    %132 = vector.load %arg10[%c9, %c15_132, %c0_133] : memref<18x33x256xbf16, #tpu.memory_space<vmem>>, vector<8x16x256xbf16>
    %133 = vector.shape_cast %132 : vector<8x16x256xbf16> to vector<128x256xbf16>
    %c1_134 = arith.constant 1 : index
    %c0_135 = arith.constant 0 : index
    %c0_136 = arith.constant 0 : index
    %c0_137 = arith.constant 0 : index
    %134 = vector.load %arg5[%c1_134, %c0_135, %c0_136, %c0_137] : memref<3x3x256x256xbf16, #tpu.memory_space<vmem>>, vector<1x1x256x256xbf16>
    %135 = vector.shape_cast %134 : vector<1x1x256x256xbf16> to vector<256x256xbf16>
    %cst_138 = arith.constant dense<0.000000e+00> : vector<128x256xf32>
    %136 = tpu.matmul %133, %135, %cst_138 {dimension_numbers = #tpu.dot_dimension_numbers<[1], [0], [0], [1], [0, 0, 1, 1], [], []>} : vector<128x256xbf16>, vector<256x256xbf16>, vector<128x256xf32> -> vector<128x256xf32>
    %137 = arith.addf %131, %136 : vector<128x256xf32>
    %c9_139 = arith.constant 9 : index
    %c16_140 = arith.constant 16 : index
    %c0_141 = arith.constant 0 : index
    %138 = vector.load %arg10[%c9_139, %c16_140, %c0_141] : memref<18x33x256xbf16, #tpu.memory_space<vmem>>, vector<8x16x256xbf16>
    %139 = vector.shape_cast %138 : vector<8x16x256xbf16> to vector<128x256xbf16>
    %c1_142 = arith.constant 1 : index
    %c1_143 = arith.constant 1 : index
    %c0_144 = arith.constant 0 : index
    %c0_145 = arith.constant 0 : index
    %140 = vector.load %arg5[%c1_142, %c1_143, %c0_144, %c0_145] : memref<3x3x256x256xbf16, #tpu.memory_space<vmem>>, vector<1x1x256x256xbf16>
    %141 = vector.shape_cast %140 : vector<1x1x256x256xbf16> to vector<256x256xbf16>
    %cst_146 = arith.constant dense<0.000000e+00> : vector<128x256xf32>
    %142 = tpu.matmul %139, %141, %cst_146 {dimension_numbers = #tpu.dot_dimension_numbers<[1], [0], [0], [1], [0, 0, 1, 1], [], []>} : vector<128x256xbf16>, vector<256x256xbf16>, vector<128x256xf32> -> vector<128x256xf32>
    %143 = arith.addf %137, %142 : vector<128x256xf32>
    %c9_147 = arith.constant 9 : index
    %c17_148 = arith.constant 17 : index
    %c0_149 = arith.constant 0 : index
    %144 = vector.load %arg10[%c9_147, %c17_148, %c0_149] : memref<18x33x256xbf16, #tpu.memory_space<vmem>>, vector<8x16x256xbf16>
    %145 = vector.shape_cast %144 : vector<8x16x256xbf16> to vector<128x256xbf16>
    %c1_150 = arith.constant 1 : index
    %c2_151 = arith.constant 2 : index
    %c0_152 = arith.constant 0 : index
    %c0_153 = arith.constant 0 : index
    %146 = vector.load %arg5[%c1_150, %c2_151, %c0_152, %c0_153] : memref<3x3x256x256xbf16, #tpu.memory_space<vmem>>, vector<1x1x256x256xbf16>
    %147 = vector.shape_cast %146 : vector<1x1x256x256xbf16> to vector<256x256xbf16>
    %cst_154 = arith.constant dense<0.000000e+00> : vector<128x256xf32>
    %148 = tpu.matmul %145, %147, %cst_154 {dimension_numbers = #tpu.dot_dimension_numbers<[1], [0], [0], [1], [0, 0, 1, 1], [], []>} : vector<128x256xbf16>, vector<256x256xbf16>, vector<128x256xf32> -> vector<128x256xf32>
    %149 = arith.addf %143, %148 : vector<128x256xf32>
    %c10 = arith.constant 10 : index
    %c15_155 = arith.constant 15 : index
    %c0_156 = arith.constant 0 : index
    %150 = vector.load %arg10[%c10, %c15_155, %c0_156] : memref<18x33x256xbf16, #tpu.memory_space<vmem>>, vector<8x16x256xbf16>
    %151 = vector.shape_cast %150 : vector<8x16x256xbf16> to vector<128x256xbf16>
    %c2_157 = arith.constant 2 : index
    %c0_158 = arith.constant 0 : index
    %c0_159 = arith.constant 0 : index
    %c0_160 = arith.constant 0 : index
    %152 = vector.load %arg5[%c2_157, %c0_158, %c0_159, %c0_160] : memref<3x3x256x256xbf16, #tpu.memory_space<vmem>>, vector<1x1x256x256xbf16>
    %153 = vector.shape_cast %152 : vector<1x1x256x256xbf16> to vector<256x256xbf16>
    %cst_161 = arith.constant dense<0.000000e+00> : vector<128x256xf32>
    %154 = tpu.matmul %151, %153, %cst_161 {dimension_numbers = #tpu.dot_dimension_numbers<[1], [0], [0], [1], [0, 0, 1, 1], [], []>} : vector<128x256xbf16>, vector<256x256xbf16>, vector<128x256xf32> -> vector<128x256xf32>
    %155 = arith.addf %149, %154 : vector<128x256xf32>
    %c10_162 = arith.constant 10 : index
    %c16_163 = arith.constant 16 : index
    %c0_164 = arith.constant 0 : index
    %156 = vector.load %arg10[%c10_162, %c16_163, %c0_164] : memref<18x33x256xbf16, #tpu.memory_space<vmem>>, vector<8x16x256xbf16>
    %157 = vector.shape_cast %156 : vector<8x16x256xbf16> to vector<128x256xbf16>
    %c2_165 = arith.constant 2 : index
    %c1_166 = arith.constant 1 : index
    %c0_167 = arith.constant 0 : index
    %c0_168 = arith.constant 0 : index
    %158 = vector.load %arg5[%c2_165, %c1_166, %c0_167, %c0_168] : memref<3x3x256x256xbf16, #tpu.memory_space<vmem>>, vector<1x1x256x256xbf16>
    %159 = vector.shape_cast %158 : vector<1x1x256x256xbf16> to vector<256x256xbf16>
    %cst_169 = arith.constant dense<0.000000e+00> : vector<128x256xf32>
    %160 = tpu.matmul %157, %159, %cst_169 {dimension_numbers = #tpu.dot_dimension_numbers<[1], [0], [0], [1], [0, 0, 1, 1], [], []>} : vector<128x256xbf16>, vector<256x256xbf16>, vector<128x256xf32> -> vector<128x256xf32>
    %161 = arith.addf %155, %160 : vector<128x256xf32>
    %c10_170 = arith.constant 10 : index
    %c17_171 = arith.constant 17 : index
    %c0_172 = arith.constant 0 : index
    %162 = vector.load %arg10[%c10_170, %c17_171, %c0_172] : memref<18x33x256xbf16, #tpu.memory_space<vmem>>, vector<8x16x256xbf16>
    %163 = vector.shape_cast %162 : vector<8x16x256xbf16> to vector<128x256xbf16>
    %c2_173 = arith.constant 2 : index
    %c2_174 = arith.constant 2 : index
    %c0_175 = arith.constant 0 : index
    %c0_176 = arith.constant 0 : index
    %164 = vector.load %arg5[%c2_173, %c2_174, %c0_175, %c0_176] : memref<3x3x256x256xbf16, #tpu.memory_space<vmem>>, vector<1x1x256x256xbf16>
    %165 = vector.shape_cast %164 : vector<1x1x256x256xbf16> to vector<256x256xbf16>
    %cst_177 = arith.constant dense<0.000000e+00> : vector<128x256xf32>
    %166 = tpu.matmul %163, %165, %cst_177 {dimension_numbers = #tpu.dot_dimension_numbers<[1], [0], [0], [1], [0, 0, 1, 1], [], []>} : vector<128x256xbf16>, vector<256x256xbf16>, vector<128x256xf32> -> vector<128x256xf32>
    %167 = arith.addf %161, %166 : vector<128x256xf32>
    %168 = vector.broadcast %51 : vector<1x256xf32> to vector<128x256xf32>
    %169 = arith.mulf %167, %168 : vector<128x256xf32>
    %170 = vector.broadcast %52 : vector<1x256xf32> to vector<128x256xf32>
    %171 = arith.addf %169, %170 : vector<128x256xf32>
    %cst_178 = arith.constant 0.000000e+00 : f32
    %172 = vector.broadcast %cst_178 : f32 to vector<128x256xf32>
    %173 = arith.maximumf %171, %172 : vector<128x256xf32>
    %c0_179 = arith.constant 0 : index
    %c128 = arith.constant 128 : index
    %c0_180 = arith.constant 0 : index
    %174 = vector.load %arg9[%c0_179, %c128, %c0_180] : memref<1x256x256xf32, #tpu.memory_space<vmem>>, vector<1x128x256xf32>
    %175 = vector.shape_cast %174 : vector<1x128x256xf32> to vector<128x256xf32>
    %176 = vector.shape_cast %173 : vector<128x256xf32> to vector<1x128x256xf32>
    tpu.vector_store %arg9[%c0_179, %c128, %c0_180], %176 {strides = array<i32>} : memref<1x256x256xf32, #tpu.memory_space<vmem>>, vector<1x128x256xf32>,
    return
  }
  func.func @transform_0(%arg0: i32) -> (i32, i32, i32) {
    %c0_i32 = arith.constant 0 : i32
    %c0_i32_0 = arith.constant 0 : i32
    %c0_i32_1 = arith.constant 0 : i32
    return %arg0, %c0_i32, %c0_i32_0 : i32, i32, i32
  }
  func.func @transform_1(%arg0: i32) -> (i32, i32) {
    %c0_i32 = arith.constant 0 : i32
    %c0_i32_0 = arith.constant 0 : i32
    %c0_i32_1 = arith.constant 0 : i32
    return %c0_i32, %c0_i32_0 : i32, i32
  }
  func.func @transform_2(%arg0: i32) -> (i32, i32) {
    %c0_i32 = arith.constant 0 : i32
    %c0_i32_0 = arith.constant 0 : i32
    %c0_i32_1 = arith.constant 0 : i32
    return %c0_i32, %c0_i32_0 : i32, i32
  }
  func.func @transform_3(%arg0: i32) -> (i32, i32) {
    %c0_i32 = arith.constant 0 : i32
    %c0_i32_0 = arith.constant 0 : i32
    %c0_i32_1 = arith.constant 0 : i32
    return %c0_i32, %c0_i32_0 : i32, i32
  }
  func.func @transform_4(%arg0: i32) -> (i32, i32, i32, i32) {
    %c0_i32 = arith.constant 0 : i32
    %c0_i32_0 = arith.constant 0 : i32
    %c0_i32_1 = arith.constant 0 : i32
    %c0_i32_2 = arith.constant 0 : i32
    %c0_i32_3 = arith.constant 0 : i32
    return %c0_i32, %c0_i32_0, %c0_i32_1, %c0_i32_2 : i32, i32, i32, i32
  }
  func.func @transform_5(%arg0: i32) -> (i32, i32) {
    %c0_i32 = arith.constant 0 : i32
    %c0_i32_0 = arith.constant 0 : i32
    %c0_i32_1 = arith.constant 0 : i32
    return %c0_i32, %c0_i32_0 : i32, i32
  }
  func.func @transform_6(%arg0: i32) -> (i32, i32) {
    %c0_i32 = arith.constant 0 : i32
    %c0_i32_0 = arith.constant 0 : i32
    %c0_i32_1 = arith.constant 0 : i32
    return %c0_i32, %c0_i32_0 : i32, i32
  }
  func.func @transform_7(%arg0: i32) -> (i32, i32, i32) {
    %c0_i32 = arith.constant 0 : i32
    %c0_i32_0 = arith.constant 0 : i32
    %c0_i32_1 = arith.constant 0 : i32
    return %arg0, %c0_i32, %c0_i32_0 : i32, i32, i32
  }
  func.func @transform_8(%arg0: i32) -> (i32, i32, i32) {
    %c0_i32 = arith.constant 0 : i32
    %c0_i32_0 = arith.constant 0 : i32
    %c0_i32_1 = arith.constant 0 : i32
    return %arg0, %c0_i32, %c0_i32_0 : i32, i32, i32
  }
}

</mosaic_0001>

<bundles_post_ra>
// kernel: fpn_layer_last_forward.1
= control target key start
LH: loop header
LB: loop body
LE: loop exit
PB: predicated region body
PF: predicated region fallthrough
CT: control target
= control target key end

     0   :  { %14 = vsyncpa [#allocation4], 0  ;;  %s19322_s0 = inlined_call_operand.hbm [shape: f32[2,256,4], index: 0, kind: input, shape index: {}]   ;;  %s19323_s1 = inlined_call_operand.hbm [shape: f32[4,256], index: 1, kind: input, shape index: {}]   ;;  %s19324_s2 = inlined_call_operand.hbm [shape: f32[1,256], index: 2, kind: input, shape index: {}]   ;;  %s19325_s3 = inlined_call_operand.hbm [shape: f32[1,256], index: 3, kind: input, shape index: {}]   ;;  %s19326_s4 = inlined_call_operand.hbm [shape: bf16[3,3,256,256], index: 4, kind: input, shape index: {}]   ;;  %s19327_s5 = inlined_call_operand.hbm [shape: f32[1,256], index: 5, kind: input, shape index: {}]   ;;  %s19328_s6 = inlined_call_operand.hbm [shape: f32[1,256], index: 6, kind: input, shape index: {}]   ;;  %s19329_s7 = inlined_call_operand.hbm [shape: f32[2,256,256], index: 7, kind: output, shape index: {0}]   ;;  %s19330_s8 = inlined_call_operand.hbm [shape: f32[2,256,256], index: 8, kind: output, shape index: {1}]  }
   0x1   :  { %16 = vsyncpa [#allocation4 + $0x1], 0 }
   0x2   :  { %17 = vsyncpa [#allocation7], 0 }
   0x3   :  { %18 = vsyncpa [#allocation10], 0 }
   0x4   :  { %19 = vsyncpa [#allocation13], 0 }
   0x5   :  { %20 = vsyncpa [#allocation5], 0 }
   0x6   :  { %22 = vsyncpa [#allocation5 + $0x1], 0 }
   0x7   :  { %23 = vsyncpa [#allocation17], 0 }
   0x8   :  { %25 = vsyncpa [#allocation17 + $0x1], 0  ;;  %s14919_s27 = smov 0   ;;  %s14921_s28 = smov 0  }
   0x9   :  { %s14923_s29 = smov 0   ;;  %s14925_s30 = smov 0  }
   0xa LB: > { %s14857_s9 = smov [#allocation6]   ;;  %s14940_s11 = sadd.s32 4294967295, %s14855_s30   ;;  %s14855_s30 = sphi %s14925_s30, %s19766_s30   ;;  %s14851_s29 = sphi %s14923_s29, %s19765_s29   ;;  %s14847_s28 = sphi %s14921_s28, %s19764_s28   ;;  %s14843_s27 = sphi %s14919_s27, %s19763_s27  }
   0xb   : > { %s253_s10 = sshll.u32 %s14857_s9, 4  ;;  %p12297_p0 = scmp.ge.s32.totalorder %s14855_s30, 1  ;;  %s14945_s10 = int_to_ptr.vmem [resolvable:$true] %s253_s10 }
   0xc   : > { %p19331_p1 = scmp.eq.s32.totalorder %s14940_s11, 0  ;;  %p240_p2 = scmp.lt.s32.totalorder %s14855_s30, 3 }
   0xd   : > { %s14858_s13 = smov [#allocation9]   ;;  %s14859_s15 = smov [#allocation12]  }
   0xe   : > { %p14947_p3 = pnand %p12297_p0, %p240_p2  ;;  %s275_s14 = sshll.u32 %s14858_s13, 4  ;;  %s14954_s14 = int_to_ptr.vmem [resolvable:$true] %s275_s14 }
   0xf   : > { %s299_s16 = sshll.u32 %s14859_s15, 4  ;;  %s14860_s18 = smov [#allocation8]   ;;  %s14962_s16 = int_to_ptr.vmem [resolvable:$true] %s299_s16 }
  0x10   : > { %s19470_s12 = scalar_select %p14947_p3, 1, 0 }
  0x11   : > { %p13847_p5 = pneg %p14947_p3  ;;  %s14964_s19 = sshll.u32 %s14860_s18, 4  ;;  %s265_s19 = int_to_ptr.vmem [resolvable:$true] %s14964_s19 }
  0x12   : > { %s14547_s22 = scalar_lea.hbm %s19323_s1, 128 }
  0x13   : > { %p14958_p6 = pnand %p13847_p5, %p19331_p1  ;;  %p14548_p7 = scmp.ne.s32.totalorder %s19323_s1, %s14547_s22 }
  0x14   : > { %p14554_p11 = scmp.lt.u32.totalorder %s14547_s22, %s19323_s1 }
  0x15   : > { %p14974_p8 = pneg %p14958_p6 }
  0x17   : > { %p14550_p9 = pnand %p14974_p8, %p14548_p7 }
  0x19   : > { %p14551_p10 = pneg %p14550_p9 }
  0x1b   : > { %p14556_p12 = pnand %p14554_p11, %p14551_p10 }
  0x1d   : > { %14559 = shalt.err (!%p14556_p12)
}
  0x1e   : > { %s14560_s13 = scalar_lea.vmem %s14945_s10, 128  ;;  %p14568_p5 = scmp.lt.s32.totalorder %s14945_s10, %s14945_s10 }
  0x1f   : > { %p14561_p13 = scmp.ne.s32.totalorder %s14945_s10, %s14560_s13  ;;  %p14569_p4 = scmp.lt.s32.totalorder %s14560_s13, %s14560_s13 }
  0x21   : > { %p14563_p0 = pnand %p14561_p13, %p14974_p8  ;;  %p14570_p7 = por %p14569_p4, %p14568_p5 }
  0x23   : > { %p14564_p2 = pneg %p14563_p0 }
  0x25   : > { %p14571_p9 = pnand %p14570_p7, %p14564_p2 }
  0x27   : > { %14574 = shalt.err (!%p14571_p9)
}
  0x28   : > { %13850 = dma.hbm_to_vmem [thread:$0]  (!%p14958_p6), %s19323_s1, 128, %s14945_s10, [#allocation7]  }
  0x29   : > { %s14575_s22 = scalar_lea.hbm %s19325_s3, 32 }
  0x2a   : > { %p14576_p10 = scmp.ne.s32.totalorder %s19325_s3, %s14575_s22  ;;  %p14582_p12 = scmp.lt.u32.totalorder %s14575_s22, %s19325_s3 }
  0x2c   : > { %p14578_p4 = pnand %p14576_p10, %p14974_p8 }
  0x2e   : > { %p14579_p11 = pneg %p14578_p4 }
  0x30   : > { %p14584_p13 = pnand %p14582_p12, %p14579_p11 }
  0x32   : > { %14587 = shalt.err (!%p14584_p13)
}
  0x33   : > { %s14588_s10 = scalar_lea.vmem %s14954_s14, 32  ;;  %p14596_p7 = scmp.lt.s32.totalorder %s14954_s14, %s14954_s14 }
  0x34   : > { %p14589_p0 = scmp.ne.s32.totalorder %s14954_s14, %s14588_s10  ;;  %p14597_p9 = scmp.lt.s32.totalorder %s14588_s10, %s14588_s10 }
  0x36   : > { %p14591_p2 = pnand %p14589_p0, %p14974_p8  ;;  %p14598_p10 = por %p14597_p9, %p14596_p7 }
  0x38   : > { %p14592_p5 = pneg %p14591_p2 }
  0x3a   : > { %p14599_p4 = pnand %p14598_p10, %p14592_p5 }
  0x3c   : > { %14602 = shalt.err (!%p14599_p4)
}
  0x3d   : > { %13856 = dma.hbm_to_vmem [thread:$0]  (!%p14958_p6), %s19325_s3, 32, %s14954_s14, [#allocation10]  }
  0x3e   : > { %s14603_s21 = scalar_lea.hbm %s19327_s5, 32 }
  0x3f   : > { %p14604_p11 = scmp.ne.s32.totalorder %s19327_s5, %s14603_s21  ;;  %p14610_p0 = scmp.lt.u32.totalorder %s14603_s21, %s19327_s5 }
  0x41   : > { %p14606_p12 = pnand %p14604_p11, %p14974_p8 }
  0x43   : > { %p14607_p13 = pneg %p14606_p12 }
  0x45   : > { %p14612_p2 = pnand %p14610_p0, %p14607_p13 }
  0x47   : > { %14615 = shalt.err (!%p14612_p2)
}
  0x48   : > { %s14616_s14 = scalar_lea.vmem %s14962_s16, 32  ;;  %p14624_p10 = scmp.lt.s32.totalorder %s14962_s16, %s14962_s16 }
  0x49   : > { %p14617_p5 = scmp.ne.s32.totalorder %s14962_s16, %s14616_s14  ;;  %p14625_p4 = scmp.lt.s32.totalorder %s14616_s14, %s14616_s14 }
  0x4b   : > { %p14619_p7 = pnand %p14617_p5, %p14974_p8  ;;  %p14626_p11 = por %p14625_p4, %p14624_p10 }
  0x4d   : > { %p14620_p9 = pneg %p14619_p7 }
  0x4f   : > { %p14627_p12 = pnand %p14626_p11, %p14620_p9 }
  0x51   : > { %14630 = shalt.err (!%p14627_p12)
}
  0x52   : > { %13862 = dma.hbm_to_vmem [thread:$0]  (!%p14958_p6), %s19327_s5, 32, %s14962_s16, [#allocation13]  }
  0x53   : > { %s14861_s13 = smov [#allocation11]   ;;  %s14631_s21 = scalar_lea.hbm %s19324_s2, 32 }
  0x54   : > { %s285_s15 = sshll.u32 %s14861_s13, 4  ;;  %p14632_p13 = scmp.ne.s32.totalorder %s19324_s2, %s14631_s21  ;;  %s286_s15 = int_to_ptr.vmem [resolvable:$true] %s285_s15 }
  0x55   : > { %p14638_p5 = scmp.lt.u32.totalorder %s14631_s21, %s19324_s2 }
  0x56   : > { %p14634_p0 = pnand %p14632_p13, %p14974_p8 }
  0x58   : > { %p14635_p2 = pneg %p14634_p0 }
  0x5a   : > { %p14640_p7 = pnand %p14638_p5, %p14635_p2 }
  0x5c   : > { %14643 = shalt.err (!%p14640_p7)
}
  0x5d   : > { %s14644_s16 = scalar_lea.vmem %s265_s19, 32  ;;  %p14652_p11 = scmp.lt.s32.totalorder %s265_s19, %s265_s19 }
  0x5e   : > { %p14645_p9 = scmp.ne.s32.totalorder %s265_s19, %s14644_s16  ;;  %p14653_p12 = scmp.lt.s32.totalorder %s14644_s16, %s14644_s16 }
  0x60   : > { %p14647_p10 = pnand %p14645_p9, %p14974_p8  ;;  %p14654_p1 = por %p14653_p12, %p14652_p11 }
  0x62   : > { %p14648_p4 = pneg %p14647_p10 }
  0x64   : > { %p14655_p3 = pnand %p14654_p1, %p14648_p4 }
  0x66   : > { %14658 = shalt.err (!%p14655_p3)
}
  0x67   : > { %13853 = dma.hbm_to_vmem [thread:$0]  (!%p14958_p6), %s19324_s2, 32, %s265_s19, [#allocation7]  }
  0x68   : > { %s14659_s18 = scalar_lea.hbm %s19326_s4, 36864 }
  0x69   : > { %p14660_p13 = scmp.ne.s32.totalorder %s19326_s4, %s14659_s18  ;;  %p14666_p3 = scmp.lt.u32.totalorder %s14659_s18, %s19326_s4 }
  0x6b   : > { %p14662_p0 = pnand %p14660_p13, %p14974_p8 }
  0x6d   : > { %p14663_p1 = pneg %p14662_p0 }
  0x6f   : > { %p14668_p2 = pnand %p14666_p3, %p14663_p1 }
  0x71   : > { %14671 = shalt.err (!%p14668_p2)
}
  0x72   : > { %s14672_s24 = scalar_lea.vmem %s286_s15, 36864  ;;  %p14680_p10 = scmp.lt.s32.totalorder %s286_s15, %s286_s15 }
  0x73   : > { %p14673_p5 = scmp.ne.s32.totalorder %s286_s15, %s14672_s24  ;;  %p14681_p4 = scmp.lt.s32.totalorder %s14672_s24, %s14672_s24 }
  0x75   : > { %p14675_p7 = pnand %p14673_p5, %p14974_p8  ;;  %p14682_p11 = por %p14681_p4, %p14680_p10 }
  0x77   : > { %p14676_p9 = pneg %p14675_p7 }
  0x79   : > { %p14683_p12 = pnand %p14682_p11, %p14676_p9 }
  0x7b   : > { %14686 = shalt.err (!%p14683_p12)
}
  0x7c   : > { %s19333_s19 = smov 128   ;;  %s19334_s26 = smov 8  }
  0x7d   : > { %13859 = dma.hbm_to_vmem [thread:$0]  (!%p14958_p6), %s19326_s4, 36864, %s286_s15, [#allocation10], %s19333_s19, %s19333_s19, %s19334_s26  }
  0x7e   : > { %s14864_s9 = smov [#allocation14]   ;;  %s14687_s20 = scalar_lea.hbm %s19328_s6, 32 }
  0x7f   : > { %s310_s10 = sshll.u32 %s14864_s9, 4  ;;  %p14688_p13 = scmp.ne.s32.totalorder %s19328_s6, %s14687_s20  ;;  %s311_s10 = int_to_ptr.vmem [resolvable:$true] %s310_s10 }
  0x80   : > { %p14694_p3 = scmp.lt.u32.totalorder %s14687_s20, %s19328_s6 }
  0x81   : > { %p14690_p0 = pnand %p14688_p13, %p14974_p8 }
  0x83   : > { %p14691_p1 = pneg %p14690_p0 }
  0x85   : > { %p14696_p2 = pnand %p14694_p3, %p14691_p1 }
  0x87   : > { %14699 = shalt.err (!%p14696_p2)
}
  0x88   : > { %s14700_s15 = scalar_lea.vmem %s311_s10, 32  ;;  %p14708_p10 = scmp.lt.s32.totalorder %s311_s10, %s311_s10 }
  0x89   : > { %p14701_p5 = scmp.ne.s32.totalorder %s311_s10, %s14700_s15  ;;  %p14709_p4 = scmp.lt.s32.totalorder %s14700_s15, %s14700_s15 }
  0x8b   : > { %p14703_p7 = pnand %p14701_p5, %p14974_p8  ;;  %p14710_p11 = por %p14709_p4, %p14708_p10 }
  0x8d   : > { %p14704_p9 = pneg %p14703_p7 }
  0x8f   : > { %p14711_p12 = pnand %p14710_p11, %p14704_p9 }
  0x91   : > { %14714 = shalt.err (!%p14711_p12)
}
  0x92   : > { %13865 = dma.hbm_to_vmem [thread:$0]  (!%p14958_p6), %s19328_s6, 32, %s311_s10, [#allocation13]  }
  0x93   : > { %s12296_s25 = sadd.s32 4294967294, %s14855_s30   ;;  %s15101_s17 = sadd.s32 1, %s14855_s30  }
  0x94   : > { %s35_s9 = ssub.s32 %s14855_s30, %s15101_s17  ;;  %s38_s13 = sadd.s32 1, %s14851_s29 }
  0x95   : > { %p36_p8 = scmp.eq.s32.totalorder %s35_s9, 0  ;;  %p45_p13 = scmp.ne.s32.totalorder %s14851_s29, %s14847_s28 }
  0x96   : > { %p46_p0 = scmp.eq.s32.totalorder %s14855_s30, 0  ;;  %p51_p1 = scmp.ne.s32.totalorder %s14847_s28, %s14843_s27 }
  0x97   : > { %s15112_s18 = scalar_select %p36_p8, %s14851_s29, %s38_s13  }
  0x98   : > { %p15114_p3 = por %p46_p0, %p45_p13  ;;  %p19474_p2 = scmp.eq.s32.totalorder %s14940_s11, 0 }
  0x99   : > { %p201_p5 = scmp.eq.s32.totalorder %s14940_s11, 1  ;;  %p207_p7 = scmp.eq.s32.totalorder %s12296_s25, 1 }
  0x9a   : > { %p15120_p6 = por %p19474_p2, %p51_p1  ;;  %p13883_p9 = scmp.lt.s32.totalorder %s14855_s30, 2 }
  0x9b   : > { %s321_s21 = sand.u32 1, %s14851_s29   ;;  %p15127_p10 = por %p201_p5, %p45_p13 }
  0x9c   : > { %p15131_p4 = por %p207_p7, %p51_p1  ;;  %s12305_s24 = sshll.u32 %s321_s21, 8 }
  0x9d   : > { %s19476_s22 = scalar_select %p15127_p10, 1, 0 }
  0x9e   : > { %s19477_s23 = scalar_select %p15131_p4, 1, 0 }
  0x9f   : > { %s13270_s15 = sshll.u32 %s14855_s30, 12  ;;  %s325_s25 = scalar_lea.vmem [#allocation3], %s12305_s24 }
  0xa0   : > { %s15139_s9 = scalar_lea.hbm %s19322_s0, %s13270_s15  ;;  %s332_s13 = sshll.u32 %s325_s25, 4  ;;  %s15141_s13 = int_to_ptr.vmem [resolvable:$true] %s332_s13 }
  0xa1   : > { %p15145_p11 = pnand %p13883_p9, %p15114_p3  ;;  %s15149_s26 = scalar_lea.sflag [#allocation4], %s321_s21 }
  0xa2   : > { %s14715_s16 = scalar_lea.hbm %s15139_s9, 4096  ;;  %s14720_s20 = scalar_lea.hbm %s19322_s0, 8192 }
  0xa3   : > { %p14716_p12 = scmp.ne.s32.totalorder %s15139_s9, %s14715_s16  ;;  %p14717_p8 = pneg %p15145_p11 }
  0xa4   : > { %p14721_p1 = scmp.lt.u32.totalorder %s15139_s9, %s19322_s0  ;;  %p14722_p3 = scmp.lt.u32.totalorder %s14720_s20, %s14715_s16 }
  0xa5   : > { %p14718_p13 = pnand %p14717_p8, %p14716_p12  ;;  %p14724_p5 = scmp.lt.u32.totalorder %s14715_s16, %s15139_s9 }
  0xa6   : > { %p14723_p2 = por %p14722_p3, %p14721_p1 }
  0xa7   : > { %p14719_p0 = pneg %p14718_p13 }
  0xa8   : > { %p14725_p7 = por %p14724_p5, %p14723_p2 }
  0xaa   : > { %p14726_p9 = pnand %p14725_p7, %p14719_p0 }
  0xac   : > { %14729 = shalt.err (!%p14726_p9)
}
  0xad   : > { %s14730_s21 = scalar_lea.vmem %s15141_s13, 4096  ;;  %s14865_s24 = smov [#allocation3]  }
  0xae   : > { %p14731_p12 = scmp.ne.s32.totalorder %s15141_s13, %s14730_s21  ;;  %s14735_s15 = sshll.u32 %s14865_s24, 4  ;;  %s14736_s15 = int_to_ptr.vmem [resolvable:$false] %s14735_s15 }
  0xaf   : > { %s14737_s14 = scalar_lea.vmem %s14736_s15, 8192  ;;  %p14738_p10 = scmp.lt.s32.totalorder %s15141_s13, %s14736_s15 }
  0xb0   : > { %p14733_p13 = pnand %p14731_p12, %p14717_p8  ;;  %p14739_p1 = scmp.lt.s32.totalorder %s14737_s14, %s14730_s21 }
  0xb2   : > { %p14734_p4 = pneg %p14733_p13  ;;  %p14740_p3 = por %p14739_p1, %p14738_p10 }
  0xb4   : > { %p14741_p2 = pnand %p14740_p3, %p14734_p4 }
  0xb6   : > { %14744 = shalt.err (!%p14741_p2)
}
  0xb7   : > { %s19479_s16 = smov 8   ;;  %s19480_s20 = smov 128  }
  0xb8   : > { %13869 = dma.hbm_to_vmem [thread:$0]  (!%p15145_p11), %s15139_s9, 4096, %s15141_s13, %s15149_s26, %s19480_s20, %s19480_s20, %s19479_s16  }
  0xb9   : > { %p19481_p8 = scmp.ne.s32.totalorder %s19470_s12, 0 }
  0xbb   : > { %344 = sbr.rel (%p19481_p8) target bundleno = 1427 (0x593), region = 48 }
  0xc2   : > { %s15183_s25 = sand.u32 1, %s14847_s28  }
  0xc3   : > { %s12309_s21 = sshll.u32 %s15183_s25, 8  ;;  %s347_s24 = scalar_lea.sflag [#allocation4], %s15183_s25 }
  0xc4   : > { %s15187_s15 = scalar_lea.vmem [#allocation3], %s12309_s21 }
  0xc5   : > { %14818 = dma.done.wait (%p15120_p6), %s347_s24, 4096  }
  0xc6   : > { %14820 = vsyncadd (%p15120_p6), %s347_s24, 4294963200  ;;  %p19482_p10 = scmp.eq.s32.totalorder %s14940_s11, 0 }
  0xc8   : > { %14822 = dma.done.wait (%p19482_p10), [#allocation7], 160   ;;  %p19483_p4 = pmov %p19482_p10 }
  0xca   : > { %14824 = vsyncadd (%p19483_p4), [#allocation7], 4294967136  ;;  %p19484_p11 = pmov %p19483_p4 }
  0xcb   : > { %p19485_p0 = pmov %p19483_p4 }
  0xcc   : > { %14826 = dma.done.wait (%p19484_p11), [#allocation10], 36896  }
  0xcd   : > { %14828 = vsyncadd (%p19485_p0), [#allocation10], 4294930400  ;;  %p19486_p5 = pmov %p19485_p0 }
  0xce   : > { %p19487_p7 = pmov %p19485_p0 }
  0xcf   : > { %14830 = dma.done.wait (%p19486_p5), [#allocation13], 64  }
  0xd0   : > { %14832 = vsyncadd (%p19487_p7), [#allocation13], 4294967232  ;;  %v19338_v0 = vmov 3   ;;  %v19336_v1 = vmov 1   ;;  %v14868_v2 = vmov 0   ;;  %v428_v3 = vld [vmem:[%s15187_s15 + $0x78] sm:$0xff] }
  0xd1   : > { %13940 = vset.pattern.permute.xlu0 %v19338_v0  ;;  %13937 = vset.pattern.permute.xlu1 %v19336_v1  ;;  %1778 = vst [vmem:[#allocation2 + $0x10] sm:$0xff] %v14868_v2  ;;  %v15210_v4 = vld [vmem:[%s15187_s15 + $0x70] sm:$0xff]  ;;  %v15214_v5 = vld [vmem:[%s15187_s15 + $0x8] sm:$0xff]  ;;  %v15218_v6 = vld [vmem:[%s15187_s15 + $0x18] sm:$0xff]  ;;  %v19340_v7 = vmov 2   ;;  %vm1768_vm0 = vcmask 1043459  }
  0xd2   : > { %1282 = vperm.xlu0 %13940, %v428_v3   ;;  %740 = vperm.xlu1 %13937, %v15210_v4   ;;  %v15223_v8 = vld [vmem:[%s15187_s15 + $0x28] sm:$0xff]  ;;  %v15226_v9 = vld [vmem:[%s15187_s15 + $0x38] sm:$0xff]  ;;  %v15232_v10 = vld [vmem:[%s15187_s15] sm:$0xff]  ;;  %vm1769_vm1 = vsmask.f32 7950  ;;  %vm1771_vm2 = vcmask 1047559  }
  0xd3   : > { %v15236_v11 = vld [vmem:[%s15187_s15 + $0x48] sm:$0xff]  ;;  %v15241_v12 = vld [vmem:[%s15187_s15 + $0x58] sm:$0xff]  ;;  %v429_v14 = vld [vmem:[%s15187_s15 + $0x80] sm:$0xff]  ;;  %vm1772_vm3 = vsmask.f32 7966  ;;  %v19488_v46 = vmov 0 }
  0xd4   : > { %v15245_v13 = vld [vmem:[%s15187_s15 + $0x88] sm:$0xff]  ;;  %v15256_v15 = vld [vmem:[%s15187_s15 + $0x10] sm:$0xff]  ;;  %v15260_v16 = vld [vmem:[%s15187_s15 + $0x98] sm:$0xff]  ;;  %vm1781_vm7 = vsmask.f32 256  ;;  %vm1780_vm8 = vcmask 1040384  }
  0xd5   : > { %v15265_v17 = vld [vmem:[%s15187_s15 + $0x20] sm:$0xff]  ;;  %v15270_v18 = vld [vmem:[%s15187_s15 + $0xa8] sm:$0xff]  ;;  %v15274_v19 = vld [vmem:[%s15187_s15 + $0x30] sm:$0xff]  ;;  %vm1783_vm10 = vcmask 1044484   ;;  %vm1784_vm11 = vsmask.f32 4352 }
  0xd6   : > { %744 = vperm.xlu1 %13937, %v428_v3   ;;  %1226 = vperm.xlu0 %13940, %v15214_v5   ;;  %v15280_v20 = vld [vmem:[%s15187_s15 + $0xb8] sm:$0xff]  ;;  %v15284_v21 = vld [vmem:[%s15187_s15 + $0x40] sm:$0xff]  ;;  %v15289_v22 = vld [vmem:[%s15187_s15 + $0xc8] sm:$0xff]  ;;  %v19495_v62 = vmov 0  ;;  %s12316_s12 = sshll.u32 %s15183_s25, 9  ;;  %s19469_s26 = sshll.u32 %s14940_s11, 13 }
  0xd7   : > { %v15294_v23 = vld [vmem:[%s15187_s15 + $0x90] sm:$0xff]  ;;  %v13983_v27 = vld [vmem:[#allocation11 + $0x114] ss:$8 sps:$4 sm:$0xff]   ;;  %v13985_v28 = vld [vmem:[#allocation11 + $0x110] ss:$8 sps:$4 sm:$0xff]   ;;  %s15524_s19 = scalar_lea.vmem [#allocation15], %s12316_s12  ;;  %s19027_s13 = scalar_lea.hbm %s19329_s7, %s19469_s26 }
  0xd8   : > { %v13980_v24 = vld [vmem:[#allocation11 + $0x104] ss:$8 sps:$4 sm:$0xff]   ;;  %v13982_v25 = vld [vmem:[#allocation11 + $0x100] ss:$8 sps:$4 sm:$0xff]   ;;  %v15309_v32 = vld [vmem:[%s15187_s15 + $0x60] sm:$0xff]  ;;  %s12118_s14 = sshll.u32 %s15524_s19, 4  ;;  %s19030_s14 = int_to_ptr.vmem [resolvable:$true] %s12118_s14 }
  0xd9   : > { %v15298_v26 = vld [vmem:[%s15187_s15 + $0x50] sm:$0xff]  ;;  %2629 = vmatprep.subr.bf16.mxu0 %v13980_v24  ;;  %7632 = vmatprep.subr.bf16.mxu1 %v13980_v24  ;;  %v15304_v29 = vld [vmem:[%s15187_s15 + $0xd8] sm:$0xff]  ;;  %v13989_v33 = vld [vmem:[#allocation11 + $0x134] ss:$8 sps:$4 sm:$0xff]   ;;  %vm2146_vm14 = vsmask.f32 4368 }
  0xda   : > { %13938 = vset.pattern.permute.xlu1 %v19340_v7  ;;  %1234 = vperm.xlu0 %13940, %v15218_v6   ;;  %v13986_v30 = vld [vmem:[#allocation11 + $0x124] ss:$8 sps:$4 sm:$0xff]   ;;  %v13988_v31 = vld [vmem:[#allocation11 + $0x120] ss:$8 sps:$4 sm:$0xff]   ;;  %v13991_v34 = vld [vmem:[#allocation11 + $0x130] ss:$8 sps:$4 sm:$0xff]  }
  0xdb   : > { %1013 = vperm.xlu1 %13938, %v428_v3   ;;  %2630 = vmatpush1.bf16.msra.mxu0 %v13982_v25  ;;  %v15315_v35 = vld [vmem:[%s15187_s15 + $0xe8] sm:$0xff]  ;;  %v13992_v36 = vld [vmem:[#allocation11 + $0x144] ss:$8 sps:$4 sm:$0xff]   ;;  %v13997_v39 = vld [vmem:[#allocation11 + $0x150] ss:$8 sps:$4 sm:$0xff]   ;;  %s12100_s16 = scalar_lea.sflag [#allocation5], %s15183_s25 }
  0xdc   : > { %7633 = vmatpush1.bf16.msra.mxu1 %v13982_v25  ;;  %2631 = vmatprep.subr.bf16.mxu0 %v13983_v27  ;;  %v13994_v37 = vld [vmem:[#allocation11 + $0x140] ss:$8 sps:$4 sm:$0xff]   ;;  %v13995_v38 = vld [vmem:[#allocation11 + $0x154] ss:$8 sps:$4 sm:$0xff]   ;;  %v13998_v40 = vld [vmem:[#allocation11 + $0x164] ss:$8 sps:$4 sm:$0xff]  }
  0xdd   : > { %7634 = vmatprep.subr.bf16.mxu1 %v13983_v27  ;;  %v14000_v41 = vld [vmem:[#allocation11 + $0x160] ss:$8 sps:$4 sm:$0xff]   ;;  %v14001_v42 = vld [vmem:[#allocation11 + $0x174] ss:$8 sps:$4 sm:$0xff]   ;;  %v14003_v43 = vld [vmem:[#allocation11 + $0x170] ss:$8 sps:$4 sm:$0xff]  }
  0xde   : > { %1242 = vperm.xlu0 %13940, %v15223_v8   ;;  %vm1770_vm4 = vmand %vm1768_vm0, %vm1769_vm1  ;;  %v14004_v44 = vld [vmem:[#allocation11 + $0x184] ss:$8 sps:$4 sm:$0xff]   ;;  %v14006_v45 = vld [vmem:[#allocation11 + $0x180] ss:$8 sps:$4 sm:$0xff]   ;;  %vm3103_vm0 = vsmask.f32 3328 }
  0xdf   : > { %13939 = vset.pattern.permute.xlu1 %v19338_v0  ;;  %2632 = vmatpush1.bf16.msra.mxu0 %v13985_v28  ;;  %vm1773_vm5 = vmand %vm1771_vm2, %vm1772_vm3  ;;  %v14007_v47 = vld [vmem:[#allocation11 + $0x194] ss:$8 sps:$4 sm:$0xff]   ;;  %v14009_v49 = vld [vmem:[#allocation11 + $0x190] ss:$8 sps:$4 sm:$0xff]   ;;  %vm3104_vm1 = vsmask.f32 7440 }
  0xe0   : > { %1278 = vperm.xlu1 %13939, %v15210_v4   ;;  %7635 = vmatpush1.bf16.msra.mxu1 %v13985_v28  ;;  %vm15328_vm6 = vmor %vm1773_vm5, %vm1770_vm4  ;;  %v1824_v48 = vld [vmem:[#allocation2 + $0x170] sm:$0x88]  ;;  %v14010_v51 = vld [vmem:[#allocation11 + $0x1a4] ss:$8 sps:$4 sm:$0xff]   ;;  %s14745_s20 = scalar_lea.vmem %s19030_s14, 8192  ;;  %p19757_p9 = scmp.ne.s32.totalorder %s19476_s22, 0 }
  0xe1   : > { %2633 = vmatprep.subr.bf16.mxu0 %v13986_v30  ;;  %7636 = vmatprep.subr.bf16.mxu1 %v13986_v30  ;;  %v19489_v46 = vsel %vm15328_vm6, 4294967295, %v19488_v46  ;;  %v1825_v50 = vsel %vm15328_vm6, 0, %v1824_v48  ;;  %v14012_v52 = vld [vmem:[#allocation11 + $0x1a0] ss:$8 sps:$4 sm:$0xff]   ;;  %vm15339_vm9 = vmand %vm1780_vm8, %vm1781_vm7  ;;  %v15349_v55 = vld [vmem:[%s15187_s15 + $0xa0] sm:$0xff]  ;;  %p14746_p6 = scmp.ne.s32.totalorder %s19030_s14, %s14745_s20  ;;  %s14870_s21 = smov [#allocation15]  }
  0xe2   : > { %1250 = vperm.xlu0 %13940, %v15226_v9   ;;  %19490 = vst [vmem:[#allocation24_spill] sm:$0xff] %v19489_v46  ;;  %1826 = vst [vmem:[#allocation2 + $0x170] sm:$0x88] %v1825_v50  ;;  %v15344_v54 = vld [vmem:[%s15187_s15 + $0x68] sm:$0xff]  ;;  %v14015_v57 = vld [vmem:[#allocation11 + $0x1b0] ss:$8 sps:$4 sm:$0xff]  }
  0xe3   : > { %2634 = vmatpush1.bf16.msra.mxu0 %v13988_v31  ;;  %v14013_v56 = vld [vmem:[#allocation11 + $0x1b4] ss:$8 sps:$4 sm:$0xff]   ;;  %vm15352_vm12 = vmand %vm1783_vm10, %vm1784_vm11  ;;  %v14016_v59 = vld [vmem:[#allocation11 + $0x1c4] ss:$8 sps:$4 sm:$0xff]   ;;  %p14747_p12 = pnand %p14746_p6, %p19757_p9  ;;  %s14749_s24 = sshll.u32 %s14870_s21, 4  ;;  %s14750_s24 = int_to_ptr.vmem [resolvable:$false] %s14749_s24 }
  0xe4   : > { %13941 = vset.pattern.permute.xlu1 %v14868_v2  ;;  %7637 = vmatpush1.bf16.msra.mxu1 %v13988_v31  ;;  %v14018_v60 = vld [vmem:[#allocation11 + $0x1c0] ss:$8 sps:$4 sm:$0xff]   ;;  %v14019_v61 = vld [vmem:[#allocation11 + $0x1d4] ss:$8 sps:$4 sm:$0xff]   ;;  %vm15365_vm13 = vmor %vm15352_vm12, %vm15339_vm9  ;;  %p14752_p1 = scmp.lt.s32.totalorder %s19030_s14, %s14750_s24 }
  0xe5   : > { %448 = vperm.xlu1 %13941, %v15232_v10   ;;  %2635 = vmatprep.subr.bf16.mxu0 %v13989_v33  ;;  %v19496_v62 = vsel %vm15365_vm13, 4294967295, %v19495_v62  ;;  %v14021_v63 = vld [vmem:[#allocation11 + $0x1d0] ss:$8 sps:$4 sm:$0xff]   ;;  %v1827_v27 = vld [vmem:[#allocation2 + $0x198] sm:$0x88]  ;;  %vm16149_vm15 = vmor %vm1781_vm7, %vm2146_vm14  ;;  %p14748_p13 = pneg %p14747_p12 }
  0xe6   : > { %1258 = vperm.xlu0 %13940, %v15236_v11   ;;  %7638 = vmatprep.subr.bf16.mxu1 %v13989_v33  ;;  %19497 = vst [vmem:[#allocation25_spill] sm:$0xff] %v19496_v62  ;;  %v1828_v28 = vsel %vm15328_vm6, 0, %v1827_v27  ;;  %v1848_v30 = vld [vmem:[#allocation2 + $0x48] sm:$0x11]  ;;  %vm16868_vm2 = vmor %vm3103_vm0, %vm3104_vm1 }
  0xe7   : > { %2636 = vmatpush1.bf16.msra.mxu0 %v13991_v34  ;;  %1829 = vst [vmem:[#allocation2 + $0x198] sm:$0x88] %v1828_v28  ;;  %v1849_v31 = vsel %vm15365_vm13, 0, %v1848_v30  ;;  %v951_v48 = vld [vmem:[#allocation6 + $0x2] ss:$4 sm:$0x3] }
  0xe8   : > { %7639 = vmatpush1.bf16.msra.mxu1 %v13991_v34  ;;  %2637 = vmatprep.subr.bf16.mxu0 %v13992_v36  ;;  %1850 = vst [vmem:[#allocation2 + $0x48] sm:$0x11] %v1849_v31  ;;  %v607_v34 = vlaneseq  ;;  %v445_v50 = vld [vmem:[#allocation6] ss:$4 sm:$0x3] }
  0xe9   : > { %453 = vperm.xlu1 %13941, %v15214_v5   ;;  %7640 = vmatprep.subr.bf16.mxu1 %v13992_v36  ;;  %v1220_v53 = vld [vmem:[#allocation6 + $0x3] ss:$4 sm:$0x3]  ;;  %v1488_v28 = vld [vmem:[#allocation8] sm:$0x3] }
  0xea   : > { %1266 = vperm.xlu0 %13940, %v15241_v12  }
  0xeb   : > { %2638 = vmatpush1.bf16.msra.mxu0 %v13994_v37 }
  0xec   : > { %7641 = vmatpush1.bf16.msra.mxu1 %v13994_v37  ;;  %2639 = vmatprep.subr.bf16.mxu0 %v13995_v38  ;;  %v1800_v37 = vld [vmem:[#allocation2 + $0x30] sm:$0x88] }
  0xed   : > { %533 = vperm.xlu1 %13941, %v15245_v13   ;;  %7642 = vmatprep.subr.bf16.mxu1 %v13995_v38 }
  0xee   : > { %13965 = vset.pattern.permute.xlu0 %v14868_v2 }
  0xef   : > { %518 = vperm.xlu0 %13965, %v15210_v4   ;;  %2640 = vmatpush1.bf16.msra.mxu0 %v13997_v39 }
  0xf0   : > { %7643 = vmatpush1.bf16.msra.mxu1 %v13997_v39  ;;  %2641 = vmatprep.subr.bf16.mxu0 %v13998_v40  ;;  %v608_v39 = vshrl.u32 %v607_v34, 7 }
  0xf1   : > { %13942 = vset.pattern.permute.xlu1 %v19336_v1  ;;  %7644 = vmatprep.subr.bf16.mxu1 %v13998_v40 }
  0xf2   : > { %684 = vperm.xlu1 %13942, %v15232_v10  }
  0xf3   : > { %523 = vperm.xlu0 %13965, %v428_v3   ;;  %2642 = vmatpush1.bf16.msra.mxu0 %v14000_v41 }
  0xf4   : > { %7645 = vmatpush1.bf16.msra.mxu1 %v14000_v41  ;;  %2643 = vmatprep.subr.bf16.mxu0 %v14001_v42 }
  0xf5   : > { %7646 = vmatprep.subr.bf16.mxu1 %v14001_v42  ;;  %v1821_v42 = vld [vmem:[#allocation2 + $0x148] sm:$0x88] }
  0xf6   : > { %748 = vperm.xlu1 %13942, %v429_v14  }
  0xf7   : > { %528 = vperm.xlu0 %13965, %v429_v14   ;;  %2644 = vmatpush1.bf16.msra.mxu0 %v14003_v43 }
  0xf8   : > { %7647 = vmatpush1.bf16.msra.mxu1 %v14003_v43  ;;  %2645 = vmatprep.subr.bf16.mxu0 %v14004_v44  ;;  %v15427_v43 = vsub.s32 0, %v608_v39 }
  0xf9   : > { %7648 = vmatprep.subr.bf16.mxu1 %v14004_v44  ;;  %v15429_v44 = vsub.s32 1, %v608_v39 }
  0xfa   : > { %752 = vperm.xlu1 %13942, %v15245_v13   ;;  %19500 = vst [vmem:[#allocation28_spill] sm:$0xff] %v15427_v43 }
  0xfb   : > { %458 = vperm.xlu0 %13965, %v15256_v15   ;;  %2646 = vmatpush1.bf16.msra.mxu0 %v14006_v45  ;;  %19501 = vst [vmem:[#allocation29_spill] sm:$0xff] %v15429_v44  ;;  %v15456_v58 = vrot.slane %v951_v48, %v15429_v44  ;;  %v15495_v39 = vrot.slane %v1488_v28, %v15429_v44 }
  0xfc   : > { %7649 = vmatpush1.bf16.msra.mxu1 %v14006_v45  ;;  %2647 = vmatprep.subr.bf16.mxu0 %v14007_v47 }
  0xfd   : > { %7650 = vmatprep.subr.bf16.mxu1 %v14007_v47  ;;  %v1822_v47 = vsel %vm15328_vm6, 0, %v1821_v42 }
  0xfe   : > { %13943 = vset.pattern.permute.xlu1 %v19340_v7  ;;  %1823 = vst [vmem:[#allocation2 + $0x148] sm:$0x88] %v1822_v47 }
  0xff   : > { %543 = vperm.xlu0 %13965, %v15260_v16   ;;  %957 = vperm.xlu1 %13943, %v15214_v5  }
 0x100   : > { %2648 = vmatpush1.bf16.msra.mxu0 %v14009_v49  ;;  %7651 = vmatpush1.bf16.msra.mxu1 %v14009_v49  ;;  %v15437_v49 = vld [vmem:[%s15187_s15 + $0x38] sm:$0xff] }
 0x101   : > { %2649 = vmatprep.subr.bf16.mxu0 %v14010_v51  ;;  %7652 = vmatprep.subr.bf16.mxu1 %v14010_v51 }
 0x103   : > { %468 = vperm.xlu0 %13965, %v15265_v17   ;;  %1017 = vperm.xlu1 %13943, %v429_v14  }
 0x104   : > { %2650 = vmatpush1.bf16.msra.mxu0 %v14012_v52  ;;  %7653 = vmatpush1.bf16.msra.mxu1 %v14012_v52  ;;  %v15444_v52 = vld [vmem:[%s15187_s15 + $0xb0] sm:$0xff] }
 0x105   : > { %2651 = vmatprep.subr.bf16.mxu0 %v14013_v56  ;;  %7654 = vmatprep.subr.bf16.mxu1 %v14013_v56 }
 0x107   : > { %553 = vperm.xlu0 %13965, %v15270_v18   ;;  %13944 = vset.pattern.permute.xlu1 %v19338_v0 }
 0x108   : > { %1222 = vperm.xlu1 %13944, %v15232_v10   ;;  %2652 = vmatpush1.bf16.msra.mxu0 %v14015_v57 }
 0x109   : > { %7655 = vmatpush1.bf16.msra.mxu1 %v14015_v57  ;;  %2653 = vmatprep.subr.bf16.mxu0 %v14016_v59  ;;  %v15453_v57 = vrot.slane %v951_v48, %v15427_v43 }
 0x10a   : > { %7656 = vmatprep.subr.bf16.mxu1 %v14016_v59  ;;  %v15459_v59 = vrot.slane %v445_v50, %v15427_v43 }
 0x10b   : > { %478 = vperm.xlu0 %13965, %v15274_v19  }
 0x10c   : > { %1286 = vperm.xlu1 %13944, %v429_v14   ;;  %2654 = vmatpush1.bf16.msra.mxu0 %v14018_v60  ;;  %v14027_v14 = vld [vmem:[#allocation11 + $0x1f0] ss:$8 sps:$4 sm:$0xff]  }
 0x10d   : > { %2655 = vmatprep.subr.bf16.mxu0 %v14019_v61  ;;  %7657 = vmatpush1.bf16.msra.mxu1 %v14018_v60  ;;  %v15462_v60 = vrot.slane %v445_v50, %v15429_v44 }
 0x10e   : > { %7658 = vmatprep.subr.bf16.mxu1 %v14019_v61 }
 0x10f   : > { %563 = vperm.xlu0 %13965, %v15280_v20  }
 0x110   : > { %1290 = vperm.xlu1 %13944, %v15245_v13   ;;  %2656 = vmatpush1.bf16.msra.mxu0 %v14021_v63 }
 0x111   : > { %7659 = vmatpush1.bf16.msra.mxu1 %v14021_v63  ;;  %v15469_v63 = vrot.slane %v1220_v53, %v15427_v43 }
 0x113   : > { %488 = vperm.xlu0 %13965, %v15284_v21  }
 0x114   : > { %13945 = vset.pattern.permute.xlu1 %v14868_v2 }
 0x115   : > { %463 = vperm.xlu1 %13945, %v15218_v6  }
 0x117   : > { %573 = vperm.xlu0 %13965, %v15289_v22  }
 0x119   : > { %538 = vperm.xlu1 %13945, %v15294_v23  }
 0x11b   : > { %498 = vperm.xlu0 %13965, %v15298_v26  }
 0x11d   : > { %13946 = vset.pattern.permute.xlu1 %v19336_v1 }
 0x11e   : > { %692 = vperm.xlu1 %13946, %v15256_v15  }
 0x11f   : > { %583 = vperm.xlu0 %13965, %v15304_v29  }
 0x122   : > { %756 = vperm.xlu1 %13946, %v15294_v23  }
 0x123   : > { %508 = vperm.xlu0 %13965, %v15309_v32  }
 0x126   : > { %760 = vperm.xlu1 %13946, %v15260_v16  }
 0x127   : > { %593 = vperm.xlu0 %13965, %v15315_v35  }
 0x12a   : > { %13947 = vset.pattern.permute.xlu1 %v19340_v7 }
 0x12b   : > { %13967 = vset.pattern.permute.xlu0 %v19336_v1  ;;  %965 = vperm.xlu1 %13947, %v15218_v6  }
 0x12c   : > { %688 = vperm.xlu0 %13967, %v15214_v5   ;;  %v14024_v5 = vld [vmem:[#allocation11 + $0x1e0] ss:$8 sps:$4 sm:$0xff]  }
 0x12f   : > { %1025 = vperm.xlu1 %13947, %v15294_v23  }
 0x130   : > { %696 = vperm.xlu0 %13967, %v15218_v6  }
 0x133   : > { %13948 = vset.pattern.permute.xlu1 %v19338_v0 }
 0x134   : > { %704 = vperm.xlu0 %13967, %v15223_v8   ;;  %1230 = vperm.xlu1 %13948, %v15256_v15  }
 0x138   : > { %712 = vperm.xlu0 %13967, %v15226_v9   ;;  %1294 = vperm.xlu1 %13948, %v15294_v23  }
 0x13c   : > { %720 = vperm.xlu0 %13967, %v15236_v11   ;;  %1298 = vperm.xlu1 %13948, %v15260_v16   ;;  %v14025_v11 = vld [vmem:[#allocation11 + $0x1f4] ss:$8 sps:$4 sm:$0xff]  }
 0x140   : > { %728 = vperm.xlu0 %13967, %v15241_v12   ;;  %13949 = vset.pattern.permute.xlu1 %v14868_v2  ;;  %v1869_v2 = vld [vmem:[#allocation2 + $0x160] sm:$0x11] }
 0x141   : > { %473 = vperm.xlu1 %13949, %v15223_v8   ;;  %v1870_v3 = vsel %vm15365_vm13, 0, %v1869_v2  ;;  %v15472_v2 = vrot.slane %v1220_v53, %v15429_v44 }
 0x142   : > { %1871 = vst [vmem:[#allocation2 + $0x160] sm:$0x11] %v1870_v3 }
 0x144   : > { %736 = vperm.xlu0 %13967, %v15344_v54  }
 0x145   : > { %548 = vperm.xlu1 %13949, %v15349_v55  }
 0x148   : > { %13969 = vset.pattern.permute.xlu0 %v19340_v7 }
 0x149   : > { %1009 = vperm.xlu0 %13969, %v15210_v4   ;;  %13950 = vset.pattern.permute.xlu1 %v19336_v1  ;;  %v14022_v4 = vld [vmem:[#allocation11 + $0x1e4] ss:$8 sps:$4 sm:$0xff]  }
 0x14a   : > { %700 = vperm.xlu1 %13950, %v15265_v17   ;;  %2657 = vmatprep.subr.bf16.mxu0 %v14022_v4 }
 0x14b   : > { %7660 = vmatprep.subr.bf16.mxu1 %v14022_v4  ;;  %2658 = vmatpush1.bf16.msra.mxu0 %v14024_v5 }
 0x14c   : > { %7661 = vmatpush1.bf16.msra.mxu1 %v14024_v5  ;;  %2659 = vmatprep.subr.bf16.mxu0 %v14025_v11 }
 0x14d   : > { %953 = vperm.xlu0 %13969, %v15232_v10   ;;  %7662 = vmatprep.subr.bf16.mxu1 %v14025_v11 }
 0x14e   : > { %764 = vperm.xlu1 %13950, %v15349_v55  }
 0x14f   : > { %2660 = vmatpush1.bf16.msra.mxu0 %v14027_v14 }
 0x150   : > { %7663 = vmatpush1.bf16.msra.mxu1 %v14027_v14 }
 0x151   : > { %v15374_v6 = vpop.permute.xlu1 %740  ;;  %1021 = vperm.xlu0 %13969, %v15245_v13   ;;  %v15377_v9 = vpop.permute.xlu0 %1282  ;;  %v15387_v13 = vld [vmem:[#allocation2 + $0x10] sm:$0xff] }
 0x152   : > { %768 = vperm.xlu1 %13950, %v15270_v18   ;;  %v12359_v23 = vcombine.high %v15387_v13, %v15387_v13 }
 0x154   : > { %2661 = vmatprep.mubr.bf16.mxu0 %v12359_v23  ;;  %v1390_v23 = vmul.f32 %v15469_v63, %v15377_v9 }
 0x155   : > { %v15380_v10 = vpop.permute.xlu1 %744  ;;  %961 = vperm.xlu0 %13969, %v15256_v15   ;;  %v15383_v12 = vpop.permute.xlu0 %1226  ;;  %v12358_v15 = vcombine.low %v15387_v13, %v15387_v13 }
 0x156   : > { %13951 = vset.pattern.permute.xlu1 %v19340_v7 }
 0x157   : > { %973 = vperm.xlu1 %13951, %v15223_v8   ;;  %2662 = vmatmul.mubr.bf16.vlgmr.msra.gmra.mrb[0].mxu0 %v12358_v15  ;;  %v1391_v15 = vmul.f32 %v15472_v2, %v15377_v9  ;;  %v15492_v9 = vrot.slane %v1488_v28, %v15427_v43 }
 0x159   : > { %1029 = vperm.xlu0 %13969, %v15260_v16   ;;  %v15392_v24 = vpop.permute.xlu0 %1234 }
 0x15a   : > { %v15396_v25 = vpop.permute.xlu1 %1013 }
 0x15b   : > { %1033 = vperm.xlu1 %13951, %v15349_v55   ;;  %v1121_v27 = vmul.f32 %v15453_v57, %v15396_v25  ;;  %v1122_v30 = vmul.f32 %v15456_v58, %v15396_v25 }
 0x15d   : > { %969 = vperm.xlu0 %13969, %v15265_v17   ;;  %v15400_v8 = vpop.permute.xlu0 %1242 }
 0x15f   : > { %v15404_v16 = vpop.permute.xlu1 %1278  ;;  %13952 = vset.pattern.permute.xlu1 %v19338_v0 }
 0x160   : > { %1238 = vperm.xlu1 %13952, %v15265_v17   ;;  %v1801_v17 = vsel %vm15328_vm6, 0, %v1800_v37  ;;  %v1564_v37 = vld [vmem:[#allocation9] sm:$0x3] }
 0x161   : > { %1037 = vperm.xlu0 %13969, %v15270_v18   ;;  %v15411_v33 = vpop.permute.xlu0 %1250  ;;  %1802 = vst [vmem:[#allocation2 + $0x30] sm:$0x88] %v1801_v17  ;;  %v15498_v47 = vrot.slane %v1564_v37, %v15427_v43 }
 0x164   : > { %1302 = vperm.xlu1 %13952, %v15349_v55   ;;  %v15414_v36 = vpop.permute.xlu1 %448 }
 0x165   : > { %v15416_v38 = vpop.permute.xlu0 %1258  ;;  %977 = vperm.xlu0 %13969, %v15274_v19  }
 0x166   : > { %19498 = vst [vmem:[#allocation26_spill] sm:$0xff] %v15416_v38 }
 0x168   : > { %1306 = vperm.xlu1 %13952, %v15270_v18   ;;  %v15422_v40 = vpop.permute.xlu1 %453  ;;  %v682_v18 = vld [vmem:[#allocation6 + $0x1] ss:$4 sm:$0x3] }
 0x169   : > { %v15424_v41 = vpop.permute.xlu0 %1266  ;;  %1045 = vperm.xlu0 %13969, %v15280_v20   ;;  %v15447_v55 = vrot.slane %v682_v18, %v15427_v43  ;;  %v15450_v56 = vrot.slane %v682_v18, %v15429_v44  ;;  %v15501_v18 = vrot.slane %v1564_v37, %v15429_v44  ;;  %v1806_v37 = vld [vmem:[#allocation2 + $0x80] sm:$0x88] }
 0x16a   : > { %19499 = vst [vmem:[#allocation27_spill] sm:$0xff] %v15424_v41 }
 0x16b   : > { %v852_v4 = vmul.f32 %v15447_v55, %v15380_v10  ;;  %v853_v5 = vmul.f32 %v15450_v56, %v15380_v10 }
 0x16c   : > { %13953 = vset.pattern.permute.xlu1 %v15387_v13  ;;  %v15432_v45 = vpop.permute.xlu1 %533 }
 0x16d   : > { %483 = vperm.xlu1 %13953, %v15437_v49   ;;  %985 = vperm.xlu0 %13969, %v15284_v21  }
 0x16e   : > { %v15441_v51 = vpop.permute.xlu0 %518 }
 0x171   : > { %558 = vperm.xlu1 %13953, %v15444_v52   ;;  %v15465_v61 = vpop.permute.xlu1 %684  ;;  %1053 = vperm.xlu0 %13969, %v15289_v22  }
 0x172   : > { %v524_v3 = vpop.permute.xlu0 %523 }
 0x173   : > { %v647_v11 = vmul.f32 %v15459_v59, %v524_v3  ;;  %v648_v14 = vmul.f32 %v15462_v60, %v524_v3 }
 0x175   : > { %v916_v31 = vadd.f32 %v852_v4, %v647_v11  ;;  %v917_v34 = vadd.f32 %v853_v5, %v648_v14  ;;  %13954 = vset.pattern.permute.xlu1 %v19336_v1  ;;  %v749_v10 = vpop.permute.xlu1 %748  ;;  %993 = vperm.xlu0 %13969, %v15298_v26   ;;  %v1803_v5 = vld [vmem:[#allocation2 + $0x58] sm:$0x88] }
 0x176   : > { %v529_v17 = vpop.permute.xlu0 %528  ;;  %708 = vperm.xlu1 %13954, %v15274_v19  }
 0x177   : > { %v1185_v42 = vadd.f32 %v1121_v27, %v916_v31  ;;  %v1186_v25 = vadd.f32 %v1122_v30, %v917_v34  ;;  %v854_v34 = vmul.f32 %v15447_v55, %v749_v10 }
 0x179   : > { %v1454_v26 = vadd.f32 %v1390_v23, %v1185_v42  ;;  %v1455_v48 = vadd.f32 %v1391_v15, %v1186_v25  ;;  %v15503_v50 = vpop.permute.xlu1 %752  ;;  %1061 = vperm.xlu0 %13969, %v15304_v29   ;;  %v1804_v29 = vsel %vm15328_vm6, 0, %v1803_v5  ;;  %v855_v42 = vmul.f32 %v15450_v56, %v749_v10 }
 0x17a   : > { %772 = vperm.xlu1 %13954, %v15444_v52   ;;  %v15507_v53 = vpop.permute.xlu0 %458  ;;  %1805 = vst [vmem:[#allocation2 + $0x58] sm:$0x88] %v1804_v29  ;;  %v649_v25 = vmul.f32 %v15459_v59, %v529_v17  ;;  %v857_v38 = vmul.f32 %v15450_v56, %v15503_v50 }
 0x17b   : > { %v1530_v3 = vmul.f32 %v15492_v9, %v1454_v26  ;;  %v1531_v4 = vmul.f32 %v15495_v39, %v1455_v48  ;;  %v650_v26 = vmul.f32 %v15462_v60, %v529_v17  ;;  %v1807_v48 = vsel %vm15328_vm6, 0, %v1806_v37 }
 0x17c   : > { %1808 = vst [vmem:[#allocation2 + $0x80] sm:$0x88] %v1807_v48  ;;  %v918_v5 = vadd.f32 %v854_v34, %v649_v25 }
 0x17d   : > { %v1606_v11 = vadd.f32 %v15498_v47, %v1530_v3  ;;  %v1607_v14 = vadd.f32 %v15501_v18, %v1531_v4  ;;  %1001 = vperm.xlu0 %13969, %v15309_v32   ;;  %v1830_v4 = vld [vmem:[#allocation2 + $0x1c0] sm:$0x88] }
 0x17e   : > { %776 = vperm.xlu1 %13954, %v15280_v20   ;;  %v15518_v23 = vpop.permute.xlu1 %957  ;;  %v15520_v15 = vpop.permute.xlu0 %543 }
 0x17f   : > { %v1670_v27 = vmax.f32 %v1606_v11, 0.0  ;;  %v1671_v28 = vmax.f32 %v1607_v14, 0.0  ;;  %v919_v11 = vadd.f32 %v855_v42, %v650_v26  ;;  %v1851_v42 = vld [vmem:[#allocation2 + $0x70] sm:$0x11] }
 0x181   : > { %1734 = vst [vmem:[%s15524_s19 + $0xf0] sm:$0xff] %v1670_v27  ;;  %1735 = vst [vmem:[%s15524_s19 + $0xf8] sm:$0xff] %v1671_v28  ;;  %v13286_v32 = vpack.c.bf16 %v1671_v28, %v1670_v27  ;;  %1069 = vperm.xlu0 %13969, %v15315_v35  }
 0x182   : > { %13955 = vset.pattern.permute.xlu1 %v19340_v7  ;;  %v1018_v30 = vpop.permute.xlu1 %1017  ;;  %v15530_v31 = vpop.permute.xlu0 %468  ;;  %v1094_v7 = vmul.f32 %v15456_v58, %v15518_v23 }
 0x183   : > { %2103 = vst [vmem:[#allocation2 + $0x158] sm:$0xff] %v13286_v32  ;;  %981 = vperm.xlu1 %13955, %v15437_v49   ;;  %v1123_v3 = vmul.f32 %v15453_v57, %v1018_v30  ;;  %v1124_v10 = vmul.f32 %v15456_v58, %v1018_v30 }
 0x185   : > { %13972 = vset.pattern.permute.xlu0 %v19338_v0  ;;  %v1187_v29 = vadd.f32 %v1123_v3, %v918_v5  ;;  %v1188_v27 = vadd.f32 %v1124_v10, %v919_v11  ;;  %v1852_v3 = vsel %vm15365_vm13, 0, %v1851_v42 }
 0x186   : > { %v15538_v35 = vpop.permute.xlu0 %553  ;;  %1274 = vperm.xlu0 %13972, %v15344_v54   ;;  %v1831_v54 = vsel %vm15328_vm6, 0, %v1830_v4  ;;  %1853 = vst [vmem:[#allocation2 + $0x70] sm:$0x11] %v1852_v3 }
 0x187   : > { %1041 = vperm.xlu1 %13955, %v15444_v52   ;;  %v15544_v49 = vpop.permute.xlu1 %1222  ;;  %1832 = vst [vmem:[#allocation2 + $0x1c0] sm:$0x88] %v1831_v54 }
 0x18a   : > { %v15548_v17 = vpop.permute.xlu0 %478  ;;  %13973 = vset.pattern.permute.xlu0 %v15387_v13 }
 0x18b   : > { %19502 = vst [vmem:[#allocation30_spill] sm:$0xff] %v15548_v17  ;;  %13956 = vset.pattern.permute.xlu1 %v19338_v0  ;;  %v1287_v14 = vpop.permute.xlu1 %1286  ;;  %v1872_v0 = vld [vmem:[#allocation2 + $0x188] sm:$0x11] }
 0x18c   : > { %v1392_v28 = vmul.f32 %v15469_v63, %v1287_v14  ;;  %v1393_v32 = vmul.f32 %v15472_v2, %v1287_v14  ;;  %1246 = vperm.xlu1 %13956, %v15274_v19  }
 0x18e   : > { %v1456_v30 = vadd.f32 %v1392_v28, %v1187_v29  ;;  %v1457_v34 = vadd.f32 %v1393_v32, %v1188_v27  ;;  %v15557_v37 = vpop.permute.xlu0 %563  ;;  %v14474_v27 = vld [vmem:[%s15187_s15 + $0x48] sm:$0xff]  ;;  %v15580_v32 = vld [vmem:[%s15187_s15 + $0xc0] sm:$0xff] }
 0x18f   : > { %19503 = vst [vmem:[#allocation31_spill] sm:$0xff] %v15557_v37  ;;  %v15559_v25 = vpop.permute.xlu1 %1290 }
 0x190   : > { %v1532_v26 = vmul.f32 %v15492_v9, %v1456_v30  ;;  %v1533_v48 = vmul.f32 %v15495_v39, %v1457_v34  ;;  %1310 = vperm.xlu1 %13956, %v15444_v52  }
 0x192   : > { %v1608_v19 = vadd.f32 %v15498_v47, %v1532_v26  ;;  %v1609_v10 = vadd.f32 %v15501_v18, %v1533_v48  ;;  %v15568_v4 = vpop.permute.xlu0 %488 }
 0x193   : > { %19504 = vst [vmem:[#allocation32_spill] sm:$0xff] %v15568_v4 }
 0x194   : > { %v1672_v5 = vmax.f32 %v1608_v19, 0.0  ;;  %v1673_v11 = vmax.f32 %v1609_v10, 0.0  ;;  %1314 = vperm.xlu1 %13956, %v15280_v20   ;;  %v464_v54 = vpop.permute.xlu1 %463  ;;  %v619_v10 = vmul.f32 %v15459_v59, %v15422_v40 }
 0x196   : > { %1736 = vst [vmem:[%s15524_s19 + $0x100] sm:$0xff] %v1672_v5  ;;  %1737 = vst [vmem:[%s15524_s19 + $0x108] sm:$0xff] %v1673_v11  ;;  %v13287_v52 = vpack.c.bf16 %v1673_v11, %v1672_v5  ;;  %v15573_v14 = vpop.permute.xlu0 %573  ;;  %v620_v5 = vmul.f32 %v15462_v60, %v15422_v40  ;;  %v19510_v40 = vmov 2  }
 0x197   : > { %19505 = vst [vmem:[#allocation33_spill] sm:$0xff] %v15573_v14 }
 0x198   : > { %2104 = vst [vmem:[#allocation2 + $0x178] sm:$0xff] %v13287_v52  ;;  %13957 = vset.pattern.permute.xlu1 %v15387_v13  ;;  %v539_v29 = vpop.permute.xlu1 %538  ;;  %v1362_v52 = vmul.f32 %v15469_v63, %v15383_v12 }
 0x199   : > { %493 = vperm.xlu1 %13957, %v14474_v27  }
 0x19a   : > { %v15577_v28 = vpop.permute.xlu0 %498 }
 0x19b   : > { %19506 = vst [vmem:[#allocation34_spill] sm:$0xff] %v15577_v28 }
 0x19d   : > { %568 = vperm.xlu1 %13957, %v15580_v32   ;;  %v15583_v30 = vpop.permute.xlu1 %692 }
 0x19e   : > { %v15585_v20 = vpop.permute.xlu0 %583 }
 0x19f   : > { %19507 = vst [vmem:[#allocation35_spill] sm:$0xff] %v15585_v20  ;;  %v624_v20 = vmul.f32 %v15462_v60, %v464_v54 }
 0x1a1   : > { %13958 = vset.pattern.permute.xlu1 %v19336_v1  ;;  %v757_v34 = vpop.permute.xlu1 %756  ;;  %v1363_v1 = vmul.f32 %v15472_v2, %v15383_v12 }
 0x1a2   : > { %716 = vperm.xlu1 %13958, %v15284_v21   ;;  %v15589_v42 = vpop.permute.xlu0 %508 }
 0x1a3   : > { %19508 = vst [vmem:[#allocation36_spill] sm:$0xff] %v15589_v42  ;;  %v623_v42 = vmul.f32 %v15459_v59, %v464_v54  ;;  %v1809_v54 = vld [vmem:[#allocation2 + $0xa8] sm:$0x88] }
 0x1a5   : > { %v15591_v26 = vpop.permute.xlu1 %760 }
 0x1a6   : > { %780 = vperm.xlu1 %13958, %v15580_v32   ;;  %v15594_v48 = vpop.permute.xlu0 %593 }
 0x1a7   : > { %19509 = vst [vmem:[#allocation37_spill] sm:$0xff] %v15594_v48 }
 0x1aa   : > { %784 = vperm.xlu1 %13958, %v15289_v22   ;;  %v966_v3 = vpop.permute.xlu1 %965  ;;  %v1093_v22 = vmul.f32 %v15453_v57, %v15518_v23 }
 0x1ab   : > { %v689_v19 = vpop.permute.xlu0 %688 }
 0x1ac   : > { %v824_v21 = vmul.f32 %v15447_v55, %v689_v19  ;;  %v825_v11 = vmul.f32 %v15450_v56, %v689_v19  ;;  %v1873_v19 = vsel %vm15365_vm13, 0, %v1872_v0  ;;  %v1097_v0 = vmul.f32 %v15453_v57, %v966_v3 }
 0x1ad   : > { %1874 = vst [vmem:[#allocation2 + $0x188] sm:$0x11] %v1873_v19 }
 0x1ae   : > { %v888_v44 = vadd.f32 %v824_v21, %v619_v10  ;;  %v889_v43 = vadd.f32 %v825_v11, %v620_v5  ;;  %13959 = vset.pattern.permute.xlu1 %v19510_v40  ;;  %v1026_v48 = vpop.permute.xlu1 %1025  ;;  %v1366_v10 = vmul.f32 %v15469_v63, %v15392_v24  ;;  %v1367_v5 = vmul.f32 %v15472_v2, %v15392_v24 }
 0x1af   : > { %v697_v12 = vpop.permute.xlu0 %696  ;;  %989 = vperm.xlu1 %13959, %v14474_v27   ;;  %v1098_v21 = vmul.f32 %v15456_v58, %v966_v3  ;;  %v1810_v24 = vsel %vm15328_vm6, 0, %v1809_v54 }
 0x1b0   : > { %v1157_v41 = vadd.f32 %v1093_v22, %v888_v44  ;;  %v1158_v28 = vadd.f32 %v1094_v7, %v889_v43  ;;  %v828_v14 = vmul.f32 %v15447_v55, %v697_v12  ;;  %v829_v23 = vmul.f32 %v15450_v56, %v697_v12  ;;  %1811 = vst [vmem:[#allocation2 + $0xa8] sm:$0x88] %v1810_v24 }
 0x1b1   : > { %v858_v7 = vmul.f32 %v15447_v55, %v757_v34  ;;  %v859_v43 = vmul.f32 %v15450_v56, %v757_v34  ;;  %v1127_v34 = vmul.f32 %v15453_v57, %v1026_v48 }
 0x1b2   : > { %v1426_v11 = vadd.f32 %v1362_v52, %v1157_v41  ;;  %v1427_v27 = vadd.f32 %v1363_v1, %v1158_v28  ;;  %v892_v19 = vadd.f32 %v828_v14, %v623_v42  ;;  %v893_v44 = vadd.f32 %v829_v23, %v624_v20  ;;  %v1833_v52 = vld [vmem:[#allocation2 + $0x1e8] sm:$0x88] }
 0x1b3   : > { %1049 = vperm.xlu1 %13959, %v15580_v32   ;;  %v15627_v22 = vpop.permute.xlu1 %1230  ;;  %v15629_v12 = vpop.permute.xlu0 %704  ;;  %v653_v28 = vmul.f32 %v15459_v59, %v539_v29  ;;  %v654_v20 = vmul.f32 %v15462_v60, %v539_v29  ;;  %v1128_v42 = vmul.f32 %v15456_v58, %v1026_v48  ;;  %v1834_v48 = vsel %vm15328_vm6, 0, %v1833_v52 }
 0x1b4   : > { %v1502_v3 = vmul.f32 %v15492_v9, %v1426_v11  ;;  %v1503_v41 = vmul.f32 %v15495_v39, %v1427_v27  ;;  %v1161_v1 = vadd.f32 %v1097_v0, %v892_v19  ;;  %v1162_v14 = vadd.f32 %v1098_v21, %v893_v44  ;;  %v1854_v27 = vld [vmem:[#allocation2 + $0x98] sm:$0x11]  ;;  %1835 = vst [vmem:[#allocation2 + $0x1e8] sm:$0x88] %v1834_v48 }
 0x1b5   : > { %v922_v0 = vadd.f32 %v858_v7, %v653_v28  ;;  %v923_v21 = vadd.f32 %v859_v43, %v654_v20  ;;  %v19511_v19 = vmov 3   ;;  %v1855_v24 = vsel %vm15365_vm13, 0, %v1854_v27  ;;  %v14475_v43 = vld [vmem:[%s15187_s15 + $0x40] sm:$0xff] }
 0x1b6   : > { %v1578_v23 = vadd.f32 %v15498_v47, %v1502_v3  ;;  %v1579_v54 = vadd.f32 %v15501_v18, %v1503_v41  ;;  %v1430_v11 = vadd.f32 %v1366_v10, %v1161_v1  ;;  %v1431_v4 = vadd.f32 %v1367_v5, %v1162_v14  ;;  %1856 = vst [vmem:[#allocation2 + $0x98] sm:$0x11] %v1855_v24 }
 0x1b7   : > { %13960 = vset.pattern.permute.xlu1 %v19511_v19  ;;  %v1295_v44 = vpop.permute.xlu1 %1294  ;;  %v15642_v29 = vpop.permute.xlu0 %712  ;;  %v1191_v41 = vadd.f32 %v1127_v34, %v922_v0  ;;  %v1192_v1 = vadd.f32 %v1128_v42, %v923_v21  ;;  %v850_v0 = vmul.f32 %v15447_v55, %v15374_v6  ;;  %v851_v21 = vmul.f32 %v15450_v56, %v15374_v6 }
 0x1b8   : > { %19512 = vst [vmem:[#allocation38_spill] sm:$0xff] %v15642_v29  ;;  %v15648_v3 = vmax.f32 %v1578_v23, 0.0  ;;  %v15650_v10 = vmax.f32 %v1579_v54, 0.0  ;;  %v1506_v5 = vmul.f32 %v15492_v9, %v1430_v11  ;;  %v1507_v7 = vmul.f32 %v15495_v39, %v1431_v4  ;;  %1254 = vperm.xlu1 %13960, %v14475_v43  }
 0x1b9   : > { %v1396_v14 = vmul.f32 %v15469_v63, %v1295_v44  ;;  %v1397_v28 = vmul.f32 %v15472_v2, %v1295_v44  ;;  %v15685_v24 = vmul.f32 %v15469_v63, %v15400_v8  ;;  %v822_v43 = vmul.f32 %v15447_v55, %v15465_v61 }
 0x1ba   : > { %1706 = vst [vmem:[%s15524_s19 + $0x10] sm:$0xff] %v15648_v3  ;;  %1707 = vst [vmem:[%s15524_s19 + $0x18] sm:$0xff] %v15650_v10  ;;  %v15663_v20 = vpack.c.bf16 %v15650_v10, %v15648_v3  ;;  %v1582_v4 = vadd.f32 %v15498_v47, %v1506_v5  ;;  %v1583_v52 = vadd.f32 %v15501_v18, %v1507_v7 }
 0x1bb   : > { %v1460_v23 = vadd.f32 %v1396_v14, %v1191_v41  ;;  %v1461_v34 = vadd.f32 %v1397_v28, %v1192_v1  ;;  %v15667_v42 = vpop.permute.xlu1 %1298  ;;  %v15669_v54 = vpop.permute.xlu0 %720  ;;  %v15689_v5 = vmul.f32 %v15472_v2, %v15400_v8  ;;  %v646_v7 = vmul.f32 %v15462_v60, %v15441_v51 }
 0x1bc   : > { %19513 = vst [vmem:[#allocation39_spill] sm:$0xff] %v15663_v20  ;;  %19514 = vst [vmem:[#allocation40_spill] sm:$0xff] %v15669_v54  ;;  %v15672_v11 = vmax.f32 %v1582_v4, 0.0  ;;  %v15674_v27 = vmax.f32 %v1583_v52, 0.0  ;;  %1318 = vperm.xlu1 %13960, %v15580_v32   ;;  %v645_v32 = vmul.f32 %v15459_v59, %v15441_v51  ;;  %v15711_v14 = vmul.f32 %v15469_v63, %v15404_v16  ;;  %v14476_v52 = vld [vmem:[%s15187_s15 + $0xc8] sm:$0xff] }
 0x1bd   : > { %2089 = vst [vmem:[#allocation2 + $0x40] sm:$0xff] %v15663_v20  ;;  %v1536_v44 = vmul.f32 %v15492_v9, %v1460_v23  ;;  %v1537_v48 = vmul.f32 %v15495_v39, %v1461_v34  ;;  %v15715_v28 = vmul.f32 %v15472_v2, %v15404_v16  ;;  %v15719_v51 = vmul.f32 %v15469_v63, %v15411_v33 }
 0x1be   : > { %19515 = vst [vmem:[#allocation41_spill] sm:$0xff] %v15672_v11  ;;  %19516 = vst [vmem:[#allocation42_spill] sm:$0xff] %v15674_v27  ;;  %v15699_v6 = vpack.c.bf16 %v15674_v27, %v15672_v11  ;;  %v823_v4 = vmul.f32 %v15450_v56, %v15465_v61  ;;  %v617_v34 = vmul.f32 %v15459_v59, %v15414_v36 }
 0x1bf   : > { %1710 = vst [vmem:[%s15524_s19 + $0x30] sm:$0xff] %v15672_v11  ;;  %1711 = vst [vmem:[%s15524_s19 + $0x38] sm:$0xff] %v15674_v27  ;;  %v1612_v8 = vadd.f32 %v15498_v47, %v1536_v44  ;;  %v1613_v41 = vadd.f32 %v15501_v18, %v1537_v48  ;;  %v15707_v1 = vpop.permute.xlu0 %728  ;;  %v856_v16 = vmul.f32 %v15447_v55, %v15503_v50 }
 0x1c0   : > { %19517 = vst [vmem:[#allocation43_spill] sm:$0xff] %v15699_v6  ;;  %19518 = vst [vmem:[#allocation44_spill] sm:$0xff] %v15707_v1  ;;  %1322 = vperm.xlu1 %13960, %v14476_v52   ;;  %v474_v23 = vpop.permute.xlu1 %473  ;;  %v618_v61 = vmul.f32 %v15462_v60, %v15414_v36  ;;  %v651_v1 = vmul.f32 %v15459_v59, %v15432_v45  ;;  %v652_v52 = vmul.f32 %v15462_v60, %v15432_v45 }
 0x1c1   : > { %19519 = vst [vmem:[#allocation45_spill] sm:$0xff] %v15719_v51  ;;  %2091 = vst [vmem:[#allocation2 + $0x68] sm:$0xff] %v15699_v6  ;;  %v15729_v44 = vmax.f32 %v1612_v8, 0.0  ;;  %v15731_v48 = vmax.f32 %v1613_v41, 0.0  ;;  %v914_v54 = vadd.f32 %v850_v0, %v645_v32  ;;  %v915_v46 = vadd.f32 %v851_v21, %v646_v7 }
 0x1c2   : > { %v15741_v51 = vadd.f32 %v822_v43, %v617_v34  ;;  %v15753_v41 = vadd.f32 %v823_v4, %v618_v61  ;;  %v621_v45 = vmul.f32 %v15459_v59, %v15507_v53  ;;  %v622_v50 = vmul.f32 %v15462_v60, %v15507_v53  ;;  %v15772_v53 = vld [vmem:[%s15187_s15 + $0x58] sm:$0xff] }
 0x1c3   : > { %19520 = vst [vmem:[#allocation46_spill] sm:$0xff] %v15729_v44  ;;  %19521 = vst [vmem:[#allocation47_spill] sm:$0xff] %v15731_v48  ;;  %v15749_v36 = vpack.c.bf16 %v15731_v48, %v15729_v44  ;;  %v15751_v8 = vpop.permute.xlu0 %736  ;;  %v826_v0 = vmul.f32 %v15447_v55, %v15583_v30  ;;  %v15762_v32 = vadd.f32 %v856_v16, %v651_v1  ;;  %v15784_v16 = vld [vmem:[%s15187_s15 + $0xd0] sm:$0xff] }
 0x1c4   : > { %1740 = vst [vmem:[%s15524_s19 + $0x120] sm:$0xff] %v15729_v44  ;;  %1741 = vst [vmem:[%s15524_s19 + $0x128] sm:$0xff] %v15731_v48  ;;  %13961 = vset.pattern.permute.xlu1 %v15387_v13  ;;  %v549_v21 = vpop.permute.xlu1 %548  ;;  %v655_v7 = vmul.f32 %v15459_v59, %v15520_v15  ;;  %v827_v43 = vmul.f32 %v15450_v56, %v15583_v30  ;;  %v860_v4 = vmul.f32 %v15447_v55, %v15591_v26 }
 0x1c5   : > { %19522 = vst [vmem:[#allocation48_spill] sm:$0xff] %v15749_v36  ;;  %19523 = vst [vmem:[#allocation49_spill] sm:$0xff] %v15751_v8  ;;  %503 = vperm.xlu1 %13961, %v15772_v53   ;;  %v15775_v34 = vadd.f32 %v857_v38, %v652_v52  ;;  %v656_v13 = vmul.f32 %v15462_v60, %v15520_v15  ;;  %v625_v1 = vmul.f32 %v15459_v59, %v15530_v31 }
 0x1c6   : > { %2106 = vst [vmem:[#allocation2 + $0x1a0] sm:$0xff] %v15749_v36  ;;  %v626_v30 = vmul.f32 %v15462_v60, %v15530_v31  ;;  %v15788_v61 = vmul.f32 %v15459_v59, %v15538_v35  ;;  %v15792_v8 = vmul.f32 %v15462_v60, %v15538_v35  ;;  %v1360_v38 = vmul.f32 %v15469_v63, %v15544_v49 }
 0x1c7   : > { %v861_v15 = vmul.f32 %v15450_v56, %v15591_v26  ;;  %v1361_v52 = vmul.f32 %v15472_v2, %v15544_v49  ;;  %v15802_v31 = vmul.f32 %v15469_v63, %v15559_v25  ;;  %v15806_v44 = vmul.f32 %v15472_v2, %v15559_v25 }
 0x1c8   : > { %v15808_v29 = vadd.f32 %v826_v0, %v621_v45  ;;  %v1010_v35 = vpop.permute.xlu0 %1009  ;;  %v15810_v37 = vadd.f32 %v827_v43, %v622_v50  ;;  %v15812_v17 = vadd.f32 %v860_v4, %v655_v7  ;;  %v832_v20 = vmul.f32 %v15447_v55, %v15629_v12 }
 0x1c9   : > { %v1119_v26 = vmul.f32 %v15453_v57, %v1010_v35  ;;  %v1120_v6 = vmul.f32 %v15456_v58, %v1010_v35  ;;  %578 = vperm.xlu1 %13961, %v15784_v16   ;;  %v701_v49 = vpop.permute.xlu1 %700  ;;  %v833_v25 = vmul.f32 %v15450_v56, %v15629_v12  ;;  %v627_v45 = vmul.f32 %v15459_v59, %v474_v23  ;;  %v1875_v35 = vld [vmem:[#allocation2 + $0x1b0] sm:$0x11] }
 0x1ca   : > { %v628_v50 = vmul.f32 %v15462_v60, %v474_v23  ;;  %v15823_v0 = vadd.f32 %v861_v15, %v656_v13  ;;  %v15827_v7 = vmul.f32 %v15469_v63, %v15627_v22  ;;  %v15831_v48 = vmul.f32 %v15472_v2, %v15627_v22 }
 0x1cb   : > { %v1183_v43 = vadd.f32 %v1119_v26, %v914_v54  ;;  %v1184_v4 = vadd.f32 %v1120_v6, %v915_v46  ;;  %v15835_v12 = vmul.f32 %v15469_v63, %v15667_v42  ;;  %v15839_v23 = vmul.f32 %v15472_v2, %v15667_v42 }
 0x1cc   : > { %v954_v13 = vpop.permute.xlu0 %953  ;;  %v1876_v15 = vsel %vm15365_vm13, 0, %v1875_v35  ;;  %v19524_v26 = vmov 1   ;;  %v896_v36 = vadd.f32 %v832_v20, %v627_v45  ;;  %v15848_v27 = vadd.f32 %v833_v25, %v628_v50  ;;  %v15853_v35 = vld [vmem:[%s15187_s15 + $0x50] sm:$0xff] }
 0x1cd   : > { %v1452_v46 = vadd.f32 %v15711_v14, %v1183_v43  ;;  %v1453_v54 = vadd.f32 %v15715_v28, %v1184_v4  ;;  %v1091_v22 = vmul.f32 %v15453_v57, %v954_v13  ;;  %v1092_v6 = vmul.f32 %v15456_v58, %v954_v13  ;;  %13962 = vset.pattern.permute.xlu1 %v19524_v26  ;;  %v765_v11 = vpop.permute.xlu1 %764 }
 0x1ce   : > { %1877 = vst [vmem:[#allocation2 + $0x1b0] sm:$0x11] %v1876_v15  ;;  %v830_v42 = vmul.f32 %v15447_v55, %v701_v49  ;;  %v831_v62 = vmul.f32 %v15450_v56, %v701_v49  ;;  %724 = vperm.xlu1 %13962, %v15853_v35   ;;  %v657_v20 = vmul.f32 %v15459_v59, %v549_v21 }
 0x1cf   : > { %v1528_v14 = vmul.f32 %v15492_v9, %v1452_v46  ;;  %v1529_v28 = vmul.f32 %v15495_v39, %v1453_v54  ;;  %v1155_v43 = vadd.f32 %v1091_v22, %v15741_v51  ;;  %v1156_v4 = vadd.f32 %v1092_v6, %v15753_v41 }
 0x1d0   : > { %v658_v25 = vmul.f32 %v15462_v60, %v549_v21  ;;  %v862_v45 = vmul.f32 %v15447_v55, %v765_v11  ;;  %v863_v49 = vmul.f32 %v15450_v56, %v765_v11  ;;  %v1022_v50 = vpop.permute.xlu0 %1021  ;;  %v15868_v51 = vadd.f32 %v830_v42, %v625_v1 }
 0x1d1   : > { %v1604_v13 = vadd.f32 %v15498_v47, %v1528_v14  ;;  %v1605_v15 = vadd.f32 %v15501_v18, %v1529_v28  ;;  %v1424_v46 = vadd.f32 %v1360_v38, %v1155_v43  ;;  %v1425_v26 = vadd.f32 %v1361_v52, %v1156_v4  ;;  %v15866_v54 = vpop.permute.xlu1 %768 }
 0x1d2   : > { %v15870_v41 = vadd.f32 %v831_v62, %v626_v30  ;;  %v1125_v21 = vmul.f32 %v15453_v57, %v1022_v50  ;;  %v1126_v22 = vmul.f32 %v15456_v58, %v1022_v50  ;;  %788 = vperm.xlu1 %13962, %v15784_v16   ;;  %v15877_v52 = vadd.f32 %v862_v45, %v657_v20  ;;  %v15896_v45 = vld [vmem:[%s15187_s15 + $0xd8] sm:$0xff] }
 0x1d3   : > { %v1668_v11 = vmax.f32 %v1604_v13, 0.0  ;;  %v1669_v6 = vmax.f32 %v1605_v15, 0.0  ;;  %v1500_v14 = vmul.f32 %v15492_v9, %v1424_v46  ;;  %v1501_v38 = vmul.f32 %v15495_v39, %v1425_v26 }
 0x1d4   : > { %v15879_v28 = vadd.f32 %v863_v49, %v658_v25  ;;  %v1189_v62 = vadd.f32 %v1125_v21, %v15762_v32  ;;  %v1190_v1 = vadd.f32 %v1126_v22, %v15775_v34  ;;  %v962_v30 = vpop.permute.xlu0 %961  ;;  %v864_v32 = vmul.f32 %v15447_v55, %v15866_v54 }
 0x1d5   : > { %1732 = vst [vmem:[%s15524_s19 + $0xe0] sm:$0xff] %v1668_v11  ;;  %1733 = vst [vmem:[%s15524_s19 + $0xe8] sm:$0xff] %v1669_v6  ;;  %v15885_v42 = vpack.c.bf16 %v1669_v6, %v1668_v11  ;;  %v1576_v43 = vadd.f32 %v15498_v47, %v1500_v14  ;;  %v1577_v4 = vadd.f32 %v15501_v18, %v1501_v38 }
 0x1d6   : > { %v1095_v26 = vmul.f32 %v15453_v57, %v962_v30  ;;  %v1458_v20 = vadd.f32 %v15802_v31, %v1189_v62  ;;  %v1459_v25 = vadd.f32 %v15806_v44, %v1190_v1  ;;  %v1096_v34 = vmul.f32 %v15456_v58, %v962_v30  ;;  %792 = vperm.xlu1 %13962, %v15896_v45   ;;  %v974_v49 = vpop.permute.xlu1 %973 }
 0x1d7   : > { %2102 = vst [vmem:[#allocation2 + $0x150] sm:$0xff] %v15885_v42  ;;  %v15900_v50 = vmax.f32 %v1576_v43, 0.0  ;;  %v15902_v13 = vmax.f32 %v1577_v4, 0.0  ;;  %v1101_v31 = vmul.f32 %v15453_v57, %v974_v49  ;;  %v1102_v22 = vmul.f32 %v15456_v58, %v974_v49 }
 0x1d8   : > { %v1159_v44 = vadd.f32 %v1095_v26, %v15808_v29  ;;  %v1534_v15 = vmul.f32 %v15492_v9, %v1458_v20  ;;  %v1535_v46 = vmul.f32 %v15495_v39, %v1459_v25  ;;  %v1160_v21 = vadd.f32 %v1096_v34, %v15810_v37  ;;  %v1030_v11 = vpop.permute.xlu0 %1029 }
 0x1d9   : > { %1704 = vst [vmem:[%s15524_s19] sm:$0xff] %v15900_v50  ;;  %1705 = vst [vmem:[%s15524_s19 + $0x8] sm:$0xff] %v15902_v13  ;;  %v15916_v6 = vpack.c.bf16 %v15902_v13, %v15900_v50  ;;  %v1165_v14 = vadd.f32 %v1101_v31, %v896_v36  ;;  %v1129_v38 = vmul.f32 %v15453_v57, %v1030_v11 }
 0x1da   : > { %v1428_v29 = vadd.f32 %v15827_v7, %v1159_v44  ;;  %v1610_v62 = vadd.f32 %v15498_v47, %v1534_v15  ;;  %v1611_v37 = vadd.f32 %v15501_v18, %v1535_v46  ;;  %v1429_v1 = vadd.f32 %v15831_v48, %v1160_v21  ;;  %13963 = vset.pattern.permute.xlu1 %v19510_v40  ;;  %v1034_v43 = vpop.permute.xlu1 %1033 }
 0x1db   : > { %v1166_v30 = vadd.f32 %v1102_v22, %v15848_v27  ;;  %2088 = vst [vmem:[#allocation2 + $0x38] sm:$0xff] %v15916_v6  ;;  %v1434_v36 = vadd.f32 %v15685_v24, %v1165_v14  ;;  %v1130_v4 = vmul.f32 %v15456_v58, %v1030_v11  ;;  %v1193_v26 = vadd.f32 %v1129_v38, %v15812_v17 }
 0x1dc   : > { %v1504_v7 = vmul.f32 %v15492_v9, %v1428_v29  ;;  %997 = vperm.xlu1 %13963, %v15772_v53   ;;  %v1674_v48 = vmax.f32 %v1610_v62, 0.0  ;;  %v1675_v20 = vmax.f32 %v1611_v37, 0.0  ;;  %v1505_v27 = vmul.f32 %v15495_v39, %v1429_v1  ;;  %v970_v34 = vpop.permute.xlu0 %969 }
 0x1dd   : > { %v1435_v25 = vadd.f32 %v15689_v5, %v1166_v30  ;;  %v1510_v44 = vmul.f32 %v15492_v9, %v1434_v36  ;;  %v1194_v31 = vadd.f32 %v1130_v4, %v15823_v0  ;;  %v1462_v24 = vadd.f32 %v15835_v12, %v1193_v26 }
 0x1de   : > { %v1580_v49 = vadd.f32 %v15498_v47, %v1504_v7  ;;  %1738 = vst [vmem:[%s15524_s19 + $0x110] sm:$0xff] %v1674_v48  ;;  %1739 = vst [vmem:[%s15524_s19 + $0x118] sm:$0xff] %v1675_v20  ;;  %v15939_v17 = vpack.c.bf16 %v1675_v20, %v1674_v48  ;;  %v865_v53 = vmul.f32 %v15450_v56, %v15866_v54 }
 0x1df   : > { %v1581_v15 = vadd.f32 %v15501_v18, %v1505_v27  ;;  %v1511_v5 = vmul.f32 %v15495_v39, %v1435_v25  ;;  %v1586_v21 = vadd.f32 %v15498_v47, %v1510_v44  ;;  %v1463_v0 = vadd.f32 %v15839_v23, %v1194_v31  ;;  %v1239_v22 = vpop.permute.xlu1 %1238 }
 0x1e0   : > { %v15945_v46 = vmax.f32 %v1580_v49, 0.0  ;;  %v1538_v12 = vmul.f32 %v15492_v9, %v1462_v24  ;;  %1057 = vperm.xlu1 %13963, %v15784_v16   ;;  %2105 = vst [vmem:[#allocation2 + $0x180] sm:$0xff] %v15939_v17  ;;  %v928_v54 = vadd.f32 %v864_v32, %v15788_v61  ;;  %v1131_v14 = vmul.f32 %v15453_v57, %v1034_v43  ;;  %v1038_v1 = vpop.permute.xlu0 %1037  ;;  %v7130_v24 = vld [vmem:[#allocation2 + $0x158] sm:$0xff] }
 0x1e1   : > { %v15953_v11 = vmax.f32 %v1581_v15, 0.0  ;;  %v1587_v29 = vadd.f32 %v15501_v18, %v1511_v5  ;;  %v15959_v38 = vmax.f32 %v1586_v21, 0.0  ;;  %v1539_v23 = vmul.f32 %v15495_v39, %v1463_v0 }
 0x1e2   : > { %1708 = vst [vmem:[%s15524_s19 + $0x20] sm:$0xff] %v15945_v46  ;;  %v1614_v62 = vadd.f32 %v15498_v47, %v1538_v12  ;;  %v1099_v37 = vmul.f32 %v15453_v57, %v970_v34  ;;  %v1132_v30 = vmul.f32 %v15456_v58, %v1034_v43  ;;  %v1100_v7 = vmul.f32 %v15456_v58, %v970_v34 }
 0x1e3   : > { %1709 = vst [vmem:[%s15524_s19 + $0x28] sm:$0xff] %v15953_v11  ;;  %v15968_v61 = vpack.c.bf16 %v15953_v11, %v15945_v46  ;;  %v15970_v32 = vmax.f32 %v1587_v29, 0.0  ;;  %1714 = vst [vmem:[%s15524_s19 + $0x50] sm:$0xff] %v15959_v38  ;;  %v1615_v36 = vadd.f32 %v15501_v18, %v1539_v23  ;;  %v1368_v48 = vmul.f32 %v15469_v63, %v1239_v22  ;;  %v1303_v20 = vpop.permute.xlu1 %1302 }
 0x1e4   : > { %v15977_v4 = vmax.f32 %v1614_v62, 0.0  ;;  %v1163_v26 = vadd.f32 %v1099_v37, %v15868_v51  ;;  %13964 = vset.pattern.permute.xlu1 %v19511_v19  ;;  %v1164_v27 = vadd.f32 %v1100_v7, %v15870_v41  ;;  %v1369_v25 = vmul.f32 %v15472_v2, %v1239_v22  ;;  %v7132_v7 = vld [vmem:[#allocation2 + $0x178] sm:$0xff] }
 0x1e5   : > { %2090 = vst [vmem:[#allocation2 + $0x60] sm:$0xff] %v15968_v61  ;;  %1715 = vst [vmem:[%s15524_s19 + $0x58] sm:$0xff] %v15970_v32  ;;  %v15987_v43 = vpack.c.bf16 %v15970_v32, %v15959_v38  ;;  %v1133_v51 = vmul.f32 %v15453_v57, %v1038_v1  ;;  %1262 = vperm.xlu1 %13964, %v15853_v35   ;;  %v929_v34 = vadd.f32 %v865_v53, %v15792_v8 }
 0x1e6   : > { %v15994_v49 = vmax.f32 %v1615_v36, 0.0  ;;  %1742 = vst [vmem:[%s15524_s19 + $0x130] sm:$0xff] %v15977_v4  ;;  %v1432_v44 = vadd.f32 %v1368_v48, %v1163_v26  ;;  %v1134_v31 = vmul.f32 %v15456_v58, %v1038_v1  ;;  %v1195_v41 = vadd.f32 %v1131_v14, %v15877_v52  ;;  %v2125_v36 = vld [vmem:[#allocation2 + $0x30] sm:$0x88]  ;;  %v7134_v26 = vld [vmem:[#allocation2 + $0x198] sm:$0x88] }
 0x1e7   : > { %2093 = vst [vmem:[#allocation2 + $0x90] sm:$0xff] %v15987_v43  ;;  %v1196_v15 = vadd.f32 %v1132_v30, %v15879_v28  ;;  %v1433_v5 = vadd.f32 %v1369_v25, %v1164_v27  ;;  %v12815_v21 = vcombine.high %v15885_v42, %v7130_v24  ;;  %v1197_v53 = vadd.f32 %v1133_v51, %v928_v54  ;;  %v1307_v12 = vpop.permute.xlu1 %1306  ;;  %v2128_v51 = vld [vmem:[#allocation2 + $0x58] sm:$0x88] }
 0x1e8   : > { %1743 = vst [vmem:[%s15524_s19 + $0x138] sm:$0xff] %v15994_v49  ;;  %v16007_v8 = vpack.c.bf16 %v15994_v49, %v15977_v4  ;;  %v1508_v35 = vmul.f32 %v15492_v9, %v1432_v44  ;;  %v1198_v0 = vadd.f32 %v1134_v31, %v929_v34  ;;  %v12814_v52 = vcombine.low %v15885_v42, %v7130_v24 }
 0x1e9   : > { %v1509_v22 = vmul.f32 %v15495_v39, %v1433_v5  ;;  %7664 = vmatprep.mubr.bf16.mxu1 %v12815_v21  ;;  %v1400_v28 = vmul.f32 %v15469_v63, %v1303_v20  ;;  %v1401_v29 = vmul.f32 %v15472_v2, %v1303_v20  ;;  %v14521_v23 = vpack.c.bf16 %v15650_v10, %v15902_v13 }
 0x1ea   : > { %2107 = vst [vmem:[#allocation2 + $0x1a8] sm:$0xff] %v16007_v8  ;;  %v1584_v14 = vadd.f32 %v15498_v47, %v1508_v35  ;;  %v14522_v54 = vpack.c.bf16 %v15648_v3, %v15900_v50  ;;  %v1402_v62 = vmul.f32 %v15469_v63, %v1307_v12  ;;  %1326 = vperm.xlu1 %13964, %v15784_v16   ;;  %v2171_v44 = vshrl.u32 %v2125_v36, 16  ;;  %v19531_v36 = vld [vmem:[#allocation43_spill] sm:$0xff] }
 0x1eb   : > { %v1585_v42 = vadd.f32 %v15501_v18, %v1509_v22  ;;  %7665 = vmatmul.mubr.bf16.vlgmr.msra.gmra.mrb[0].mxu1 %v12814_v52  ;;  %v1464_v37 = vadd.f32 %v1400_v28, %v1195_v41  ;;  %v1465_v1 = vadd.f32 %v1401_v29, %v1196_v15  ;;  %v1403_v30 = vmul.f32 %v15472_v2, %v1307_v12  ;;  %v19527_v28 = vld [vmem:[#allocation41_spill] sm:$0xff] }
 0x1ec   : > { %v16026_v10 = vmul.f32 %v15472_v2, %v15411_v33  ;;  %v16028_v3 = vmax.f32 %v1584_v14, 0.0  ;;  %2671 = vmatprep.mubr.bf16.mxu0 %v14521_v23  ;;  %v1466_v50 = vadd.f32 %v1402_v62, %v1197_v53  ;;  %v12817_v16 = vcombine.high %v7132_v7, %v15939_v17  ;;  %v16035_v25 = vpop.permute.xlu1 %483  ;;  %v19526_v53 = vld [vmem:[#allocation48_spill] sm:$0xff]  ;;  %v16067_v23 = vld [vmem:[#allocation2 + $0x10] sm:$0xff] }
 0x1ed   : > { %v16031_v13 = vmax.f32 %v1585_v42, 0.0  ;;  %v1540_v48 = vmul.f32 %v15492_v9, %v1464_v37  ;;  %v1541_v20 = vmul.f32 %v15495_v39, %v1465_v1  ;;  %2672 = vmatmul.mubr.bf16.gmra.mrb[4].mxu0 %v14522_v54  ;;  %v1467_v27 = vadd.f32 %v1403_v30, %v1198_v0  ;;  %v19529_v54 = vld [vmem:[#allocation47_spill] sm:$0xff] }
 0x1ee   : > { %1712 = vst [vmem:[%s15524_s19 + $0x40] sm:$0xff] %v16028_v3  ;;  %v1542_v33 = vmul.f32 %v15492_v9, %v1466_v50  ;;  %7674 = vmatprep.mubr.bf16.mxu1 %v12817_v16  ;;  %v12816_v34 = vcombine.low %v7132_v7, %v15939_v17  ;;  %1330 = vperm.xlu1 %13964, %v15896_v45   ;;  %v7197_v31 = vshrl.u32 %v7134_v26, 16  ;;  %v19525_v17 = vld [vmem:[#allocation42_spill] sm:$0xff]  ;;  %v2193_v45 = vshrl.u32 %v2128_v51, 16  ;;  %v19530_v42 = vld [vmem:[#allocation39_spill] sm:$0xff] }
 0x1ef   : > { %1713 = vst [vmem:[%s15524_s19 + $0x48] sm:$0xff] %v16031_v13  ;;  %v16046_v24 = vpack.c.bf16 %v16031_v13, %v16028_v3  ;;  %v1616_v41 = vadd.f32 %v15498_v47, %v1540_v48  ;;  %v1617_v15 = vadd.f32 %v15501_v18, %v1541_v20  ;;  %v1543_v5 = vmul.f32 %v15495_v39, %v1467_v27  ;;  %v16086_v7 = vld [vmem:[%s15187_s15 + $0x68] sm:$0xff]  ;;  %v16092_v50 = vld [vmem:[#allocation2 + $0x80] sm:$0x88]  ;;  %v16097_v16 = vld [vmem:[%s15187_s15 + $0xe0] sm:$0xff] }
 0x1f0   : > { %v1618_v21 = vadd.f32 %v15498_v47, %v1542_v33  ;;  %v14523_v35 = vpack.c.bf16 %v19525_v17, %v15953_v11  ;;  %v7202_v0 = vshrl.u32 %v19526_v53, 16  ;;  %v14524_v29 = vpack.c.bf16 %v19527_v28, %v15945_v46  ;;  %v16063_v14 = vpop.permute.xlu1 %558  ;;  %19528 = vst [vmem:[#allocation42_spill] sm:$0xff] %v16067_v23  ;;  %v19532_v33 = vld [vmem:[#allocation30_spill] sm:$0xff] }
 0x1f1   : > { %2092 = vst [vmem:[#allocation2 + $0x88] sm:$0xff] %v16046_v24  ;;  %v16056_v12 = vmax.f32 %v1616_v41, 0.0  ;;  %v16058_v22 = vmax.f32 %v1617_v15, 0.0  ;;  %v1619_v52 = vadd.f32 %v15501_v18, %v1543_v5  ;;  %v14525_v62 = vpack.c.bf16 %v15994_v49, %v19529_v54  ;;  %v14028_v54 = vld [vmem:[#allocation11] ss:$8 sps:$4 sm:$0xff]  }
 0x1f2   : > { %v16065_v11 = vmax.f32 %v1618_v21, 0.0  ;;  %2681 = vmatprep.mubr.bf16.mxu0 %v14523_v35  ;;  %13966 = vset.pattern.permute.xlu1 %v16067_v23  ;;  %v2185_v37 = vshrl.u32 %v19530_v42, 16  ;;  %v16073_v1 = vrot.slane %v7197_v31, 11  ;;  %v14526_v49 = vpack.c.bf16 %v15970_v32, %v16031_v13  ;;  %v19535_v21 = vld [vmem:[#allocation38_spill] sm:$0xff]  ;;  %v7137_v15 = vld [vmem:[#allocation2 + $0x1c0] sm:$0x88] }
 0x1f3   : > { %1744 = vst [vmem:[%s15524_s19 + $0x140] sm:$0xff] %v16056_v12  ;;  %1745 = vst [vmem:[%s15524_s19 + $0x148] sm:$0xff] %v16058_v22  ;;  %v16081_v46 = vpack.c.bf16 %v16058_v22, %v16056_v12  ;;  %v16083_v30 = vmax.f32 %v1619_v52, 0.0  ;;  %7675 = vmatmul.mubr.bf16.gmra.mrb[4].mxu1 %v12816_v34  ;;  %513 = vperm.xlu1 %13966, %v16086_v7   ;;  %v2207_v26 = vshrl.u32 %v19531_v36, 16  ;;  %v12351_v20 = vrot.slane %v2171_v44, 11  ;;  %v19536_v35 = vld [vmem:[#allocation46_spill] sm:$0xff] }
 0x1f4   : > { %1746 = vst [vmem:[%s15524_s19 + $0x150] sm:$0xff] %v16065_v11  ;;  %7684 = vmatprep.mubr.bf16.mxu1 %v14525_v62  ;;  %v14527_v48 = vpack.c.bf16 %v15959_v38, %v16028_v3  ;;  %v2176_v27 = vshrl.u32 %v15916_v6, 16  ;;  %v16102_v51 = vrot.slane %v7202_v0, 7  ;;  %v629_v32 = vmul.f32 %v15459_v59, %v19532_v33  ;;  %v19534_v3 = vld [vmem:[#allocation31_spill] sm:$0xff]  ;;  %v14030_v0 = vld [vmem:[#allocation11 + $0x4] ss:$8 sps:$4 sm:$0xff]  }
 0x1f5   : > { %v630_v13 = vmul.f32 %v15462_v60, %v19532_v33  ;;  %2108 = vst [vmem:[#allocation2 + $0x1c8] sm:$0xff] %v16081_v46  ;;  %1747 = vst [vmem:[%s15524_s19 + $0x158] sm:$0xff] %v16083_v30  ;;  %v16113_v34 = vpack.c.bf16 %v16083_v30, %v16065_v11  ;;  %2682 = vmatmul.mubr.bf16.gmra.mrb[8].mxu0 %v14524_v29  ;;  %v16115_v38 = vrot.slane %v2193_v45, 11  ;;  %v709_v41 = vpop.permute.xlu1 %708  ;;  %v7205_v5 = vshll.u32 %v19526_v53, 16 }
 0x1f6   : > { %v16119_v44 = vmul.f32 %v15459_v59, %v19534_v3  ;;  %v16123_v31 = vmul.f32 %v15462_v60, %v19534_v3  ;;  %2691 = vmatprep.mubr.bf16.mxu0 %v14526_v49  ;;  %v836_v17 = vmul.f32 %v15447_v55, %v19535_v21  ;;  %v14528_v45 = vpack.c.bf16 %v15977_v4, %v19536_v35 }
 0x1f7   : > { %19533 = vst [vmem:[#allocation48_spill] sm:$0xff] %v16113_v34  ;;  %2109 = vst [vmem:[#allocation2 + $0x1d0] sm:$0xff] %v16113_v34  ;;  %588 = vperm.xlu1 %13966, %v16097_v16   ;;  %v2187_v52 = vrot.slane %v2185_v37, 7  ;;  %v2209_v28 = vrot.slane %v2207_v26, 7  ;;  %v14529_v29 = vpack.c.bf16 %v16083_v30, %v16058_v22  ;;  %v2178_v62 = vrot.slane %v2176_v27, 7  ;;  %2966 = vmatprep.subr.bf16.mxu0 %v14030_v0  ;;  %v978_v30 = vpop.permute.xlu0 %977 }
 0x1f8   : > { %v2179_v53 = vshll.u32 %v15916_v6, 16  ;;  %v7207_v49 = vor.u32 %v7205_v5, %v16102_v51  ;;  %v631_v33 = vmul.f32 %v15459_v59, %v16035_v25  ;;  %7969 = vmatprep.subr.bf16.mxu1 %v14030_v0  ;;  %v2188_v4 = vshll.u32 %v19530_v42, 16  ;;  %2967 = vmatpush1.bf16.msra.mxu0 %v14028_v54  ;;  %v14031_v6 = vld [vmem:[#allocation11 + $0x10] ss:$8 sps:$4 sm:$0xff]   ;;  %v14033_v5 = vld [vmem:[#allocation11 + $0x14] ss:$8 sps:$4 sm:$0xff]  }
 0x1f9   : > { %v2198_v3 = vshrl.u32 %v15968_v61, 16  ;;  %v2210_v37 = vshll.u32 %v19531_v36, 16  ;;  %v834_v26 = vmul.f32 %v15447_v55, %v709_v41  ;;  %v835_v22 = vmul.f32 %v15450_v56, %v709_v41  ;;  %v773_v27 = vpop.permute.xlu1 %772  ;;  %7970 = vmatpush1.bf16.msra.mxu1 %v14028_v54  ;;  %v14036_v36 = vld [vmem:[#allocation11 + $0x24] ss:$8 sps:$4 sm:$0xff]   ;;  %2968 = vmatprep.subr.bf16.mxu0 %v14033_v5 }
 0x1fa   : > { %v2181_v35 = vor.u32 %v2179_v53, %v2178_v62  ;;  %v837_v42 = vmul.f32 %v15450_v56, %v19535_v21  ;;  %v19537_v0 = vmov 1   ;;  %v2183_v23 = vrot.slane %v2178_v62, 4  ;;  %v16156_v53 = vld [vmem:[%s15187_s15 + $0x60] sm:$0xff]  ;;  %7971 = vmatprep.subr.bf16.mxu1 %v14033_v5 }
 0x1fb   : > { %7685 = vmatmul.mubr.bf16.gmra.mrb[8].mxu1 %v14528_v45  ;;  %13968 = vset.pattern.permute.xlu1 %v19537_v0  ;;  %v2190_v19 = vor.u32 %v2188_v4, %v2187_v52  ;;  %v2212_v34 = vor.u32 %v2210_v37, %v2209_v28  ;;  %v632_v54 = vmul.f32 %v15462_v60, %v16035_v25  ;;  %v2200_v45 = vrot.slane %v2198_v3, 7  ;;  %v1046_v37 = vpop.permute.xlu0 %1045 }
 0x1fc   : > { %732 = vperm.xlu1 %13968, %v16156_v53   ;;  %7694 = vmatprep.mubr.bf16.mxu1 %v14529_v29  ;;  %v16161_v21 = vsel %vm16149_vm15, %v12351_v20, %v2181_v35  ;;  %v16166_v0 = vsel %vm16149_vm15, %v16073_v1, %v7207_v49  ;;  %v900_v52 = vadd.f32 %v836_v17, %v631_v33  ;;  %v7219_v29 = vshrl.u32 %v7137_v15, 16  ;;  %v14034_v35 = vld [vmem:[#allocation11 + $0x20] ss:$8 sps:$4 sm:$0xff]   ;;  %v14039_v49 = vld [vmem:[#allocation11 + $0x34] ss:$8 sps:$4 sm:$0xff]  }
 0x1fd   : > { %v1103_v28 = vmul.f32 %v15453_v57, %v978_v30  ;;  %2692 = vmatmul.mubr.bf16.gmra.mrb[12].mxu0 %v14527_v48  ;;  %v16171_v25 = vsel %vm16149_vm15, %v2183_v23, %v2190_v19  ;;  %v898_v62 = vadd.f32 %v834_v26, %v629_v32  ;;  %v899_v4 = vadd.f32 %v835_v22, %v630_v13  ;;  %v777_v3 = vpop.permute.xlu1 %776 }
 0x1fe   : > { %v1104_v20 = vmul.f32 %v15456_v58, %v978_v30  ;;  %2969 = vmatpush1.bf16.msra.mxu0 %v14031_v6  ;;  %v2205_v1 = vrot.slane %v2200_v45, 4  ;;  %v866_v17 = vmul.f32 %v15447_v55, %v773_v27  ;;  %v14530_v48 = vpack.c.bf16 %v16065_v11, %v16056_v12  ;;  %7972 = vmatpush1.bf16.msra.mxu1 %v14031_v6 }
 0x1ff   : > { %2970 = vmatprep.subr.bf16.mxu0 %v14036_v36  ;;  %v2201_v23 = vshll.u32 %v15968_v61, 16  ;;  %v901_v32 = vadd.f32 %v837_v42, %v632_v54  ;;  %v661_v13 = vmul.f32 %v15459_v59, %v16063_v14  ;;  %7973 = vmatprep.subr.bf16.mxu1 %v14036_v36  ;;  %v19540_v12 = vshrl.u32 %v16092_v50, 16  ;;  %v14037_v50 = vld [vmem:[#allocation11 + $0x30] ss:$8 sps:$4 sm:$0xff]  }
 0x200   : > { %796 = vperm.xlu1 %13968, %v16097_v16   ;;  %v662_v33 = vmul.f32 %v15462_v60, %v16063_v14  ;;  %v16190_v26 = vmul.f32 %v15453_v57, %v1046_v37  ;;  %v16194_v22 = vsel %vm16149_vm15, %v2205_v1, %v2212_v34  ;;  %v16196_v30 = vadd.f32 %v1103_v28, %v898_v62  ;;  %v16213_v62 = vld [vmem:[%s15187_s15 + $0xe8] sm:$0xff] }
 0x201   : > { %v12353_v11 = vrot.slane %v19540_v12, 11  ;;  %v2203_v61 = vor.u32 %v2201_v23, %v2200_v45  ;;  %19541 = vst [vmem:[#allocation41_spill] sm:$0xff] %v16194_v22  ;;  %v16198_v6 = vadd.f32 %v1104_v20, %v899_v4  ;;  %v16201_v5 = vmul.f32 %v15456_v58, %v1046_v37  ;;  %v14042_v45 = vld [vmem:[#allocation11 + $0x44] ss:$8 sps:$4 sm:$0xff]  }
 0x202   : > { %2971 = vmatpush1.bf16.msra.mxu0 %v14034_v35  ;;  %v2220_v14 = vshrl.u32 %v16046_v24, 16  ;;  %v867_v42 = vmul.f32 %v15450_v56, %v773_v27  ;;  %v930_v36 = vadd.f32 %v866_v17, %v661_v13  ;;  %v982_v54 = vpop.permute.xlu1 %981  ;;  %v16210_v28 = vrot.slane %v7219_v29, 11  ;;  %7974 = vmatpush1.bf16.msra.mxu1 %v14034_v35  ;;  %v14040_v35 = vld [vmem:[#allocation11 + $0x40] ss:$8 sps:$4 sm:$0xff]  }
 0x203   : > { %7695 = vmatmul.mubr.bf16.gmra.mrb[12].mxu1 %v14530_v48  ;;  %2972 = vmatprep.subr.bf16.mxu0 %v14039_v49  ;;  %v16208_v34 = vsel %vm16149_vm15, %v16115_v38, %v2203_v61  ;;  %v1105_v4 = vmul.f32 %v15453_v57, %v982_v54  ;;  %v1106_v27 = vmul.f32 %v15456_v58, %v982_v54  ;;  %v2223_v29 = vshll.u32 %v16046_v24, 16  ;;  %v19542_v24 = vld [vmem:[#allocation45_spill] sm:$0xff] }
 0x204   : > { %800 = vperm.xlu1 %13968, %v16213_v62   ;;  %v2222_v37 = vrot.slane %v2220_v14, 7  ;;  %v868_v1 = vmul.f32 %v15447_v55, %v777_v3  ;;  %7975 = vmatprep.subr.bf16.mxu1 %v14039_v49  ;;  %v2229_v17 = vshrl.u32 %v15987_v43, 16  ;;  %v869_v48 = vmul.f32 %v15450_v56, %v777_v3  ;;  %v14045_v14 = vld [vmem:[#allocation11 + $0x54] ss:$8 sps:$4 sm:$0xff]  }
 0x205   : > { %v1169_v23 = vadd.f32 %v1105_v4, %v900_v52  ;;  %v1170_v13 = vadd.f32 %v1106_v27, %v901_v32  ;;  %v2232_v12 = vshll.u32 %v15987_v43, 16  ;;  %v7211_v38 = vshrl.u32 %v16007_v8, 16 }
 0x206   : > { %2973 = vmatpush1.bf16.msra.mxu0 %v14037_v50  ;;  %v1042_v61 = vpop.permute.xlu1 %1041  ;;  %v2225_v54 = vor.u32 %v2223_v29, %v2222_v37  ;;  %v2227_v49 = vrot.slane %v2222_v37, 4  ;;  %v2231_v20 = vrot.slane %v2229_v17, 7  ;;  %v931_v15 = vadd.f32 %v867_v42, %v662_v33  ;;  %7976 = vmatpush1.bf16.msra.mxu1 %v14037_v50  ;;  %v14048_v50 = vld [vmem:[#allocation11 + $0x64] ss:$8 sps:$4 sm:$0xff]  }
 0x207   : > { %2974 = vmatprep.subr.bf16.mxu0 %v14042_v45  ;;  %v1438_v19 = vadd.f32 %v19542_v24, %v1169_v23  ;;  %v1439_v22 = vadd.f32 %v16026_v10, %v1170_v13  ;;  %v1135_v52 = vmul.f32 %v15453_v57, %v1042_v61  ;;  %v932_v3 = vadd.f32 %v868_v1, %v16119_v44  ;;  %v14043_v10 = vld [vmem:[#allocation11 + $0x50] ss:$8 sps:$4 sm:$0xff]   ;;  %v16263_v23 = vld [vmem:[#allocation11 + $0x60] ss:$8 sps:$4 sm:$0xff]  }
 0x208   : > { %13970 = vset.pattern.permute.xlu1 %v19510_v40  ;;  %v2234_v43 = vor.u32 %v2232_v12, %v2231_v20  ;;  %v7213_v32 = vrot.slane %v7211_v38, 7  ;;  %v7214_v4 = vshll.u32 %v16007_v8, 16  ;;  %v933_v27 = vadd.f32 %v869_v48, %v16123_v31  ;;  %v16242_v44 = vld [vmem:[#allocation2 + $0xa8] sm:$0x88]  ;;  %7977 = vmatprep.subr.bf16.mxu1 %v14042_v45 }
 0x209   : > { %1005 = vperm.xlu1 %13970, %v16086_v7   ;;  %v1514_v33 = vmul.f32 %v15492_v9, %v1438_v19  ;;  %v1515_v42 = vmul.f32 %v15495_v39, %v1439_v22  ;;  %v16240_v37 = vsel %vm16149_vm15, %v12353_v11, %v2225_v54  ;;  %v1136_v7 = vmul.f32 %v15456_v58, %v1042_v61 }
 0x20a   : > { %2975 = vmatpush1.bf16.msra.mxu0 %v14040_v35  ;;  %v16247_v8 = vsel %vm16149_vm15, %v2227_v49, %v2234_v43  ;;  %v7209_v31 = vrot.slane %v16102_v51, 4  ;;  %v7216_v19 = vor.u32 %v7214_v4, %v7213_v32  ;;  %v1199_v11 = vadd.f32 %v1135_v52, %v930_v36  ;;  %7978 = vmatpush1.bf16.msra.mxu1 %v14040_v35  ;;  %v14073_v49 = vld [vmem:[#allocation11 + $0xf0] ss:$8 sps:$4 sm:$0xff]  }
 0x20b   : > { %2976 = vmatprep.subr.bf16.mxu0 %v14045_v14  ;;  %v1590_v22 = vadd.f32 %v15498_v47, %v1514_v33  ;;  %v1591_v20 = vadd.f32 %v15501_v18, %v1515_v42  ;;  %v1247_v1 = vpop.permute.xlu1 %1246  ;;  %v7224_v38 = vshrl.u32 %v16081_v46, 16  ;;  %v2237_v17 = vshrl.u32 %v16242_v44, 16  ;;  %7979 = vmatprep.subr.bf16.mxu1 %v14045_v14 }
 0x20c   : > { %v1372_v45 = vmul.f32 %v15469_v63, %v1247_v1  ;;  %v1373_v29 = vmul.f32 %v15472_v2, %v1247_v1  ;;  %v16267_v13 = vsel %vm16149_vm15, %v7209_v31, %v7216_v19  ;;  %v1200_v24 = vadd.f32 %v1136_v7, %v931_v15  ;;  %v1812_v19 = vld [vmem:[#allocation2 + $0xd0] sm:$0x88] }
 0x20d   : > { %1065 = vperm.xlu1 %13970, %v16097_v16   ;;  %v16259_v48 = vmax.f32 %v1590_v22, 0.0  ;;  %v16261_v36 = vmax.f32 %v1591_v20, 0.0  ;;  %v19544_v33 = vmov 3   ;;  %v1815_v22 = vld [vmem:[#allocation2 + $0xf8] sm:$0x88]  ;;  %v1201_v20 = vadd.f32 %v16190_v26, %v932_v3 }
 0x20e   : > { %2977 = vmatpush1.bf16.msra.mxu0 %v14043_v10  ;;  %v1436_v12 = vadd.f32 %v1372_v45, %v16196_v30  ;;  %v1437_v61 = vadd.f32 %v1373_v29, %v16198_v6  ;;  %v16285_v30 = vrot.slane %v7224_v38, 7  ;;  %v19543_v6 = vld [vmem:[#allocation48_spill] sm:$0xff]  ;;  %v1202_v15 = vadd.f32 %v16201_v5, %v933_v27  ;;  %7980 = vmatpush1.bf16.msra.mxu1 %v14043_v10  ;;  %v1836_v26 = vld [vmem:[#allocation2 + $0x210] sm:$0x88] }
 0x20f   : > { %2978 = vmatprep.subr.bf16.mxu0 %v14048_v50  ;;  %1718 = vst [vmem:[%s15524_s19 + $0x70] sm:$0xff] %v16259_v48  ;;  %1719 = vst [vmem:[%s15524_s19 + $0x78] sm:$0xff] %v16261_v36  ;;  %v16283_v14 = vpack.c.bf16 %v16261_v36, %v16259_v48  ;;  %v1311_v52 = vpop.permute.xlu1 %1310  ;;  %v7233_v43 = vshrl.u32 %v19543_v6, 16  ;;  %v7227_v7 = vshll.u32 %v16081_v46, 16  ;;  %v16301_v5 = vld [vmem:[#allocation11 + $0x70] ss:$8 sps:$4 sm:$0xff]   ;;  %7981 = vmatprep.subr.bf16.mxu1 %v14048_v50 }
 0x210   : > { %v1512_v32 = vmul.f32 %v15492_v9, %v1436_v12  ;;  %v1513_v4 = vmul.f32 %v15495_v39, %v1437_v61  ;;  %v1404_v42 = vmul.f32 %v15469_v63, %v1311_v52  ;;  %v1405_v31 = vmul.f32 %v15472_v2, %v1311_v52  ;;  %v14051_v61 = vld [vmem:[#allocation11 + $0x74] ss:$8 sps:$4 sm:$0xff]  }
 0x211   : > { %13971 = vset.pattern.permute.xlu1 %v19544_v33  ;;  %2095 = vst [vmem:[#allocation2 + $0xb8] sm:$0xff] %v16283_v14  ;;  %v7235_v1 = vrot.slane %v7233_v43, 7  ;;  %v7236_v27 = vshll.u32 %v19543_v6, 16  ;;  %v1813_v46 = vsel %vm15328_vm6, 0, %v1812_v19  ;;  %v1816_v43 = vsel %vm15328_vm6, 0, %v1815_v22 }
 0x212   : > { %1270 = vperm.xlu1 %13971, %v16156_v53   ;;  %2979 = vmatpush1.bf16.msra.mxu0 %v16263_v23  ;;  %v1588_v38 = vadd.f32 %v15498_v47, %v1512_v32  ;;  %v1589_v45 = vadd.f32 %v15501_v18, %v1513_v4  ;;  %v1468_v29 = vadd.f32 %v1404_v42, %v1199_v11  ;;  %v1839_v50 = vld [vmem:[#allocation2 + $0x238] sm:$0x88]  ;;  %v2251_v42 = vshrl.u32 %v16283_v14, 16 }
 0x213   : > { %v1469_v12 = vadd.f32 %v1405_v31, %v1200_v24  ;;  %v1315_v3 = vpop.permute.xlu1 %1314  ;;  %v7229_v53 = vor.u32 %v7227_v7, %v16285_v30  ;;  %2980 = vmatprep.subr.bf16.mxu0 %v14051_v61  ;;  %1814 = vst [vmem:[#allocation2 + $0xd0] sm:$0x88] %v1813_v46  ;;  %1817 = vst [vmem:[#allocation2 + $0xf8] sm:$0x88] %v1816_v43  ;;  %v1837_v31 = vsel %vm15328_vm6, 0, %v1836_v26  ;;  %7982 = vmatpush1.bf16.msra.mxu1 %v16263_v23 }
 0x214   : > { %v1652_v11 = vmax.f32 %v1588_v38, 0.0  ;;  %v1653_v24 = vmax.f32 %v1589_v45, 0.0  ;;  %v1544_v10 = vmul.f32 %v15492_v9, %v1468_v29  ;;  %v1406_v6 = vmul.f32 %v15469_v63, %v1315_v3  ;;  %v14052_v38 = vld [vmem:[#allocation11 + $0x80] ss:$8 sps:$4 sm:$0xff]   ;;  %v14054_v45 = vld [vmem:[#allocation11 + $0x84] ss:$8 sps:$4 sm:$0xff]   ;;  %7983 = vmatprep.subr.bf16.mxu1 %v14051_v61 }
 0x215   : > { %v1545_v32 = vmul.f32 %v15495_v39, %v1469_v12  ;;  %v1407_v4 = vmul.f32 %v15472_v2, %v1315_v3  ;;  %v7238_v29 = vor.u32 %v7236_v27, %v7235_v1  ;;  %1838 = vst [vmem:[#allocation2 + $0x210] sm:$0x88] %v1837_v31  ;;  %v7231_v26 = vrot.slane %v16285_v30, 4 }
 0x216   : > { %1334 = vperm.xlu1 %13971, %v16097_v16   ;;  %2981 = vmatpush1.bf16.msra.mxu0 %v16301_v5  ;;  %1716 = vst [vmem:[%s15524_s19 + $0x60] sm:$0xff] %v1652_v11  ;;  %1717 = vst [vmem:[%s15524_s19 + $0x68] sm:$0xff] %v1653_v24  ;;  %v13277_v19 = vpack.c.bf16 %v1653_v24, %v1652_v11  ;;  %v1620_v22 = vadd.f32 %v15498_v47, %v1544_v10  ;;  %v1840_v3 = vsel %vm15328_vm6, 0, %v1839_v50 }
 0x217   : > { %v1621_v7 = vadd.f32 %v15501_v18, %v1545_v32  ;;  %v1470_v16 = vadd.f32 %v1406_v6, %v1201_v20  ;;  %v1471_v12 = vadd.f32 %v1407_v4, %v1202_v15  ;;  %v14531_v23 = vpack.c.bf16 %v16261_v36, %v1653_v24  ;;  %2982 = vmatprep.subr.bf16.mxu0 %v14054_v45 }
 0x218   : > { %2094 = vst [vmem:[#allocation2 + $0xb0] sm:$0xff] %v13277_v19  ;;  %v16326_v46 = vmax.f32 %v1620_v22, 0.0  ;;  %v16330_v10 = vpop.permute.xlu1 %493  ;;  %v14532_v20 = vpack.c.bf16 %v16259_v48, %v1652_v11  ;;  %1841 = vst [vmem:[#allocation2 + $0x238] sm:$0x88] %v1840_v3  ;;  %v12354_v1 = vrot.slane %v2237_v17, 11  ;;  %v2242_v61 = vshrl.u32 %v13277_v19, 16  ;;  %7984 = vmatpush1.bf16.msra.mxu1 %v16301_v5 }
 0x219   : > { %v16328_v43 = vmax.f32 %v1621_v7, 0.0  ;;  %v1546_v15 = vmul.f32 %v15492_v9, %v1470_v16  ;;  %v1547_v30 = vmul.f32 %v15495_v39, %v1471_v12  ;;  %2701 = vmatprep.mubr.bf16.mxu0 %v14531_v23  ;;  %v14057_v48 = vld [vmem:[#allocation11 + $0x94] ss:$8 sps:$4 sm:$0xff]   ;;  %v2253_v27 = vrot.slane %v2251_v42, 7  ;;  %v14055_v17 = vld [vmem:[#allocation11 + $0x90] ss:$8 sps:$4 sm:$0xff]   ;;  %7985 = vmatprep.subr.bf16.mxu1 %v14054_v45 }
 0x21a   : > { %1338 = vperm.xlu1 %13971, %v16213_v62   ;;  %1748 = vst [vmem:[%s15524_s19 + $0x160] sm:$0xff] %v16326_v46  ;;  %2983 = vmatpush1.bf16.msra.mxu0 %v14052_v38  ;;  %v16349_v11 = vsel %vm16149_vm15, %v7231_v26, %v7238_v29  ;;  %v2254_v24 = vshll.u32 %v16283_v14, 16  ;;  %v16357_v32 = vsel %vm16149_vm15, %v16210_v28, %v7229_v53  ;;  %v2244_v6 = vrot.slane %v2242_v61, 7  ;;  %v19546_v53 = vld [vmem:[#allocation42_spill] sm:$0xff]  ;;  %v14060_v22 = vld [vmem:[#allocation11 + $0xa4] ss:$8 sps:$4 sm:$0xff]  }
 0x21b   : > { %1749 = vst [vmem:[%s15524_s19 + $0x168] sm:$0xff] %v16328_v43  ;;  %v16345_v36 = vpack.c.bf16 %v16328_v43, %v16326_v46  ;;  %v1622_v62 = vadd.f32 %v15498_v47, %v1546_v15  ;;  %v1623_v44 = vadd.f32 %v15501_v18, %v1547_v30  ;;  %2702 = vmatmul.mubr.bf16.gmra.mrb[16].mxu0 %v14532_v20  ;;  %v2245_v4 = vshll.u32 %v13277_v19, 16  ;;  %v14058_v12 = vld [vmem:[#allocation11 + $0xa0] ss:$8 sps:$4 sm:$0xff]   ;;  %v7140_v26 = vld [vmem:[#allocation2 + $0x1e8] sm:$0x88] }
 0x21c   : > { %v16360_v50 = vpop.permute.xlu1 %568  ;;  %2984 = vmatprep.subr.bf16.mxu0 %v14057_v48  ;;  %v2249_v29 = vrot.slane %v2244_v6, 4  ;;  %v2256_v16 = vor.u32 %v2254_v24, %v2253_v27  ;;  %7986 = vmatpush1.bf16.msra.mxu1 %v14052_v38  ;;  %v7241_v61 = vshrl.u32 %v7140_v26, 16 }
 0x21d   : > { %2110 = vst [vmem:[#allocation2 + $0x1f0] sm:$0xff] %v16345_v36  ;;  %v1686_v31 = vmax.f32 %v1622_v62, 0.0  ;;  %v1687_v28 = vmax.f32 %v1623_v44, 0.0  ;;  %v2247_v7 = vor.u32 %v2245_v4, %v2244_v6  ;;  %v7246_v5 = vshrl.u32 %v16345_v36, 16  ;;  %7987 = vmatprep.subr.bf16.mxu1 %v14057_v48  ;;  %v14061_v62 = vld [vmem:[#allocation11 + $0xb0] ss:$8 sps:$4 sm:$0xff]  }
 0x21e   : > { %13974 = vset.pattern.permute.xlu1 %v19546_v53  ;;  %2985 = vmatpush1.bf16.msra.mxu0 %v14055_v17  ;;  %v16377_v45 = vsel %vm16149_vm15, %v2249_v29, %v2256_v16  ;;  %v14064_v6 = vld [vmem:[#allocation11 + $0xc0] ss:$8 sps:$4 sm:$0xff]   ;;  %v14066_v4 = vld [vmem:[#allocation11 + $0xc4] ss:$8 sps:$4 sm:$0xff]   ;;  %v14069_v53 = vld [vmem:[#allocation11 + $0xd4] ss:$8 sps:$4 sm:$0xff]  }
 0x21f   : > { %1750 = vst [vmem:[%s15524_s19 + $0x170] sm:$0xff] %v1686_v31  ;;  %1751 = vst [vmem:[%s15524_s19 + $0x178] sm:$0xff] %v1687_v28  ;;  %v13294_v19 = vpack.c.bf16 %v1687_v28, %v1686_v31  ;;  %2986 = vmatprep.subr.bf16.mxu0 %v14060_v22  ;;  %v16373_v3 = vsel %vm16149_vm15, %v12354_v1, %v2247_v7  ;;  %v14533_v20 = vpack.c.bf16 %v1687_v28, %v16328_v43  ;;  %v14063_v1 = vld [vmem:[#allocation11 + $0xb4] ss:$8 sps:$4 sm:$0xff]   ;;  %v16389_v16 = vld [vmem:[%s15187_s15 + $0xf8] sm:$0xff] }
 0x220   : > { %v14534_v15 = vpack.c.bf16 %v1686_v31, %v16326_v46  ;;  %v7248_v27 = vrot.slane %v7246_v5, 7  ;;  %v7249_v43 = vshll.u32 %v16345_v36, 16  ;;  %7988 = vmatpush1.bf16.msra.mxu1 %v14055_v17  ;;  %v12810_v31 = vrot.slane %v7241_v61, 11  ;;  %v19547_v5 = vld [vmem:[#allocation40_spill] sm:$0xff]  ;;  %603 = vperm.xlu1 %13974, %v16389_v16   ;;  %v1775_v17 = vld [vmem:[#allocation2 + $0x8] sm:$0x88] }
 0x221   : > { %2111 = vst [vmem:[#allocation2 + $0x1f8] sm:$0xff] %v13294_v19  ;;  %v717_v23 = vpop.permute.xlu1 %716  ;;  %7704 = vmatprep.mubr.bf16.mxu1 %v14533_v20  ;;  %v7255_v44 = vshrl.u32 %v13294_v19, 16  ;;  %v7258_v24 = vshll.u32 %v13294_v19, 16  ;;  %7989 = vmatprep.subr.bf16.mxu1 %v14060_v22  ;;  %v840_v36 = vmul.f32 %v15447_v55, %v19547_v5  ;;  %v841_v22 = vmul.f32 %v15450_v56, %v19547_v5  ;;  %v14070_v5 = vld [vmem:[#allocation11 + $0xe0] ss:$8 sps:$4 sm:$0xff]  }
 0x222   : > { %2987 = vmatpush1.bf16.msra.mxu0 %v14058_v12  ;;  %7705 = vmatmul.mubr.bf16.gmra.mrb[16].mxu1 %v14534_v15  ;;  %v7251_v28 = vor.u32 %v7249_v43, %v7248_v27  ;;  %v7253_v7 = vrot.slane %v7248_v27, 4  ;;  %v635_v20 = vmul.f32 %v15459_v59, %v16330_v10  ;;  %v14067_v15 = vld [vmem:[#allocation11 + $0xd0] ss:$8 sps:$4 sm:$0xff]   ;;  %v1776_v61 = vsel %vm15328_vm6, 0, %v1775_v17  ;;  %v14072_v43 = vld [vmem:[#allocation11 + $0xe4] ss:$8 sps:$4 sm:$0xff]  }
 0x223   : > { %2988 = vmatprep.subr.bf16.mxu0 %v14063_v1  ;;  %v7257_v48 = vrot.slane %v7255_v44, 7  ;;  %v636_v44 = vmul.f32 %v15462_v60, %v16330_v10  ;;  %1777 = vst [vmem:[#allocation2 + $0x8] sm:$0x88] %v1776_v61  ;;  %v986_v10 = vpop.permute.xlu0 %985 }
 0x224   : > { %7990 = vmatpush1.bf16.msra.mxu1 %v14058_v12  ;;  %v16407_v12 = vld [vmem:[%s15187_s15 + $0xf0] sm:$0xff]  ;;  %v16411_v27 = vsel %vm16149_vm15, %v12810_v31, %v7251_v28  ;;  %v838_v31 = vmul.f32 %v15447_v55, %v717_v23  ;;  %v839_v28 = vmul.f32 %v15450_v56, %v717_v23  ;;  %v1108_v30 = vmul.f32 %v15456_v58, %v986_v10  ;;  %s14751_s15 = scalar_lea.vmem %s14750_s24, 16384 }
 0x225   : > { %v16386_v46 = vpop.permute.xlu1 %780  ;;  %v7260_v29 = vor.u32 %v7258_v24, %v7257_v48  ;;  %7991 = vmatprep.subr.bf16.mxu1 %v14063_v1  ;;  %598 = vperm.xlu0 %13973, %v16407_v12   ;;  %v19548_v24 = vmov 1   ;;  %v905_v17 = vadd.f32 %v841_v22, %v636_v44  ;;  %v14075_v48 = vld [vmem:[#allocation11 + $0xf4] ss:$8 sps:$4 sm:$0xff]   ;;  %v1107_v22 = vmul.f32 %v15453_v57, %v986_v10  ;;  %p14753_p3 = scmp.lt.s32.totalorder %s14751_s15, %s14745_s20 }
 0x226   : > { %2989 = vmatpush1.bf16.msra.mxu0 %v14061_v62  ;;  %13975 = vset.pattern.permute.xlu1 %v19548_v24 }
 0x227   : > { %2990 = vmatprep.subr.bf16.mxu0 %v14066_v4  ;;  %v16398_v19 = vsel %vm16149_vm15, %v7253_v7, %v7260_v29  ;;  %v904_v7 = vadd.f32 %v840_v36, %v635_v20  ;;  %804 = vperm.xlu1 %13975, %v16407_v12   ;;  %v19550_v20 = vld [vmem:[#allocation32_spill] sm:$0xff]  ;;  %p14754_p2 = por %p14753_p3, %p14752_p1 }
 0x228   : > { %7992 = vmatpush1.bf16.msra.mxu1 %v14061_v62  ;;  %v19549_v62 = vld [vmem:[#allocation26_spill] sm:$0xff]  ;;  %v633_v14 = vmul.f32 %v15459_v59, %v19550_v20 }
 0x229   : > { %v16393_v26 = vpop.permute.xlu1 %784  ;;  %7993 = vmatprep.subr.bf16.mxu1 %v14066_v4  ;;  %v1378_v36 = vmul.f32 %v15469_v63, %v19549_v62  ;;  %v1379_v23 = vmul.f32 %v15472_v2, %v19549_v62  ;;  %v634_v4 = vmul.f32 %v15462_v60, %v19550_v20  ;;  %13976 = vset.pattern.permute.xlu0 %v19548_v24  ;;  %v16438_v20 = vld [vmem:[#allocation11 + $0x204] ss:$8 sps:$4 sm:$0xff]   ;;  %p14755_p8 = pnand %p14754_p2, %p14748_p13 }
 0x22a   : > { %2991 = vmatpush1.bf16.msra.mxu0 %v14064_v6  ;;  %808 = vperm.xlu0 %13976, %v16389_v16   ;;  %v902_v38 = vadd.f32 %v838_v31, %v633_v14  ;;  %v870_v24 = vmul.f32 %v15447_v55, %v16386_v46  ;;  %v665_v14 = vmul.f32 %v15459_v59, %v16360_v50  ;;  %v1818_v31 = vld [vmem:[#allocation2 + $0x120] sm:$0x88] }
 0x22b   : > { %2992 = vmatprep.subr.bf16.mxu0 %v14069_v53  ;;  %v903_v42 = vadd.f32 %v839_v28, %v634_v4  ;;  %13977 = vset.pattern.permute.xlu1 %v19510_v40  ;;  %v1819_v40 = vsel %vm15328_vm6, 0, %v1818_v31  ;;  %v1842_v4 = vld [vmem:[#allocation2 + $0x260] sm:$0x88] }
 0x22c   : > { %7994 = vmatpush1.bf16.msra.mxu1 %v14064_v6  ;;  %v871_v6 = vmul.f32 %v15450_v56, %v16386_v46  ;;  %v1171_v28 = vadd.f32 %v1107_v22, %v902_v38  ;;  %1073 = vperm.xlu1 %13977, %v16407_v12   ;;  %1820 = vst [vmem:[#allocation2 + $0x120] sm:$0x88] %v1819_v40  ;;  %v19551_v22 = vld [vmem:[#allocation33_spill] sm:$0xff] }
 0x22d   : > { %7995 = vmatprep.subr.bf16.mxu1 %v14069_v53  ;;  %v666_v53 = vmul.f32 %v15462_v60, %v16360_v50  ;;  %v1172_v10 = vadd.f32 %v1108_v30, %v903_v42 }
 0x22e   : > { %v990_v29 = vpop.permute.xlu1 %989  ;;  %2993 = vmatpush1.bf16.msra.mxu0 %v14067_v15  ;;  %13978 = vset.pattern.permute.xlu0 %v19544_v33 }
 0x22f   : > { %v1109_v61 = vmul.f32 %v15453_v57, %v990_v29  ;;  %v1110_v1 = vmul.f32 %v15456_v58, %v990_v29  ;;  %2994 = vmatprep.subr.bf16.mxu0 %v14072_v43  ;;  %v935_v42 = vadd.f32 %v871_v6, %v666_v53  ;;  %1342 = vperm.xlu0 %13978, %v16407_v12   ;;  %v1843_v6 = vsel %vm15328_vm6, 0, %v1842_v4 }
 0x230   : > { %7996 = vmatpush1.bf16.msra.mxu1 %v14067_v15  ;;  %v872_v15 = vmul.f32 %v15447_v55, %v16393_v26  ;;  %1077 = vperm.xlu1 %13977, %v16389_v16   ;;  %1844 = vst [vmem:[#allocation2 + $0x260] sm:$0x88] %v1843_v6 }
 0x231   : > { %v1173_v44 = vadd.f32 %v1109_v61, %v904_v7  ;;  %v1174_v29 = vadd.f32 %v1110_v1, %v905_v17  ;;  %7997 = vmatprep.subr.bf16.mxu1 %v14072_v43  ;;  %v873_v43 = vmul.f32 %v15450_v56, %v16393_v26  ;;  %v668_v26 = vmul.f32 %v15462_v60, %v19551_v22 }
 0x232   : > { %v1050_v62 = vpop.permute.xlu1 %1049  ;;  %2995 = vmatpush1.bf16.msra.mxu0 %v14070_v5 }
 0x233   : > { %v1442_v35 = vadd.f32 %v1378_v36, %v1173_v44  ;;  %v1443_v54 = vadd.f32 %v1379_v23, %v1174_v29  ;;  %2996 = vmatprep.subr.bf16.mxu0 %v14075_v48  ;;  %v1139_v17 = vmul.f32 %v15453_v57, %v1050_v62  ;;  %v1140_v50 = vmul.f32 %v15456_v58, %v1050_v62  ;;  %v1054_v29 = vpop.permute.xlu0 %1053 }
 0x234   : > { %7998 = vmatpush1.bf16.msra.mxu1 %v14070_v5  ;;  %v667_v44 = vmul.f32 %v15459_v59, %v19551_v22  ;;  %v1141_v40 = vmul.f32 %v15453_v57, %v1054_v29  ;;  %13979 = vset.pattern.permute.xlu1 %v19544_v33 }
 0x235   : > { %v1518_v1 = vmul.f32 %v15492_v9, %v1442_v35  ;;  %v1519_v7 = vmul.f32 %v15495_v39, %v1443_v54  ;;  %v934_v54 = vadd.f32 %v870_v24, %v665_v14  ;;  %7999 = vmatprep.subr.bf16.mxu1 %v14075_v48  ;;  %v1204_v14 = vadd.f32 %v1140_v50, %v935_v42 }
 0x236   : > { %2997 = vmatpush1.bf16.msra.mxu0 %v14073_v49  ;;  %1346 = vperm.xlu1 %13979, %v16389_v16  }
 0x237   : > { %v1594_v46 = vadd.f32 %v15498_v47, %v1518_v1  ;;  %v1595_v61 = vadd.f32 %v15501_v18, %v1519_v7  ;;  %v1255_v35 = vpop.permute.xlu1 %1254  ;;  %3555 = vmatprep.subr.bf16.mxu0 %v16438_v20  ;;  %v1203_v5 = vadd.f32 %v1139_v17, %v934_v54 }
 0x238   : > { %v1376_v30 = vmul.f32 %v15469_v63, %v1255_v35  ;;  %v1377_v38 = vmul.f32 %v15472_v2, %v1255_v35  ;;  %8000 = vmatpush1.bf16.msra.mxu1 %v14073_v49  ;;  %v2137_v49 = vld [vmem:[#allocation2 + $0xd0] sm:$0x88] }
 0x239   : > { %v16466_v36 = vmax.f32 %v1594_v46, 0.0  ;;  %v16468_v23 = vmax.f32 %v1595_v61, 0.0  ;;  %v1142_v46 = vmul.f32 %v15456_v58, %v1054_v29  ;;  %8554 = vmatprep.subr.bf16.mxu1 %v16438_v20  ;;  %v2259_v6 = vshrl.u32 %v2137_v49, 16 }
 0x23a   : > { %v1440_v62 = vadd.f32 %v1376_v30, %v1171_v28  ;;  %v1441_v24 = vadd.f32 %v1377_v38, %v1172_v10  ;;  %v936_v28 = vadd.f32 %v872_v15, %v667_v44  ;;  %v937_v10 = vadd.f32 %v873_v43, %v668_v26 }
 0x23b   : > { %1722 = vst [vmem:[%s15524_s19 + $0x90] sm:$0xff] %v16466_v36  ;;  %1723 = vst [vmem:[%s15524_s19 + $0x98] sm:$0xff] %v16468_v23  ;;  %v16483_v12 = vpack.c.bf16 %v16468_v23, %v16466_v36  ;;  %v1319_v53 = vpop.permute.xlu1 %1318 }
 0x23c   : > { %v1516_v48 = vmul.f32 %v15492_v9, %v1440_v62  ;;  %v1517_v1 = vmul.f32 %v15495_v39, %v1441_v24  ;;  %v1408_v7 = vmul.f32 %v15469_v63, %v1319_v53  ;;  %v1409_v31 = vmul.f32 %v15472_v2, %v1319_v53 }
 0x23d   : > { %2097 = vst [vmem:[#allocation2 + $0xe0] sm:$0xff] %v16483_v12  ;;  %v1205_v43 = vadd.f32 %v1141_v40, %v936_v28  ;;  %v1206_v4 = vadd.f32 %v1142_v46, %v937_v10  ;;  %v2273_v62 = vshrl.u32 %v16483_v12, 16 }
 0x23e   : > { %v1592_v17 = vadd.f32 %v15498_v47, %v1516_v48  ;;  %v1593_v61 = vadd.f32 %v15501_v18, %v1517_v1  ;;  %v1472_v50 = vadd.f32 %v1408_v7, %v1203_v5  ;;  %v1473_v35 = vadd.f32 %v1409_v31, %v1204_v14 }
 0x23f   : > { %v1323_v54 = vpop.permute.xlu1 %1322  ;;  %v2275_v10 = vrot.slane %v2273_v62, 7  ;;  %v19564_v62 = vld [vmem:[#allocation36_spill] sm:$0xff] }
 0x240   : > { %v1656_v42 = vmax.f32 %v1592_v17, 0.0  ;;  %v1657_v30 = vmax.f32 %v1593_v61, 0.0  ;;  %v1548_v38 = vmul.f32 %v15492_v9, %v1472_v50  ;;  %v1549_v15 = vmul.f32 %v15495_v39, %v1473_v35 }
 0x241   : > { %v1410_v22 = vmul.f32 %v15469_v63, %v1323_v54  ;;  %v1411_v44 = vmul.f32 %v15472_v2, %v1323_v54  ;;  %v2276_v50 = vshll.u32 %v16483_v12, 16  ;;  %v642_v51 = vmul.f32 %v15462_v60, %v19564_v62 }
 0x242   : > { %1720 = vst [vmem:[%s15524_s19 + $0x80] sm:$0xff] %v1656_v42  ;;  %1721 = vst [vmem:[%s15524_s19 + $0x88] sm:$0xff] %v1657_v30  ;;  %v13279_v20 = vpack.c.bf16 %v1657_v30, %v1656_v42  ;;  %v1624_v33 = vadd.f32 %v15498_v47, %v1548_v38  ;;  %v1625_v29 = vadd.f32 %v15501_v18, %v1549_v15 }
 0x243   : > { %v1474_v24 = vadd.f32 %v1410_v22, %v1205_v43  ;;  %v1475_v16 = vadd.f32 %v1411_v44, %v1206_v4  ;;  %v14535_v53 = vpack.c.bf16 %v16468_v23, %v1657_v30  ;;  %v14536_v48 = vpack.c.bf16 %v16466_v36, %v1656_v42  ;;  %v7143_v30 = vld [vmem:[#allocation2 + $0x210] sm:$0x88] }
 0x244   : > { %2096 = vst [vmem:[#allocation2 + $0xd8] sm:$0xff] %v13279_v20  ;;  %v1688_v26 = vmax.f32 %v1624_v33, 0.0  ;;  %v1689_v5 = vmax.f32 %v1625_v29, 0.0  ;;  %v504_v14 = vpop.permute.xlu1 %503  ;;  %v2264_v28 = vshrl.u32 %v13279_v20, 16  ;;  %v12355_v23 = vrot.slane %v2259_v6, 11 }
 0x245   : > { %v1550_v1 = vmul.f32 %v15492_v9, %v1474_v24  ;;  %v1551_v7 = vmul.f32 %v15495_v39, %v1475_v16  ;;  %2711 = vmatprep.mubr.bf16.mxu0 %v14535_v53  ;;  %v2267_v61 = vshll.u32 %v13279_v20, 16  ;;  %v2278_v49 = vor.u32 %v2276_v50, %v2275_v10  ;;  %v1857_v10 = vld [vmem:[#allocation2 + $0xc0] sm:$0x11] }
 0x246   : > { %1752 = vst [vmem:[%s15524_s19 + $0x180] sm:$0xff] %v1688_v26  ;;  %1753 = vst [vmem:[%s15524_s19 + $0x188] sm:$0xff] %v1689_v5  ;;  %v13295_v31 = vpack.c.bf16 %v1689_v5, %v1688_v26  ;;  %2712 = vmatmul.mubr.bf16.gmra.mrb[20].mxu0 %v14536_v48  ;;  %v2266_v17 = vrot.slane %v2264_v28, 7  ;;  %v7263_v44 = vshrl.u32 %v7143_v30, 16 }
 0x247   : > { %v1626_v40 = vadd.f32 %v15498_v47, %v1550_v1  ;;  %v1627_v46 = vadd.f32 %v15501_v18, %v1551_v7 }
 0x248   : > { %2112 = vst [vmem:[#allocation2 + $0x218] sm:$0xff] %v13295_v31  ;;  %v16515_v36 = vpop.permute.xlu1 %578  ;;  %v7268_v35 = vshrl.u32 %v13295_v31, 16  ;;  %v2269_v38 = vor.u32 %v2267_v61, %v2266_v17  ;;  %v2271_v15 = vrot.slane %v2266_v17, 4  ;;  %v7271_v6 = vshll.u32 %v13295_v31, 16 }
 0x249   : > { %v1690_v54 = vmax.f32 %v1626_v40, 0.0  ;;  %v1691_v42 = vmax.f32 %v1627_v46, 0.0  ;;  %v12811_v1 = vrot.slane %v7263_v44, 11  ;;  %v1858_v31 = vsel %vm15365_vm13, 0, %v1857_v10 }
 0x24a   : > { %v16522_v4 = vsel %vm16149_vm15, %v12355_v23, %v2269_v38  ;;  %v16526_v22 = vsel %vm16149_vm15, %v2271_v15, %v2278_v49  ;;  %v7270_v12 = vrot.slane %v7268_v35, 7  ;;  %1859 = vst [vmem:[#allocation2 + $0xc0] sm:$0x11] %v1858_v31  ;;  %v639_v35 = vmul.f32 %v15459_v59, %v504_v14  ;;  %v1878_v15 = vld [vmem:[#allocation2 + $0x1d8] sm:$0x11] }
 0x24b   : > { %1754 = vst [vmem:[%s15524_s19 + $0x190] sm:$0xff] %v1690_v54  ;;  %1755 = vst [vmem:[%s15524_s19 + $0x198] sm:$0xff] %v1691_v42  ;;  %v13296_v43 = vpack.c.bf16 %v1691_v42, %v1690_v54  ;;  %v14537_v33 = vpack.c.bf16 %v1691_v42, %v1689_v5  ;;  %v14538_v29 = vpack.c.bf16 %v1690_v54, %v1688_v26  ;;  %v19555_v42 = vld [vmem:[#allocation44_spill] sm:$0xff] }
 0x24c   : > { %v7273_v7 = vor.u32 %v7271_v6, %v7270_v12  ;;  %v7275_v40 = vrot.slane %v7270_v12, 4  ;;  %v640_v54 = vmul.f32 %v15462_v60, %v504_v14  ;;  %v844_v30 = vmul.f32 %v15447_v55, %v19555_v42  ;;  %v19556_v6 = vld [vmem:[#allocation34_spill] sm:$0xff] }
 0x24d   : > { %2113 = vst [vmem:[#allocation2 + $0x220] sm:$0xff] %v13296_v43  ;;  %v725_v20 = vpop.permute.xlu1 %724  ;;  %v7277_v16 = vshrl.u32 %v13296_v43, 16  ;;  %7714 = vmatprep.mubr.bf16.mxu1 %v14537_v33  ;;  %v7280_v28 = vshll.u32 %v13296_v43, 16  ;;  %v845_v38 = vmul.f32 %v15450_v56, %v19555_v42  ;;  %v994_v33 = vpop.permute.xlu0 %993  ;;  %v637_v14 = vmul.f32 %v15459_v59, %v19556_v6 }
 0x24e   : > { %7715 = vmatmul.mubr.bf16.gmra.mrb[20].mxu1 %v14538_v29  ;;  %v16534_v26 = vsel %vm16149_vm15, %v12811_v1, %v7273_v7  ;;  %v842_v49 = vmul.f32 %v15447_v55, %v725_v20  ;;  %v908_v44 = vadd.f32 %v844_v30, %v639_v35  ;;  %v1879_v1 = vsel %vm15365_vm13, 0, %v1878_v15  ;;  %v19557_v7 = vld [vmem:[#allocation27_spill] sm:$0xff] }
 0x24f   : > { %v7279_v53 = vrot.slane %v7277_v16, 7  ;;  %19552 = vst [vmem:[#allocation47_spill] sm:$0xff] %v16534_v26  ;;  %v909_v12 = vadd.f32 %v845_v38, %v640_v54  ;;  %v1383_v10 = vmul.f32 %v15472_v2, %v19557_v7  ;;  %1880 = vst [vmem:[#allocation2 + $0x1d8] sm:$0x11] %v1879_v1  ;;  %v638_v31 = vmul.f32 %v15462_v60, %v19556_v6  ;;  %v16693_v26 = vld [vmem:[#allocation2 + $0x150] sm:$0xff] }
 0x250   : > { %v906_v35 = vadd.f32 %v842_v49, %v637_v14  ;;  %v1111_v54 = vmul.f32 %v15453_v57, %v994_v33  ;;  %v1112_v15 = vmul.f32 %v15456_v58, %v994_v33  ;;  %v669_v49 = vmul.f32 %v15459_v59, %v16515_v36 }
 0x251   : > { %v789_v48 = vpop.permute.xlu1 %788  ;;  %v7282_v46 = vor.u32 %v7280_v28, %v7279_v53  ;;  %v843_v53 = vmul.f32 %v15450_v56, %v725_v20  ;;  %v1382_v28 = vmul.f32 %v15469_v63, %v19557_v7 }
 0x252   : > { %v1175_v6 = vadd.f32 %v1111_v54, %v906_v35  ;;  %v874_v14 = vmul.f32 %v15447_v55, %v789_v48  ;;  %v875_v33 = vmul.f32 %v15450_v56, %v789_v48 }
 0x253   : > { %v16538_v23 = vsel %vm16149_vm15, %v7275_v40, %v7282_v46  ;;  %v907_v38 = vadd.f32 %v843_v53, %v638_v31  ;;  %v1062_v31 = vpop.permute.xlu0 %1061 }
 0x254   : > { %19553 = vst [vmem:[#allocation39_spill] sm:$0xff] %v16538_v23  ;;  %v2122_v23 = vld [vmem:[#allocation2 + $0x8] sm:$0x88] }
 0x255   : > { %v793_v5 = vpop.permute.xlu1 %792 }
 0x256   : > { %v876_v53 = vmul.f32 %v15447_v55, %v793_v5 }
 0x25b   : > { %v998_v43 = vpop.permute.xlu1 %997 }
 0x25c   : > { %v1113_v29 = vmul.f32 %v15453_v57, %v998_v43  ;;  %v1114_v16 = vmul.f32 %v15456_v58, %v998_v43  ;;  %v19558_v43 = vld [vmem:[#allocation35_spill] sm:$0xff] }
 0x25d   : > { %v671_v50 = vmul.f32 %v15459_v59, %v19558_v43 }
 0x25e   : > { %v1177_v40 = vadd.f32 %v1113_v29, %v908_v44  ;;  %v1178_v46 = vadd.f32 %v1114_v16, %v909_v12  ;;  %v672_v44 = vmul.f32 %v15462_v60, %v19558_v43  ;;  %v670_v16 = vmul.f32 %v15462_v60, %v16515_v36 }
 0x25f   : > { %v1058_v42 = vpop.permute.xlu1 %1057  ;;  %v1145_v43 = vmul.f32 %v15453_v57, %v1062_v31 }
 0x260   : > { %v1446_v20 = vadd.f32 %v1382_v28, %v1177_v40  ;;  %v1447_v30 = vadd.f32 %v1383_v10, %v1178_v46  ;;  %v1176_v10 = vadd.f32 %v1112_v15, %v907_v38  ;;  %v877_v40 = vmul.f32 %v15450_v56, %v793_v5 }
 0x261   : > { %v1143_v54 = vmul.f32 %v15453_v57, %v1058_v42  ;;  %v939_v5 = vadd.f32 %v875_v33, %v670_v16 }
 0x262   : > { %v1522_v12 = vmul.f32 %v15492_v9, %v1446_v20  ;;  %v1523_v29 = vmul.f32 %v15495_v39, %v1447_v30  ;;  %v1144_v20 = vmul.f32 %v15456_v58, %v1058_v42  ;;  %v938_v30 = vadd.f32 %v874_v14, %v669_v49 }
 0x263   : > { %v941_v61 = vadd.f32 %v877_v40, %v672_v44 }
 0x264   : > { %v1598_v1 = vadd.f32 %v15498_v47, %v1522_v12  ;;  %v1599_v7 = vadd.f32 %v15501_v18, %v1523_v29  ;;  %v1263_v28 = vpop.permute.xlu1 %1262  ;;  %v1787_v12 = vld [vmem:[#allocation2 + $0x20] sm:$0x11]  ;;  %v940_v29 = vadd.f32 %v876_v53, %v671_v50  ;;  %v1207_v16 = vadd.f32 %v1143_v54, %v938_v30 }
 0x265   : > { %v1380_v46 = vmul.f32 %v15469_v63, %v1263_v28  ;;  %v1381_v36 = vmul.f32 %v15472_v2, %v1263_v28  ;;  %v1208_v50 = vadd.f32 %v1144_v20, %v939_v5 }
 0x266   : > { %v16586_v35 = vmax.f32 %v1598_v1, 0.0  ;;  %v1663_v48 = vmax.f32 %v1599_v7, 0.0  ;;  %v1788_v1 = vsel %vm15365_vm13, 0, %v1787_v12  ;;  %v1146_v7 = vmul.f32 %v15456_v58, %v1062_v31 }
 0x267   : > { %v1444_v38 = vadd.f32 %v1380_v46, %v1175_v6  ;;  %v1445_v15 = vadd.f32 %v1381_v36, %v1176_v10  ;;  %1789 = vst [vmem:[#allocation2 + $0x20] sm:$0x11] %v1788_v1  ;;  %v1209_v46 = vadd.f32 %v1145_v43, %v940_v29  ;;  %v2140_v36 = vld [vmem:[#allocation2 + $0xf8] sm:$0x88] }
 0x268   : > { %1726 = vst [vmem:[%s15524_s19 + $0xb0] sm:$0xff] %v16586_v35  ;;  %1727 = vst [vmem:[%s15524_s19 + $0xb8] sm:$0xff] %v1663_v48  ;;  %v13282_v28 = vpack.c.bf16 %v1663_v48, %v16586_v35 }
 0x269   : > { %v1520_v42 = vmul.f32 %v15492_v9, %v1444_v38  ;;  %v1521_v49 = vmul.f32 %v15495_v39, %v1445_v15  ;;  %v1327_v6 = vpop.permute.xlu1 %1326  ;;  %v1210_v15 = vadd.f32 %v1146_v7, %v941_v61 }
 0x26a   : > { %2099 = vst [vmem:[#allocation2 + $0x108] sm:$0xff] %v13282_v28  ;;  %v1412_v14 = vmul.f32 %v15469_v63, %v1327_v6  ;;  %v1413_v33 = vmul.f32 %v15472_v2, %v1327_v6  ;;  %v2295_v54 = vshrl.u32 %v13282_v28, 16 }
 0x26b   : > { %v1596_v53 = vadd.f32 %v15498_v47, %v1520_v42  ;;  %v1597_v10 = vadd.f32 %v15501_v18, %v1521_v49  ;;  %v2281_v49 = vshrl.u32 %v2140_v36, 16 }
 0x26c   : > { %v1476_v44 = vadd.f32 %v1412_v14, %v1207_v16  ;;  %v1477_v40 = vadd.f32 %v1413_v33, %v1208_v50  ;;  %v2297_v14 = vrot.slane %v2295_v54, 7 }
 0x26d   : > { %v1660_v31 = vmax.f32 %v1596_v53, 0.0  ;;  %v1661_v38 = vmax.f32 %v1597_v10, 0.0  ;;  %v1331_v12 = vpop.permute.xlu1 %1330  ;;  %v12356_v36 = vrot.slane %v2281_v49, 11 }
 0x26e   : > { %v1552_v20 = vmul.f32 %v15492_v9, %v1476_v44  ;;  %v1553_v30 = vmul.f32 %v15495_v39, %v1477_v40  ;;  %v1414_v5 = vmul.f32 %v15469_v63, %v1331_v12  ;;  %v1415_v1 = vmul.f32 %v15472_v2, %v1331_v12 }
 0x26f   : > { %1724 = vst [vmem:[%s15524_s19 + $0xa0] sm:$0xff] %v1660_v31  ;;  %1725 = vst [vmem:[%s15524_s19 + $0xa8] sm:$0xff] %v1661_v38  ;;  %v13281_v42 = vpack.c.bf16 %v1661_v38, %v1660_v31  ;;  %v14539_v7 = vpack.c.bf16 %v1663_v48, %v1661_v38  ;;  %v14540_v16 = vpack.c.bf16 %v16586_v35, %v1660_v31 }
 0x270   : > { %v1628_v43 = vadd.f32 %v15498_v47, %v1552_v20  ;;  %v1629_v29 = vadd.f32 %v15501_v18, %v1553_v30  ;;  %v1478_v6 = vadd.f32 %v1414_v5, %v1209_v46  ;;  %v1479_v61 = vadd.f32 %v1415_v1, %v1210_v15 }
 0x271   : > { %2098 = vst [vmem:[#allocation2 + $0x100] sm:$0xff] %v13281_v42  ;;  %v2286_v50 = vshrl.u32 %v13281_v42, 16  ;;  %2721 = vmatprep.mubr.bf16.mxu0 %v14539_v7  ;;  %v2289_v46 = vshll.u32 %v13281_v42, 16  ;;  %v2298_v15 = vshll.u32 %v13282_v28, 16  ;;  %v7146_v42 = vld [vmem:[#allocation2 + $0x238] sm:$0x88] }
 0x272   : > { %v1692_v33 = vmax.f32 %v1628_v43, 0.0  ;;  %v1693_v53 = vmax.f32 %v1629_v29, 0.0  ;;  %v1554_v10 = vmul.f32 %v15492_v9, %v1478_v6  ;;  %v1555_v44 = vmul.f32 %v15495_v39, %v1479_v61  ;;  %v514_v40 = vpop.permute.xlu1 %513  ;;  %2722 = vmatmul.mubr.bf16.gmra.mrb[24].mxu0 %v14540_v16 }
 0x273   : > { %v2288_v12 = vrot.slane %v2286_v50, 7  ;;  %v2300_v20 = vor.u32 %v2298_v15, %v2297_v14  ;;  %v7285_v7 = vshrl.u32 %v7146_v42, 16 }
 0x274   : > { %1756 = vst [vmem:[%s15524_s19 + $0x1a0] sm:$0xff] %v1692_v33  ;;  %1757 = vst [vmem:[%s15524_s19 + $0x1a8] sm:$0xff] %v1693_v53  ;;  %v13297_v48 = vpack.c.bf16 %v1693_v53, %v1692_v33  ;;  %v1630_v35 = vadd.f32 %v15498_v47, %v1554_v10  ;;  %v1631_v31 = vadd.f32 %v15501_v18, %v1555_v44  ;;  %v16635_v10 = vpop.permute.xlu0 %1001 }
 0x275   : > { %v2291_v38 = vor.u32 %v2289_v46, %v2288_v12  ;;  %v2293_v54 = vrot.slane %v2288_v12, 4  ;;  %v1860_v46 = vld [vmem:[#allocation2 + $0xe8] sm:$0x11]  ;;  %v12812_v15 = vrot.slane %v7285_v7, 11 }
 0x276   : > { %2114 = vst [vmem:[#allocation2 + $0x240] sm:$0xff] %v13297_v48  ;;  %v1694_v30 = vmax.f32 %v1630_v35, 0.0  ;;  %v1695_v5 = vmax.f32 %v1631_v31, 0.0  ;;  %v16619_v1 = vpop.permute.xlu1 %588  ;;  %v7290_v28 = vshrl.u32 %v13297_v48, 16 }
 0x277   : > { %v16623_v49 = vsel %vm16149_vm15, %v12356_v36, %v2291_v38  ;;  %v16627_v43 = vsel %vm16149_vm15, %v2293_v54, %v2300_v20  ;;  %v7293_v36 = vshll.u32 %v13297_v48, 16  ;;  %v1861_v54 = vsel %vm15365_vm13, 0, %v1860_v46  ;;  %v16659_v46 = vld [vmem:[#allocation2 + $0x10] sm:$0xff] }
 0x278   : > { %19559 = vst [vmem:[#allocation43_spill] sm:$0xff] %v16623_v49  ;;  %19560 = vst [vmem:[#allocation30_spill] sm:$0xff] %v16627_v43  ;;  %v13298_v29 = vpack.c.bf16 %v1695_v5, %v1694_v30  ;;  %v7292_v16 = vrot.slane %v7290_v28, 7  ;;  %v14541_v50 = vpack.c.bf16 %v1695_v5, %v1693_v53  ;;  %v14542_v14 = vpack.c.bf16 %v1694_v30, %v1692_v33  ;;  %v1881_v33 = vld [vmem:[#allocation2 + $0x200] sm:$0x11]  ;;  %v16639_v53 = vpop.permute.xlu0 %1069 }
 0x279   : > { %1758 = vst [vmem:[%s15524_s19 + $0x1b0] sm:$0xff] %v1694_v30  ;;  %1759 = vst [vmem:[%s15524_s19 + $0x1b8] sm:$0xff] %v1695_v5  ;;  %v1863_v5 = vld [vmem:[#allocation2 + $0x110] sm:$0x11] }
 0x27a   : > { %2115 = vst [vmem:[#allocation2 + $0x248] sm:$0xff] %v13298_v29  ;;  %v7299_v12 = vshrl.u32 %v13298_v29, 16  ;;  %7724 = vmatprep.mubr.bf16.mxu1 %v14541_v50  ;;  %v7295_v35 = vor.u32 %v7293_v36, %v7292_v16  ;;  %v7302_v38 = vshll.u32 %v13298_v29, 16  ;;  %v7297_v42 = vrot.slane %v7292_v16, 4  ;;  %1862 = vst [vmem:[#allocation2 + $0xe8] sm:$0x11] %v1861_v54 }
 0x27b   : > { %v733_v44 = vpop.permute.xlu1 %732  ;;  %7725 = vmatmul.mubr.bf16.gmra.mrb[24].mxu1 %v14542_v14  ;;  %v7128_v16 = vld [vmem:[#allocation2 + $0x148] sm:$0x88]  ;;  %v1882_v50 = vsel %vm15365_vm13, 0, %v1881_v33  ;;  %v643_v14 = vmul.f32 %v15459_v59, %v514_v40  ;;  %v644_v36 = vmul.f32 %v15462_v60, %v514_v40 }
 0x27c   : > { %v7301_v31 = vrot.slane %v7299_v12, 7  ;;  %v16643_v48 = vsel %vm16149_vm15, %v12812_v15, %v7295_v35  ;;  %1883 = vst [vmem:[#allocation2 + $0x200] sm:$0x11] %v1882_v50  ;;  %v1275_v12 = vpop.permute.xlu0 %1274  ;;  %v19385_v15 = vshrl.u32 %v16659_v46, 16  ;;  %v7153_v35 = vshrl.u32 %v7128_v16, 16 }
 0x27d   : > { %19561 = vst [vmem:[#allocation31_spill] sm:$0xff] %v16643_v48  ;;  %v847_v33 = vmul.f32 %v15450_v56, %v733_v44  ;;  %v1386_v40 = vmul.f32 %v15469_v63, %v1275_v12  ;;  %v1387_v29 = vmul.f32 %v15472_v2, %v1275_v12  ;;  %v16683_v12 = vld [vmem:[#allocation2 + $0x158] sm:$0xff]  ;;  %v14515_v41 = vld [vmem:[#allocation2 + $0x240] sm:$0xff] }
 0x27e   : > { %v7304_v28 = vor.u32 %v7302_v38, %v7301_v31  ;;  %v19563_v31 = vld [vmem:[#allocation49_spill] sm:$0xff] }
 0x27f   : > { %v797_v20 = vpop.permute.xlu1 %796  ;;  %v848_v38 = vmul.f32 %v15447_v55, %v19563_v31  ;;  %v849_v54 = vmul.f32 %v15450_v56, %v19563_v31  ;;  %v641_v31 = vmul.f32 %v15459_v59, %v19564_v62  ;;  %v911_v48 = vadd.f32 %v847_v33, %v642_v51  ;;  %v1884_v33 = vld [vmem:[#allocation2 + $0x228] sm:$0x11] }
 0x280   : > { %v16647_v30 = vsel %vm16149_vm15, %v7297_v42, %v7304_v28  ;;  %v846_v28 = vmul.f32 %v15447_v55, %v733_v44  ;;  %v16679_v44 = vrot.slane %v19385_v15, 7  ;;  %v16681_v42 = vrot.slane %v7153_v35, 11 }
 0x281   : > { %19562 = vst [vmem:[#allocation38_spill] sm:$0xff] %v16647_v30  ;;  %v912_v61 = vadd.f32 %v848_v38, %v643_v14  ;;  %v913_v16 = vadd.f32 %v849_v54, %v644_v36  ;;  %v1864_v54 = vsel %vm15365_vm13, 0, %v1863_v5  ;;  %v1115_v5 = vmul.f32 %v15453_v57, %v16635_v10 }
 0x282   : > { %v910_v30 = vadd.f32 %v846_v28, %v641_v31  ;;  %1865 = vst [vmem:[#allocation2 + $0x110] sm:$0x11] %v1864_v54  ;;  %v878_v51 = vmul.f32 %v15447_v55, %v797_v20  ;;  %v879_v28 = vmul.f32 %v15450_v56, %v797_v20  ;;  %v673_v31 = vmul.f32 %v15459_v59, %v16619_v1 }
 0x283   : > { %v16653_v7 = vpop.permute.xlu1 %800 }
 0x288   : > { %v1006_v50 = vpop.permute.xlu1 %1005 }
 0x289   : > { %v1117_v6 = vmul.f32 %v15453_v57, %v1006_v50  ;;  %v1118_v24 = vmul.f32 %v15456_v58, %v1006_v50  ;;  %v19565_v50 = vld [vmem:[#allocation37_spill] sm:$0xff] }
 0x28a   : > { %v675_v52 = vmul.f32 %v15459_v59, %v19565_v50  ;;  %v676_v35 = vmul.f32 %v15462_v60, %v19565_v50 }
 0x28b   : > { %v1181_v36 = vadd.f32 %v1117_v6, %v912_v61  ;;  %v1182_v38 = vadd.f32 %v1118_v24, %v913_v16  ;;  %v7158_v24 = vshrl.u32 %v16693_v26, 16  ;;  %v1116_v16 = vmul.f32 %v15456_v58, %v16635_v10 }
 0x28c   : > { %v1066_v15 = vpop.permute.xlu1 %1065 }
 0x28d   : > { %v1450_v6 = vadd.f32 %v1386_v40, %v1181_v36  ;;  %v1451_v61 = vadd.f32 %v1387_v29, %v1182_v38  ;;  %v2149_v40 = vshrl.u32 %v2122_v23, 16  ;;  %v674_v29 = vmul.f32 %v15462_v60, %v16619_v1 }
 0x28e   : > { %v1147_v36 = vmul.f32 %v15453_v57, %v1066_v15  ;;  %v1179_v38 = vadd.f32 %v1115_v5, %v910_v30  ;;  %v1180_v10 = vadd.f32 %v1116_v16, %v911_v48  ;;  %v1148_v14 = vmul.f32 %v15456_v58, %v1066_v15 }
 0x28f   : > { %v1526_v54 = vmul.f32 %v15492_v9, %v1450_v6  ;;  %v1527_v50 = vmul.f32 %v15495_v39, %v1451_v61  ;;  %v1885_v6 = vsel %vm15365_vm13, 0, %v1884_v33  ;;  %v942_v23 = vadd.f32 %v878_v51, %v673_v31 }
 0x290   : > { %v943_v61 = vadd.f32 %v879_v28, %v674_v29  ;;  %1886 = vst [vmem:[#allocation2 + $0x228] sm:$0x11] %v1885_v6  ;;  %v880_v48 = vmul.f32 %v15447_v55, %v16653_v7  ;;  %v881_v30 = vmul.f32 %v15450_v56, %v16653_v7  ;;  %v19566_v51 = vshll.u32 %v16659_v46, 16 }
 0x291   : > { %v1602_v62 = vadd.f32 %v15498_v47, %v1526_v54  ;;  %v1603_v20 = vadd.f32 %v15501_v18, %v1527_v50  ;;  %v1271_v43 = vpop.permute.xlu1 %1270  ;;  %v2161_v33 = vrot.slane %v16679_v44, 4  ;;  %v1211_v31 = vadd.f32 %v1147_v36, %v942_v23 }
 0x292   : > { %v1384_v1 = vmul.f32 %v15469_v63, %v1271_v43  ;;  %v1385_v49 = vmul.f32 %v15472_v2, %v1271_v43  ;;  %v2159_v28 = vor.u32 %v19566_v51, %v16679_v44  ;;  %v1212_v50 = vadd.f32 %v1148_v14, %v943_v61 }
 0x293   : > { %v16720_v15 = vmax.f32 %v1602_v62, 0.0  ;;  %v1667_v5 = vmax.f32 %v1603_v20, 0.0  ;;  %v12350_v62 = vrot.slane %v2149_v40, 11  ;;  %v16736_v20 = vrot.slane %v7158_v24, 7 }
 0x294   : > { %v1448_v16 = vadd.f32 %v1384_v1, %v1179_v38  ;;  %v1449_v54 = vadd.f32 %v1385_v49, %v1180_v10  ;;  %v1149_v44 = vmul.f32 %v15453_v57, %v16639_v53  ;;  %v944_v6 = vadd.f32 %v880_v48, %v675_v52 }
 0x295   : > { %1730 = vst [vmem:[%s15524_s19 + $0xd0] sm:$0xff] %v16720_v15  ;;  %1731 = vst [vmem:[%s15524_s19 + $0xd8] sm:$0xff] %v1667_v5  ;;  %v16730_v43 = vpack.c.bf16 %v1667_v5, %v16720_v15  ;;  %v1335_v7 = vpop.permute.xlu1 %1334  ;;  %v945_v1 = vadd.f32 %v881_v30, %v676_v35  ;;  %v1150_v61 = vmul.f32 %v15456_v58, %v16639_v53  ;;  %v2143_v35 = vld [vmem:[#allocation2 + $0x120] sm:$0x88] }
 0x296   : > { %v1524_v29 = vmul.f32 %v15492_v9, %v1448_v16  ;;  %v1525_v49 = vmul.f32 %v15495_v39, %v1449_v54  ;;  %v1416_v38 = vmul.f32 %v15469_v63, %v1335_v7  ;;  %v1417_v10 = vmul.f32 %v15472_v2, %v1335_v7 }
 0x297   : > { %2101 = vst [vmem:[#allocation2 + $0x130] sm:$0xff] %v16730_v43  ;;  %v16747_v16 = vsel %vm16149_vm15, %v12350_v62, %v2159_v28  ;;  %v16751_v52 = vsel %vm16149_vm15, %v2161_v33, %v2159_v28  ;;  %v2317_v48 = vshrl.u32 %v16730_v43, 16  ;;  %v1214_v53 = vadd.f32 %v1150_v61, %v945_v1 }
 0x298   : > { %v1600_v14 = vadd.f32 %v15498_v47, %v1524_v29  ;;  %v1601_v40 = vadd.f32 %v15501_v18, %v1525_v49  ;;  %v1480_v36 = vadd.f32 %v1416_v38, %v1211_v31  ;;  %v1481_v23 = vadd.f32 %v1417_v10, %v1212_v50 }
 0x299   : > { %v1339_v24 = vpop.permute.xlu1 %1338  ;;  %v1213_v50 = vadd.f32 %v1149_v44, %v944_v6  ;;  %v2303_v49 = vshrl.u32 %v2143_v35, 16  ;;  %v12407_v44 = vcombine.high %v16747_v16, %v16751_v52  ;;  %v2319_v6 = vrot.slane %v2317_v48, 7 }
 0x29a   : > { %v1664_v30 = vmax.f32 %v1600_v14, 0.0  ;;  %v1665_v54 = vmax.f32 %v1601_v40, 0.0  ;;  %v1556_v51 = vmul.f32 %v15492_v9, %v1480_v36  ;;  %v1557_v31 = vmul.f32 %v15495_v39, %v1481_v23 }
 0x29b   : > { %v1418_v7 = vmul.f32 %v15469_v63, %v1339_v24  ;;  %v1419_v62 = vmul.f32 %v15472_v2, %v1339_v24  ;;  %v19567_v23 = vshrl.u32 %v16683_v12, 16  ;;  %v12357_v48 = vrot.slane %v2303_v49, 11 }
 0x29c   : > { %1728 = vst [vmem:[%s15524_s19 + $0xc0] sm:$0xff] %v1664_v30  ;;  %1729 = vst [vmem:[%s15524_s19 + $0xc8] sm:$0xff] %v1665_v54  ;;  %v13283_v29 = vpack.c.bf16 %v1665_v54, %v1664_v30  ;;  %v1632_v28 = vadd.f32 %v15498_v47, %v1556_v51  ;;  %v1633_v33 = vadd.f32 %v15501_v18, %v1557_v31  ;;  %v7161_v31 = vshll.u32 %v16693_v26, 16 }
 0x29d   : > { %v1482_v38 = vadd.f32 %v1418_v7, %v1213_v50  ;;  %v1483_v10 = vadd.f32 %v1419_v62, %v1214_v53  ;;  %v14543_v40 = vpack.c.bf16 %v1667_v5, %v1665_v54  ;;  %v14544_v36 = vpack.c.bf16 %v16720_v15, %v1664_v30  ;;  %v14487_v62 = vld [vmem:[#allocation2 + $0x180] sm:$0xff] }
 0x29e   : > { %2100 = vst [vmem:[#allocation2 + $0x128] sm:$0xff] %v13283_v29  ;;  %v1696_v1 = vmax.f32 %v1632_v28, 0.0  ;;  %v1697_v14 = vmax.f32 %v1633_v33, 0.0  ;;  %v7169_v61 = vrot.slane %v19567_v23, 7  ;;  %v2308_v51 = vshrl.u32 %v13283_v29, 16  ;;  %v14488_v23 = vld [vmem:[#allocation2 + $0x178] sm:$0xff] }
 0x29f   : > { %v1558_v24 = vmul.f32 %v15492_v9, %v1482_v38  ;;  %v1559_v35 = vmul.f32 %v15495_v39, %v1483_v10  ;;  %2731 = vmatprep.mubr.bf16.mxu0 %v14543_v40  ;;  %v2320_v5 = vshll.u32 %v16730_v43, 16  ;;  %v2311_v53 = vshll.u32 %v13283_v29, 16 }
 0x2a0   : > { %1760 = vst [vmem:[%s15524_s19 + $0x1c0] sm:$0xff] %v1696_v1  ;;  %1761 = vst [vmem:[%s15524_s19 + $0x1c8] sm:$0xff] %v1697_v14  ;;  %v16772_v50 = vpack.c.bf16 %v1697_v14, %v1696_v1  ;;  %2732 = vmatmul.mubr.bf16.gmra.mrb[28].mxu0 %v14544_v36  ;;  %v2310_v54 = vrot.slane %v2308_v51, 7  ;;  %v7163_v26 = vor.u32 %v7161_v31, %v16736_v20  ;;  %v7165_v7 = vrot.slane %v16736_v20, 4  ;;  %v7131_v51 = vld [vmem:[#allocation2 + $0x170] sm:$0x88] }
 0x2a1   : > { %v1634_v15 = vadd.f32 %v15498_v47, %v1558_v24  ;;  %v1635_v30 = vadd.f32 %v15501_v18, %v1559_v35  ;;  %2998 = vmatprep.mubr.bf16.mxu0 %v12407_v44  ;;  %v7189_v28 = vshrl.u32 %v14487_v62, 16  ;;  %v2322_v33 = vor.u32 %v2320_v5, %v2319_v6  ;;  %v1866_v35 = vld [vmem:[#allocation2 + $0x138] sm:$0x11] }
 0x2a2   : > { %2116 = vst [vmem:[#allocation2 + $0x268] sm:$0xff] %v16772_v50  ;;  %v2313_v38 = vor.u32 %v2311_v53, %v2310_v54  ;;  %v2315_v10 = vrot.slane %v2310_v54, 4  ;;  %v19568_v40 = vshll.u32 %v16683_v12, 16  ;;  %v7180_v29 = vshrl.u32 %v14488_v23, 16  ;;  %v14081_v54 = vld [vmem:[#allocation11 + $0x214] ss:$8 sps:$4 sm:$0xff]  }
 0x2a3   : > { %v1698_v43 = vmax.f32 %v1634_v15, 0.0  ;;  %v1699_v49 = vmax.f32 %v1635_v30, 0.0  ;;  %v12406_v44 = vcombine.low %v16747_v16, %v16751_v52  ;;  %v7164_v12 = vsel %vm16149_vm15, %v16681_v42, %v7163_v26  ;;  %v1887_v30 = vld [vmem:[#allocation2 + $0x250] sm:$0x11] }
 0x2a4   : > { %v7172_v36 = vor.u32 %v19568_v40, %v7169_v61  ;;  %v16790_v20 = vsel %vm16149_vm15, %v12357_v48, %v2313_v38  ;;  %v16794_v6 = vsel %vm16149_vm15, %v2315_v10, %v2322_v33  ;;  %v14076_v48 = vld [vmem:[#allocation11 + $0x200] ss:$8 sps:$4 sm:$0xff]   ;;  %v7191_v15 = vrot.slane %v7189_v28, 7 }
 0x2a5   : > { %1762 = vst [vmem:[%s15524_s19 + $0x1d0] sm:$0xff] %v1698_v43  ;;  %1763 = vst [vmem:[%s15524_s19 + $0x1d8] sm:$0xff] %v1699_v49  ;;  %v16784_v24 = vpack.c.bf16 %v1699_v49, %v1698_v43  ;;  %v14545_v31 = vpack.c.bf16 %v1699_v49, %v1697_v14  ;;  %v14546_v5 = vpack.c.bf16 %v1698_v43, %v1696_v1  ;;  %v1867_v42 = vsel %vm15365_vm13, 0, %v1866_v35  ;;  %v14079_v14 = vld [vmem:[#allocation11 + $0x210] ss:$8 sps:$4 sm:$0xff]  }
 0x2a6   : > { %v7173_v61 = vsel %vm16149_vm15, %v7165_v7, %v7172_v36  ;;  %v7175_v26 = vshrl.u32 %v7131_v51, 16  ;;  %v7182_v7 = vrot.slane %v7180_v29, 7  ;;  %v7192_v33 = vshll.u32 %v14487_v62, 16  ;;  %1868 = vst [vmem:[#allocation2 + $0x138] sm:$0x11] %v1867_v42 }
 0x2a7   : > { %2117 = vst [vmem:[#allocation2 + $0x270] sm:$0xff] %v16784_v24  ;;  %7734 = vmatprep.mubr.bf16.mxu1 %v14545_v31  ;;  %v12863_v53 = vcombine.high %v7164_v12, %v7173_v61  ;;  %v19569_v38 = vcombine.high %v16161_v21, %v16171_v25  ;;  %v1888_v1 = vsel %vm15365_vm13, 0, %v1887_v30  ;;  %v7183_v28 = vshll.u32 %v14488_v23, 16  ;;  %v14084_v49 = vld [vmem:[#allocation11 + $0x224] ss:$8 sps:$4 sm:$0xff]  }
 0x2a8   : > { %2999 = vmatmul.mubr.bf16.vlgmr.msra.gmra.mrb[0].mxu0 %v12406_v44  ;;  %7735 = vmatmul.mubr.bf16.gmra.mrb[28].mxu1 %v14546_v5  ;;  %v7194_v43 = vor.u32 %v7192_v33, %v7191_v15  ;;  %1889 = vst [vmem:[#allocation2 + $0x250] sm:$0x11] %v1888_v1  ;;  %v12807_v10 = vrot.slane %v7175_v26, 11  ;;  %v7187_v62 = vrot.slane %v7182_v7, 4  ;;  %v14082_v36 = vld [vmem:[#allocation11 + $0x220] ss:$8 sps:$4 sm:$0xff]   ;;  %v12862_v44 = vcombine.low %v7164_v12, %v7173_v61 }
 0x2a9   : > { %3008 = vmatprep.mubr.bf16.mxu0 %v19569_v38  ;;  %3556 = vmatpush1.bf16.msra.mxu0 %v14076_v48  ;;  %v7185_v40 = vor.u32 %v7183_v28, %v7182_v7  ;;  %v19570_v35 = vcombine.low %v16161_v21, %v16171_v25  ;;  %v14087_v51 = vld [vmem:[#allocation11 + $0x234] ss:$8 sps:$4 sm:$0xff]   ;;  %v19571_v31 = vld [vmem:[#allocation41_spill] sm:$0xff]  ;;  %v3083_v21 = vld [vmem:[#allocation2 + $0x40] sm:$0xff]  ;;  %v16825_v7 = vpop.permute.xlu1 %603 }
 0x2aa   : > { %8001 = vmatprep.mubr.bf16.mxu1 %v12863_v53  ;;  %3557 = vmatprep.subr.bf16.mxu0 %v14081_v54  ;;  %v7195_v29 = vsel %vm16149_vm15, %v7187_v62, %v7194_v43  ;;  %v19572_v5 = vcombine.high %v16208_v34, %v19571_v31  ;;  %v1890_v30 = vld [vmem:[#allocation2 + $0x278] sm:$0x11]  ;;  %v14085_v42 = vld [vmem:[#allocation11 + $0x230] ss:$8 sps:$4 sm:$0xff]   ;;  %v14090_v61 = vld [vmem:[#allocation11 + $0x244] ss:$8 sps:$4 sm:$0xff]   ;;  %v19573_v28 = vcombine.low %v16208_v34, %v19571_v31 }
 0x2ab   : > { %v7186_v23 = vsel %vm16149_vm15, %v12807_v10, %v7185_v40  ;;  %v8083_v12 = vld [vmem:[#allocation2 + $0x158] sm:$0xff]  ;;  %v1891_v25 = vsel %vm15365_vm13, 0, %v1890_v30  ;;  %v3140_v38 = vshll.u32 %v3083_v21, 16  ;;  %v3144_v1 = vshrl.u32 %v3083_v21, 16  ;;  %v3086_v10 = vld [vmem:[#allocation2 + $0x68] sm:$0xff] }
 0x2ac   : > { %v12865_v15 = vcombine.high %v7186_v23, %v7195_v29  ;;  %v8116_v53 = vshll.u32 %v8083_v12, 16  ;;  %v8120_v26 = vshrl.u32 %v8083_v12, 16  ;;  %1892 = vst [vmem:[#allocation2 + $0x278] sm:$0x11] %v1891_v25  ;;  %v14088_v33 = vld [vmem:[#allocation11 + $0x240] ss:$8 sps:$4 sm:$0xff]   ;;  %v19574_v40 = vcombine.high %v16240_v37, %v16247_v8 }
 0x2ad   : > { %3558 = vmatpush1.bf16.msra.mxu0 %v14079_v14  ;;  %v14093_v43 = vld [vmem:[#allocation11 + $0x254] ss:$8 sps:$4 sm:$0xff]   ;;  %v19575_v34 = vcombine.high %v16166_v0, %v16267_v13  ;;  %v16840_v31 = vld [vmem:[#allocation11 + $0x264] ss:$8 sps:$4 sm:$0xff]   ;;  %v3164_v30 = vshll.u32 %v3086_v10, 16  ;;  %v3168_v12 = vshrl.u32 %v3086_v10, 16  ;;  %v805_v21 = vpop.permute.xlu1 %804 }
 0x2ae   : > { %3559 = vmatprep.subr.bf16.mxu0 %v14084_v49  ;;  %v16833_v62 = vrot.slane %v8116_v53, 5 }
 0x2af   : > { %v3170_v10 = vrot.slane %v3168_v12, 4 }
 0x2b0   : > { %3009 = vmatmul.mubr.bf16.gmra.mrb[4].mxu0 %v19570_v35  ;;  %8002 = vmatmul.mubr.bf16.vlgmr.msra.gmra.mrb[0].mxu1 %v12862_v44  ;;  %v3084_v44 = vld [vmem:[#allocation2 + $0x48] sm:$0x11] }
 0x2b1   : > { %3018 = vmatprep.mubr.bf16.mxu0 %v19572_v5  ;;  %8555 = vmatpush1.bf16.msra.mxu1 %v14076_v48  ;;  %v12864_v48 = vcombine.low %v7186_v23, %v7195_v29  ;;  %v16835_v29 = vld [vmem:[#allocation11 + $0x250] ss:$8 sps:$4 sm:$0xff]   ;;  %v16842_v5 = vrot.slane %v3140_v38, 5  ;;  %v1074_v52 = vpop.permute.xlu1 %1073 }
 0x2b2   : > { %3560 = vmatpush1.bf16.msra.mxu0 %v14082_v36  ;;  %8011 = vmatprep.mubr.bf16.mxu1 %v12865_v15  ;;  %v3146_v15 = vrot.slane %v3144_v1, 4 }
 0x2b3   : > { %8556 = vmatprep.subr.bf16.mxu1 %v14081_v54  ;;  %3561 = vmatprep.subr.bf16.mxu0 %v14087_v51  ;;  %v8085_v54 = vld [vmem:[#allocation2 + $0x178] sm:$0xff] }
 0x2b4   : > { %v8131_v35 = vshrl.u32 %v8085_v54, 16  ;;  %v8134_v23 = vshll.u32 %v8085_v54, 16  ;;  %v3147_v1 = vor.u32 %v3146_v15, %v16842_v5  ;;  %v8082_v54 = vld [vmem:[#allocation2 + $0x150] sm:$0xff]  ;;  %v19578_v15 = vcombine.high %v16373_v3, %v16377_v45 }
 0x2b5   : > { %8557 = vmatpush1.bf16.msra.mxu1 %v14079_v14  ;;  %v8084_v14 = vld [vmem:[#allocation2 + $0x160] sm:$0x11] }
 0x2b6   : > { %3562 = vmatpush1.bf16.msra.mxu0 %v14085_v42  ;;  %8558 = vmatprep.subr.bf16.mxu1 %v14084_v49  ;;  %v8122_v49 = vrot.slane %v8120_v26, 4  ;;  %v8126_v53 = vshll.u32 %v8084_v14, 16  ;;  %v16846_v26 = vld [vmem:[#allocation11 + $0x260] ss:$8 sps:$4 sm:$0xff]   ;;  %v8133_v38 = vrot.slane %v8131_v35, 4 }
 0x2b7   : > { %3563 = vmatprep.subr.bf16.mxu0 %v14090_v61  ;;  %v16855_v14 = vld [vmem:[#allocation11 + $0x274] ss:$8 sps:$4 sm:$0xff]   ;;  %v8087_v35 = vld [vmem:[#allocation2 + $0x188] sm:$0x11] }
 0x2b8   : > { %3019 = vmatmul.mubr.bf16.gmra.mrb[8].mxu0 %v19573_v28  ;;  %8012 = vmatmul.mubr.bf16.gmra.mrb[4].mxu1 %v12864_v48  ;;  %v8123_v25 = vor.u32 %v8122_v49, %v16833_v62  ;;  %v3087_v48 = vld [vmem:[#allocation2 + $0x70] sm:$0x11]  ;;  %v16850_v28 = vrot.slane %v3164_v30, 5  ;;  %v599_v49 = vpop.permute.xlu0 %598 }
 0x2b9   : > { %3028 = vmatprep.mubr.bf16.mxu0 %v19574_v40  ;;  %8559 = vmatpush1.bf16.msra.mxu1 %v14082_v36  ;;  %v3082_v36 = vld [vmem:[#allocation2 + $0x38] sm:$0xff]  ;;  %v8136_v40 = vrot.slane %v8134_v23, 5  ;;  %v8128_v23 = vrot.slane %v8126_v53, 5  ;;  %v3174_v12 = vshll.u32 %v3087_v48, 16  ;;  %v16875_v53 = vld [vmem:[#allocation11 + $0x284] ss:$8 sps:$4 sm:$0xff]  }
 0x2ba   : > { %3564 = vmatpush1.bf16.msra.mxu0 %v14088_v33  ;;  %8021 = vmatprep.mubr.bf16.mxu1 %v19575_v34  ;;  %v3134_v34 = vshll.u32 %v3082_v36, 16  ;;  %v8124_v30 = vrot.slane %v8123_v25, 4  ;;  %v19582_v25 = vcombine.high %v16357_v32, %v16349_v11  ;;  %v3171_v48 = vor.u32 %v3170_v10, %v16850_v28 }
 0x2bb   : > { %8560 = vmatprep.subr.bf16.mxu1 %v14087_v51  ;;  %3565 = vmatprep.subr.bf16.mxu0 %v14093_v43  ;;  %v3150_v51 = vshll.u32 %v3084_v44, 16  ;;  %v3131_v44 = vshrl.u32 %v3082_v36, 16  ;;  %v8110_v36 = vshll.u32 %v8082_v54, 16 }
 0x2bc   : > { %v3136_v16 = vrot.slane %v3134_v34, 5  ;;  %v16883_v17 = vsel %vm16868_vm2, %v8124_v30, %v8128_v23  ;;  %v678_v34 = vmul.f32 %v15462_v60, %v599_v49  ;;  %v16901_v30 = vrot.slane %v3171_v48, 4 }
 0x2bd   : > { %8561 = vmatpush1.bf16.msra.mxu1 %v14085_v42  ;;  %v19576_v42 = vcombine.low %v16240_v37, %v16247_v8  ;;  %v16864_v37 = vld [vmem:[#allocation11 + $0x270] ss:$8 sps:$4 sm:$0xff]   ;;  %v19579_v8 = vmov 0  ;;  %19583 = vst [vmem:[#allocation45_spill] sm:$0xff] %v16883_v17  ;;  %v19586_v48 = vcombine.high %v16522_v4, %v16526_v22 }
 0x2be   : > { %3566 = vmatpush1.bf16.msra.mxu0 %v16835_v29  ;;  %8562 = vmatprep.subr.bf16.mxu1 %v14090_v61  ;;  %v19577_v61 = vcombine.low %v16166_v0, %v16267_v13  ;;  %v19580_v8 = vsel %vm16868_vm2, 4294967295, %v19579_v8  ;;  %v3152_v0 = vrot.slane %v3150_v51, 5  ;;  %v8107_v13 = vshrl.u32 %v8082_v54, 16 }
 0x2bf   : > { %3567 = vmatprep.subr.bf16.mxu0 %v16840_v31  ;;  %19581 = vst [vmem:[#allocation46_spill] sm:$0xff] %v19580_v8  ;;  %v882_v51 = vmul.f32 %v15447_v55, %v805_v21  ;;  %v677_v54 = vmul.f32 %v15459_v59, %v599_v49  ;;  %v16910_v49 = vld [vmem:[#allocation11 + $0x294] ss:$8 sps:$4 sm:$0xff]  }
 0x2c0   : > { %3029 = vmatmul.mubr.bf16.gmra.mrb[12].mxu0 %v19576_v42  ;;  %8022 = vmatmul.mubr.bf16.gmra.mrb[8].mxu1 %v19577_v61  ;;  %v8137_v42 = vor.u32 %v8136_v40, %v8133_v38  ;;  %v8150_v61 = vshll.u32 %v8087_v35, 16  ;;  %v16891_v38 = vld [vmem:[#allocation11 + $0x280] ss:$8 sps:$4 sm:$0xff]   ;;  %v8109_v10 = vrot.slane %v8107_v13, 4  ;;  %v8112_v40 = vrot.slane %v8110_v36, 5 }
 0x2c1   : > { %3038 = vmatprep.mubr.bf16.mxu0 %v19578_v15  ;;  %8563 = vmatpush1.bf16.msra.mxu1 %v14088_v33  ;;  %v3148_v33 = vrot.slane %v3147_v1, 4  ;;  %v3133_v15 = vrot.slane %v3131_v44, 4  ;;  %v809_v1 = vpop.permute.xlu0 %808  ;;  %v883_v44 = vmul.f32 %v15450_v56, %v805_v21  ;;  %v19584_v21 = vcombine.low %v16373_v3, %v16377_v45  ;;  %v8086_v36 = vld [vmem:[#allocation2 + $0x180] sm:$0xff] }
 0x2c2   : > { %3568 = vmatpush1.bf16.msra.mxu0 %v16846_v26  ;;  %8031 = vmatprep.mubr.bf16.mxu1 %v19582_v25  ;;  %v16887_v25 = vrot.slane %v3174_v12, 5  ;;  %v16905_v23 = vrot.slane %v8150_v61, 5  ;;  %v1078_v12 = vpop.permute.xlu1 %1077  ;;  %v946_v17 = vadd.f32 %v882_v51, %v677_v54  ;;  %v679_v3 = vmul.f32 %v15459_v59, %v16825_v7  ;;  %v16934_v59 = vld [vmem:[#allocation11 + $0x2a4] ss:$8 sps:$4 sm:$0xff]  }
 0x2c3   : > { %8564 = vmatprep.subr.bf16.mxu1 %v14093_v43  ;;  %3569 = vmatprep.subr.bf16.mxu0 %v16855_v14  ;;  %v16885_v43 = vld [vmem:[#allocation2 + $0x60] sm:$0xff]  ;;  %v16899_v35 = vsel %vm16868_vm2, %v3148_v33, %v3152_v0  ;;  %v1151_v0 = vmul.f32 %v15453_v57, %v1074_v52  ;;  %v19585_v33 = vcombine.low %v16357_v32, %v16349_v11 }
 0x2c4   : > { %v3155_v13 = vshrl.u32 %v16885_v43, 16  ;;  %v680_v45 = vmul.f32 %v15462_v60, %v16825_v7  ;;  %v3158_v11 = vshll.u32 %v16885_v43, 16  ;;  %v947_v32 = vadd.f32 %v883_v44, %v678_v34 }
 0x2c5   : > { %8565 = vmatpush1.bf16.msra.mxu1 %v16835_v29  ;;  %v16903_v29 = vrot.slane %v8137_v42, 4  ;;  %v8113_v42 = vor.u32 %v8112_v40, %v8109_v10  ;;  %v1152_v61 = vmul.f32 %v15456_v58, %v1074_v52  ;;  %v8140_v60 = vshll.u32 %v8086_v36, 16  ;;  %v1343_v54 = vpop.permute.xlu0 %1342 }
 0x2c6   : > { %3570 = vmatpush1.bf16.msra.mxu0 %v16864_v37  ;;  %8566 = vmatprep.subr.bf16.mxu1 %v16840_v31  ;;  %v3137_v31 = vor.u32 %v3136_v16, %v3133_v15  ;;  %v16926_v16 = vld [vmem:[#allocation11 + $0x290] ss:$8 sps:$4 sm:$0xff]   ;;  %v19587_v15 = vcombine.high %v16411_v27, %v16398_v19  ;;  %v8144_v7 = vshrl.u32 %v8086_v36, 16  ;;  %v885_v51 = vmul.f32 %v15450_v56, %v809_v1  ;;  %v1347_v56 = vpop.permute.xlu1 %1346 }
 0x2c7   : > { %3571 = vmatprep.subr.bf16.mxu0 %v16875_v53  ;;  %v1215_v52 = vadd.f32 %v1151_v0, %v946_v17  ;;  %v1153_v10 = vmul.f32 %v15453_v57, %v1078_v12  ;;  %v1154_v40 = vmul.f32 %v15456_v58, %v1078_v12  ;;  %v19589_v34 = vshll.u32 %v16659_v46, 16  ;;  %v3081_v17 = vld [vmem:[#allocation2 + $0x20] sm:$0x11] }
 0x2c8   : > { %3039 = vmatmul.mubr.bf16.gmra.mrb[16].mxu0 %v19584_v21  ;;  %8032 = vmatmul.mubr.bf16.gmra.mrb[12].mxu1 %v19585_v33  ;;  %v16939_v43 = vrot.slane %v3137_v31, 4  ;;  %v949_v36 = vadd.f32 %v885_v51, %v680_v45  ;;  %v16953_v57 = vrot.slane %v8113_v42, 4  ;;  %v3157_v58 = vrot.slane %v3155_v13, 4  ;;  %v3088_v13 = vld [vmem:[#allocation2 + $0x88] sm:$0xff] }
 0x2c9   : > { %3048 = vmatprep.mubr.bf16.mxu0 %v19586_v48  ;;  %8567 = vmatpush1.bf16.msra.mxu1 %v16846_v26  ;;  %v884_v26 = vmul.f32 %v15447_v55, %v809_v1  ;;  %v16947_v21 = vrot.slane %v19589_v34, 5  ;;  %v16951_v1 = vld [vmem:[#allocation11 + $0x2a0] ss:$8 sps:$4 sm:$0xff]   ;;  %v1216_v12 = vadd.f32 %v1152_v61, %v947_v32  ;;  %v1420_v31 = vmul.f32 %v15469_v63, %v1343_v54 }
 0x2ca   : > { %3572 = vmatpush1.bf16.msra.mxu0 %v16891_v38  ;;  %8041 = vmatprep.mubr.bf16.mxu1 %v19587_v15  ;;  %v16958_v0 = vrot.slane %v8140_v60, 5  ;;  %v19590_v48 = vcombine.low %v16522_v4, %v16526_v22  ;;  %v16965_v45 = vrot.slane %v8144_v7, 4  ;;  %v1421_v42 = vmul.f32 %v15472_v2, %v1343_v54  ;;  %v19592_v61 = vld [vmem:[#allocation43_spill] sm:$0xff]  ;;  %v19593_v15 = vld [vmem:[#allocation30_spill] sm:$0xff]  ;;  %v7149_v34 = vld [vmem:[#allocation2 + $0x260] sm:$0x88] }
 0x2cb   : > { %8568 = vmatprep.subr.bf16.mxu1 %v16855_v14  ;;  %3573 = vmatprep.subr.bf16.mxu0 %v16910_v49  ;;  %v19588_v14 = vshrl.u32 %v16659_v46, 16  ;;  %v948_v55 = vadd.f32 %v884_v26, %v679_v3  ;;  %v3160_v46 = vrot.slane %v3158_v11, 5  ;;  %v16963_v3 = vld [vmem:[#allocation11 + $0x2b4] ss:$8 sps:$4 sm:$0xff]   ;;  %v1484_v32 = vadd.f32 %v1420_v31, %v1215_v52  ;;  %v16979_v26 = vld [vmem:[#allocation11 + $0x2b0] ss:$8 sps:$4 sm:$0xff]  }
 0x2cc   : > { %v19591_v11 = vcombine.low %v16411_v27, %v16398_v19  ;;  %v19594_v60 = vcombine.high %v19592_v61, %v19593_v15  ;;  %v3126_v22 = vshll.u32 %v3081_v17, 16  ;;  %v1423_v7 = vmul.f32 %v15472_v2, %v1347_v56  ;;  %v19595_v54 = vld [vmem:[#allocation47_spill] sm:$0xff] }
 0x2cd   : > { %v3109_v44 = vrot.slane %v19588_v14, 4  ;;  %8569 = vmatpush1.bf16.msra.mxu1 %v16864_v37  ;;  %v1217_v33 = vadd.f32 %v1153_v10, %v948_v55  ;;  %v1218_v37 = vadd.f32 %v1154_v40, %v949_v36  ;;  %v1485_v51 = vadd.f32 %v1421_v42, %v1216_v12  ;;  %v19596_v52 = vld [vmem:[#allocation39_spill] sm:$0xff]  ;;  %v16987_v40 = vld [vmem:[#allocation11 + $0x2c4] ss:$8 sps:$4 sm:$0xff]  }
 0x2ce   : > { %3574 = vmatpush1.bf16.msra.mxu0 %v16926_v16  ;;  %8570 = vmatprep.subr.bf16.mxu1 %v16875_v53  ;;  %v1422_v53 = vmul.f32 %v15469_v63, %v1347_v56  ;;  %v7321_v63 = vshrl.u32 %v16784_v24, 16  ;;  %v1560_v19 = vmul.f32 %v15492_v9, %v1484_v32  ;;  %v19597_v10 = vcombine.high %v19595_v54, %v19596_v52 }
 0x2cf   : > { %3575 = vmatprep.subr.bf16.mxu0 %v16934_v59  ;;  %v3113_v4 = vor.u32 %v16947_v21, %v3109_v44  ;;  %v3161_v2 = vor.u32 %v3160_v46, %v3157_v58  ;;  %v3182_v14 = vshll.u32 %v3088_v13, 16  ;;  %v1487_v44 = vadd.f32 %v1423_v7, %v1218_v37  ;;  %v16997_v58 = vld [vmem:[#allocation11 + $0x2c0] ss:$8 sps:$4 sm:$0xff]  }
 0x2d0   : > { %3049 = vmatmul.mubr.bf16.gmra.mrb[20].mxu0 %v19590_v48  ;;  %8042 = vmatmul.mubr.bf16.gmra.mrb[16].mxu1 %v19591_v11  ;;  %v1486_v27 = vadd.f32 %v1422_v53, %v1217_v33  ;;  %v7312_v55 = vshrl.u32 %v16772_v50, 16  ;;  %v1561_v36 = vmul.f32 %v15495_v39, %v1485_v51  ;;  %v1636_v56 = vadd.f32 %v15498_v47, %v1560_v19  ;;  %v17009_v53 = vld [vmem:[#allocation11 + $0x2d4] ss:$8 sps:$4 sm:$0xff]  }
 0x2d1   : > { %3058 = vmatprep.mubr.bf16.mxu0 %v19594_v60  ;;  %8571 = vmatpush1.bf16.msra.mxu1 %v16891_v38  ;;  %v3179_v38 = vshrl.u32 %v3088_v13, 16  ;;  %v3114_v12 = vrot.slane %v3113_v4, 4  ;;  %v3128_v31 = vrot.slane %v3126_v22, 5  ;;  %v7323_v46 = vrot.slane %v7321_v63, 7  ;;  %v17030_v22 = vld [vmem:[#allocation11 + $0x2d0] ss:$8 sps:$4 sm:$0xff]  }
 0x2d2   : > { %3576 = vmatpush1.bf16.msra.mxu0 %v16951_v1  ;;  %8051 = vmatprep.mubr.bf16.mxu1 %v19597_v10  ;;  %v1562_v17 = vmul.f32 %v15492_v9, %v1486_v27  ;;  %v1637_v33 = vadd.f32 %v15501_v18, %v1561_v36  ;;  %v1700_v37 = vmax.f32 %v1636_v56, 0.0  ;;  %v7307_v9 = vshrl.u32 %v7149_v34, 16  ;;  %v19601_v19 = vld [vmem:[#allocation31_spill] sm:$0xff]  ;;  %v19602_v27 = vld [vmem:[#allocation38_spill] sm:$0xff] }
 0x2d3   : > { %8572 = vmatprep.subr.bf16.mxu1 %v16910_v49  ;;  %3577 = vmatprep.subr.bf16.mxu0 %v16963_v3  ;;  %v1563_v49 = vmul.f32 %v15495_v39, %v1487_v44  ;;  %v3162_v13 = vrot.slane %v3161_v2, 4  ;;  %v8147_v39 = vor.u32 %v16965_v45, %v16958_v0  ;;  %v19598_v32 = vcombine.low %v19592_v61, %v19593_v15  ;;  %v8089_v2 = vld [vmem:[#allocation2 + $0x1a8] sm:$0xff]  ;;  %v17074_v56 = vld [vmem:[#allocation11 + $0x2e0] ss:$8 sps:$4 sm:$0xff]  }
 0x2d4   : > { %v1638_v48 = vadd.f32 %v15498_v47, %v1562_v17  ;;  %v7314_v11 = vrot.slane %v7312_v55, 7  ;;  %v7324_v47 = vshll.u32 %v16784_v24, 16  ;;  %1764 = vst [vmem:[%s15524_s19 + $0x1e0] sm:$0xff] %v1700_v37  ;;  %v19599_v45 = vcombine.low %v19595_v54, %v19596_v52 }
 0x2d5   : > { %8573 = vmatpush1.bf16.msra.mxu1 %v16926_v16  ;;  %v3089_v16 = vld [vmem:[#allocation2 + $0x90] sm:$0xff]  ;;  %v1639_v42 = vadd.f32 %v15501_v18, %v1563_v49  ;;  %v19600_v18 = vcombine.high %v16790_v20, %v16794_v6  ;;  %v17022_v61 = vsel %vm16868_vm2, %v3114_v12, %v16947_v21  ;;  %v17024_v15 = vrot.slane %v3179_v38, 4 }
 0x2d6   : > { %3578 = vmatpush1.bf16.msra.mxu0 %v16979_v26  ;;  %8574 = vmatprep.subr.bf16.mxu1 %v16934_v59  ;;  %v1701_v59 = vmax.f32 %v1637_v33, 0.0  ;;  %v1702_v60 = vmax.f32 %v1638_v48, 0.0  ;;  %v17026_v24 = vrot.slane %v3182_v14, 5  ;;  %v7315_v7 = vshll.u32 %v16772_v50, 16  ;;  %v17095_v33 = vld [vmem:[#allocation11 + $0x2f4] ss:$8 sps:$4 sm:$0xff]  }
 0x2d7   : > { %3579 = vmatprep.subr.bf16.mxu0 %v16987_v40  ;;  %v1703_v4 = vmax.f32 %v1639_v42, 0.0  ;;  %v7326_v63 = vor.u32 %v7324_v47, %v7323_v46  ;;  %v17035_v51 = vsel %vm16868_vm2, %v3114_v12, %v3128_v31  ;;  %v19603_v54 = vcombine.high %v19601_v19, %v19602_v27  ;;  %v3091_v42 = vld [vmem:[#allocation2 + $0xb0] sm:$0xff] }
 0x2d8   : > { %3059 = vmatmul.mubr.bf16.gmra.mrb[24].mxu0 %v19598_v32  ;;  %8052 = vmatmul.mubr.bf16.gmra.mrb[20].mxu1 %v19599_v45  ;;  %1765 = vst [vmem:[%s15524_s19 + $0x1e8] sm:$0xff] %v1701_v59  ;;  %v13301_v21 = vpack.c.bf16 %v1701_v59, %v1700_v37  ;;  %1766 = vst [vmem:[%s15524_s19 + $0x1f0] sm:$0xff] %v1702_v60  ;;  %v17049_v50 = vsel %vm16868_vm2, %v16939_v43, %v16842_v5  ;;  %v3188_v52 = vshll.u32 %v3089_v16, 16  ;;  %v3092_v32 = vld [vmem:[#allocation2 + $0xb8] sm:$0xff] }
 0x2d9   : > { %3068 = vmatprep.mubr.bf16.mxu0 %v19600_v18  ;;  %8575 = vmatpush1.bf16.msra.mxu1 %v16951_v1  ;;  %v17043_v1 = vld [vmem:[#allocation11 + $0x2e4] ss:$8 sps:$4 sm:$0xff]   ;;  %v3192_v10 = vshrl.u32 %v3089_v16, 16  ;;  %1767 = vst [vmem:[%s15524_s19 + $0x1f8] sm:$0xff] %v1703_v4  ;;  %v13302_v38 = vpack.c.bf16 %v1703_v4, %v1702_v60  ;;  %v12813_v14 = vrot.slane %v7307_v9, 11  ;;  %v7317_v44 = vor.u32 %v7315_v7, %v7314_v11  ;;  %v8092_v18 = vld [vmem:[#allocation2 + $0x1d0] sm:$0xff] }
 0x2da   : > { %3580 = vmatpush1.bf16.msra.mxu0 %v16997_v58  ;;  %8061 = vmatprep.mubr.bf16.mxu1 %v19603_v54  ;;  %v7319_v34 = vrot.slane %v7314_v11, 4  ;;  %v8148_v55 = vrot.slane %v8147_v39, 4  ;;  %2118 = vst [vmem:[#allocation2 + $0x290] sm:$0xff] %v13301_v21  ;;  %v17059_v5 = vsel %vm16868_vm2, %v16953_v57, %v16833_v62  ;;  %v17064_v43 = vsel %vm16868_vm2, %v3162_v13, %v16850_v28  ;;  %v17082_v57 = vld [vmem:[#allocation2 + $0x1a0] sm:$0xff]  ;;  %v3090_v13 = vld [vmem:[#allocation2 + $0x98] sm:$0x11] }
 0x2db   : > { %8576 = vmatprep.subr.bf16.mxu1 %v16963_v3  ;;  %3581 = vmatprep.subr.bf16.mxu0 %v17009_v53  ;;  %v12455_v3 = vcombine.high %v17022_v61, %v17035_v51  ;;  %v17070_v36 = vsel %vm16868_vm2, %v16901_v30, %v16887_v25  ;;  %2119 = vst [vmem:[#allocation2 + $0x298] sm:$0xff] %v13302_v38  ;;  %v8164_v17 = vshll.u32 %v8089_v2, 16  ;;  %v8168_v12 = vshrl.u32 %v8089_v2, 16  ;;  %v17121_v11 = vld [vmem:[#allocation11 + $0x2f0] ss:$8 sps:$4 sm:$0xff]  }
 0x2dc   : > { %v17078_v62 = vsel %vm16149_vm15, %v7319_v34, %v7326_v63  ;;  %v3185_v28 = vor.u32 %v17026_v24, %v17024_v15  ;;  %v12457_v25 = vcombine.high %v17049_v50, %v16899_v35  ;;  %v12456_v30 = vcombine.low %v17049_v50, %v16899_v35  ;;  %v8090_v24 = vld [vmem:[#allocation2 + $0x1b0] sm:$0x11]  ;;  %v3095_v34 = vld [vmem:[#allocation2 + $0xe0] sm:$0xff] }
 0x2dd   : > { %8577 = vmatpush1.bf16.msra.mxu1 %v16979_v26  ;;  %v3190_v26 = vrot.slane %v3188_v52, 5  ;;  %v3194_v31 = vrot.slane %v3192_v10, 4  ;;  %v19604_v49 = vcombine.low %v16790_v20, %v16794_v6  ;;  %v7318_v46 = vsel %vm16149_vm15, %v12813_v14, %v7317_v44  ;;  %v8091_v44 = vld [vmem:[#allocation2 + $0x1c8] sm:$0xff] }
 0x2de   : > { %3582 = vmatpush1.bf16.msra.mxu0 %v17030_v22  ;;  %8578 = vmatprep.subr.bf16.mxu1 %v16987_v40  ;;  %v19605_v40 = vld [vmem:[#allocation45_spill] sm:$0xff]  ;;  %v17104_v9 = vsel %vm16868_vm2, %v8148_v55, %v16905_v23  ;;  %v19606_v20 = vcombine.low %v19601_v19, %v19602_v27  ;;  %v12877_v6 = vcombine.high %v7318_v46, %v17078_v62  ;;  %v8155_v23 = vshrl.u32 %v17082_v57, 16 }
 0x2df   : > { %3583 = vmatprep.subr.bf16.mxu0 %v17043_v1  ;;  %v12910_v37 = vcombine.low %v17059_v5, %v19605_v40  ;;  %v12911_v48 = vcombine.high %v17059_v5, %v19605_v40  ;;  %v12459_v39 = vcombine.high %v17064_v43, %v17070_v36  ;;  %v17116_v16 = vsel %vm16868_vm2, %v16903_v29, %v16958_v0  ;;  %v17128_v29 = vld [vmem:[#allocation11 + $0x304] ss:$8 sps:$4 sm:$0xff]   ;;  %v17212_v50 = vld [vmem:[#allocation11 + $0x330] ss:$8 sps:$4 sm:$0xff]  }
 0x2e0   : > { %3069 = vmatmul.mubr.bf16.gmra.mrb[28].mxu0 %v19604_v49  ;;  %8062 = vmatmul.mubr.bf16.gmra.mrb[24].mxu1 %v19606_v20  ;;  %v12458_v47 = vcombine.low %v17064_v43, %v17070_v36  ;;  %v3186_v59 = vrot.slane %v3185_v28, 4  ;;  %v17125_v60 = vrot.slane %v8164_v17, 5  ;;  %v8170_v45 = vrot.slane %v8168_v12, 4  ;;  %v3094_v28 = vld [vmem:[#allocation2 + $0xd8] sm:$0xff]  ;;  %v17276_v43 = vld [vmem:[#allocation11 + $0x350] ss:$8 sps:$4 sm:$0xff]  }
 0x2e1   : > { %3587 = vmatprep.mubr.bf16.mxu0 %v12455_v3  ;;  %8579 = vmatpush1.bf16.msra.mxu1 %v16997_v58  ;;  %v12913_v0 = vcombine.high %v17116_v16, %v17104_v9  ;;  %v3195_v58 = vor.u32 %v3194_v31, %v3190_v26  ;;  %v3198_v15 = vshll.u32 %v3090_v13, 16  ;;  %v8158_v4 = vshll.u32 %v17082_v57, 16  ;;  %v17150_v57 = vld [vmem:[#allocation11 + $0x314] ss:$8 sps:$4 sm:$0xff]  }
 0x2e2   : > { %3584 = vmatpush1.bf16.msra.mxu0 %v17074_v56  ;;  %8071 = vmatprep.mubr.bf16.mxu1 %v12877_v6  ;;  %v3203_v7 = vshrl.u32 %v3091_v42, 16  ;;  %v3206_v63 = vshll.u32 %v3091_v42, 16  ;;  %v3212_v21 = vshll.u32 %v3092_v32, 16  ;;  %v3216_v19 = vshrl.u32 %v3092_v32, 16  ;;  %v17156_v6 = vld [vmem:[#allocation2 + $0x1f0] sm:$0xff] }
 0x2e3   : > { %8580 = vmatprep.subr.bf16.mxu1 %v17009_v53  ;;  %3585 = vmatprep.subr.bf16.mxu0 %v17095_v33  ;;  %v12454_v27 = vcombine.low %v17022_v61, %v17035_v51  ;;  %v12912_v53 = vcombine.low %v17116_v16, %v17104_v9  ;;  %v8188_v54 = vshll.u32 %v8092_v18, 16  ;;  %v8192_v52 = vshrl.u32 %v8092_v18, 16  ;;  %v17146_v61 = vld [vmem:[#allocation11 + $0x300] ss:$8 sps:$4 sm:$0xff]  }
 0x2e4   : > { %v17142_v10 = vsel %vm16868_vm2, %v3186_v59, %v3190_v26  ;;  %v8157_v2 = vrot.slane %v8155_v23, 4  ;;  %v8171_v38 = vor.u32 %v8170_v45, %v17125_v60  ;;  %v8174_v14 = vshll.u32 %v8090_v24, 16  ;;  %v3093_v42 = vld [vmem:[#allocation2 + $0xc0] sm:$0x11]  ;;  %v17166_v45 = vld [vmem:[#allocation11 + $0x310] ss:$8 sps:$4 sm:$0xff]  }
 0x2e5   : > { %8581 = vmatpush1.bf16.msra.mxu1 %v17030_v22  ;;  %v12876_v22 = vcombine.low %v7318_v46, %v17078_v62  ;;  %v3196_v51 = vrot.slane %v3195_v58, 4  ;;  %v3200_v55 = vrot.slane %v3198_v15, 5  ;;  %v8160_v3 = vrot.slane %v8158_v4, 5  ;;  %v8095_v62 = vld [vmem:[#allocation2 + $0x1f8] sm:$0xff]  ;;  %v17174_v24 = vld [vmem:[#allocation11 + $0x324] ss:$8 sps:$4 sm:$0xff]  }
 0x2e6   : > { %3586 = vmatpush1.bf16.msra.mxu0 %v17121_v11  ;;  %8582 = vmatprep.subr.bf16.mxu1 %v17043_v1  ;;  %v3205_v17 = vrot.slane %v3203_v7, 4  ;;  %v3208_v12 = vrot.slane %v3206_v63, 5  ;;  %v17152_v26 = vrot.slane %v3212_v21, 5  ;;  %v3218_v31 = vrot.slane %v3216_v19, 4  ;;  %v8093_v58 = vld [vmem:[#allocation2 + $0x1d8] sm:$0x11] }
 0x2e7   : > { %4157 = vmatprep.subr.bf16.mxu0 %v17128_v29  ;;  %v8179_v1 = vshrl.u32 %v8091_v44, 16  ;;  %v8182_v49 = vshll.u32 %v8091_v44, 16  ;;  %v17154_v13 = vrot.slane %v8188_v54, 5  ;;  %v8194_v20 = vrot.slane %v8192_v52, 4  ;;  %v17179_v52 = vld [vmem:[#allocation11 + $0x320] ss:$8 sps:$4 sm:$0xff]  }
 0x2e8   : > { %8072 = vmatmul.mubr.bf16.gmra.mrb[28].mxu1 %v12876_v22  ;;  %v8172_v46 = vrot.slane %v8171_v38, 4  ;;  %v8176_v23 = vrot.slane %v8174_v14, 5  ;;  %v3227_v32 = vshrl.u32 %v3094_v28, 16  ;;  %v3230_v59 = vshll.u32 %v3094_v28, 16  ;;  %v17184_v44 = vld [vmem:[#allocation11 + $0x334] ss:$8 sps:$4 sm:$0xff]  }
 0x2e9   : > { %3588 = vmatmul.mubr.bf16.vlgmr.msra.gmra.mrb[0].mxu0 %v12454_v27  ;;  %8583 = vmatpush1.bf16.msra.mxu1 %v17074_v56  ;;  %v17170_v56 = vsel %vm16868_vm2, %v3196_v51, %v3200_v55  ;;  %v8161_v18 = vor.u32 %v8160_v3, %v8157_v2  ;;  %v3240_v15 = vshrl.u32 %v3095_v34, 16  ;;  %v3209_v4 = vor.u32 %v3208_v12, %v3205_v17  ;;  %v3096_v28 = vld [vmem:[#allocation2 + $0xe8] sm:$0x11]  ;;  %v8096_v17 = vld [vmem:[#allocation2 + $0x200] sm:$0x11] }
 0x2ea   : > { %3597 = vmatprep.mubr.bf16.mxu0 %v12457_v25  ;;  %4158 = vmatpush1.bf16.msra.mxu0 %v17146_v61  ;;  %v3236_v25 = vshll.u32 %v3095_v34, 16  ;;  %v3219_v7 = vor.u32 %v3218_v31, %v17152_v26  ;;  %v8216_v63 = vshrl.u32 %v8095_v62, 16  ;;  %v3222_v21 = vshll.u32 %v3093_v42, 16 }
 0x2eb   : > { %8586 = vmatprep.mubr.bf16.mxu1 %v12911_v48  ;;  %8584 = vmatprep.subr.bf16.mxu1 %v17095_v33  ;;  %v8212_v48 = vshll.u32 %v8095_v62, 16  ;;  %v8181_v19 = vrot.slane %v8179_v1, 4  ;;  %v8184_v27 = vrot.slane %v8182_v49, 5  ;;  %v8195_v54 = vor.u32 %v8194_v20, %v17154_v13 }
 0x2ec   : > { %4159 = vmatprep.subr.bf16.mxu0 %v17150_v57  ;;  %v8198_v2 = vshll.u32 %v8093_v58, 16  ;;  %v3229_v33 = vrot.slane %v3227_v32, 4  ;;  %v3232_v38 = vrot.slane %v3230_v59, 5  ;;  %v8203_v14 = vshrl.u32 %v17156_v6, 16 }
 0x2ed   : > { %8585 = vmatpush1.bf16.msra.mxu1 %v17121_v11  ;;  %v8162_v34 = vrot.slane %v8161_v18, 4  ;;  %v17186_v22 = vrot.slane %v3236_v25, 5  ;;  %v3242_v51 = vrot.slane %v3240_v15, 4  ;;  %v8206_v55 = vshll.u32 %v17156_v6, 16  ;;  %v3097_v6 = vld [vmem:[#allocation2 + $0x100] sm:$0xff] }
 0x2ee   : > { %4160 = vmatpush1.bf16.msra.mxu0 %v17166_v45  ;;  %9156 = vmatprep.subr.bf16.mxu1 %v17128_v29  ;;  %v12461_v11 = vcombine.high %v17142_v10, %v17170_v56  ;;  %v17194_v3 = vsel %vm16868_vm2, %v8172_v46, %v8176_v23  ;;  %v17196_v29 = vrot.slane %v8212_v48, 5  ;;  %v8218_v12 = vrot.slane %v8216_v63, 4  ;;  %v1845_v25 = vld [vmem:[#allocation2 + $0x288] sm:$0x88]  ;;  %v17245_v63 = vld [vmem:[#allocation2 + $0x218] sm:$0xff] }
 0x2ef   : > { %4161 = vmatprep.subr.bf16.mxu0 %v17174_v24  ;;  %v3210_v31 = vrot.slane %v3209_v4, 4  ;;  %v3220_v1 = vrot.slane %v3219_v7, 4  ;;  %v3224_v49 = vrot.slane %v3222_v21, 5  ;;  %v8185_v20 = vor.u32 %v8184_v27, %v8181_v19  ;;  %v3098_v48 = vld [vmem:[#allocation2 + $0x108] sm:$0xff] }
 0x2f0   : > { %8587 = vmatmul.mubr.bf16.vlgmr.msra.gmra.mrb[0].mxu1 %v12910_v37  ;;  %v8196_v62 = vrot.slane %v8195_v54, 4  ;;  %v8200_v46 = vrot.slane %v8198_v2, 5  ;;  %v3233_v23 = vor.u32 %v3232_v38, %v3229_v33  ;;  %v8205_v35 = vrot.slane %v8203_v14, 4  ;;  %v8098_v54 = vld [vmem:[#allocation2 + $0x220] sm:$0xff]  ;;  %v17252_v2 = vld [vmem:[#allocation11 + $0x354] ss:$8 sps:$4 sm:$0xff]  }
 0x2f1   : > { %3598 = vmatmul.mubr.bf16.gmra.mrb[4].mxu0 %v12456_v30  ;;  %9157 = vmatpush1.bf16.msra.mxu1 %v17146_v61  ;;  %v3243_v5 = vor.u32 %v3242_v51, %v17186_v22  ;;  %v3246_v30 = vshll.u32 %v3096_v28, 16  ;;  %v8208_v40 = vrot.slane %v8206_v55, 5  ;;  %v8222_v37 = vshll.u32 %v8096_v17, 16 }
 0x2f2   : > { %3607 = vmatprep.mubr.bf16.mxu0 %v12459_v39  ;;  %4162 = vmatpush1.bf16.msra.mxu0 %v17179_v52  ;;  %v17217_v39 = vld [vmem:[#allocation11 + $0x344] ss:$8 sps:$4 sm:$0xff]   ;;  %v17222_v61 = vsel %vm16868_vm2, %v8162_v34, %v17125_v60  ;;  %v3251_v42 = vshrl.u32 %v3097_v6, 16  ;;  %v3254_v32 = vshll.u32 %v3097_v6, 16  ;;  %v12460_v18 = vcombine.low %v17142_v10, %v17170_v56 }
 0x2f3   : > { %8596 = vmatprep.mubr.bf16.mxu1 %v12913_v0  ;;  %9158 = vmatprep.subr.bf16.mxu1 %v17150_v57  ;;  %v8219_v0 = vor.u32 %v8218_v12, %v17196_v29  ;;  %v12915_v59 = vcombine.high %v17222_v61, %v17194_v3  ;;  %v12914_v57 = vcombine.low %v17222_v61, %v17194_v3  ;;  %v8186_v58 = vrot.slane %v8185_v20, 4  ;;  %v8100_v61 = vld [vmem:[#allocation2 + $0x240] sm:$0xff] }
 0x2f4   : > { %4163 = vmatprep.subr.bf16.mxu0 %v17184_v44  ;;  %v17235_v60 = vsel %vm16868_vm2, %v3210_v31, %v17152_v26  ;;  %v17239_v15 = vsel %vm16868_vm2, %v3220_v1, %v3224_v49  ;;  %v17243_v4 = vsel %vm16868_vm2, %v8196_v62, %v8200_v46  ;;  %v3234_v7 = vrot.slane %v3233_v23, 4  ;;  %v17296_v1 = vld [vmem:[#allocation2 + $0x1a8] sm:$0xff]  ;;  %v17311_v62 = vld [vmem:[#allocation2 + $0x90] sm:$0xff] }
 0x2f5   : > { %9159 = vmatpush1.bf16.msra.mxu1 %v17166_v45  ;;  %v17249_v45 = vld [vmem:[#allocation11 + $0x340] ss:$8 sps:$4 sm:$0xff]   ;;  %v3244_v26 = vrot.slane %v3243_v5, 4  ;;  %v3248_v21 = vrot.slane %v3246_v30, 5  ;;  %v8209_v19 = vor.u32 %v8208_v40, %v8205_v35  ;;  %v8224_v27 = vrot.slane %v8222_v37, 5  ;;  %19608 = vst [vmem:[#allocation48_spill] sm:$0xff] %v17296_v1 }
 0x2f6   : > { %4164 = vmatpush1.bf16.msra.mxu0 %v17212_v50  ;;  %9160 = vmatprep.subr.bf16.mxu1 %v17174_v24  ;;  %v8220_v33 = vrot.slane %v8219_v0, 4  ;;  %v17254_v38 = vrot.slane %v3251_v42, 4  ;;  %v17256_v14 = vrot.slane %v3254_v32, 5  ;;  %v1846_v51 = vsel %vm15328_vm6, 0, %v1845_v25  ;;  %v17313_v46 = vld [vmem:[#allocation2 + $0xb0] sm:$0xff]  ;;  %v17323_v30 = vld [vmem:[#allocation2 + $0x1a0] sm:$0xff] }
 0x2f7   : > { %4165 = vmatprep.subr.bf16.mxu0 %v17217_v39  ;;  %v17269_v24 = vsel %vm16868_vm2, %v8186_v58, %v17154_v13  ;;  %v3260_v55 = vshll.u32 %v3098_v48, 16  ;;  %v3264_v28 = vshrl.u32 %v3098_v48, 16  ;;  %v8227_v17 = vshrl.u32 %v17245_v63, 16  ;;  %1847 = vst [vmem:[#allocation2 + $0x288] sm:$0x88] %v1846_v51  ;;  %v17325_v40 = vld [vmem:[#allocation2 + $0x150] sm:$0xff] }
 0x2f8   : > { %8597 = vmatmul.mubr.bf16.gmra.mrb[4].mxu1 %v12912_v53  ;;  %v12463_v36 = vcombine.high %v17235_v60, %v17239_v15  ;;  %v12917_v9 = vcombine.high %v17269_v24, %v17243_v4  ;;  %v12462_v16 = vcombine.low %v17235_v60, %v17239_v15  ;;  %v17284_v53 = vld [vmem:[#allocation2 + $0x88] sm:$0xff]  ;;  %v8210_v12 = vrot.slane %v8209_v19, 4  ;;  %v17327_v37 = vld [vmem:[#allocation2 + $0x158] sm:$0xff]  ;;  %v8102_v60 = vld [vmem:[#allocation2 + $0x250] sm:$0x11] }
 0x2f9   : > { %3608 = vmatmul.mubr.bf16.gmra.mrb[8].mxu0 %v12458_v47  ;;  %9161 = vmatpush1.bf16.msra.mxu1 %v17179_v52  ;;  %v8236_v47 = vshll.u32 %v8098_v54, 16  ;;  %v17287_v13 = vld [vmem:[#allocation11 + $0x364] ss:$8 sps:$4 sm:$0xff]   ;;  %v12916_v52 = vcombine.low %v17269_v24, %v17243_v4  ;;  %v8240_v31 = vshrl.u32 %v8098_v54, 16  ;;  %v17302_v49 = vsel %vm16868_vm2, %v3244_v26, %v3248_v21  ;;  %19609 = vst [vmem:[#allocation42_spill] sm:$0xff] %v17327_v37  ;;  %v17348_v21 = vld [vmem:[#allocation2 + $0xd8] sm:$0xff] }
 0x2fa   : > { %3617 = vmatprep.mubr.bf16.mxu0 %v12461_v11  ;;  %4166 = vmatpush1.bf16.msra.mxu0 %v17249_v45  ;;  %v17294_v11 = vsel %vm16868_vm2, %v3234_v7, %v17186_v22  ;;  %v17306_v20 = vsel %vm16868_vm2, %v8220_v33, %v8224_v27  ;;  %v3257_v22 = vor.u32 %v17256_v14, %v17254_v38  ;;  %v8230_v6 = vshll.u32 %v17245_v63, 16  ;;  %v17332_v42 = vld [vmem:[#allocation11 + $0x360] ss:$8 sps:$4 sm:$0xff]   ;;  %v17338_v58 = vld [vmem:[#allocation2 + $0x1c8] sm:$0xff]  ;;  %v17357_v33 = vld [vmem:[#allocation11 + $0x374] ss:$8 sps:$4 sm:$0xff]  }
 0x2fb   : > { %8606 = vmatprep.mubr.bf16.mxu1 %v12915_v59  ;;  %9162 = vmatprep.subr.bf16.mxu1 %v17184_v44  ;;  %v17315_v44 = vld [vmem:[#allocation2 + $0x1d0] sm:$0xff]  ;;  %v17317_v23 = vrot.slane %v3260_v55, 5  ;;  %v17319_v35 = vrot.slane %v3264_v28, 4  ;;  %v17321_v5 = vrot.slane %v8227_v17, 4  ;;  %v17334_v32 = vrot.slane %v8236_v47, 5  ;;  %v17336_v59 = vld [vmem:[#allocation2 + $0xb8] sm:$0xff] }
 0x2fc   : > { %4167 = vmatprep.subr.bf16.mxu0 %v17252_v2  ;;  %v8099_v63 = vld [vmem:[#allocation2 + $0x228] sm:$0x11]  ;;  %v8242_v26 = vrot.slane %v8240_v31, 4  ;;  %v8232_v38 = vrot.slane %v8230_v6, 5  ;;  %v12465_v28 = vcombine.high %v17294_v11, %v17302_v49  ;;  %v17378_v17 = vsel %vm16868_vm2, %v8210_v12, %v17196_v29  ;;  %v17382_v6 = vld [vmem:[#allocation2 + $0xe0] sm:$0xff]  ;;  %v17443_v15 = vld [vmem:[#allocation2 + $0x218] sm:$0xff] }
 0x2fd   : > { %9163 = vmatpush1.bf16.msra.mxu1 %v17212_v50  ;;  %v3099_v50 = vld [vmem:[#allocation2 + $0x110] sm:$0x11]  ;;  %v12464_v47 = vcombine.low %v17294_v11, %v17302_v49  ;;  %v3100_v31 = vld [vmem:[#allocation2 + $0x128] sm:$0xff]  ;;  %v3267_v10 = vor.u32 %v17319_v35, %v17317_v23  ;;  %v8246_v3 = vshll.u32 %v8099_v63, 16  ;;  %v3258_v63 = vrot.slane %v3257_v22, 4 }
 0x2fe   : > { %4168 = vmatpush1.bf16.msra.mxu0 %v17276_v43  ;;  %9164 = vmatprep.subr.bf16.mxu1 %v17217_v39  ;;  %v17359_v39 = vld [vmem:[#allocation2 + $0x1f8] sm:$0xff]  ;;  %v3270_v56 = vshll.u32 %v3099_v50, 16  ;;  %v8243_v12 = vor.u32 %v8242_v26, %v17334_v32  ;;  %v17404_v50 = vld [vmem:[#allocation11 + $0x384] ss:$8 sps:$4 sm:$0xff]   ;;  %v8233_v55 = vor.u32 %v8232_v38, %v17321_v5  ;;  %v3275_v51 = vshrl.u32 %v3100_v31, 16 }
 0x2ff   : > { %4169 = vmatprep.subr.bf16.mxu0 %v17287_v13  ;;  %v3278_v29 = vshll.u32 %v3100_v31, 16  ;;  %v8251_v54 = vshrl.u32 %v8100_v61, 16  ;;  %v8254_v14 = vshll.u32 %v8100_v61, 16  ;;  %v12918_v26 = vcombine.low %v17378_v17, %v17306_v20  ;;  %v17412_v22 = vld [vmem:[#allocation11 + $0x380] ss:$8 sps:$4 sm:$0xff]  }
 0x300   : > { %8607 = vmatmul.mubr.bf16.gmra.mrb[8].mxu1 %v12914_v57  ;;  %v17387_v57 = vld [vmem:[#allocation2 + $0x1f0] sm:$0xff]  ;;  %v3272_v35 = vrot.slane %v3270_v56, 5  ;;  %v8248_v7 = vrot.slane %v8246_v3, 5  ;;  %v8244_v5 = vrot.slane %v8243_v12, 4  ;;  %v17414_v61 = vld [vmem:[#allocation2 + $0x100] sm:$0xff]  ;;  %v3277_v56 = vrot.slane %v3275_v51, 4 }
 0x301   : > { %3618 = vmatmul.mubr.bf16.gmra.mrb[12].mxu0 %v12460_v18  ;;  %9165 = vmatpush1.bf16.msra.mxu1 %v17249_v45  ;;  %v8101_v18 = vld [vmem:[#allocation2 + $0x248] sm:$0xff]  ;;  %v3280_v3 = vrot.slane %v3278_v29, 5  ;;  %v17426_v12 = vld [vmem:[#allocation2 + $0x220] sm:$0xff] }
 0x302   : > { %3627 = vmatprep.mubr.bf16.mxu0 %v12463_v36  ;;  %4170 = vmatpush1.bf16.msra.mxu0 %v17332_v42  ;;  %v17395_v45 = vld [vmem:[#allocation11 + $0x370] ss:$8 sps:$4 sm:$0xff]   ;;  %v12919_v36 = vcombine.high %v17378_v17, %v17306_v20  ;;  %v8260_v27 = vshll.u32 %v8101_v18, 16  ;;  %v8264_v19 = vshrl.u32 %v8101_v18, 16  ;;  %v17419_v18 = vld [vmem:[#allocation11 + $0x394] ss:$8 sps:$4 sm:$0xff]  }
 0x303   : > { %8616 = vmatprep.mubr.bf16.mxu1 %v12917_v9  ;;  %9166 = vmatprep.subr.bf16.mxu1 %v17252_v2  ;;  %v3101_v9 = vld [vmem:[#allocation2 + $0x130] sm:$0xff]  ;;  %v3268_v2 = vrot.slane %v3267_v10, 4  ;;  %v17424_v10 = vsel %vm16868_vm2, %v3258_v63, %v17317_v23  ;;  %v17436_v23 = vld [vmem:[#allocation2 + $0x108] sm:$0xff]  ;;  %v3281_v29 = vor.u32 %v3280_v3, %v3277_v56  ;;  %v17524_v20 = vld [vmem:[#allocation2 + $0x60] sm:$0xff] }
 0x304   : > { %4171 = vmatprep.subr.bf16.mxu0 %v17357_v33  ;;  %v3284_v38 = vshll.u32 %v3101_v9, 16  ;;  %v3288_v31 = vshrl.u32 %v3101_v9, 16  ;;  %v8253_v9 = vrot.slane %v8251_v54, 4  ;;  %v17434_v48 = vrot.slane %v8260_v27, 5  ;;  %v17458_v27 = vld [vmem:[#allocation2 + $0x270] sm:$0xff]  ;;  %v17497_v54 = vld [vmem:[#allocation2 + $0x128] sm:$0xff] }
 0x305   : > { %9167 = vmatpush1.bf16.msra.mxu1 %v17276_v43  ;;  %v8256_v43 = vrot.slane %v8254_v14, 5  ;;  %v8266_v25 = vrot.slane %v8264_v19, 4  ;;  %v17441_v51 = vsel %vm16868_vm2, %v3268_v2, %v3272_v35  ;;  %v17464_v14 = vld [vmem:[#allocation11 + $0x3a4] ss:$8 sps:$4 sm:$0xff]   ;;  %v8270_v2 = vshll.u32 %v8102_v60, 16 }
 0x306   : > { %4172 = vmatpush1.bf16.msra.mxu0 %v17395_v45  ;;  %9168 = vmatprep.subr.bf16.mxu1 %v17287_v13  ;;  %v8234_v13 = vrot.slane %v8233_v55, 4  ;;  %v3290_v19 = vrot.slane %v3288_v31, 4  ;;  %v12467_v55 = vcombine.high %v17424_v10, %v17441_v51  ;;  %v17483_v31 = vld [vmem:[#allocation11 + $0x3a0] ss:$8 sps:$4 sm:$0xff]   ;;  %v3282_v4 = vrot.slane %v3281_v29, 4 }
 0x307   : > { %4173 = vmatprep.subr.bf16.mxu0 %v17404_v50  ;;  %v8267_v63 = vor.u32 %v8266_v25, %v17434_v48  ;;  %v8272_v24 = vrot.slane %v8270_v2, 5  ;;  %v17513_v25 = vld [vmem:[#allocation2 + $0x130] sm:$0xff]  ;;  %v19613_v11 = vshrl.u32 %v17458_v27, 16  ;;  %v17526_v17 = vld [vmem:[#allocation2 + $0x240] sm:$0xff]  ;;  %v17550_v2 = vld [vmem:[#allocation2 + $0x68] sm:$0xff]  ;;  %v3752_v34 = vshrl.u32 %v17524_v20, 16 }
 0x308   : > { %8617 = vmatmul.mubr.bf16.gmra.mrb[12].mxu1 %v12916_v52  ;;  %v17454_v52 = vsel %vm16868_vm2, %v8244_v5, %v8248_v7  ;;  %v17475_v35 = vsel %vm16868_vm2, %v8234_v13, %v17334_v32  ;;  %v17478_v5 = vld [vmem:[#allocation2 + $0x40] sm:$0xff]  ;;  %v3700_v32 = vld [vmem:[#allocation2 + $0x30] sm:$0x88]  ;;  %v17505_v7 = vld [vmem:[#allocation2 + $0x248] sm:$0xff] }
 0x309   : > { %3628 = vmatmul.mubr.bf16.gmra.mrb[16].mxu0 %v12462_v16  ;;  %9169 = vmatpush1.bf16.msra.mxu1 %v17332_v42  ;;  %v17450_v16 = vld [vmem:[#allocation11 + $0x390] ss:$8 sps:$4 sm:$0xff]   ;;  %v17456_v42 = vrot.slane %v3284_v38, 5  ;;  %19611 = vst [vmem:[#allocation26_spill] sm:$0xff] %v17478_v5  ;;  %v12921_v56 = vcombine.high %v17475_v35, %v17454_v52  ;;  %v17493_v13 = vld [vmem:[#allocation11 + $0x3b4] ss:$8 sps:$4 sm:$0xff]  }
 0x30a   : > { %3637 = vmatprep.mubr.bf16.mxu0 %v12465_v28  ;;  %4174 = vmatpush1.bf16.msra.mxu0 %v17412_v22  ;;  %v3102_v28 = vld [vmem:[#allocation2 + $0x138] sm:$0x11]  ;;  %v17480_v38 = vld [vmem:[#allocation2 + $0x268] sm:$0xff]  ;;  %v3739_v0 = vshrl.u32 %v17478_v5, 16  ;;  %v3725_v29 = vshrl.u32 %v3700_v32, 16  ;;  %v8290_v49 = vrot.slane %v19613_v11, 4 }
 0x30b   : > { %8626 = vmatprep.mubr.bf16.mxu1 %v12919_v36  ;;  %9170 = vmatprep.subr.bf16.mxu1 %v17357_v33  ;;  %v17470_v36 = vld [vmem:[#allocation2 + $0x38] sm:$0xff]  ;;  %v8257_v33 = vor.u32 %v8256_v43, %v8253_v9  ;;  %19612 = vst [vmem:[#allocation32_spill] sm:$0xff] %v17480_v38  ;;  %v19396_v43 = vshll.u32 %v17458_v27, 16  ;;  %v3294_v9 = vshll.u32 %v3102_v28, 16  ;;  %v8268_v28 = vrot.slane %v8267_v63, 4 }
 0x30c   : > { %4175 = vmatprep.subr.bf16.mxu0 %v17419_v18  ;;  %19610 = vst [vmem:[#allocation40_spill] sm:$0xff] %v17470_v36  ;;  %v3730_v60 = vshrl.u32 %v17470_v36, 16  ;;  %v8105_v63 = vld [vmem:[#allocation2 + $0x278] sm:$0x11]  ;;  %v17537_v32 = vld [vmem:[#allocation11 + $0x3c4] ss:$8 sps:$4 sm:$0xff]  }
 0x30d   : > { %9171 = vmatpush1.bf16.msra.mxu1 %v17395_v45  ;;  %v3291_v45 = vor.u32 %v3290_v19, %v17456_v42  ;;  %v8258_v19 = vrot.slane %v8257_v33, 4  ;;  %v17520_v3 = vrot.slane %v19396_v43, 5  ;;  %v3733_v11 = vshll.u32 %v17470_v36, 16  ;;  %v17572_v36 = vld [vmem:[#allocation2 + $0x178] sm:$0xff] }
 0x30e   : > { %4176 = vmatpush1.bf16.msra.mxu0 %v17450_v16  ;;  %9172 = vmatprep.subr.bf16.mxu1 %v17404_v50  ;;  %v17516_v50 = vld [vmem:[#allocation11 + $0x3b0] ss:$8 sps:$4 sm:$0xff]   ;;  %v3732_v33 = vrot.slane %v3730_v60, 7  ;;  %v12502_v60 = vrot.slane %v3725_v29, 11  ;;  %v3703_v29 = vld [vmem:[#allocation2 + $0x58] sm:$0x88] }
 0x30f   : > { %4177 = vmatprep.subr.bf16.mxu0 %v17464_v14 }
 0x310   : > { %8627 = vmatmul.mubr.bf16.gmra.mrb[16].mxu1 %v12918_v26  ;;  %v19614_v26 = vshrl.u32 %v17480_v38, 16  ;;  %v3737_v37 = vrot.slane %v3732_v33, 4 }
 0x311   : > { %3638 = vmatmul.mubr.bf16.gmra.mrb[20].mxu0 %v12464_v47  ;;  %9173 = vmatpush1.bf16.msra.mxu1 %v17412_v22  ;;  %v3292_v22 = vrot.slane %v3291_v45, 4  ;;  %v3741_v47 = vrot.slane %v3739_v0, 7  ;;  %v17557_v0 = vsel %vm16868_vm2, %v8258_v19, %v17434_v48  ;;  %v3735_v19 = vor.u32 %v3733_v11, %v3732_v33 }
 0x312   : > { %3647 = vmatprep.mubr.bf16.mxu0 %v12467_v55  ;;  %4178 = vmatpush1.bf16.msra.mxu0 %v17483_v31  ;;  %v3296_v55 = vrot.slane %v3294_v9, 5  ;;  %v8277_v43 = vrot.slane %v19614_v26, 4  ;;  %v17547_v9 = vsel %vm16868_vm2, %v3282_v4, %v17456_v42  ;;  %v17561_v26 = vsel %vm16868_vm2, %v8268_v28, %v8272_v24 }
 0x313   : > { %8636 = vmatprep.mubr.bf16.mxu1 %v12921_v56  ;;  %9174 = vmatprep.subr.bf16.mxu1 %v17419_v18  ;;  %v19615_v56 = vshll.u32 %v17480_v38, 16  ;;  %v3742_v18 = vshll.u32 %v17478_v5, 16  ;;  %v8291_v4 = vor.u32 %v8290_v49, %v17520_v3  ;;  %v8294_v42 = vshll.u32 %v8105_v63, 16  ;;  %v17578_v49 = vld [vmem:[#allocation11 + $0x3d4] ss:$8 sps:$4 sm:$0xff]  }
 0x314   : > { %4179 = vmatprep.subr.bf16.mxu0 %v17493_v13  ;;  %v3297_v48 = vsel %vm16868_vm2, %v3292_v22, %v3296_v55  ;;  %v3761_v5 = vshrl.u32 %v17550_v2, 16  ;;  %v19616_v22 = vcombine.low %v17424_v10, %v17441_v51  ;;  %v19617_v55 = vcombine.low %v17475_v35, %v17454_v52  ;;  %v17595_v52 = vld [vmem:[#allocation11 + $0x3d0] ss:$8 sps:$4 sm:$0xff]   ;;  %v17603_v35 = vld [vmem:[#allocation11 + $0x3e4] ss:$8 sps:$4 sm:$0xff]  }
 0x315   : > { %v8280_v45 = vrot.slane %v19615_v56, 5  ;;  %9175 = vmatpush1.bf16.msra.mxu1 %v17450_v16  ;;  %v17564_v56 = vld [vmem:[#allocation2 + $0x180] sm:$0xff]  ;;  %v12469_v28 = vcombine.high %v17547_v9, %v3297_v48  ;;  %v3744_v63 = vor.u32 %v3742_v18, %v3741_v47  ;;  %v12923_v33 = vcombine.high %v17557_v0, %v17561_v26  ;;  %v17693_v51 = vld [vmem:[#allocation2 + $0x68] sm:$0xff] }
 0x316   : > { %4180 = vmatpush1.bf16.msra.mxu0 %v17516_v50  ;;  %9176 = vmatprep.subr.bf16.mxu1 %v17464_v14  ;;  %v17568_v16 = vld [vmem:[#allocation11 + $0x3c0] ss:$8 sps:$4 sm:$0xff]   ;;  %v3747_v11 = vshrl.u32 %v3703_v29, 16  ;;  %v3754_v24 = vrot.slane %v3752_v34, 7  ;;  %v8739_v38 = vshrl.u32 %v17564_v56, 16  ;;  %v8296_v47 = vrot.slane %v8294_v42, 5 }
 0x317   : > { %4181 = vmatprep.subr.bf16.mxu0 %v17537_v32  ;;  %v8281_v14 = vor.u32 %v8280_v45, %v8277_v43  ;;  %v8292_v43 = vrot.slane %v8291_v4, 4  ;;  %v8700_v45 = vld [vmem:[#allocation2 + $0x170] sm:$0x88]  ;;  %v8730_v10 = vshrl.u32 %v17572_v36, 16  ;;  %v17599_v34 = vsel %vm16149_vm15, %v12502_v60, %v3735_v19  ;;  %19621 = vst [vmem:[#allocation27_spill] sm:$0xff] %v17693_v51 }
 0x318   : > { %8637 = vmatmul.mubr.bf16.gmra.mrb[20].mxu1 %v19617_v55  ;;  %v3755_v4 = vshll.u32 %v17524_v20, 16  ;;  %v3763_v42 = vrot.slane %v3761_v5, 7  ;;  %v12503_v29 = vrot.slane %v3747_v11, 11  ;;  %v8741_v60 = vrot.slane %v8739_v38, 7  ;;  %v17619_v5 = vld [vmem:[#allocation11 + $0x3e0] ss:$8 sps:$4 sm:$0xff]  }
 0x319   : > { %3648 = vmatmul.mubr.bf16.gmra.mrb[24].mxu0 %v19616_v22  ;;  %9177 = vmatpush1.bf16.msra.mxu1 %v17483_v31  ;;  %v17607_v31 = vsel %vm16149_vm15, %v3737_v37, %v3744_v63  ;;  %v8282_v18 = vrot.slane %v8281_v14, 4  ;;  %v8725_v22 = vshrl.u32 %v8700_v45, 16  ;;  %v3759_v55 = vrot.slane %v3754_v24, 4  ;;  %v17630_v14 = vld [vmem:[#allocation11 + $0x3f4] ss:$8 sps:$4 sm:$0xff]  }
 0x31a   : > { %3657 = vmatprep.mubr.bf16.mxu0 %v12469_v28  ;;  %4182 = vmatpush1.bf16.msra.mxu0 %v17568_v16  ;;  %v3764_v28 = vshll.u32 %v17550_v2, 16  ;;  %v3757_v19 = vor.u32 %v3755_v4, %v3754_v24  ;;  %v12468_v37 = vcombine.low %v17547_v9, %v3297_v48  ;;  %v12922_v38 = vcombine.low %v17557_v0, %v17561_v26  ;;  %v3706_v11 = vld [vmem:[#allocation2 + $0x80] sm:$0x88]  ;;  %v17648_v4 = vld [vmem:[#allocation11 + $0x3f0] ss:$8 sps:$4 sm:$0xff]  }
 0x31b   : > { %8646 = vmatprep.mubr.bf16.mxu1 %v12923_v33  ;;  %9178 = vmatprep.subr.bf16.mxu1 %v17493_v13  ;;  %v17614_v13 = vsel %vm16868_vm2, %v8292_v43, %v8296_v47  ;;  %v8732_v33 = vrot.slane %v8730_v10, 7  ;;  %v8742_v63 = vshll.u32 %v17564_v56, 16  ;;  %v8287_v24 = vsel %vm16868_vm2, %v8282_v18, %v17520_v3  ;;  %v17636_v47 = vld [vmem:[#allocation2 + $0x150] sm:$0xff] }
 0x31c   : > { %4183 = vmatprep.subr.bf16.mxu0 %v17578_v49  ;;  %v8733_v9 = vshll.u32 %v17572_v36, 16  ;;  %v3774_v48 = vshrl.u32 %v17284_v53, 16  ;;  %v12925_v0 = vcombine.high %v8287_v24, %v17614_v13  ;;  %v8761_v43 = vshrl.u32 %v17296_v1, 16  ;;  %19618 = vst [vmem:[#allocation33_spill] sm:$0xff] %v17636_v47  ;;  %v17761_v47 = vld [vmem:[#allocation11 + $0x430] ss:$8 sps:$4 sm:$0xff]  }
 0x31d   : > { %9179 = vmatpush1.bf16.msra.mxu1 %v17516_v50  ;;  %v12511_v50 = vcombine.high %v17599_v34, %v17607_v31  ;;  %v8744_v26 = vor.u32 %v8742_v63, %v8741_v60  ;;  %v17641_v3 = vsel %vm16149_vm15, %v12503_v29, %v3757_v19  ;;  %v12958_v10 = vrot.slane %v8725_v22, 11  ;;  %v17652_v60 = vld [vmem:[#allocation2 + $0x158] sm:$0xff]  ;;  %v17658_v22 = vld [vmem:[#allocation11 + $0x404] ss:$8 sps:$4 sm:$0xff]  }
 0x31e   : > { %4184 = vmatpush1.bf16.msra.mxu0 %v17595_v52  ;;  %9180 = vmatprep.subr.bf16.mxu1 %v17537_v32  ;;  %v3766_v32 = vor.u32 %v3764_v28, %v3763_v42  ;;  %v8735_v18 = vor.u32 %v8733_v9, %v8732_v33  ;;  %v8737_v42 = vrot.slane %v8732_v33, 4  ;;  %v3783_v28 = vshrl.u32 %v17311_v62, 16  ;;  %19619 = vst [vmem:[#allocation44_spill] sm:$0xff] %v17652_v60  ;;  %v17689_v33 = vld [vmem:[#allocation11 + $0x414] ss:$8 sps:$4 sm:$0xff]  }
 0x31f   : > { %4185 = vmatprep.subr.bf16.mxu0 %v17603_v35  ;;  %v12510_v29 = vcombine.low %v17599_v34, %v17607_v31  ;;  %v3769_v19 = vshrl.u32 %v3706_v11, 16  ;;  %v17670_v31 = vld [vmem:[#allocation11 + $0x400] ss:$8 sps:$4 sm:$0xff]   ;;  %v3796_v9 = vshrl.u32 %v17313_v46, 16 }
 0x320   : > { %8647 = vmatmul.mubr.bf16.gmra.mrb[24].mxu1 %v12922_v38  ;;  %v17645_v45 = vsel %vm16149_vm15, %v3759_v55, %v3766_v32  ;;  %v3776_v55 = vrot.slane %v3774_v48, 7  ;;  %v12924_v38 = vcombine.low %v8287_v24, %v17614_v13  ;;  %v17667_v34 = vsel %vm16149_vm15, %v8737_v42, %v8744_v26  ;;  %v3709_v24 = vld [vmem:[#allocation2 + $0xa8] sm:$0x88]  ;;  %v17683_v11 = vld [vmem:[#allocation2 + $0x60] sm:$0xff] }
 0x321   : > { %3658 = vmatmul.mubr.bf16.gmra.mrb[28].mxu0 %v12468_v37  ;;  %9181 = vmatpush1.bf16.msra.mxu1 %v17568_v16  ;;  %v8752_v16 = vshrl.u32 %v17323_v30, 16  ;;  %v8703_v37 = vld [vmem:[#allocation2 + $0x198] sm:$0x88]  ;;  %v17674_v63 = vsel %vm16149_vm15, %v12958_v10, %v8735_v18  ;;  %v3777_v13 = vshll.u32 %v17284_v53, 16  ;;  %v3785_v48 = vrot.slane %v3783_v28, 7  ;;  %19620 = vst [vmem:[#allocation34_spill] sm:$0xff] %v17683_v11 }
 0x322   : > { %4189 = vmatprep.mubr.bf16.mxu0 %v12511_v50  ;;  %4186 = vmatpush1.bf16.msra.mxu0 %v17619_v5  ;;  %v12513_v50 = vcombine.high %v17641_v3, %v17645_v45  ;;  %v8764_v26 = vshll.u32 %v17296_v1, 16  ;;  %v12504_v10 = vrot.slane %v3769_v19, 11  ;;  %v3781_v18 = vrot.slane %v3776_v55, 4  ;;  %v8706_v19 = vld [vmem:[#allocation2 + $0x1c0] sm:$0x88] }
 0x323   : > { %8656 = vmatprep.mubr.bf16.mxu1 %v12925_v0  ;;  %9182 = vmatprep.subr.bf16.mxu1 %v17578_v49  ;;  %v8763_v49 = vrot.slane %v8761_v43, 7  ;;  %v8754_v0 = vrot.slane %v8752_v16, 7  ;;  %v12967_v43 = vcombine.high %v17674_v63, %v17667_v34  ;;  %v3786_v42 = vshll.u32 %v17311_v62, 16 }
 0x324   : > { %4187 = vmatprep.subr.bf16.mxu0 %v17630_v14  ;;  %v8755_v28 = vshll.u32 %v17323_v30, 16  ;;  %v3791_v32 = vshrl.u32 %v3709_v24, 16  ;;  %v3798_v8 = vrot.slane %v3796_v9, 7  ;;  %v8774_v1 = vshrl.u32 %v17338_v58, 16 }
 0x325   : > { %9183 = vmatpush1.bf16.msra.mxu1 %v17595_v52  ;;  %v8747_v52 = vshrl.u32 %v8703_v37, 16  ;;  %v8766_v16 = vor.u32 %v8764_v26, %v8763_v49  ;;  %v3805_v37 = vshrl.u32 %v17336_v59, 16  ;;  %v3788_v49 = vor.u32 %v3786_v42, %v3785_v48 }
 0x326   : > { %4188 = vmatpush1.bf16.msra.mxu0 %v17648_v4  ;;  %9184 = vmatprep.subr.bf16.mxu1 %v17603_v35  ;;  %v3779_v35 = vor.u32 %v3777_v13, %v3776_v55  ;;  %v17700_v55 = vld [vmem:[#allocation11 + $0x410] ss:$8 sps:$4 sm:$0xff]   ;;  %v8759_v26 = vrot.slane %v8754_v0, 4  ;;  %v8757_v24 = vor.u32 %v8755_v28, %v8754_v0  ;;  %v3799_v9 = vshll.u32 %v17313_v46, 16 }
 0x327   : > { %4575 = vmatprep.subr.bf16.mxu0 %v17658_v22  ;;  %v12959_v13 = vrot.slane %v8747_v52, 11  ;;  %v3807_v0 = vrot.slane %v3805_v37, 7  ;;  %v8769_v28 = vshrl.u32 %v8706_v19, 16  ;;  %v17732_v37 = vld [vmem:[#allocation2 + $0x1a8] sm:$0xff]  ;;  %v8786_v19 = vshll.u32 %v17315_v44, 16 }
 0x328   : > { %8657 = vmatmul.mubr.bf16.gmra.mrb[28].mxu1 %v12924_v38  ;;  %v17714_v48 = vsel %vm16149_vm15, %v12504_v10, %v3779_v35  ;;  %v17722_v52 = vsel %vm16149_vm15, %v8759_v26, %v8766_v16  ;;  %v3801_v42 = vor.u32 %v3799_v9, %v3798_v8  ;;  %v8776_v38 = vrot.slane %v8774_v1, 7  ;;  %v17729_v10 = vld [vmem:[#allocation11 + $0x420] ss:$8 sps:$4 sm:$0xff]  }
 0x329   : > { %4190 = vmatmul.mubr.bf16.vlgmr.msra.gmra.mrb[0].mxu0 %v12510_v29  ;;  %9185 = vmatpush1.bf16.msra.mxu1 %v17619_v5  ;;  %v8783_v29 = vshrl.u32 %v17315_v44, 16  ;;  %v17704_v5 = vld [vmem:[#allocation11 + $0x424] ss:$8 sps:$4 sm:$0xff]   ;;  %v3808_v35 = vshll.u32 %v17336_v59, 16  ;;  %v8805_v26 = vshrl.u32 %v17359_v39, 16 }
 0x32a   : > { %4199 = vmatprep.mubr.bf16.mxu0 %v12513_v50  ;;  %4576 = vmatpush1.bf16.msra.mxu0 %v17670_v31  ;;  %v12966_v50 = vcombine.low %v17674_v63, %v17667_v34  ;;  %v17739_v34 = vld [vmem:[#allocation11 + $0x434] ss:$8 sps:$4 sm:$0xff]   ;;  %v3818_v63 = vshrl.u32 %v17348_v21, 16  ;;  %v17748_v9 = vld [vmem:[#allocation2 + $0x1a0] sm:$0xff] }
 0x32b   : > { %9188 = vmatprep.mubr.bf16.mxu1 %v12967_v43  ;;  %9186 = vmatprep.subr.bf16.mxu1 %v17630_v14  ;;  %v17718_v14 = vsel %vm16149_vm15, %v3781_v18, %v3788_v49  ;;  %v12505_v43 = vrot.slane %v3791_v32, 11  ;;  %v3803_v18 = vrot.slane %v3798_v8, 4  ;;  %v8785_v16 = vrot.slane %v8783_v29, 7  ;;  %v3712_v49 = vld [vmem:[#allocation2 + $0xd0] sm:$0x88]  ;;  %v17746_v29 = vld [vmem:[#allocation2 + $0x88] sm:$0xff] }
 0x32c   : > { %4577 = vmatprep.subr.bf16.mxu0 %v17689_v33  ;;  %v12515_v1 = vcombine.high %v17714_v48, %v17718_v14  ;;  %v3810_v32 = vor.u32 %v3808_v35, %v3807_v0  ;;  %19622 = vst [vmem:[#allocation35_spill] sm:$0xff] %v17748_v9  ;;  %v8709_v35 = vld [vmem:[#allocation2 + $0x1e8] sm:$0x88]  ;;  %v8807_v60 = vrot.slane %v8805_v26, 7 }
 0x32d   : > { %9187 = vmatpush1.bf16.msra.mxu1 %v17648_v4  ;;  %v8758_v4 = vsel %vm16149_vm15, %v12959_v13, %v8757_v24  ;;  %v19623_v13 = vcombine.low %v17641_v3, %v17645_v45  ;;  %v17756_v24 = vsel %vm16149_vm15, %v12505_v43, %v3801_v42  ;;  %v8788_v45 = vor.u32 %v8786_v19, %v8785_v16  ;;  %v17769_v42 = vld [vmem:[#allocation2 + $0x90] sm:$0xff] }
 0x32e   : > { %4578 = vmatpush1.bf16.msra.mxu0 %v17700_v55  ;;  %9573 = vmatprep.subr.bf16.mxu1 %v17658_v22  ;;  %v8777_v22 = vshll.u32 %v17338_v58, 16  ;;  %v12969_v8 = vcombine.high %v8758_v4, %v17722_v52  ;;  %v17765_v3 = vsel %vm16149_vm15, %v3803_v18, %v3810_v32  ;;  %v8796_v43 = vshrl.u32 %v17387_v57, 16  ;;  %v17796_v18 = vld [vmem:[#allocation11 + $0x454] ss:$8 sps:$4 sm:$0xff]  }
 0x32f   : > { %4579 = vmatprep.subr.bf16.mxu0 %v17704_v5  ;;  %v12968_v16 = vcombine.low %v8758_v4, %v17722_v52  ;;  %v8781_v32 = vrot.slane %v8776_v38, 4  ;;  %v8791_v19 = vshrl.u32 %v8709_v35, 16  ;;  %v8808_v4 = vshll.u32 %v17359_v39, 16 }
 0x330   : > { %9189 = vmatmul.mubr.bf16.vlgmr.msra.gmra.mrb[0].mxu1 %v12966_v50  ;;  %v12960_v50 = vrot.slane %v8769_v28, 11  ;;  %v8779_v0 = vor.u32 %v8777_v22, %v8776_v38  ;;  %v12514_v28 = vcombine.low %v17714_v48, %v17718_v14  ;;  %v3813_v22 = vshrl.u32 %v3712_v49, 16  ;;  %v3715_v49 = vld [vmem:[#allocation2 + $0xf8] sm:$0x88] }
 0x331   : > { %4200 = vmatmul.mubr.bf16.gmra.mrb[4].mxu0 %v19623_v13  ;;  %9574 = vmatpush1.bf16.msra.mxu1 %v17670_v31  ;;  %v3827_v31 = vshrl.u32 %v17382_v6, 16  ;;  %v3820_v13 = vrot.slane %v3818_v63, 7  ;;  %v3821_v14 = vshll.u32 %v17348_v21, 16  ;;  %v3840_v63 = vshrl.u32 %v17414_v61, 16 }
 0x332   : > { %4209 = vmatprep.mubr.bf16.mxu0 %v12515_v1  ;;  %4580 = vmatpush1.bf16.msra.mxu0 %v17729_v10  ;;  %v14186_v1 = vld [vmem:[#allocation11 + $0x444] ss:$8 sps:$4 sm:$0xff]   ;;  %v17785_v48 = vsel %vm16149_vm15, %v12960_v50, %v8779_v0  ;;  %v8789_v38 = vsel %vm16149_vm15, %v8781_v32, %v8788_v45  ;;  %v8798_v52 = vrot.slane %v8796_v43, 7  ;;  %v12506_v26 = vrot.slane %v3813_v22, 11 }
 0x333   : > { %9198 = vmatprep.mubr.bf16.mxu1 %v12969_v8  ;;  %9575 = vmatprep.subr.bf16.mxu1 %v17689_v33  ;;  %v17779_v8 = vld [vmem:[#allocation11 + $0x440] ss:$8 sps:$4 sm:$0xff]   ;;  %v12517_v33 = vcombine.high %v17756_v24, %v17765_v3  ;;  %v3823_v50 = vor.u32 %v3821_v14, %v3820_v13  ;;  %v3830_v0 = vshll.u32 %v17382_v6, 16  ;;  %v8799_v35 = vshll.u32 %v17387_v57, 16 }
 0x334   : > { %4581 = vmatprep.subr.bf16.mxu0 %v17739_v34  ;;  %v3825_v51 = vrot.slane %v3820_v13, 4  ;;  %v8810_v11 = vor.u32 %v8808_v4, %v8807_v60  ;;  %v3849_v45 = vshrl.u32 %v17436_v23, 16  ;;  %v3835_v43 = vshrl.u32 %v3715_v49, 16 }
 0x335   : > { %9576 = vmatpush1.bf16.msra.mxu1 %v17700_v55  ;;  %v3829_v55 = vrot.slane %v3827_v31, 7  ;;  %v12971_v31 = vcombine.high %v17785_v48, %v8789_v38  ;;  %v3842_v22 = vrot.slane %v3840_v63, 7  ;;  %v8803_v60 = vrot.slane %v8798_v52, 4 }
 0x336   : > { %4582 = vmatpush1.bf16.msra.mxu0 %v17761_v47  ;;  %9577 = vmatprep.subr.bf16.mxu1 %v17704_v5  ;;  %v12961_v5 = vrot.slane %v8791_v19, 11  ;;  %v8801_v19 = vor.u32 %v8799_v35, %v8798_v52  ;;  %v8827_v14 = vshrl.u32 %v17426_v12, 16  ;;  %v3851_v52 = vrot.slane %v3849_v45, 7 }
 0x337   : > { %4583 = vmatprep.subr.bf16.mxu0 %v14186_v1  ;;  %v3832_v13 = vor.u32 %v3830_v0, %v3829_v55  ;;  %v17822_v55 = vsel %vm16149_vm15, %v8803_v60, %v8810_v11  ;;  %v8818_v4 = vshrl.u32 %v17443_v15, 16  ;;  %v12970_v49 = vcombine.low %v17785_v48, %v8789_v38  ;;  %v17828_v0 = vld [vmem:[#allocation11 + $0x460] ss:$8 sps:$4 sm:$0xff]   ;;  %v17841_v38 = vld [vmem:[#allocation11 + $0x474] ss:$8 sps:$4 sm:$0xff]  }
 0x338   : > { %9199 = vmatmul.mubr.bf16.gmra.mrb[4].mxu1 %v12968_v16  ;;  %v17804_v16 = vld [vmem:[#allocation11 + $0x450] ss:$8 sps:$4 sm:$0xff]   ;;  %v3847_v11 = vrot.slane %v3842_v22, 4  ;;  %v3852_v35 = vshll.u32 %v17436_v23, 16  ;;  %v8829_v45 = vrot.slane %v8827_v14, 7  ;;  %v3862_v60 = vshrl.u32 %v17497_v54, 16 }
 0x339   : > { %4210 = vmatmul.mubr.bf16.gmra.mrb[8].mxu0 %v12514_v28  ;;  %9578 = vmatpush1.bf16.msra.mxu1 %v17729_v10  ;;  %v17808_v10 = vld [vmem:[#allocation11 + $0x464] ss:$8 sps:$4 sm:$0xff]   ;;  %v17812_v28 = vsel %vm16149_vm15, %v12506_v26, %v3823_v50  ;;  %v17818_v63 = vsel %vm16149_vm15, %v3825_v51, %v3832_v13  ;;  %v12507_v26 = vrot.slane %v3835_v43, 11  ;;  %v8802_v51 = vsel %vm16149_vm15, %v12961_v5, %v8801_v19 }
 0x33a   : > { %4219 = vmatprep.mubr.bf16.mxu0 %v12517_v33  ;;  %4584 = vmatpush1.bf16.msra.mxu0 %v17779_v8  ;;  %v3843_v33 = vshll.u32 %v17414_v61, 16  ;;  %v12519_v48 = vcombine.high %v17812_v28, %v17818_v63  ;;  %v3718_v5 = vld [vmem:[#allocation2 + $0x120] sm:$0x88]  ;;  %v8820_v13 = vrot.slane %v8818_v4, 7  ;;  %v8830_v19 = vshll.u32 %v17426_v12, 16  ;;  %v17845_v14 = vld [vmem:[#allocation2 + $0x1c8] sm:$0xff] }
 0x33b   : > { %9208 = vmatprep.mubr.bf16.mxu1 %v12971_v31  ;;  %9579 = vmatprep.subr.bf16.mxu1 %v17739_v34  ;;  %v8712_v34 = vld [vmem:[#allocation2 + $0x210] sm:$0x88]  ;;  %19625 = vst [vmem:[#allocation36_spill] sm:$0xff] %v17845_v14  ;;  %v8852_v14 = vshll.u32 %v17505_v7, 16 }
 0x33c   : > { %4585 = vmatprep.subr.bf16.mxu0 %v17796_v18  ;;  %v3845_v50 = vor.u32 %v3843_v33, %v3842_v22  ;;  %v17833_v31 = vld [vmem:[#allocation2 + $0x1d0] sm:$0xff]  ;;  %v8813_v43 = vshrl.u32 %v8712_v34, 16  ;;  %v3854_v22 = vor.u32 %v3852_v35, %v3851_v52  ;;  %v8821_v33 = vshll.u32 %v17443_v15, 16  ;;  %v17880_v34 = vld [vmem:[#allocation11 + $0x480] ss:$8 sps:$4 sm:$0xff]  }
 0x33d   : > { %9580 = vmatpush1.bf16.msra.mxu1 %v17761_v47  ;;  %19624 = vst [vmem:[#allocation49_spill] sm:$0xff] %v17833_v31  ;;  %v12516_v47 = vcombine.low %v17756_v24, %v17765_v3  ;;  %v17847_v24 = vld [vmem:[#allocation2 + $0x180] sm:$0xff]  ;;  %v14193_v4 = vld [vmem:[#allocation11 + $0x470] ss:$8 sps:$4 sm:$0xff]   ;;  %v3857_v35 = vshrl.u32 %v3718_v5, 16  ;;  %v8825_v5 = vrot.slane %v8820_v13, 4 }
 0x33e   : > { %4586 = vmatpush1.bf16.msra.mxu0 %v17804_v16  ;;  %9581 = vmatprep.subr.bf16.mxu1 %v14186_v1  ;;  %v12973_v1 = vcombine.high %v8802_v51, %v17822_v55  ;;  %19626 = vst [vmem:[#allocation37_spill] sm:$0xff] %v17847_v24  ;;  %v17852_v3 = vsel %vm16149_vm15, %v12507_v26, %v3845_v50  ;;  %v8849_v26 = vshrl.u32 %v17505_v7, 16  ;;  %v17865_v50 = vld [vmem:[#allocation2 + $0x178] sm:$0xff]  ;;  %v12962_v32 = vrot.slane %v8813_v43, 11  ;;  %v18473_v24 = vld [vmem:[#allocation2 + $0x268] sm:$0xff] }
 0x33f   : > { %4587 = vmatprep.subr.bf16.mxu0 %v17808_v10  ;;  %19627 = vst [vmem:[#allocation41_spill] sm:$0xff] %v17865_v50  ;;  %v12972_v43 = vcombine.low %v8802_v51, %v17822_v55  ;;  %v17890_v55 = vld [vmem:[#allocation11 + $0x494] ss:$8 sps:$4 sm:$0xff]  }
 0x340   : > { %9209 = vmatmul.mubr.bf16.gmra.mrb[8].mxu1 %v12970_v49  ;;  %v17862_v49 = vsel %vm16149_vm15, %v3847_v11, %v3854_v22  ;;  %v3864_v22 = vrot.slane %v3862_v60, 7  ;;  %v3865_v60 = vshll.u32 %v17497_v54, 16  ;;  %v8851_v11 = vrot.slane %v8849_v26, 7 }
 0x341   : > { %4220 = vmatmul.mubr.bf16.gmra.mrb[12].mxu0 %v12516_v47  ;;  %9582 = vmatpush1.bf16.msra.mxu1 %v17779_v8  ;;  %v8832_v8 = vor.u32 %v8830_v19, %v8829_v45  ;;  %v14198_v47 = vld [vmem:[#allocation11 + $0x484] ss:$8 sps:$4 sm:$0xff]   ;;  %v8823_v45 = vor.u32 %v8821_v33, %v8820_v13  ;;  %v8715_v19 = vld [vmem:[#allocation2 + $0x238] sm:$0x88]  ;;  %v12521_v33 = vcombine.high %v17852_v3, %v17862_v49 }
 0x342   : > { %4229 = vmatprep.mubr.bf16.mxu0 %v12519_v48  ;;  %4588 = vmatpush1.bf16.msra.mxu0 %v17828_v0  ;;  %v3871_v48 = vshrl.u32 %v17513_v25, 16  ;;  %v3867_v51 = vor.u32 %v3865_v60, %v3864_v22 }
 0x343   : > { %9218 = vmatprep.mubr.bf16.mxu1 %v12973_v1  ;;  %9583 = vmatprep.subr.bf16.mxu1 %v17796_v18  ;;  %v8840_v1 = vshrl.u32 %v17526_v17, 16  ;;  %v12518_v18 = vcombine.low %v17812_v28, %v17818_v63  ;;  %v8833_v13 = vsel %vm16149_vm15, %v8825_v5, %v8832_v8  ;;  %v3874_v28 = vshll.u32 %v17513_v25, 16  ;;  %v3721_v8 = vld [vmem:[#allocation2 + $0x148] sm:$0x88] }
 0x344   : > { %4589 = vmatprep.subr.bf16.mxu0 %v17841_v38  ;;  %v3873_v52 = vrot.slane %v3871_v48, 7  ;;  %v8835_v63 = vshrl.u32 %v8715_v19, 16  ;;  %v3884_v48 = vshrl.u32 %v17325_v40, 16  ;;  %v8854_v19 = vor.u32 %v8852_v14, %v8851_v11  ;;  %v8718_v11 = vld [vmem:[#allocation2 + $0x260] sm:$0x88] }
 0x345   : > { %9584 = vmatpush1.bf16.msra.mxu1 %v17804_v16  ;;  %v12508_v16 = vrot.slane %v3857_v35, 11  ;;  %v8842_v31 = vrot.slane %v8840_v1, 7  ;;  %v3869_v35 = vrot.slane %v3864_v22, 4  ;;  %v14204_v1 = vld [vmem:[#allocation11 + $0x4a4] ss:$8 sps:$4 sm:$0xff]  }
 0x346   : > { %4590 = vmatpush1.bf16.msra.mxu0 %v14193_v4  ;;  %9585 = vmatprep.subr.bf16.mxu1 %v17808_v10  ;;  %v8824_v10 = vsel %vm16149_vm15, %v12962_v32, %v8823_v45  ;;  %v14199_v32 = vld [vmem:[#allocation11 + $0x490] ss:$8 sps:$4 sm:$0xff]   ;;  %v8843_v45 = vshll.u32 %v17526_v17, 16  ;;  %v12963_v60 = vrot.slane %v8835_v63, 11  ;;  %v12520_v63 = vcombine.low %v17852_v3, %v17862_v49  ;;  %v14207_v49 = vld [vmem:[#allocation11 + $0x4b4] ss:$8 sps:$4 sm:$0xff]  }
 0x347   : > { %4591 = vmatprep.subr.bf16.mxu0 %v14198_v47  ;;  %v12975_v26 = vcombine.high %v8824_v10, %v8833_v13  ;;  %v8847_v5 = vrot.slane %v8842_v31, 4 }
 0x348   : > { %9219 = vmatmul.mubr.bf16.gmra.mrb[12].mxu1 %v12972_v43  ;;  %v14489_v43 = vld [vmem:[#allocation2 + $0x158] sm:$0xff]  ;;  %v8845_v9 = vor.u32 %v8843_v45, %v8842_v31 }
 0x349   : > { %4230 = vmatmul.mubr.bf16.gmra.mrb[16].mxu0 %v12518_v18  ;;  %9586 = vmatpush1.bf16.msra.mxu1 %v17828_v0  ;;  %v3876_v18 = vor.u32 %v3874_v28, %v3873_v52  ;;  %v3879_v0 = vshrl.u32 %v3721_v8, 16  ;;  %v3893_v22 = vshrl.u32 %v14489_v43, 16  ;;  %v19628_v52 = vshrl.u32 %v17458_v27, 16  ;;  %v14202_v31 = vld [vmem:[#allocation11 + $0x4a0] ss:$8 sps:$4 sm:$0xff]   ;;  %v14490_v8 = vld [vmem:[#allocation2 + $0x150] sm:$0xff] }
 0x34a   : > { %4239 = vmatprep.mubr.bf16.mxu0 %v12521_v33  ;;  %4592 = vmatpush1.bf16.msra.mxu0 %v17880_v34  ;;  %v17903_v33 = vsel %vm16149_vm15, %v12508_v16, %v3867_v51  ;;  %v8855_v16 = vsel %vm16149_vm15, %v8847_v5, %v8854_v19  ;;  %v8846_v3 = vsel %vm16149_vm15, %v12963_v60, %v8845_v9  ;;  %v17927_v9 = vld [vmem:[#allocation2 + $0x298] sm:$0xff] }
 0x34b   : > { %9228 = vmatprep.mubr.bf16.mxu1 %v12975_v26  ;;  %9587 = vmatprep.subr.bf16.mxu1 %v17841_v38  ;;  %v17907_v14 = vsel %vm16149_vm15, %v3869_v35, %v3876_v18  ;;  %v3886_v38 = vrot.slane %v3884_v48, 7  ;;  %v8873_v28 = vrot.slane %v19628_v52, 7  ;;  %v12509_v51 = vrot.slane %v3879_v0, 11  ;;  %v19629_v48 = vld [vmem:[#allocation32_spill] sm:$0xff] }
 0x34c   : > { %4593 = vmatprep.subr.bf16.mxu0 %v17890_v55  ;;  %v3887_v26 = vshll.u32 %v14490_v8, 16  ;;  %v3895_v35 = vrot.slane %v3893_v22, 7  ;;  %v19630_v45 = vshrl.u32 %v19629_v48, 16  ;;  %v12977_v5 = vcombine.high %v8846_v3, %v8855_v16  ;;  %v17924_v8 = vld [vmem:[#allocation2 + $0x290] sm:$0xff] }
 0x34d   : > { %9588 = vmatpush1.bf16.msra.mxu1 %v14193_v4  ;;  %v12974_v4 = vcombine.low %v8824_v10, %v8833_v13  ;;  %v3896_v13 = vshll.u32 %v14489_v43, 16  ;;  %v8857_v10 = vshrl.u32 %v8718_v11, 16  ;;  %v3891_v0 = vrot.slane %v3886_v38, 4  ;;  %v8721_v11 = vld [vmem:[#allocation2 + $0x288] sm:$0x88] }
 0x34e   : > { %4594 = vmatpush1.bf16.msra.mxu0 %v14199_v32  ;;  %9589 = vmatprep.subr.bf16.mxu1 %v14198_v47  ;;  %v8864_v18 = vrot.slane %v19630_v45, 7  ;;  %v12523_v47 = vcombine.high %v17903_v33, %v17907_v14  ;;  %v3889_v19 = vor.u32 %v3887_v26, %v3886_v38  ;;  %v19631_v22 = vshll.u32 %v17458_v27, 16 }
 0x34f   : > { %4595 = vmatprep.subr.bf16.mxu0 %v14204_v1  ;;  %v8884_v45 = vshrl.u32 %v17924_v8, 16  ;;  %v8893_v43 = vshrl.u32 %v17927_v9, 16  ;;  %v3898_v60 = vor.u32 %v3896_v13, %v3895_v35  ;;  %v12976_v27 = vcombine.low %v8846_v3, %v8855_v16  ;;  %v14208_v13 = vld [vmem:[#allocation11 + $0x4c0] ss:$8 sps:$4 sm:$0xff]  }
 0x350   : > { %9229 = vmatmul.mubr.bf16.gmra.mrb[16].mxu1 %v12974_v4  ;;  %v8876_v52 = vor.u32 %v8873_v28, %v19631_v22  ;;  %v14205_v4 = vld [vmem:[#allocation11 + $0x4b0] ss:$8 sps:$4 sm:$0xff]   ;;  %v8869_v38 = vrot.slane %v8864_v18, 4  ;;  %v12964_v28 = vrot.slane %v8857_v10, 11  ;;  %v8887_v35 = vshll.u32 %v17924_v8, 16 }
 0x351   : > { %4240 = vmatmul.mubr.bf16.gmra.mrb[20].mxu0 %v12520_v63  ;;  %9590 = vmatpush1.bf16.msra.mxu1 %v17880_v34  ;;  %v14210_v34 = vld [vmem:[#allocation11 + $0x4c4] ss:$8 sps:$4 sm:$0xff]   ;;  %v19632_v63 = vshll.u32 %v19629_v48, 16  ;;  %v3899_v22 = vsel %vm16149_vm15, %v3891_v0, %v3898_v60  ;;  %v8879_v16 = vshrl.u32 %v8721_v11, 16  ;;  %v8886_v3 = vrot.slane %v8884_v45, 7 }
 0x352   : > { %4249 = vmatprep.mubr.bf16.mxu0 %v12523_v47  ;;  %4596 = vmatpush1.bf16.msra.mxu0 %v14202_v31  ;;  %v3890_v47 = vsel %vm16149_vm15, %v12509_v51, %v3889_v19  ;;  %v8895_v10 = vrot.slane %v8893_v43, 7  ;;  %v8896_v48 = vshll.u32 %v17927_v9, 16 }
 0x353   : > { %9238 = vmatprep.mubr.bf16.mxu1 %v12977_v5  ;;  %9591 = vmatprep.subr.bf16.mxu1 %v17890_v55  ;;  %v8867_v26 = vor.u32 %v8864_v18, %v19632_v63  ;;  %v8877_v55 = vsel %vm16149_vm15, %v8869_v38, %v8876_v52  ;;  %v12525_v51 = vcombine.high %v3890_v47, %v3899_v22  ;;  %v14213_v5 = vld [vmem:[#allocation11 + $0x4d4] ss:$8 sps:$4 sm:$0xff]   ;;  %v12965_v0 = vrot.slane %v8879_v16, 11 }
 0x354   : > { %4597 = vmatprep.subr.bf16.mxu0 %v14207_v49  ;;  %v8889_v52 = vor.u32 %v8887_v35, %v8886_v3  ;;  %v8891_v45 = vrot.slane %v8886_v3, 4  ;;  %v8898_v43 = vor.u32 %v8896_v48, %v8895_v10  ;;  %v12524_v11 = vcombine.low %v3890_v47, %v3899_v22  ;;  %v14222_v47 = vld [vmem:[#allocation11 + $0x500] ss:$8 sps:$4 sm:$0xff]  }
 0x355   : > { %9592 = vmatpush1.bf16.msra.mxu1 %v14199_v32  ;;  %v12522_v32 = vcombine.low %v17903_v33, %v17907_v14  ;;  %v8868_v18 = vsel %vm16149_vm15, %v12964_v28, %v8867_v26  ;;  %v14216_v33 = vld [vmem:[#allocation11 + $0x4e4] ss:$8 sps:$4 sm:$0xff]   ;;  %v14214_v14 = vld [vmem:[#allocation11 + $0x4e0] ss:$8 sps:$4 sm:$0xff]   ;;  %v12561_v48 = vcombine.high %v17524_v20, %v17550_v2 }
 0x356   : > { %4598 = vmatpush1.bf16.msra.mxu0 %v14205_v4  ;;  %9593 = vmatprep.subr.bf16.mxu1 %v14204_v1  ;;  %v12979_v19 = vcombine.high %v8868_v18, %v8877_v55  ;;  %v14211_v1 = vld [vmem:[#allocation11 + $0x4d0] ss:$8 sps:$4 sm:$0xff]   ;;  %v12978_v60 = vcombine.low %v8868_v18, %v8877_v55  ;;  %v8899_v38 = vsel %vm16149_vm15, %v8891_v45, %v8898_v43  ;;  %v19634_v28 = vld [vmem:[#allocation40_spill] sm:$0xff]  ;;  %v14493_v3 = vld [vmem:[#allocation2 + $0x38] sm:$0xff] }
 0x357   : > { %4599 = vmatprep.subr.bf16.mxu0 %v14210_v34  ;;  %v1893_v26 = vld [vmem:[#allocation2 + $0x2a0] sm:$0x11]  ;;  %v14227_v18 = vld [vmem:[#allocation11 + $0x510] ss:$8 sps:$4 sm:$0xff]   ;;  %v19636_v45 = vcombine.high %v17284_v53, %v17311_v62 }
 0x358   : > { %9239 = vmatmul.mubr.bf16.gmra.mrb[20].mxu1 %v12976_v27  ;;  %v19633_v27 = vld [vmem:[#allocation26_spill] sm:$0xff]  ;;  %v14224_v55 = vld [vmem:[#allocation11 + $0x504] ss:$8 sps:$4 sm:$0xff]   ;;  %v1894_v16 = vsel %vm15365_vm13, 0, %v1893_v26 }
 0x359   : > { %4250 = vmatmul.mubr.bf16.gmra.mrb[24].mxu0 %v12522_v32  ;;  %9594 = vmatpush1.bf16.msra.mxu1 %v14202_v31  ;;  %v8890_v31 = vsel %vm16149_vm15, %v12965_v0, %v8889_v52  ;;  %v12559_v63 = vcombine.high %v19634_v28, %v19633_v27  ;;  %1895 = vst [vmem:[#allocation2 + $0x2a0] sm:$0x11] %v1894_v16  ;;  %v14229_v32 = vld [vmem:[#allocation11 + $0x514] ss:$8 sps:$4 sm:$0xff]   ;;  %v14237_v43 = vld [vmem:[#allocation11 + $0x530] ss:$8 sps:$4 sm:$0xff]  }
 0x35a   : > { %4259 = vmatprep.mubr.bf16.mxu0 %v12525_v51  ;;  %4600 = vmatpush1.bf16.msra.mxu0 %v14208_v13  ;;  %v12980_v22 = vcombine.low %v8890_v31, %v8899_v38  ;;  %v13015_v51 = vcombine.high %v17572_v36, %v17564_v56  ;;  %v12560_v0 = vcombine.low %v17524_v20, %v17550_v2  ;;  %v14239_v52 = vld [vmem:[#allocation11 + $0x534] ss:$8 sps:$4 sm:$0xff]   ;;  %v14241_v20 = vld [vmem:[#allocation11 + $0x540] ss:$8 sps:$4 sm:$0xff]   ;;  %v14253_v27 = vld [vmem:[#allocation11 + $0x564] ss:$8 sps:$4 sm:$0xff]  }
 0x35b   : > { %9248 = vmatprep.mubr.bf16.mxu1 %v12979_v19  ;;  %9595 = vmatprep.subr.bf16.mxu1 %v14207_v49  ;;  %v14220_v49 = vld [vmem:[#allocation11 + $0x4f4] ss:$8 sps:$4 sm:$0xff]   ;;  %v14231_v19 = vld [vmem:[#allocation11 + $0x520] ss:$8 sps:$4 sm:$0xff]   ;;  %v19644_v28 = vcombine.low %v17313_v46, %v17336_v59 }
 0x35c   : > { %4601 = vmatprep.subr.bf16.mxu0 %v14213_v5  ;;  %v14269_v16 = vld [vmem:[#allocation11 + $0x594] ss:$8 sps:$4 sm:$0xff]  }
 0x35d   : > { %9596 = vmatpush1.bf16.msra.mxu1 %v14205_v4  ;;  %v12981_v4 = vcombine.high %v8890_v31, %v8899_v38  ;;  %v19641_v31 = vcombine.high %v17313_v46, %v17336_v59  ;;  %v14247_v38 = vld [vmem:[#allocation11 + $0x550] ss:$8 sps:$4 sm:$0xff]   ;;  %v14261_v46 = vld [vmem:[#allocation11 + $0x580] ss:$8 sps:$4 sm:$0xff]  }
 0x35e   : > { %4602 = vmatpush1.bf16.msra.mxu0 %v14211_v1  ;;  %9597 = vmatprep.subr.bf16.mxu1 %v14210_v34  ;;  %v14218_v34 = vld [vmem:[#allocation11 + $0x4f0] ss:$8 sps:$4 sm:$0xff]  }
 0x35f   : > { %4603 = vmatprep.subr.bf16.mxu0 %v14216_v33 }
 0x360   : > { %9249 = vmatmul.mubr.bf16.gmra.mrb[24].mxu1 %v12978_v60  ;;  %v19640_v60 = vcombine.low %v17284_v53, %v17311_v62  ;;  %v19643_v53 = vcombine.low %v17338_v58, %v17315_v44  ;;  %v14259_v62 = vld [vmem:[#allocation11 + $0x574] ss:$8 sps:$4 sm:$0xff]  }
 0x361   : > { %4260 = vmatmul.mubr.bf16.gmra.mrb[28].mxu0 %v12524_v11  ;;  %9598 = vmatpush1.bf16.msra.mxu1 %v14208_v13  ;;  %v14494_v13 = vld [vmem:[#allocation2 + $0x40] sm:$0xff]  ;;  %v19642_v11 = vcombine.high %v17338_v58, %v17315_v44  ;;  %v4720_v44 = vld [vmem:[#allocation2 + $0x38] sm:$0xff] }
 0x362   : > { %4604 = vmatpush1.bf16.msra.mxu0 %v14214_v14  ;;  %4607 = vmatprep.mubr.bf16.mxu0 %v12559_v63  ;;  %v12558_v10 = vcombine.low %v14493_v3, %v14494_v13  ;;  %v19645_v63 = vcombine.high %v17348_v21, %v17382_v6  ;;  %v4721_v58 = vld [vmem:[#allocation2 + $0x40] sm:$0xff]  ;;  %v4745_v59 = vshrl.u32 %v4720_v44, 16  ;;  %v4748_v26 = vshll.u32 %v4720_v44, 16 }
 0x363   : > { %9258 = vmatprep.mubr.bf16.mxu1 %v12981_v4  ;;  %9599 = vmatprep.subr.bf16.mxu1 %v14213_v5  ;;  %v14233_v5 = vld [vmem:[#allocation11 + $0x524] ss:$8 sps:$4 sm:$0xff]   ;;  %v19646_v4 = vcombine.high %v17387_v57, %v17359_v39  ;;  %v19648_v3 = vcombine.low %v17348_v21, %v17382_v6  ;;  %v19649_v13 = vcombine.high %v17414_v61, %v17436_v23  ;;  %v19652_v6 = vld [vmem:[#allocation27_spill] sm:$0xff] }
 0x364   : > { %4605 = vmatprep.subr.bf16.mxu0 %v14220_v49  ;;  %v14273_v21 = vld [vmem:[#allocation11 + $0x5a4] ss:$8 sps:$4 sm:$0xff]  }
 0x365   : > { %9600 = vmatpush1.bf16.msra.mxu1 %v14211_v1  ;;  %v13014_v1 = vcombine.low %v17572_v36, %v17564_v56  ;;  %v14243_v36 = vld [vmem:[#allocation11 + $0x544] ss:$8 sps:$4 sm:$0xff]   ;;  %v14249_v56 = vld [vmem:[#allocation11 + $0x554] ss:$8 sps:$4 sm:$0xff]  }
 0x366   : > { %4606 = vmatpush1.bf16.msra.mxu0 %v14218_v34  ;;  %9601 = vmatprep.subr.bf16.mxu1 %v14216_v33  ;;  %v19637_v33 = vld [vmem:[#allocation48_spill] sm:$0xff] }
 0x367   : > { %5193 = vmatprep.subr.bf16.mxu0 %v14224_v55  ;;  %v19639_v2 = vcombine.low %v17323_v30, %v19637_v33 }
 0x368   : > { %9259 = vmatmul.mubr.bf16.gmra.mrb[28].mxu1 %v12980_v22  ;;  %v4758_v22 = vshrl.u32 %v4721_v58, 16 }
 0x369   : > { %4608 = vmatmul.mubr.bf16.vlgmr.msra.gmra.mrb[0].mxu0 %v12558_v10  ;;  %9602 = vmatpush1.bf16.msra.mxu1 %v14214_v14  ;;  %v19638_v14 = vcombine.high %v17323_v30, %v19637_v33  ;;  %v14251_v30 = vld [vmem:[#allocation11 + $0x560] ss:$8 sps:$4 sm:$0xff]   ;;  %v14267_v10 = vld [vmem:[#allocation11 + $0x590] ss:$8 sps:$4 sm:$0xff]  }
 0x36a   : > { %4617 = vmatprep.mubr.bf16.mxu0 %v12561_v48  ;;  %5194 = vmatpush1.bf16.msra.mxu0 %v14222_v47  ;;  %v4747_v48 = vrot.slane %v4745_v59, 4 }
 0x36b   : > { %9605 = vmatprep.mubr.bf16.mxu1 %v13015_v51  ;;  %9603 = vmatprep.subr.bf16.mxu1 %v14220_v49  ;;  %v14257_v49 = vld [vmem:[#allocation11 + $0x570] ss:$8 sps:$4 sm:$0xff]  }
 0x36c   : > { %5195 = vmatprep.subr.bf16.mxu0 %v14229_v32  ;;  %v19650_v51 = vld [vmem:[#allocation34_spill] sm:$0xff] }
 0x36d   : > { %9604 = vmatpush1.bf16.msra.mxu1 %v14218_v34  ;;  %v14263_v34 = vld [vmem:[#allocation11 + $0x584] ss:$8 sps:$4 sm:$0xff]  }
 0x36e   : > { %5196 = vmatpush1.bf16.msra.mxu0 %v14227_v18  ;;  %10190 = vmatprep.subr.bf16.mxu1 %v14224_v55  ;;  %v19647_v55 = vcombine.low %v17387_v57, %v17359_v39  ;;  %v19446_v39 = vshll.u32 %v19650_v51, 16  ;;  %v19651_v57 = vcombine.high %v17443_v15, %v17426_v12 }
 0x36f   : > { %5197 = vmatprep.subr.bf16.mxu0 %v14233_v5 }
 0x370   : > { %9606 = vmatmul.mubr.bf16.vlgmr.msra.gmra.mrb[0].mxu1 %v13014_v1 }
 0x371   : > { %4618 = vmatmul.mubr.bf16.gmra.mrb[4].mxu0 %v12560_v0  ;;  %10191 = vmatpush1.bf16.msra.mxu1 %v14222_v47  ;;  %v4754_v47 = vshll.u32 %v4721_v58, 16  ;;  %v4760_v0 = vrot.slane %v4758_v22, 4  ;;  %v19430_v58 = vshrl.u32 %v17746_v29, 16 }
 0x372   : > { %4627 = vmatprep.mubr.bf16.mxu0 %v19636_v45  ;;  %5198 = vmatpush1.bf16.msra.mxu0 %v14231_v19  ;;  %v14271_v45 = vld [vmem:[#allocation11 + $0x5a0] ss:$8 sps:$4 sm:$0xff]  }
 0x373   : > { %9615 = vmatprep.mubr.bf16.mxu1 %v19638_v14  ;;  %10192 = vmatprep.subr.bf16.mxu1 %v14229_v32  ;;  %v4750_v32 = vrot.slane %v4748_v26, 5  ;;  %v4756_v1 = vrot.slane %v4754_v47, 5  ;;  %v4774_v14 = vrot.slane %v19446_v39, 5 }
 0x374   : > { %5199 = vmatprep.subr.bf16.mxu0 %v14239_v52 }
 0x375   : > { %10193 = vmatpush1.bf16.msra.mxu1 %v14227_v18  ;;  %v19448_v18 = vshrl.u32 %v19650_v51, 16 }
 0x376   : > { %5200 = vmatpush1.bf16.msra.mxu0 %v14237_v43  ;;  %10194 = vmatprep.subr.bf16.mxu1 %v14233_v5  ;;  %v19445_v5 = vshll.u32 %v19652_v6, 16 }
 0x377   : > { %5201 = vmatprep.subr.bf16.mxu0 %v14243_v36  ;;  %v4771_v33 = vrot.slane %v19448_v18, 4 }
 0x378   : > { %9616 = vmatmul.mubr.bf16.gmra.mrb[4].mxu1 %v19639_v2 }
 0x379   : > { %4628 = vmatmul.mubr.bf16.gmra.mrb[8].mxu0 %v19640_v60  ;;  %10195 = vmatpush1.bf16.msra.mxu1 %v14231_v19  ;;  %v19447_v19 = vshrl.u32 %v19652_v6, 16  ;;  %v19653_v60 = vcombine.low %v17443_v15, %v17426_v12  ;;  %v4775_v15 = vor.u32 %v4774_v14, %v4771_v33 }
 0x37a   : > { %4637 = vmatprep.mubr.bf16.mxu0 %v19641_v31  ;;  %5202 = vmatpush1.bf16.msra.mxu0 %v14241_v20  ;;  %v14279_v31 = vld [vmem:[#allocation11 + $0x5b4] ss:$8 sps:$4 sm:$0xff]  }
 0x37b   : > { %9625 = vmatprep.mubr.bf16.mxu1 %v19642_v11  ;;  %10196 = vmatprep.subr.bf16.mxu1 %v14239_v52  ;;  %v4722_v52 = vld [vmem:[#allocation2 + $0x48] sm:$0x11]  ;;  %v4784_v2 = vrot.slane %v19447_v19, 4 }
 0x37c   : > { %5203 = vmatprep.subr.bf16.mxu0 %v14249_v56  ;;  %v4764_v11 = vshll.u32 %v4722_v52, 16  ;;  %v4795_v52 = vrot.slane %v19430_v58, 4 }
 0x37d   : > { %10197 = vmatpush1.bf16.msra.mxu1 %v14237_v43  ;;  %v4751_v43 = vor.u32 %v4750_v32, %v4747_v48  ;;  %v4776_v48 = vrot.slane %v4775_v15, 4  ;;  %v19422_v15 = vshll.u32 %v17732_v37, 16 }
 0x37e   : > { %5204 = vmatpush1.bf16.msra.mxu0 %v14247_v38  ;;  %10198 = vmatprep.subr.bf16.mxu1 %v14243_v36  ;;  %v9718_v36 = vld [vmem:[#allocation2 + $0x178] sm:$0xff]  ;;  %v4766_v26 = vrot.slane %v4764_v11, 5 }
 0x37f   : > { %5205 = vmatprep.subr.bf16.mxu0 %v14253_v27  ;;  %v4752_v12 = vrot.slane %v4751_v43, 4  ;;  %v19658_v43 = vcombine.low %v17526_v17, %v17505_v7 }
 0x380   : > { %9626 = vmatmul.mubr.bf16.gmra.mrb[8].mxu1 %v19643_v53  ;;  %v9743_v53 = vshrl.u32 %v9718_v36, 16 }
 0x381   : > { %4638 = vmatmul.mubr.bf16.gmra.mrb[12].mxu0 %v19644_v28  ;;  %10199 = vmatpush1.bf16.msra.mxu1 %v14241_v20  ;;  %v18013_v20 = vrot.slane %v19445_v5, 5  ;;  %v19655_v28 = vcombine.high %v17497_v54, %v17513_v25 }
 0x382   : > { %4647 = vmatprep.mubr.bf16.mxu0 %v19645_v63  ;;  %5206 = vmatpush1.bf16.msra.mxu0 %v14251_v30  ;;  %v18026_v63 = vld [vmem:[#allocation11 + $0x5b0] ss:$8 sps:$4 sm:$0xff]   ;;  %v9745_v47 = vrot.slane %v9743_v53, 4 }
 0x383   : > { %9635 = vmatprep.mubr.bf16.mxu1 %v19646_v4  ;;  %10200 = vmatprep.subr.bf16.mxu1 %v14249_v56  ;;  %v9719_v56 = vld [vmem:[#allocation2 + $0x180] sm:$0xff]  ;;  %v18070_v53 = vld [vmem:[#allocation11 + $0x5d0] ss:$8 sps:$4 sm:$0xff]  }
 0x384   : > { %5207 = vmatprep.subr.bf16.mxu0 %v14259_v62  ;;  %v9756_v4 = vshrl.u32 %v9719_v56, 16 }
 0x385   : > { %10201 = vmatpush1.bf16.msra.mxu1 %v14247_v38  ;;  %v4761_v38 = vor.u32 %v4760_v0, %v4756_v1 }
 0x386   : > { %5208 = vmatpush1.bf16.msra.mxu0 %v14257_v49  ;;  %10202 = vmatprep.subr.bf16.mxu1 %v14253_v27  ;;  %v4725_v27 = vld [vmem:[#allocation2 + $0x70] sm:$0x11] }
 0x387   : > { %5209 = vmatprep.subr.bf16.mxu0 %v14263_v34  ;;  %v4788_v44 = vshll.u32 %v4725_v27, 16  ;;  %v4762_v59 = vrot.slane %v4761_v38, 4  ;;  %v14496_v38 = vld [vmem:[#allocation2 + $0x268] sm:$0xff]  ;;  %v19660_v27 = vld [vmem:[#allocation42_spill] sm:$0xff] }
 0x388   : > { %9636 = vmatmul.mubr.bf16.gmra.mrb[12].mxu1 %v19647_v55  ;;  %v9720_v55 = vld [vmem:[#allocation2 + $0x188] sm:$0x11] }
 0x389   : > { %4648 = vmatmul.mubr.bf16.gmra.mrb[16].mxu0 %v19648_v3  ;;  %10203 = vmatpush1.bf16.msra.mxu1 %v14251_v30  ;;  %v19654_v30 = vcombine.low %v17414_v61, %v17436_v23  ;;  %v18031_v61 = vld [vmem:[#allocation11 + $0x5c4] ss:$8 sps:$4 sm:$0xff]   ;;  %v4785_v23 = vor.u32 %v4784_v2, %v18013_v20  ;;  %v18057_v33 = vsel %vm16868_vm2, %v4762_v59, %v4766_v26  ;;  %v9762_v14 = vshll.u32 %v9720_v55, 16 }
 0x38a   : > { %4657 = vmatprep.mubr.bf16.mxu0 %v19649_v13  ;;  %5210 = vmatpush1.bf16.msra.mxu0 %v14261_v46  ;;  %v18041_v13 = vsel %vm16868_vm2, %v4752_v12, %v4756_v1  ;;  %v18053_v1 = vld [vmem:[#allocation11 + $0x5d4] ss:$8 sps:$4 sm:$0xff]   ;;  %v19426_v2 = vshrl.u32 %v17769_v42, 16 }
 0x38b   : > { %9645 = vmatprep.mubr.bf16.mxu1 %v19651_v57  ;;  %10204 = vmatprep.subr.bf16.mxu1 %v14259_v62  ;;  %v9746_v62 = vshll.u32 %v9718_v36, 16  ;;  %v9758_v57 = vrot.slane %v9756_v4, 4  ;;  %v4786_v0 = vrot.slane %v4785_v23, 4  ;;  %v19421_v36 = vshll.u32 %v17769_v42, 16  ;;  %v18088_v4 = vld [vmem:[#allocation2 + $0xb0] sm:$0xff] }
 0x38c   : > { %5211 = vmatprep.subr.bf16.mxu0 %v14269_v16  ;;  %v4808_v23 = vrot.slane %v19426_v2, 4 }
 0x38d   : > { %10205 = vmatpush1.bf16.msra.mxu1 %v14257_v49  ;;  %v9752_v49 = vshll.u32 %v9719_v56, 16  ;;  %v9748_v22 = vrot.slane %v9746_v62, 5  ;;  %v19659_v56 = vcombine.low %v17497_v54, %v17513_v25  ;;  %v12607_v54 = vcombine.high %v18041_v13, %v18057_v33  ;;  %v18080_v62 = vld [vmem:[#allocation11 + $0x5e4] ss:$8 sps:$4 sm:$0xff]  }
 0x38e   : > { %5212 = vmatpush1.bf16.msra.mxu0 %v14267_v10  ;;  %10206 = vmatprep.subr.bf16.mxu1 %v14263_v34  ;;  %v19656_v34 = vcombine.high %v17526_v17, %v17505_v7  ;;  %v12606_v17 = vcombine.low %v18041_v13, %v18057_v33  ;;  %v18077_v25 = vsel %vm16868_vm2, %v4776_v48, %v18013_v20  ;;  %v9764_v20 = vrot.slane %v9762_v14, 5  ;;  %v18104_v48 = vld [vmem:[#allocation2 + $0xb8] sm:$0xff]  ;;  %v9723_v14 = vld [vmem:[#allocation2 + $0x1b0] sm:$0x11] }
 0x38f   : > { %5213 = vmatprep.subr.bf16.mxu0 %v14273_v21  ;;  %v18043_v32 = vrot.slane %v9752_v49, 5  ;;  %v9749_v11 = vor.u32 %v9748_v22, %v9745_v47  ;;  %v19429_v49 = vshrl.u32 %v17732_v37, 16  ;;  %v18214_v13 = vld [vmem:[#allocation11 + $0x610] ss:$8 sps:$4 sm:$0xff]  }
 0x390   : > { %9646 = vmatmul.mubr.bf16.gmra.mrb[16].mxu1 %v19653_v60  ;;  %v14495_v60 = vld [vmem:[#allocation2 + $0x270] sm:$0xff] }
 0x391   : > { %4658 = vmatmul.mubr.bf16.gmra.mrb[20].mxu0 %v19654_v30  ;;  %10207 = vmatpush1.bf16.msra.mxu1 %v14261_v46  ;;  %v19423_v46 = vshll.u32 %v17746_v29, 16  ;;  %v13027_v7 = vcombine.high %v14496_v38, %v14495_v60  ;;  %v19661_v30 = vcombine.high %v17325_v40, %v19660_v27  ;;  %v18099_v55 = vrot.slane %v9749_v11, 4 }
 0x392   : > { %4667 = vmatprep.mubr.bf16.mxu0 %v19655_v28  ;;  %5214 = vmatpush1.bf16.msra.mxu0 %v14271_v45  ;;  %v19432_v11 = vshll.u32 %v18104_v48, 16 }
 0x393   : > { %9655 = vmatprep.mubr.bf16.mxu1 %v19656_v34  ;;  %10208 = vmatprep.subr.bf16.mxu1 %v14269_v16  ;;  %v18037_v16 = vld [vmem:[#allocation11 + $0x5c0] ss:$8 sps:$4 sm:$0xff]  }
 0x394   : > { %5215 = vmatprep.subr.bf16.mxu0 %v14279_v31  ;;  %v4728_v34 = vld [vmem:[#allocation2 + $0x98] sm:$0x11] }
 0x395   : > { %10209 = vmatpush1.bf16.msra.mxu1 %v14267_v10  ;;  %v4790_v10 = vrot.slane %v4788_v44, 5  ;;  %v19662_v44 = vld [vmem:[#allocation35_spill] sm:$0xff] }
 0x396   : > { %5216 = vmatpush1.bf16.msra.mxu0 %v18026_v63  ;;  %10210 = vmatprep.subr.bf16.mxu1 %v14273_v21  ;;  %v4798_v21 = vrot.slane %v19423_v46, 5  ;;  %v19425_v59 = vshrl.u32 %v19662_v44, 16  ;;  %v19424_v22 = vshll.u32 %v19662_v44, 16  ;;  %v18136_v46 = vld [vmem:[#allocation11 + $0x5f0] ss:$8 sps:$4 sm:$0xff]  }
 0x397   : > { %5217 = vmatprep.subr.bf16.mxu0 %v18031_v61  ;;  %v18084_v28 = vsel %vm16868_vm2, %v4786_v0, %v4790_v10  ;;  %v13026_v0 = vcombine.low %v14496_v38, %v14495_v60  ;;  %v19427_v10 = vshrl.u32 %v18088_v4, 16 }
 0x398   : > { %9656 = vmatmul.mubr.bf16.gmra.mrb[20].mxu1 %v19658_v43  ;;  %v4799_v12 = vor.u32 %v4798_v21, %v4795_v52  ;;  %v12609_v26 = vcombine.high %v18077_v25, %v18084_v28  ;;  %v12608_v47 = vcombine.low %v18077_v25, %v18084_v28  ;;  %v19428_v52 = vshll.u32 %v18088_v4, 16  ;;  %v18297_v25 = vld [vmem:[#allocation11 + $0x630] ss:$8 sps:$4 sm:$0xff]  }
 0x399   : > { %4668 = vmatmul.mubr.bf16.gmra.mrb[24].mxu0 %v19659_v56  ;;  %10211 = vmatpush1.bf16.msra.mxu1 %v14271_v45  ;;  %v9759_v45 = vor.u32 %v9758_v57, %v18043_v32  ;;  %v18108_v57 = vld [vmem:[#allocation11 + $0x5e0] ss:$8 sps:$4 sm:$0xff]   ;;  %v4812_v43 = vshll.u32 %v4728_v34, 16  ;;  %v18115_v56 = vrot.slane %v19422_v15, 5  ;;  %v9769_v38 = vrot.slane %v19425_v59, 4 }
 0x39a   : > { %4677 = vmatprep.mubr.bf16.mxu0 %v19661_v30  ;;  %5218 = vmatpush1.bf16.msra.mxu0 %v18037_v16  ;;  %v4800_v21 = vrot.slane %v4799_v12, 4  ;;  %v19435_v30 = vshrl.u32 %v18104_v48, 16  ;;  %v13029_v12 = vcombine.high %v17924_v8, %v17927_v9  ;;  %v9772_v34 = vrot.slane %v19424_v22, 5  ;;  %v18145_v59 = vld [vmem:[#allocation11 + $0x604] ss:$8 sps:$4 sm:$0xff]  }
 0x39b   : > { %9665 = vmatprep.mubr.bf16.mxu1 %v13027_v7  ;;  %10212 = vmatprep.subr.bf16.mxu1 %v14279_v31  ;;  %v4804_v31 = vrot.slane %v19421_v36, 5  ;;  %v18119_v7 = vld [vmem:[#allocation11 + $0x5f4] ss:$8 sps:$4 sm:$0xff]   ;;  %v4814_v58 = vrot.slane %v4812_v43, 5  ;;  %v18170_v43 = vld [vmem:[#allocation11 + $0x600] ss:$8 sps:$4 sm:$0xff]  }
 0x39c   : > { %5219 = vmatprep.subr.bf16.mxu0 %v18053_v1 }
 0x39d   : > { %10213 = vmatpush1.bf16.msra.mxu1 %v18026_v63  ;;  %v9760_v63 = vrot.slane %v9759_v45, 4  ;;  %v4809_v60 = vor.u32 %v4808_v23, %v4804_v31  ;;  %v19663_v45 = vcombine.low %v17325_v40, %v19660_v27  ;;  %v4731_v23 = vld [vmem:[#allocation2 + $0xc0] sm:$0x11]  ;;  %v4819_v40 = vrot.slane %v19427_v10, 4  ;;  %v19665_v27 = vld [vmem:[#allocation49_spill] sm:$0xff] }
 0x39e   : > { %5220 = vmatpush1.bf16.msra.mxu0 %v18070_v53  ;;  %10214 = vmatprep.subr.bf16.mxu1 %v18031_v61  ;;  %v9782_v61 = vrot.slane %v19429_v49, 4  ;;  %v19436_v22 = vshrl.u32 %v19665_v27, 16  ;;  %v18153_v2 = vsel %vm16868_vm2, %v4800_v21, %v4804_v31 }
 0x39f   : > { %5221 = vmatprep.subr.bf16.mxu0 %v18080_v62  ;;  %v4810_v49 = vrot.slane %v4809_v60, 4 }
 0x3a0   : > { %9666 = vmatmul.mubr.bf16.gmra.mrb[24].mxu1 %v13026_v0  ;;  %v19664_v0 = vld [vmem:[#allocation36_spill] sm:$0xff]  ;;  %v9783_v10 = vor.u32 %v9782_v61, %v18115_v56  ;;  %v9806_v60 = vrot.slane %v19436_v22, 4 }
 0x3a1   : > { %4678 = vmatmul.mubr.bf16.gmra.mrb[28].mxu0 %v19663_v45  ;;  %10215 = vmatpush1.bf16.msra.mxu1 %v18037_v16  ;;  %v19434_v36 = vshrl.u32 %v19664_v0, 16  ;;  %v19431_v15 = vshll.u32 %v19664_v0, 16  ;;  %v4822_v16 = vrot.slane %v19428_v52, 5  ;;  %v19433_v45 = vshll.u32 %v19665_v27, 16  ;;  %v18261_v22 = vld [vmem:[#allocation2 + $0x220] sm:$0xff] }
 0x3a2   : > { %5222 = vmatpush1.bf16.msra.mxu0 %v18108_v57  ;;  %5225 = vmatprep.mubr.bf16.mxu0 %v12607_v54  ;;  %v18149_v54 = vsel %vm16868_vm2, %v9760_v63, %v9764_v20  ;;  %v9786_v52 = vshll.u32 %v9723_v14, 16  ;;  %v9773_v20 = vor.u32 %v9772_v34, %v9769_v38  ;;  %v4836_v63 = vshll.u32 %v4731_v23, 16  ;;  %v1791_v38 = vld [vmem:[#allocation2 + $0x2b0] sm:$0x88] }
 0x3a3   : > { %9675 = vmatprep.mubr.bf16.mxu1 %v13029_v12  ;;  %10216 = vmatprep.subr.bf16.mxu1 %v18053_v1  ;;  %v18159_v1 = vrot.slane %v19432_v11, 5  ;;  %v4832_v12 = vrot.slane %v19435_v30, 4  ;;  %v9793_v31 = vrot.slane %v19434_v36, 4  ;;  %v9796_v21 = vrot.slane %v19431_v15, 5  ;;  %v9726_v15 = vld [vmem:[#allocation2 + $0x1d8] sm:$0x11] }
 0x3a4   : > { %5223 = vmatprep.subr.bf16.mxu0 %v18119_v7  ;;  %v13028_v14 = vcombine.low %v17924_v8, %v17927_v9  ;;  %v4823_v61 = vor.u32 %v4822_v16, %v4819_v40  ;;  %v9784_v34 = vrot.slane %v9783_v10, 4  ;;  %v9788_v23 = vrot.slane %v9786_v52, 5  ;;  %v18189_v11 = vld [vmem:[#allocation11 + $0x614] ss:$8 sps:$4 sm:$0xff]  }
 0x3a5   : > { %10217 = vmatpush1.bf16.msra.mxu1 %v18070_v53  ;;  %v18176_v53 = vrot.slane %v19433_v45, 5  ;;  %v1792_v9 = vsel %vm15328_vm6, 0, %v1791_v38  ;;  %v18193_v45 = vsel %vm16868_vm2, %v4810_v49, %v4814_v58  ;;  %v4833_v36 = vor.u32 %v4832_v12, %v18159_v1 }
 0x3a6   : > { %5224 = vmatpush1.bf16.msra.mxu0 %v18136_v46  ;;  %10218 = vmatprep.subr.bf16.mxu1 %v18080_v62  ;;  %v9755_v62 = vsel %vm16868_vm2, %v18099_v55, %v18043_v32  ;;  %v18196_v32 = vld [vmem:[#allocation2 + $0xd8] sm:$0xff]  ;;  %v18198_v55 = vld [vmem:[#allocation2 + $0x1f0] sm:$0xff]  ;;  %1793 = vst [vmem:[#allocation2 + $0x2b0] sm:$0x88] %v1792_v9  ;;  %v12611_v10 = vcombine.high %v18153_v2, %v18193_v45  ;;  %v9774_v52 = vrot.slane %v9773_v20, 4  ;;  %v4824_v33 = vrot.slane %v4823_v61, 4 }
 0x3a7   : > { %5796 = vmatprep.subr.bf16.mxu0 %v18145_v59  ;;  %v13062_v40 = vcombine.low %v9755_v62, %v18149_v54  ;;  %v13063_v16 = vcombine.high %v9755_v62, %v18149_v54  ;;  %v12610_v58 = vcombine.low %v18153_v2, %v18193_v45  ;;  %v9797_v49 = vor.u32 %v9796_v21, %v9793_v31  ;;  %v18208_v54 = vld [vmem:[#allocation2 + $0x1f8] sm:$0xff]  ;;  %v18217_v20 = vld [vmem:[#allocation2 + $0xe0] sm:$0xff] }
 0x3a8   : > { %9676 = vmatmul.mubr.bf16.gmra.mrb[28].mxu1 %v13028_v14  ;;  %v9810_v12 = vshll.u32 %v9726_v15, 16  ;;  %v18220_v31 = vld [vmem:[#allocation11 + $0x624] ss:$8 sps:$4 sm:$0xff]   ;;  %v18224_v21 = vsel %vm16868_vm2, %v9784_v34, %v9788_v23  ;;  %v19440_v14 = vshll.u32 %v18196_v32, 16  ;;  %v4834_v15 = vrot.slane %v4833_v36, 4 }
 0x3a9   : > { %5226 = vmatmul.mubr.bf16.vlgmr.msra.gmra.mrb[0].mxu0 %v12606_v17  ;;  %10219 = vmatpush1.bf16.msra.mxu1 %v18108_v57  ;;  %v4838_v17 = vrot.slane %v4836_v63, 5  ;;  %v9807_v57 = vor.u32 %v9806_v60, %v18176_v53  ;;  %v19441_v63 = vshrl.u32 %v18198_v55, 16  ;;  %v19437_v61 = vshll.u32 %v18198_v55, 16  ;;  %v18243_v36 = vld [vmem:[#allocation11 + $0x620] ss:$8 sps:$4 sm:$0xff]  }
 0x3aa   : > { %5235 = vmatprep.mubr.bf16.mxu0 %v12609_v26  ;;  %5797 = vmatpush1.bf16.msra.mxu0 %v18170_v43  ;;  %v19444_v26 = vshrl.u32 %v18196_v32, 16  ;;  %v19438_v60 = vshll.u32 %v18208_v54, 16  ;;  %v18237_v38 = vsel %vm16868_vm2, %v9774_v52, %v18115_v56  ;;  %v9798_v62 = vrot.slane %v9797_v49, 4  ;;  %v9729_v49 = vld [vmem:[#allocation2 + $0x200] sm:$0x11] }
 0x3ab   : > { %10222 = vmatprep.mubr.bf16.mxu1 %v13063_v16  ;;  %10220 = vmatprep.subr.bf16.mxu1 %v18119_v7  ;;  %v19443_v7 = vshrl.u32 %v18208_v54, 16  ;;  %v19439_v34 = vshll.u32 %v18217_v20, 16  ;;  %v19442_v23 = vshrl.u32 %v18217_v20, 16  ;;  %v13065_v8 = vcombine.high %v18237_v38, %v18224_v21 }
 0x3ac   : > { %5798 = vmatprep.subr.bf16.mxu0 %v18189_v11  ;;  %v9808_v56 = vrot.slane %v9807_v57, 4  ;;  %v9812_v9 = vrot.slane %v9810_v12, 5  ;;  %v13064_v16 = vcombine.low %v18237_v38, %v18224_v21  ;;  %v4846_v52 = vrot.slane %v19440_v14, 5  ;;  %v18277_v38 = vld [vmem:[#allocation2 + $0x100] sm:$0xff] }
 0x3ad   : > { %10221 = vmatpush1.bf16.msra.mxu1 %v18136_v46  ;;  %v18250_v46 = vsel %vm16868_vm2, %v4824_v33, %v18159_v1  ;;  %v9817_v30 = vrot.slane %v19441_v63, 4  ;;  %v18263_v1 = vld [vmem:[#allocation11 + $0x634] ss:$8 sps:$4 sm:$0xff]   ;;  %v18267_v33 = vsel %vm16868_vm2, %v4834_v15, %v4838_v17  ;;  %v9820_v57 = vrot.slane %v19437_v61, 5  ;;  %v4734_v15 = vld [vmem:[#allocation2 + $0xe8] sm:$0x11] }
 0x3ae   : > { %5799 = vmatpush1.bf16.msra.mxu0 %v18214_v13  ;;  %10792 = vmatprep.subr.bf16.mxu1 %v18145_v59  ;;  %v4843_v59 = vrot.slane %v19444_v26, 4  ;;  %v18273_v12 = vrot.slane %v19438_v60, 5  ;;  %v9830_v21 = vrot.slane %v19443_v7, 4  ;;  %v18288_v17 = vsel %vm16868_vm2, %v9798_v62, %v18176_v53  ;;  %v18312_v63 = vld [vmem:[#allocation2 + $0x108] sm:$0xff]  ;;  %v18318_v26 = vld [vmem:[#allocation2 + $0x150] sm:$0xff] }
 0x3af   : > { %5800 = vmatprep.subr.bf16.mxu0 %v18220_v31  ;;  %v18292_v61 = vrot.slane %v19439_v34, 5  ;;  %v4856_v60 = vrot.slane %v19442_v23, 4  ;;  %v18301_v28 = vsel %vm16868_vm2, %v9808_v56, %v9812_v9  ;;  %v19449_v53 = vshll.u32 %v18261_v22, 16 }
 0x3b0   : > { %10223 = vmatmul.mubr.bf16.vlgmr.msra.gmra.mrb[0].mxu1 %v13062_v40  ;;  %v12613_v40 = vcombine.high %v18250_v46, %v18267_v33  ;;  %v19450_v62 = vshrl.u32 %v18261_v22, 16  ;;  %v4847_v34 = vor.u32 %v4846_v52, %v4843_v59  ;;  %v9834_v14 = vshll.u32 %v9729_v49, 16 }
 0x3b1   : > { %5236 = vmatmul.mubr.bf16.gmra.mrb[4].mxu0 %v12608_v47  ;;  %10793 = vmatpush1.bf16.msra.mxu1 %v18170_v43  ;;  %v18305_v43 = vld [vmem:[#allocation2 + $0x218] sm:$0xff]  ;;  %v19452_v56 = vshrl.u32 %v18277_v38, 16  ;;  %v19451_v9 = vshll.u32 %v18277_v38, 16  ;;  %v9821_v23 = vor.u32 %v9820_v57, %v9817_v30  ;;  %v9831_v7 = vor.u32 %v9830_v21, %v18273_v12 }
 0x3b2   : > { %5245 = vmatprep.mubr.bf16.mxu0 %v12611_v10  ;;  %5801 = vmatpush1.bf16.msra.mxu0 %v18243_v36  ;;  %v18310_v10 = vld [vmem:[#allocation11 + $0x644] ss:$8 sps:$4 sm:$0xff]   ;;  %v4857_v59 = vor.u32 %v4856_v60, %v18292_v61  ;;  %v4860_v52 = vshll.u32 %v4734_v15, 16  ;;  %v19455_v49 = vshrl.u32 %v18305_v43, 16  ;;  %v19453_v5 = vshll.u32 %v18305_v43, 16 }
 0x3b3   : > { %10232 = vmatprep.mubr.bf16.mxu1 %v13065_v8  ;;  %10794 = vmatprep.subr.bf16.mxu1 %v18189_v11  ;;  %v18328_v30 = vld [vmem:[#allocation11 + $0x640] ss:$8 sps:$4 sm:$0xff]   ;;  %v19454_v57 = vshll.u32 %v18312_v63, 16  ;;  %v19456_v21 = vshrl.u32 %v18312_v63, 16  ;;  %v9854_v60 = vrot.slane %v19450_v62, 4  ;;  %v4848_v15 = vrot.slane %v4847_v34, 4 }
 0x3b4   : > { %5802 = vmatprep.subr.bf16.mxu0 %v18263_v1  ;;  %v9836_v39 = vrot.slane %v9834_v14, 5  ;;  %v4870_v19 = vrot.slane %v19451_v9, 5  ;;  %v13067_v18 = vcombine.high %v18288_v17, %v18301_v28  ;;  %v18345_v47 = vld [vmem:[#allocation11 + $0x654] ss:$8 sps:$4 sm:$0xff]   ;;  %v9822_v62 = vrot.slane %v9821_v23, 4  ;;  %v18369_v23 = vld [vmem:[#allocation2 + $0x248] sm:$0xff] }
 0x3b5   : > { %10795 = vmatpush1.bf16.msra.mxu1 %v18214_v13  ;;  %v18334_v13 = vrot.slane %v19449_v53, 5  ;;  %v13066_v53 = vcombine.low %v18288_v17, %v18301_v28  ;;  %v9832_v11 = vrot.slane %v9831_v7, 4  ;;  %v9732_v8 = vld [vmem:[#allocation2 + $0x228] sm:$0x11]  ;;  %v4858_v14 = vrot.slane %v4857_v59, 4 }
 0x3b6   : > { %5803 = vmatpush1.bf16.msra.mxu0 %v18297_v25  ;;  %10796 = vmatprep.subr.bf16.mxu1 %v18220_v31  ;;  %v4867_v31 = vrot.slane %v19452_v56, 4  ;;  %v4862_v34 = vrot.slane %v4860_v52, 5  ;;  %v9844_v9 = vrot.slane %v19453_v5, 5  ;;  %v18357_v56 = vld [vmem:[#allocation2 + $0x128] sm:$0xff]  ;;  %v18364_v2 = vrot.slane %v19454_v57, 5 }
 0x3b7   : > { %5804 = vmatprep.subr.bf16.mxu0 %v18310_v10  ;;  %v18360_v7 = vld [vmem:[#allocation11 + $0x650] ss:$8 sps:$4 sm:$0xff]   ;;  %v4880_v45 = vrot.slane %v19456_v21, 4  ;;  %v18381_v28 = vsel %vm16868_vm2, %v4848_v15, %v18292_v61  ;;  %v9858_v5 = vshll.u32 %v9732_v8, 16  ;;  %v19457_v8 = vshll.u32 %v18357_v56, 16 }
 0x3b8   : > { %10233 = vmatmul.mubr.bf16.gmra.mrb[4].mxu1 %v13064_v16  ;;  %v9841_v16 = vrot.slane %v19455_v49, 4  ;;  %v4737_v59 = vld [vmem:[#allocation2 + $0x110] sm:$0x11]  ;;  %v4871_v52 = vor.u32 %v4870_v19, %v4867_v31  ;;  %v19458_v19 = vshrl.u32 %v18357_v56, 16  ;;  %v18404_v15 = vsel %vm16868_vm2, %v4858_v14, %v4862_v34 }
 0x3b9   : > { %5246 = vmatmul.mubr.bf16.gmra.mrb[8].mxu0 %v12610_v58  ;;  %10797 = vmatpush1.bf16.msra.mxu1 %v18243_v36  ;;  %v9855_v58 = vor.u32 %v9854_v60, %v18334_v13  ;;  %v19667_v36 = vshrl.u32 %v18318_v26, 16  ;;  %v19668_v60 = vshll.u32 %v18318_v26, 16  ;;  %v18397_v61 = vld [vmem:[#allocation2 + $0x130] sm:$0xff]  ;;  %v4884_v14 = vshll.u32 %v4737_v59, 16 }
 0x3ba   : > { %5255 = vmatprep.mubr.bf16.mxu0 %v12613_v40  ;;  %5805 = vmatpush1.bf16.msra.mxu0 %v18328_v30  ;;  %v18376_v40 = vld [vmem:[#allocation11 + $0x664] ss:$8 sps:$4 sm:$0xff]   ;;  %v9845_v31 = vor.u32 %v9844_v9, %v9841_v16  ;;  %v4872_v9 = vrot.slane %v4871_v52, 4  ;;  %v9860_v16 = vrot.slane %v9858_v5, 5  ;;  %v18420_v21 = vld [vmem:[#allocation11 + $0x674] ss:$8 sps:$4 sm:$0xff]   ;;  %v19669_v5 = vcombine.low %v18250_v46, %v18267_v33 }
 0x3bb   : > { %v18373_v17 = vrot.slane %v19667_v36, 4  ;;  %10242 = vmatprep.mubr.bf16.mxu1 %v13067_v18  ;;  %10798 = vmatprep.subr.bf16.mxu1 %v18263_v1  ;;  %v18385_v57 = vrot.slane %v19668_v60, 5  ;;  %v18391_v18 = vsel %vm16868_vm2, %v9822_v62, %v18273_v12  ;;  %v18395_v1 = vsel %vm16868_vm2, %v9832_v11, %v9836_v39  ;;  %v18406_v36 = vld [vmem:[#allocation2 + $0x240] sm:$0xff]  ;;  %v18434_v59 = vld [vmem:[#allocation11 + $0x670] ss:$8 sps:$4 sm:$0xff]  }
 0x3bc   : > { %5806 = vmatprep.subr.bf16.mxu0 %v18345_v47  ;;  %v19459_v12 = vshll.u32 %v18369_v23, 16  ;;  %v18412_v62 = vld [vmem:[#allocation11 + $0x660] ss:$8 sps:$4 sm:$0xff]   ;;  %v4881_v11 = vor.u32 %v4880_v45, %v18364_v2  ;;  %v9856_v34 = vrot.slane %v9855_v58, 4  ;;  %v19460_v60 = vshll.u32 %v18397_v61, 16  ;;  %v18446_v49 = vld [vmem:[#allocation2 + $0x270] sm:$0xff] }
 0x3bd   : > { %10799 = vmatpush1.bf16.msra.mxu1 %v18297_v25  ;;  %v12615_v25 = vcombine.high %v18381_v28, %v18404_v15  ;;  %v4894_v39 = vrot.slane %v19457_v8, 5  ;;  %v19670_v8 = vshrl.u32 %v18369_v23, 16  ;;  %v18442_v45 = vld [vmem:[#allocation2 + $0x158] sm:$0xff]  ;;  %v4886_v33 = vrot.slane %v4884_v14, 5 }
 0x3be   : > { %5807 = vmatpush1.bf16.msra.mxu0 %v18360_v7  ;;  %10800 = vmatprep.subr.bf16.mxu1 %v18310_v10  ;;  %v4891_v10 = vrot.slane %v19458_v19, 4  ;;  %v18438_v52 = vrot.slane %v19459_v12, 5  ;;  %v4882_v46 = vrot.slane %v4881_v11, 4  ;;  %v18449_v12 = vld [vmem:[#allocation11 + $0x684] ss:$8 sps:$4 sm:$0xff]   ;;  %v18455_v58 = vsel %vm16868_vm2, %v9856_v34, %v9860_v16 }
 0x3bf   : > { %5808 = vmatprep.subr.bf16.mxu0 %v18376_v40  ;;  %v9878_v19 = vrot.slane %v19670_v8, 4  ;;  %v13068_v8 = vcombine.low %v18391_v18, %v18395_v1  ;;  %v4740_v14 = vld [vmem:[#allocation2 + $0x138] sm:$0x11]  ;;  %v19673_v34 = vshll.u32 %v18406_v36, 16  ;;  %v19465_v50 = vshll.u32 %v18446_v49, 16 }
 0x3c0   : > { %10243 = vmatmul.mubr.bf16.gmra.mrb[8].mxu1 %v13066_v53  ;;  %v13069_v53 = vcombine.high %v18391_v18, %v18395_v1  ;;  %v19672_v18 = vshrl.u32 %v18406_v36, 16 }
 0x3c1   : > { %5256 = vmatmul.mubr.bf16.gmra.mrb[12].mxu0 %v19669_v5  ;;  %10801 = vmatpush1.bf16.msra.mxu1 %v18328_v30  ;;  %v9846_v30 = vrot.slane %v9845_v31, 4  ;;  %v9735_v5 = vld [vmem:[#allocation2 + $0x250] sm:$0x11]  ;;  %v19671_v31 = vshrl.u32 %v18397_v61, 16  ;;  %v9868_v16 = vrot.slane %v19673_v34, 5  ;;  %v4908_v34 = vshll.u32 %v4740_v14, 16 }
 0x3c2   : > { %5265 = vmatprep.mubr.bf16.mxu0 %v12615_v25  ;;  %5809 = vmatpush1.bf16.msra.mxu0 %v18412_v62  ;;  %v4900_v25 = vrot.slane %v19460_v60, 5  ;;  %v9865_v1 = vrot.slane %v19672_v18, 4  ;;  %v9879_v60 = vor.u32 %v9878_v19, %v18438_v52  ;;  %v14325_v14 = vld [vmem:[#allocation11 + $0x690] ss:$8 sps:$4 sm:$0xff]  }
 0x3c3   : > { %10252 = vmatprep.mubr.bf16.mxu1 %v13069_v53  ;;  %10802 = vmatprep.subr.bf16.mxu1 %v18345_v47  ;;  %v4904_v11 = vrot.slane %v19671_v31, 4  ;;  %v18465_v47 = vsel %vm16868_vm2, %v4872_v9, %v18364_v2  ;;  %v4895_v53 = vor.u32 %v4894_v39, %v4891_v10  ;;  %v9882_v31 = vshll.u32 %v9735_v5, 16  ;;  %v18481_v9 = vld [vmem:[#allocation11 + $0x680] ss:$8 sps:$4 sm:$0xff]  }
 0x3c4   : > { %5810 = vmatprep.subr.bf16.mxu0 %v18420_v21  ;;  %v12614_v39 = vcombine.low %v18381_v28, %v18404_v15  ;;  %v9851_v19 = vsel %vm16868_vm2, %v9846_v30, %v18334_v13  ;;  %v18492_v28 = vld [vmem:[#allocation11 + $0x694] ss:$8 sps:$4 sm:$0xff]   ;;  %v9869_v2 = vor.u32 %v9868_v16, %v9865_v1  ;;  %v9880_v13 = vrot.slane %v9879_v60, 4 }
 0x3c5   : > { %10803 = vmatpush1.bf16.msra.mxu1 %v18360_v7  ;;  %v4887_v7 = vsel %vm16868_vm2, %v4882_v46, %v4886_v33  ;;  %v4905_v18 = vor.u32 %v4904_v11, %v4900_v25  ;;  %v4896_v15 = vrot.slane %v4895_v53, 4  ;;  %v9884_v30 = vrot.slane %v9882_v31, 5  ;;  %v9738_v60 = vld [vmem:[#allocation2 + $0x278] sm:$0x11]  ;;  %v14330_v31 = vld [vmem:[#allocation11 + $0x6a4] ss:$8 sps:$4 sm:$0xff]  }
 0x3c6   : > { %5811 = vmatpush1.bf16.msra.mxu0 %v18434_v59  ;;  %10804 = vmatprep.subr.bf16.mxu1 %v18376_v40  ;;  %v12617_v5 = vcombine.high %v18465_v47, %v4887_v7  ;;  %v13071_v40 = vcombine.high %v9851_v19, %v18455_v58  ;;  %v18499_v10 = vrot.slane %v19465_v50, 5  ;;  %v19674_v11 = vshrl.u32 %v18446_v49, 16  ;;  %v18515_v33 = vld [vmem:[#allocation2 + $0x298] sm:$0xff] }
 0x3c7   : > { %5812 = vmatprep.subr.bf16.mxu0 %v18449_v12  ;;  %v19675_v53 = vshll.u32 %v18442_v45, 16  ;;  %v19676_v16 = vshrl.u32 %v18442_v45, 16  ;;  %v4910_v50 = vrot.slane %v4908_v34, 5  ;;  %19677 = vst [vmem:[#allocation43_spill] sm:$0xff] %v18515_v33  ;;  %v9870_v46 = vrot.slane %v9869_v2, 4 }
 0x3c8   : > { %10253 = vmatmul.mubr.bf16.gmra.mrb[12].mxu1 %v13068_v8  ;;  %v9902_v8 = vrot.slane %v19674_v11, 4  ;;  %v18513_v11 = vld [vmem:[#allocation2 + $0x290] sm:$0xff]  ;;  %v14328_v2 = vld [vmem:[#allocation11 + $0x6a0] ss:$8 sps:$4 sm:$0xff]  }
 0x3c9   : > { %5266 = vmatmul.mubr.bf16.gmra.mrb[16].mxu0 %v12614_v39  ;;  %10805 = vmatpush1.bf16.msra.mxu1 %v18412_v62  ;;  %v18506_v1 = vrot.slane %v19675_v53, 5  ;;  %v4928_v62 = vrot.slane %v19676_v16, 4  ;;  %v4906_v39 = vrot.slane %v4905_v18, 4  ;;  %v13070_v53 = vcombine.low %v9851_v19, %v18455_v58  ;;  %v4743_v16 = vld [vmem:[#allocation2 + $0x160] sm:$0x11] }
 0x3ca   : > { %5275 = vmatprep.mubr.bf16.mxu0 %v12617_v5  ;;  %5813 = vmatpush1.bf16.msra.mxu0 %v18481_v9  ;;  %v4919_v5 = vor.u32 %v18385_v57, %v18373_v17  ;;  %v18526_v57 = vsel %vm16868_vm2, %v4896_v15, %v4900_v25  ;;  %v9885_v17 = vsel %vm16868_vm2, %v9880_v13, %v9884_v30  ;;  %v9906_v58 = vshll.u32 %v9738_v60, 16  ;;  %v14333_v60 = vld [vmem:[#allocation11 + $0x6b4] ss:$8 sps:$4 sm:$0xff]  }
 0x3cb   : > { %10262 = vmatprep.mubr.bf16.mxu1 %v13071_v40  ;;  %10806 = vmatprep.subr.bf16.mxu1 %v18420_v21  ;;  %v19678_v40 = vshrl.u32 %v18473_v24, 16  ;;  %v19679_v21 = vshll.u32 %v18473_v24, 16  ;;  %v9903_v34 = vor.u32 %v9902_v8, %v18499_v10  ;;  %v19466_v19 = vshrl.u32 %v18513_v11, 16 }
 0x3cc   : > { %5814 = vmatprep.subr.bf16.mxu0 %v18492_v28  ;;  %v12616_v25 = vcombine.low %v18465_v47, %v4887_v7  ;;  %v4911_v15 = vsel %vm16868_vm2, %v4906_v39, %v4910_v50  ;;  %v4929_v13 = vor.u32 %v4928_v62, %v18506_v1  ;;  %v4932_v30 = vshll.u32 %v4743_v16, 16  ;;  %v5339_v50 = vld [vmem:[#allocation2 + $0x58] sm:$0x88]  ;;  %v14331_v62 = vld [vmem:[#allocation11 + $0x6b0] ss:$8 sps:$4 sm:$0xff]  }
 0x3cd   : > { %v9889_v35 = vrot.slane %v19678_v40, 4  ;;  %v9892_v18 = vrot.slane %v19679_v21, 5  ;;  %10807 = vmatpush1.bf16.msra.mxu1 %v18434_v59  ;;  %v9875_v8 = vsel %vm16868_vm2, %v9870_v46, %v18438_v52  ;;  %v4920_v7 = vrot.slane %v4919_v5, 4  ;;  %v14336_v5 = vld [vmem:[#allocation11 + $0x6c4] ss:$8 sps:$4 sm:$0xff]  }
 0x3ce   : > { %5815 = vmatpush1.bf16.msra.mxu0 %v14325_v14  ;;  %10808 = vmatprep.subr.bf16.mxu1 %v18449_v12  ;;  %v12619_v12 = vcombine.high %v18526_v57, %v4911_v15  ;;  %v13073_v47 = vcombine.high %v9875_v8, %v9885_v17  ;;  %v9904_v21 = vrot.slane %v9903_v34, 4  ;;  %v9908_v40 = vrot.slane %v9906_v58, 5  ;;  %v9741_v58 = vld [vmem:[#allocation2 + $0x2a0] sm:$0x11] }
 0x3cf   : > { %5816 = vmatprep.subr.bf16.mxu0 %v14330_v31  ;;  %v9893_v59 = vor.u32 %v9892_v18, %v9889_v35  ;;  %v9913_v39 = vrot.slane %v19466_v19, 4  ;;  %v19681_v52 = vshll.u32 %v18515_v33, 16  ;;  %v19682_v46 = vshrl.u32 %v18515_v33, 16 }
 0x3d0   : > { %10263 = vmatmul.mubr.bf16.gmra.mrb[16].mxu1 %v13070_v53  ;;  %v19680_v53 = vshll.u32 %v18513_v11, 16  ;;  %v4930_v18 = vrot.slane %v4929_v13, 4  ;;  %v4934_v34 = vrot.slane %v4932_v30, 5  ;;  %v5364_v19 = vshrl.u32 %v5339_v50, 16 }
 0x3d1   : > { %5276 = vmatmul.mubr.bf16.gmra.mrb[20].mxu0 %v12616_v25  ;;  %10809 = vmatpush1.bf16.msra.mxu1 %v18481_v9  ;;  %v9922_v35 = vrot.slane %v19681_v52, 5  ;;  %v9926_v9 = vrot.slane %v19682_v46, 4  ;;  %v9894_v25 = vrot.slane %v9893_v59, 4  ;;  %v19683_v52 = vshrl.u32 %v19650_v51, 16 }
 0x3d2   : > { %5285 = vmatprep.mubr.bf16.mxu0 %v12619_v12  ;;  %5817 = vmatpush1.bf16.msra.mxu0 %v14328_v2  ;;  %v9916_v16 = vrot.slane %v19680_v53, 5  ;;  %v13072_v12 = vcombine.low %v9875_v8, %v9885_v17  ;;  %v4925_v53 = vsel %vm16868_vm2, %v4920_v7, %v18506_v1  ;;  %v9930_v46 = vshll.u32 %v9741_v58, 16  ;;  %v14339_v7 = vld [vmem:[#allocation11 + $0x6d4] ss:$8 sps:$4 sm:$0xff]   ;;  %v14342_v58 = vld [vmem:[#allocation11 + $0x6e4] ss:$8 sps:$4 sm:$0xff]  }
 0x3d3   : > { %10272 = vmatprep.mubr.bf16.mxu1 %v13073_v47  ;;  %10810 = vmatprep.subr.bf16.mxu1 %v18492_v28  ;;  %v5371_v33 = vrot.slane %v19683_v52, 7  ;;  %v14334_v47 = vld [vmem:[#allocation11 + $0x6c0] ss:$8 sps:$4 sm:$0xff]   ;;  %v9909_v28 = vsel %vm16868_vm2, %v9904_v21, %v9908_v40  ;;  %v9927_v30 = vor.u32 %v9926_v9, %v9922_v35  ;;  %v4935_v17 = vsel %vm16868_vm2, %v4930_v18, %v4934_v34 }
 0x3d4   : > { %5818 = vmatprep.subr.bf16.mxu0 %v14333_v60  ;;  %v9917_v13 = vor.u32 %v9916_v16, %v9913_v39  ;;  %v19684_v1 = vshrl.u32 %v19652_v6, 16  ;;  %v12621_v8 = vcombine.high %v4925_v53, %v4935_v17  ;;  %v12654_v21 = vrot.slane %v5364_v19, 11  ;;  %v5342_v39 = vld [vmem:[#allocation2 + $0x80] sm:$0x88]  ;;  %v14337_v16 = vld [vmem:[#allocation11 + $0x6d0] ss:$8 sps:$4 sm:$0xff]  }
 0x3d5   : > { %10811 = vmatpush1.bf16.msra.mxu1 %v14325_v14  ;;  %v12618_v14 = vcombine.low %v18526_v57, %v4911_v15  ;;  %v19685_v57 = vshll.u32 %v19650_v51, 16  ;;  %v5376_v50 = vrot.slane %v5371_v33, 4  ;;  %v9928_v18 = vrot.slane %v9927_v30, 4 }
 0x3d6   : > { %5819 = vmatpush1.bf16.msra.mxu0 %v14331_v62  ;;  %10812 = vmatprep.subr.bf16.mxu1 %v14330_v31  ;;  %v5380_v59 = vrot.slane %v19684_v1, 7  ;;  %v9899_v31 = vsel %vm16868_vm2, %v9894_v25, %v18499_v10  ;;  %v9918_v9 = vrot.slane %v9917_v13, 4  ;;  %v9932_v34 = vrot.slane %v9930_v46, 5  ;;  %v10336_v13 = vld [vmem:[#allocation2 + $0x198] sm:$0x88] }
 0x3d7   : > { %5820 = vmatprep.subr.bf16.mxu0 %v14336_v5  ;;  %v13075_v40 = vcombine.high %v9899_v31, %v9909_v28  ;;  %v5374_v15 = vor.u32 %v5371_v33, %v19685_v57  ;;  %v19686_v10 = vshll.u32 %v19652_v6, 16  ;;  %v5386_v19 = vshrl.u32 %v5342_v39, 16  ;;  %v14345_v57 = vld [vmem:[#allocation11 + $0x6f4] ss:$8 sps:$4 sm:$0xff]  }
 0x3d8   : > { %10273 = vmatmul.mubr.bf16.gmra.mrb[20].mxu1 %v13072_v12  ;;  %v19687_v12 = vshrl.u32 %v17746_v29, 16  ;;  %v13074_v30 = vcombine.low %v9899_v31, %v9909_v28  ;;  %v9923_v46 = vsel %vm16868_vm2, %v9918_v9, %v9922_v35  ;;  %v19690_v28 = vshrl.u32 %v19662_v44, 16 }
 0x3d9   : > { %5286 = vmatmul.mubr.bf16.gmra.mrb[24].mxu0 %v12618_v14  ;;  %10813 = vmatpush1.bf16.msra.mxu1 %v14328_v2  ;;  %v5383_v25 = vor.u32 %v5380_v59, %v19686_v10  ;;  %v5375_v2 = vsel %vm16149_vm15, %v12654_v21, %v5374_v15  ;;  %v19688_v14 = vshrl.u32 %v17732_v37, 16  ;;  %v12620_v59 = vcombine.low %v4925_v53, %v4935_v17  ;;  %v14343_v53 = vld [vmem:[#allocation11 + $0x6f0] ss:$8 sps:$4 sm:$0xff]   ;;  %v14348_v10 = vld [vmem:[#allocation11 + $0x704] ss:$8 sps:$4 sm:$0xff]  }
 0x3da   : > { %5295 = vmatprep.mubr.bf16.mxu0 %v12621_v8  ;;  %5821 = vmatpush1.bf16.msra.mxu0 %v14334_v47  ;;  %v5393_v52 = vrot.slane %v19687_v12, 7  ;;  %v19689_v8 = vshrl.u32 %v17769_v42, 16  ;;  %v10368_v31 = vrot.slane %v19690_v28, 7  ;;  %v12655_v15 = vrot.slane %v5386_v19, 11 }
 0x3db   : > { %10282 = vmatprep.mubr.bf16.mxu1 %v13075_v40  ;;  %10814 = vmatprep.subr.bf16.mxu1 %v14333_v60  ;;  %v5384_v33 = vsel %vm16149_vm15, %v5376_v50, %v5383_v25  ;;  %v14340_v60 = vld [vmem:[#allocation11 + $0x6e0] ss:$8 sps:$4 sm:$0xff]   ;;  %v10377_v1 = vrot.slane %v19688_v14, 7  ;;  %v19691_v50 = vshll.u32 %v17746_v29, 16  ;;  %v19692_v17 = vshll.u32 %v17732_v37, 16 }
 0x3dc   : > { %5822 = vmatprep.subr.bf16.mxu0 %v14339_v7  ;;  %v5402_v40 = vrot.slane %v19689_v8, 7  ;;  %v12663_v21 = vcombine.high %v5375_v2, %v5384_v33  ;;  %v5398_v9 = vrot.slane %v5393_v52, 4  ;;  %v19693_v25 = vshll.u32 %v17769_v42, 16  ;;  %v10339_v8 = vld [vmem:[#allocation2 + $0x1c0] sm:$0x88] }
 0x3dd   : > { %10815 = vmatpush1.bf16.msra.mxu1 %v14331_v62  ;;  %v9933_v62 = vsel %vm16868_vm2, %v9928_v18, %v9932_v34  ;;  %v5396_v39 = vor.u32 %v5393_v52, %v19691_v50  ;;  %v10380_v18 = vor.u32 %v10377_v1, %v19692_v17  ;;  %v5345_v34 = vld [vmem:[#allocation2 + $0xa8] sm:$0x88]  ;;  %v19694_v19 = vshll.u32 %v19662_v44, 16 }
 0x3de   : > { %5823 = vmatpush1.bf16.msra.mxu0 %v14337_v16  ;;  %10816 = vmatprep.subr.bf16.mxu1 %v14336_v5  ;;  %v10361_v5 = vshrl.u32 %v10336_v13, 16  ;;  %v13077_v35 = vcombine.high %v9923_v46, %v9933_v62  ;;  %v5405_v12 = vor.u32 %v5402_v40, %v19693_v25  ;;  %v5408_v1 = vshrl.u32 %v5345_v34, 16  ;;  %v14346_v40 = vld [vmem:[#allocation11 + $0x700] ss:$8 sps:$4 sm:$0xff]   ;;  %v14349_v25 = vld [vmem:[#allocation11 + $0x710] ss:$8 sps:$4 sm:$0xff]  }
 0x3df   : > { %5824 = vmatprep.subr.bf16.mxu0 %v14342_v58  ;;  %v10371_v13 = vor.u32 %v10368_v31, %v19694_v19  ;;  %v5397_v52 = vsel %vm16149_vm15, %v12655_v15, %v5396_v39 }
 0x3e0   : > { %10283 = vmatmul.mubr.bf16.gmra.mrb[24].mxu1 %v13074_v30  ;;  %v10373_v30 = vrot.slane %v10368_v31, 4  ;;  %v5406_v14 = vsel %vm16149_vm15, %v5398_v9, %v5405_v12  ;;  %v12662_v31 = vcombine.low %v5375_v2, %v5384_v33  ;;  %v14351_v9 = vld [vmem:[#allocation11 + $0x714] ss:$8 sps:$4 sm:$0xff]   ;;  %v19699_v2 = vshll.u32 %v18088_v4, 16 }
 0x3e1   : > { %5296 = vmatmul.mubr.bf16.gmra.mrb[28].mxu0 %v12620_v59  ;;  %10817 = vmatpush1.bf16.msra.mxu1 %v14334_v47  ;;  %v13110_v47 = vrot.slane %v10361_v5, 11  ;;  %v12665_v50 = vcombine.high %v5397_v52, %v5406_v14  ;;  %v19700_v12 = vshll.u32 %v19665_v27, 16 }
 0x3e2   : > { %5825 = vmatpush1.bf16.msra.mxu0 %v14340_v60  ;;  %5828 = vmatprep.mubr.bf16.mxu0 %v12663_v21  ;;  %v13076_v21 = vcombine.low %v9923_v46, %v9933_v62  ;;  %v10381_v5 = vsel %vm16149_vm15, %v10373_v30, %v10380_v18  ;;  %v19698_v46 = vshrl.u32 %v19664_v0, 16  ;;  %v12656_v18 = vrot.slane %v5408_v1, 11 }
 0x3e3   : > { %10292 = vmatprep.mubr.bf16.mxu1 %v13077_v35  ;;  %10818 = vmatprep.subr.bf16.mxu1 %v14339_v7  ;;  %v19695_v7 = vshrl.u32 %v18088_v4, 16  ;;  %v19697_v35 = vshrl.u32 %v18104_v48, 16  ;;  %v10372_v39 = vsel %vm16149_vm15, %v13110_v47, %v10371_v13  ;;  %v5348_v47 = vld [vmem:[#allocation2 + $0xd0] sm:$0x88]  ;;  %v14354_v13 = vld [vmem:[#allocation11 + $0x724] ss:$8 sps:$4 sm:$0xff]  }
 0x3e4   : > { %5826 = vmatprep.subr.bf16.mxu0 %v14345_v57  ;;  %v10390_v62 = vrot.slane %v19698_v46, 7  ;;  %v13119_v17 = vcombine.high %v10372_v39, %v10381_v5  ;;  %v19701_v30 = vshll.u32 %v18104_v48, 16  ;;  %v19702_v1 = vshll.u32 %v19664_v0, 16 }
 0x3e5   : > { %10819 = vmatpush1.bf16.msra.mxu1 %v14337_v16  ;;  %v5415_v59 = vrot.slane %v19695_v7, 7  ;;  %v19696_v16 = vshrl.u32 %v19665_v27, 16  ;;  %v5424_v15 = vrot.slane %v19697_v35, 7  ;;  %v13118_v48 = vcombine.low %v10372_v39, %v10381_v5  ;;  %v14352_v35 = vld [vmem:[#allocation11 + $0x720] ss:$8 sps:$4 sm:$0xff]  }
 0x3e6   : > { %5827 = vmatpush1.bf16.msra.mxu0 %v14343_v53  ;;  %10820 = vmatprep.subr.bf16.mxu1 %v14342_v58  ;;  %v10383_v58 = vshrl.u32 %v10339_v8, 16  ;;  %v10393_v4 = vor.u32 %v10390_v62, %v19702_v1  ;;  %v10395_v8 = vrot.slane %v10390_v62, 4  ;;  %v19705_v46 = vshrl.u32 %v18217_v20, 16  ;;  %v14357_v5 = vld [vmem:[#allocation11 + $0x734] ss:$8 sps:$4 sm:$0xff]  }
 0x3e7   : > { %v10399_v28 = vrot.slane %v19696_v16, 7  ;;  %6214 = vmatprep.subr.bf16.mxu0 %v14348_v10  ;;  %v5418_v33 = vor.u32 %v5415_v59, %v19699_v2  ;;  %v5420_v34 = vrot.slane %v5415_v59, 4  ;;  %v5427_v7 = vor.u32 %v5424_v15, %v19701_v30 }
 0x3e8   : > { %10293 = vmatmul.mubr.bf16.gmra.mrb[28].mxu1 %v13076_v21  ;;  %v5430_v16 = vshrl.u32 %v5348_v47, 16  ;;  %v5446_v62 = vrot.slane %v19705_v46, 7  ;;  %v19708_v47 = vshll.u32 %v18208_v54, 16  ;;  %v19709_v1 = vshll.u32 %v18217_v20, 16  ;;  %v14358_v20 = vld [vmem:[#allocation11 + $0x740] ss:$8 sps:$4 sm:$0xff]  }
 0x3e9   : > { %5829 = vmatmul.mubr.bf16.vlgmr.msra.gmra.mrb[0].mxu0 %v12662_v31  ;;  %10821 = vmatpush1.bf16.msra.mxu1 %v14340_v60  ;;  %v10402_v19 = vor.u32 %v10399_v28, %v19700_v12  ;;  %v13111_v60 = vrot.slane %v10383_v58, 11  ;;  %v5419_v59 = vsel %vm16149_vm15, %v12656_v18, %v5418_v33  ;;  %v5428_v21 = vsel %vm16149_vm15, %v5420_v34, %v5427_v7  ;;  %v10342_v31 = vld [vmem:[#allocation2 + $0x1e8] sm:$0x88]  ;;  %v5351_v7 = vld [vmem:[#allocation2 + $0xf8] sm:$0x88] }
 0x3ea   : > { %5838 = vmatprep.mubr.bf16.mxu0 %v12665_v50  ;;  %6215 = vmatpush1.bf16.msra.mxu0 %v14346_v40  ;;  %v12664_v58 = vcombine.low %v5397_v52, %v5406_v14  ;;  %v10405_v39 = vshrl.u32 %v10342_v31, 16  ;;  %v12657_v34 = vrot.slane %v5430_v16, 11  ;;  %v19707_v52 = vshll.u32 %v18196_v32, 16 }
 0x3eb   : > { %10824 = vmatprep.mubr.bf16.mxu1 %v13119_v17  ;;  %10822 = vmatprep.subr.bf16.mxu1 %v14345_v57  ;;  %v19703_v57 = vshrl.u32 %v18196_v32, 16  ;;  %v10403_v15 = vsel %vm16149_vm15, %v10395_v8, %v10402_v19  ;;  %v12667_v17 = vcombine.high %v5419_v59, %v5428_v21  ;;  %v10394_v18 = vsel %vm16149_vm15, %v13111_v60, %v10393_v4  ;;  %v14355_v19 = vld [vmem:[#allocation11 + $0x730] ss:$8 sps:$4 sm:$0xff]   ;;  %v14360_v60 = vld [vmem:[#allocation11 + $0x744] ss:$8 sps:$4 sm:$0xff]  }
 0x3ec   : > { %6216 = vmatprep.subr.bf16.mxu0 %v14351_v9  ;;  %v13121_v33 = vcombine.high %v10394_v18, %v10403_v15  ;;  %v5449_v4 = vor.u32 %v5446_v62, %v19709_v1  ;;  %v19710_v8 = vshll.u32 %v18198_v55, 16  ;;  %v19713_v46 = vshrl.u32 %v18312_v63, 16 }
 0x3ed   : > { %10823 = vmatpush1.bf16.msra.mxu1 %v14343_v53  ;;  %v5437_v28 = vrot.slane %v19703_v57, 7  ;;  %v19704_v53 = vshrl.u32 %v18208_v54, 16 }
 0x3ee   : > { %6217 = vmatpush1.bf16.msra.mxu0 %v14349_v25  ;;  %11209 = vmatprep.subr.bf16.mxu1 %v14348_v10  ;;  %v19706_v10 = vshrl.u32 %v18198_v55, 16  ;;  %v5468_v62 = vrot.slane %v19713_v46, 7  ;;  %v14369_v46 = vld [vmem:[#allocation11 + $0x774] ss:$8 sps:$4 sm:$0xff]  }
 0x3ef   : > { %v10421_v50 = vrot.slane %v19704_v53, 7  ;;  %6218 = vmatprep.subr.bf16.mxu0 %v14354_v13  ;;  %v5440_v14 = vor.u32 %v5437_v28, %v19707_v52  ;;  %v5442_v12 = vrot.slane %v5437_v28, 4  ;;  %v5452_v28 = vshrl.u32 %v5351_v7, 16  ;;  %v14361_v52 = vld [vmem:[#allocation11 + $0x750] ss:$8 sps:$4 sm:$0xff]  }
 0x3f0   : > { %10825 = vmatmul.mubr.bf16.vlgmr.msra.gmra.mrb[0].mxu1 %v13118_v48  ;;  %v10412_v2 = vrot.slane %v19706_v10, 7  ;;  %v10345_v48 = vld [vmem:[#allocation2 + $0x210] sm:$0x88]  ;;  %v13120_v53 = vcombine.low %v10394_v18, %v10403_v15  ;;  %v19714_v15 = vshrl.u32 %v18305_v43, 16  ;;  %v19717_v7 = vshll.u32 %v18312_v63, 16 }
 0x3f1   : > { %5839 = vmatmul.mubr.bf16.gmra.mrb[4].mxu0 %v12664_v58  ;;  %11210 = vmatpush1.bf16.msra.mxu1 %v14346_v40  ;;  %v10424_v30 = vor.u32 %v10421_v50, %v19708_v47  ;;  %v13112_v40 = vrot.slane %v10405_v39, 11  ;;  %v5441_v57 = vsel %vm16149_vm15, %v12657_v34, %v5440_v14  ;;  %v5450_v54 = vsel %vm16149_vm15, %v5442_v12, %v5449_v4  ;;  %v14363_v10 = vld [vmem:[#allocation11 + $0x754] ss:$8 sps:$4 sm:$0xff]   ;;  %v5354_v47 = vld [vmem:[#allocation2 + $0x120] sm:$0x88] }
 0x3f2   : > { %5848 = vmatprep.mubr.bf16.mxu0 %v12667_v17  ;;  %6219 = vmatpush1.bf16.msra.mxu0 %v14352_v35  ;;  %v10415_v32 = vor.u32 %v10412_v2, %v19710_v8  ;;  %v10417_v16 = vrot.slane %v10412_v2, 4  ;;  %v12666_v58 = vcombine.low %v5419_v59, %v5428_v21  ;;  %v12669_v17 = vcombine.high %v5441_v57, %v5450_v54  ;;  %v14364_v63 = vld [vmem:[#allocation11 + $0x760] ss:$8 sps:$4 sm:$0xff]  }
 0x3f3   : > { %10834 = vmatprep.mubr.bf16.mxu1 %v13121_v33  ;;  %11211 = vmatprep.subr.bf16.mxu1 %v14351_v9  ;;  %v19711_v9 = vshrl.u32 %v18277_v38, 16  ;;  %v10434_v18 = vrot.slane %v19714_v15, 7  ;;  %v12658_v33 = vrot.slane %v5452_v28, 11  ;;  %v19715_v59 = vshll.u32 %v18277_v38, 16  ;;  %v10348_v28 = vld [vmem:[#allocation2 + $0x238] sm:$0x88] }
 0x3f4   : > { %6220 = vmatprep.subr.bf16.mxu0 %v14357_v5  ;;  %v10425_v55 = vsel %vm16149_vm15, %v10417_v16, %v10424_v30  ;;  %v10416_v39 = vsel %vm16149_vm15, %v13112_v40, %v10415_v32  ;;  %v19716_v14 = vshll.u32 %v18261_v22, 16  ;;  %v14366_v30 = vld [vmem:[#allocation11 + $0x764] ss:$8 sps:$4 sm:$0xff]   ;;  %v5471_v1 = vor.u32 %v5468_v62, %v19717_v7  ;;  %v14367_v15 = vld [vmem:[#allocation11 + $0x770] ss:$8 sps:$4 sm:$0xff]  }
 0x3f5   : > { %11212 = vmatpush1.bf16.msra.mxu1 %v14349_v25  ;;  %v5459_v31 = vrot.slane %v19711_v9, 7  ;;  %v19712_v25 = vshrl.u32 %v18261_v22, 16  ;;  %v13123_v2 = vcombine.high %v10416_v39, %v10425_v55  ;;  %v19718_v4 = vshll.u32 %v18305_v43, 16 }
 0x3f6   : > { %6221 = vmatpush1.bf16.msra.mxu0 %v14355_v19  ;;  %11213 = vmatprep.subr.bf16.mxu1 %v14354_v13  ;;  %v10427_v13 = vshrl.u32 %v10345_v48, 16  ;;  %v10439_v40 = vrot.slane %v10434_v18, 4  ;;  %v5474_v32 = vshrl.u32 %v5354_v47, 16  ;;  %v13122_v9 = vcombine.low %v10416_v39, %v10425_v55 }
 0x3f7   : > { %v10443_v50 = vrot.slane %v19712_v25, 7  ;;  %6222 = vmatprep.subr.bf16.mxu0 %v14360_v60  ;;  %v5462_v21 = vor.u32 %v5459_v31, %v19715_v59  ;;  %v5464_v34 = vrot.slane %v5459_v31, 4  ;;  %v10437_v38 = vor.u32 %v10434_v18, %v19718_v4  ;;  %v14372_v59 = vld [vmem:[#allocation11 + $0x784] ss:$8 sps:$4 sm:$0xff]  }
 0x3f8   : > { %10835 = vmatmul.mubr.bf16.gmra.mrb[4].mxu1 %v13120_v53  ;;  %v12668_v48 = vcombine.low %v5441_v57, %v5450_v54  ;;  %v19721_v53 = vshrl.u32 %v18397_v61, 16  ;;  %v19722_v55 = vshrl.u32 %v18406_v36, 16  ;;  %v12659_v39 = vrot.slane %v5474_v32, 11 }
 0x3f9   : > { %5849 = vmatmul.mubr.bf16.gmra.mrb[8].mxu0 %v12666_v58  ;;  %11214 = vmatpush1.bf16.msra.mxu1 %v14352_v35  ;;  %v10446_v12 = vor.u32 %v10443_v50, %v19716_v14  ;;  %v13113_v35 = vrot.slane %v10427_v13, 11  ;;  %v5463_v8 = vsel %vm16149_vm15, %v12658_v33, %v5462_v21  ;;  %v5472_v22 = vsel %vm16149_vm15, %v5464_v34, %v5471_v1  ;;  %v5357_v33 = vld [vmem:[#allocation2 + $0x148] sm:$0x88]  ;;  %v10351_v1 = vld [vmem:[#allocation2 + $0x260] sm:$0x88] }
 0x3fa   : > { %5858 = vmatprep.mubr.bf16.mxu0 %v12669_v17  ;;  %6223 = vmatpush1.bf16.msra.mxu0 %v14358_v20  ;;  %v5490_v25 = vrot.slane %v19721_v53, 7  ;;  %v12671_v50 = vcombine.high %v5463_v8, %v5472_v22  ;;  %v10456_v62 = vrot.slane %v19722_v55, 7  ;;  %v19723_v57 = vshll.u32 %v18357_v56, 16  ;;  %v14499_v53 = vld [vmem:[#allocation2 + $0x180] sm:$0xff] }
 0x3fb   : > { %10844 = vmatprep.mubr.bf16.mxu1 %v13123_v2  ;;  %11215 = vmatprep.subr.bf16.mxu1 %v14357_v5  ;;  %v19719_v5 = vshrl.u32 %v18357_v56, 16  ;;  %v10447_v43 = vsel %vm16149_vm15, %v10439_v40, %v10446_v12  ;;  %v10438_v58 = vsel %vm16149_vm15, %v13113_v35, %v10437_v38  ;;  %v19724_v18 = vshll.u32 %v18369_v23, 16  ;;  %v14370_v35 = vld [vmem:[#allocation11 + $0x780] ss:$8 sps:$4 sm:$0xff]   ;;  %v14378_v55 = vld [vmem:[#allocation11 + $0x7a4] ss:$8 sps:$4 sm:$0xff]  }
 0x3fc   : > { %6224 = vmatprep.subr.bf16.mxu0 %v14363_v10  ;;  %v13125_v17 = vcombine.high %v10438_v58, %v10447_v43  ;;  %v19725_v21 = vshll.u32 %v18397_v61, 16  ;;  %v19727_v12 = vshll.u32 %v18406_v36, 16  ;;  %v10461_v7 = vrot.slane %v10456_v62, 4 }
 0x3fd   : > { %11216 = vmatpush1.bf16.msra.mxu1 %v14355_v19  ;;  %v5481_v16 = vrot.slane %v19719_v5, 7  ;;  %v19720_v19 = vshrl.u32 %v18369_v23, 16  ;;  %v5496_v61 = vshrl.u32 %v5357_v33, 16  ;;  %v13124_v4 = vcombine.low %v10438_v58, %v10447_v43  ;;  %v14375_v43 = vld [vmem:[#allocation11 + $0x794] ss:$8 sps:$4 sm:$0xff]  }
 0x3fe   : > { %6225 = vmatpush1.bf16.msra.mxu0 %v14361_v52  ;;  %11217 = vmatprep.subr.bf16.mxu1 %v14360_v60  ;;  %v10449_v60 = vshrl.u32 %v10348_v28, 16  ;;  %v5493_v34 = vor.u32 %v5490_v25, %v19725_v21  ;;  %v10459_v47 = vor.u32 %v10456_v62, %v19727_v12  ;;  %v19728_v38 = vshrl.u32 %v18446_v49, 16  ;;  %v5360_v33 = vld [vmem:[#allocation2 + $0x170] sm:$0x88]  ;;  %v19736_v12 = vld [vmem:[#allocation43_spill] sm:$0xff] }
 0x3ff   : > { %v10465_v31 = vrot.slane %v19720_v19, 7  ;;  %6226 = vmatprep.subr.bf16.mxu0 %v14366_v30  ;;  %v5484_v54 = vor.u32 %v5481_v16, %v19723_v57  ;;  %v5486_v13 = vrot.slane %v5481_v16, 4  ;;  %v12670_v40 = vcombine.low %v5463_v8, %v5472_v22 }
 0x400   : > { %10845 = vmatmul.mubr.bf16.gmra.mrb[8].mxu1 %v13122_v9  ;;  %v13114_v56 = vrot.slane %v10449_v60, 11  ;;  %v19729_v32 = vshll.u32 %v18318_v26, 16  ;;  %v19730_v16 = vshrl.u32 %v18442_v45, 16  ;;  %v10471_v19 = vshrl.u32 %v10351_v1, 16 }
 0x401   : > { %5859 = vmatmul.mubr.bf16.gmra.mrb[12].mxu0 %v12668_v48  ;;  %11218 = vmatpush1.bf16.msra.mxu1 %v14358_v20  ;;  %v10468_v2 = vor.u32 %v10465_v31, %v19724_v18  ;;  %v19726_v20 = vshrl.u32 %v18318_v26, 16  ;;  %v18697_v23 = vsel %vm16149_vm15, %v12659_v39, %v5484_v54  ;;  %v19731_v31 = vshrl.u32 %v18473_v24, 16  ;;  %v14500_v39 = vld [vmem:[#allocation2 + $0x178] sm:$0xff] }
 0x402   : > { %5868 = vmatprep.mubr.bf16.mxu0 %v12671_v50  ;;  %6227 = vmatpush1.bf16.msra.mxu0 %v14364_v63  ;;  %v5512_v28 = vrot.slane %v19730_v16, 7  ;;  %v10460_v9 = vsel %vm16149_vm15, %v13114_v56, %v10459_v47  ;;  %v12660_v26 = vrot.slane %v5496_v61, 11  ;;  %v5532_v25 = vshrl.u32 %v14499_v53, 16  ;;  %v14373_v50 = vld [vmem:[#allocation11 + $0x790] ss:$8 sps:$4 sm:$0xff]  }
 0x403   : > { %10854 = vmatprep.mubr.bf16.mxu1 %v13125_v17  ;;  %11219 = vmatprep.subr.bf16.mxu1 %v14363_v10  ;;  %v5503_v14 = vrot.slane %v19726_v20, 7  ;;  %v18701_v10 = vsel %vm16149_vm15, %v5486_v13, %v5493_v34  ;;  %v10469_v36 = vsel %vm16149_vm15, %v10461_v7, %v10468_v2  ;;  %v10478_v48 = vrot.slane %v19731_v31, 7  ;;  %v14376_v34 = vld [vmem:[#allocation11 + $0x7a0] ss:$8 sps:$4 sm:$0xff]  }
 0x404   : > { %6228 = vmatprep.subr.bf16.mxu0 %v14369_v46  ;;  %v13127_v8 = vcombine.high %v10460_v9, %v10469_v36  ;;  %v19732_v58 = vshll.u32 %v18446_v49, 16  ;;  %v19733_v62 = vshll.u32 %v18442_v45, 16  ;;  %v5523_v57 = vshrl.u32 %v14500_v39, 16 }
 0x405   : > { %11220 = vmatpush1.bf16.msra.mxu1 %v14361_v52  ;;  %v10487_v52 = vrot.slane %v19728_v38, 7  ;;  %v5506_v5 = vor.u32 %v5503_v14, %v19729_v32  ;;  %v5508_v22 = vrot.slane %v5503_v14, 4  ;;  %v13115_v54 = vrot.slane %v10471_v19, 11  ;;  %v14381_v38 = vld [vmem:[#allocation11 + $0x7b4] ss:$8 sps:$4 sm:$0xff]  }
 0x406   : > { %6229 = vmatpush1.bf16.msra.mxu0 %v14367_v15  ;;  %11221 = vmatprep.subr.bf16.mxu1 %v14366_v30  ;;  %v12673_v30 = vcombine.high %v18697_v23, %v18701_v10  ;;  %v5515_v17 = vor.u32 %v5512_v28, %v19733_v62  ;;  %v19734_v13 = vshll.u32 %v18473_v24, 16  ;;  %v10483_v2 = vrot.slane %v10478_v48, 4 }
 0x407   : > { %6230 = vmatprep.subr.bf16.mxu0 %v14372_v59  ;;  %v10490_v60 = vor.u32 %v10487_v52, %v19732_v58  ;;  %v13126_v21 = vcombine.low %v10460_v9, %v10469_v36  ;;  %v5507_v49 = vsel %vm16149_vm15, %v12660_v26, %v5506_v5  ;;  %v5534_v45 = vrot.slane %v5532_v25, 7  ;;  %v18737_v5 = vld [vmem:[#allocation2 + $0x10] sm:$0xff] }
 0x408   : > { %10855 = vmatmul.mubr.bf16.gmra.mrb[12].mxu1 %v13124_v4  ;;  %v10481_v18 = vor.u32 %v10478_v48, %v19734_v13  ;;  %v19735_v24 = vshrl.u32 %v18513_v11, 16  ;;  %v12672_v7 = vcombine.low %v18697_v23, %v18701_v10  ;;  %v5518_v61 = vshrl.u32 %v5360_v33, 16  ;;  %v14379_v23 = vld [vmem:[#allocation11 + $0x7b0] ss:$8 sps:$4 sm:$0xff]   ;;  %v14390_v33 = vld [vmem:[#allocation11 + $0x7e4] ss:$8 sps:$4 sm:$0xff]  }
 0x409   : > { %5869 = vmatmul.mubr.bf16.gmra.mrb[16].mxu0 %v12670_v40  ;;  %11222 = vmatpush1.bf16.msra.mxu1 %v14364_v63  ;;  %v10354_v63 = vld [vmem:[#allocation2 + $0x288] sm:$0x88]  ;;  %v10491_v20 = vsel %vm16149_vm15, %v10483_v2, %v10490_v60  ;;  %v5525_v1 = vrot.slane %v5523_v57, 7  ;;  %v5535_v4 = vshll.u32 %v14499_v53, 16  ;;  %v5526_v40 = vshll.u32 %v14500_v39, 16 }
 0x40a   : > { %5878 = vmatprep.mubr.bf16.mxu0 %v12673_v30  ;;  %6231 = vmatpush1.bf16.msra.mxu0 %v14370_v35  ;;  %v10493_v14 = vshrl.u32 %v10354_v63, 16  ;;  %v10500_v56 = vrot.slane %v19735_v24, 7  ;;  %v10482_v36 = vsel %vm16149_vm15, %v13115_v54, %v10481_v18  ;;  %v10520_v16 = vshrl.u32 %v18737_v5, 16  ;;  %v10357_v48 = vld [vmem:[#allocation2 + $0x2b0] sm:$0x88] }
 0x40b   : > { %10864 = vmatprep.mubr.bf16.mxu1 %v13127_v8  ;;  %11223 = vmatprep.subr.bf16.mxu1 %v14369_v46  ;;  %v5516_v46 = vsel %vm16149_vm15, %v5508_v22, %v5515_v17  ;;  %v13129_v52 = vcombine.high %v10482_v36, %v10491_v20  ;;  %v5537_v32 = vor.u32 %v5535_v4, %v5534_v45  ;;  %v19738_v28 = vshll.u32 %v18513_v11, 16  ;;  %v14382_v60 = vld [vmem:[#allocation11 + $0x7c0] ss:$8 sps:$4 sm:$0xff]   ;;  %v14387_v63 = vld [vmem:[#allocation11 + $0x7d4] ss:$8 sps:$4 sm:$0xff]  }
 0x40c   : > { %6232 = vmatprep.subr.bf16.mxu0 %v14375_v43  ;;  %v13116_v10 = vrot.slane %v10493_v14, 11  ;;  %v10505_v9 = vrot.slane %v10500_v56, 4  ;;  %v19739_v19 = vshll.u32 %v19736_v12, 16  ;;  %v12661_v8 = vrot.slane %v5518_v61, 11  ;;  %v14385_v2 = vld [vmem:[#allocation11 + $0x7d0] ss:$8 sps:$4 sm:$0xff]  }
 0x40d   : > { %11224 = vmatpush1.bf16.msra.mxu1 %v14367_v15  ;;  %v19737_v15 = vshrl.u32 %v19736_v12, 16  ;;  %v10503_v30 = vor.u32 %v10500_v56, %v19738_v28  ;;  %v5528_v26 = vor.u32 %v5526_v40, %v5525_v1  ;;  %v5530_v22 = vrot.slane %v5525_v1, 4  ;;  %v1796_v24 = vld [vmem:[#allocation2 + $0x2c8] sm:$0x11]  ;;  %v14396_v61 = vld [vmem:[#allocation11 + $0x800] ss:$8 sps:$4 sm:$0xff]  }
 0x40e   : > { %6233 = vmatpush1.bf16.msra.mxu0 %v14373_v50  ;;  %11225 = vmatprep.subr.bf16.mxu1 %v14372_v59  ;;  %v12675_v59 = vcombine.high %v5507_v49, %v5516_v46  ;;  %v10515_v25 = vshrl.u32 %v10357_v48, 16  ;;  %v10522_v58 = vrot.slane %v10520_v16, 7  ;;  %v10523_v11 = vshll.u32 %v18737_v5, 16  ;;  %v14392_v12 = vld [vmem:[#allocation11 + $0x7f0] ss:$8 sps:$4 sm:$0xff]  }
 0x40f   : > { %v10509_v47 = vrot.slane %v19737_v15, 7  ;;  %6234 = vmatprep.subr.bf16.mxu0 %v14378_v55  ;;  %v5538_v53 = vsel %vm16149_vm15, %v5530_v22, %v5537_v32  ;;  %v13128_v62 = vcombine.low %v10482_v36, %v10491_v20  ;;  %v12674_v39 = vcombine.low %v5507_v49, %v5516_v46  ;;  %v14388_v46 = vld [vmem:[#allocation11 + $0x7e0] ss:$8 sps:$4 sm:$0xff]   ;;  %v14394_v20 = vld [vmem:[#allocation11 + $0x7f4] ss:$8 sps:$4 sm:$0xff]  }
 0x410   : > { %10865 = vmatmul.mubr.bf16.gmra.mrb[16].mxu1 %v13126_v21  ;;  %v10525_v13 = vor.u32 %v10523_v11, %v10522_v58  ;;  %v10527_v18 = vrot.slane %v10522_v58, 4  ;;  %v19740_v56 = vcombine.high %v19650_v51, %v19652_v6  ;;  %v1797_v15 = vsel %vm15365_vm13, 0, %v1796_v24  ;;  %v14403_v1 = vld [vmem:[#allocation11 + $0x814] ss:$8 sps:$4 sm:$0xff]   ;;  %v14401_v36 = vld [vmem:[#allocation11 + $0x810] ss:$8 sps:$4 sm:$0xff]  }
 0x411   : > { %5879 = vmatmul.mubr.bf16.gmra.mrb[20].mxu0 %v12672_v7  ;;  %11226 = vmatpush1.bf16.msra.mxu1 %v14370_v35  ;;  %v10512_v31 = vor.u32 %v10509_v47, %v19739_v19  ;;  %v14384_v35 = vld [vmem:[#allocation11 + $0x7c4] ss:$8 sps:$4 sm:$0xff]   ;;  %1798 = vst [vmem:[#allocation2 + $0x2c8] sm:$0x11] %v1797_v15  ;;  %v19742_v4 = vcombine.low %v19650_v51, %v19652_v6  ;;  %v14405_v40 = vld [vmem:[#allocation11 + $0x820] ss:$8 sps:$4 sm:$0xff]  }
 0x412   : > { %5888 = vmatprep.mubr.bf16.mxu0 %v12675_v59  ;;  %6235 = vmatpush1.bf16.msra.mxu0 %v14376_v34  ;;  %v10535_v49 = vsel %vm16149_vm15, %v10527_v18, %v10525_v13  ;;  %v14398_v47 = vld [vmem:[#allocation11 + $0x804] ss:$8 sps:$4 sm:$0xff]   ;;  %v19743_v59 = vcombine.high %v17746_v29, %v17769_v42  ;;  %v19745_v51 = vcombine.low %v19662_v44, %v17732_v37  ;;  %v14502_v6 = vld [vmem:[#allocation2 + $0xb0] sm:$0xff]  ;;  %v14503_v32 = vld [vmem:[#allocation2 + $0xb8] sm:$0xff] }
 0x413   : > { %10874 = vmatprep.mubr.bf16.mxu1 %v13129_v52  ;;  %11227 = vmatprep.subr.bf16.mxu1 %v14375_v43  ;;  %v10504_v43 = vsel %vm16149_vm15, %v13116_v10, %v10503_v30  ;;  %v10513_v17 = vsel %vm16149_vm15, %v10505_v9, %v10512_v31  ;;  %v14407_v52 = vld [vmem:[#allocation11 + $0x824] ss:$8 sps:$4 sm:$0xff]   ;;  %v12715_v16 = vcombine.high %v14502_v6, %v14503_v32  ;;  %v14411_v28 = vld [vmem:[#allocation11 + $0x830] ss:$8 sps:$4 sm:$0xff]   ;;  %v14423_v48 = vld [vmem:[#allocation11 + $0x854] ss:$8 sps:$4 sm:$0xff]  }
 0x414   : > { %6236 = vmatprep.subr.bf16.mxu0 %v14381_v38  ;;  %v13131_v54 = vcombine.high %v10504_v43, %v10513_v17  ;;  %v13130_v45 = vcombine.low %v10504_v43, %v10513_v17  ;;  %v19746_v10 = vcombine.low %v17746_v29, %v17769_v42  ;;  %v19747_v30 = vcombine.high %v19664_v0, %v19665_v27  ;;  %v14417_v9 = vld [vmem:[#allocation11 + $0x844] ss:$8 sps:$4 sm:$0xff]   ;;  %v14504_v42 = vld [vmem:[#allocation2 + $0xd8] sm:$0xff]  ;;  %v14421_v22 = vld [vmem:[#allocation11 + $0x850] ss:$8 sps:$4 sm:$0xff]  }
 0x415   : > { %11228 = vmatpush1.bf16.msra.mxu1 %v14373_v50  ;;  %v5529_v50 = vsel %vm16149_vm15, %v12661_v8, %v5528_v26  ;;  %v19748_v29 = vcombine.low %v19664_v0, %v19665_v27  ;;  %v14505_v19 = vld [vmem:[#allocation2 + $0xe0] sm:$0xff]  ;;  %v14507_v8 = vld [vmem:[#allocation2 + $0x1f8] sm:$0xff]  ;;  %v14509_v11 = vld [vmem:[#allocation2 + $0x108] sm:$0xff] }
 0x416   : > { %6237 = vmatpush1.bf16.msra.mxu0 %v14379_v23  ;;  %11229 = vmatprep.subr.bf16.mxu1 %v14378_v55  ;;  %v12677_v57 = vcombine.high %v5529_v50, %v5538_v53  ;;  %v13117_v55 = vrot.slane %v10515_v25, 11  ;;  %v12717_v31 = vcombine.high %v14504_v42, %v14505_v19  ;;  %v14425_v0 = vld [vmem:[#allocation11 + $0x860] ss:$8 sps:$4 sm:$0xff]   ;;  %v12716_v25 = vcombine.low %v14504_v42, %v14505_v19  ;;  %v18783_v42 = vld [vmem:[#allocation11 + $0x8b4] ss:$8 sps:$4 sm:$0xff]  }
 0x417   : > { %6238 = vmatprep.subr.bf16.mxu0 %v14384_v35  ;;  %v14508_v58 = vld [vmem:[#allocation2 + $0x100] sm:$0xff]  ;;  %v14511_v17 = vld [vmem:[#allocation2 + $0x218] sm:$0xff] }
 0x418   : > { %10875 = vmatmul.mubr.bf16.gmra.mrb[20].mxu1 %v13128_v62  ;;  %v10526_v21 = vsel %vm16149_vm15, %v13117_v55, %v10525_v13  ;;  %v14433_v62 = vld [vmem:[#allocation11 + $0x874] ss:$8 sps:$4 sm:$0xff]   ;;  %v14510_v43 = vld [vmem:[#allocation2 + $0x220] sm:$0xff] }
 0x419   : > { %5889 = vmatmul.mubr.bf16.gmra.mrb[24].mxu0 %v12674_v39  ;;  %11230 = vmatpush1.bf16.msra.mxu1 %v14376_v34  ;;  %v12676_v34 = vcombine.low %v5529_v50, %v5538_v53  ;;  %v13133_v14 = vcombine.high %v10526_v21, %v10535_v49  ;;  %v13132_v7 = vcombine.low %v10526_v21, %v10535_v49  ;;  %v14427_v53 = vld [vmem:[#allocation11 + $0x864] ss:$8 sps:$4 sm:$0xff]   ;;  %v14435_v18 = vld [vmem:[#allocation11 + $0x880] ss:$8 sps:$4 sm:$0xff]  }
 0x41a   : > { %5898 = vmatprep.mubr.bf16.mxu0 %v12677_v57  ;;  %6239 = vmatpush1.bf16.msra.mxu0 %v14382_v60  ;;  %v13173_v39 = vcombine.high %v14511_v17, %v14510_v43  ;;  %v6359_v50 = vld [vmem:[#allocation2 + $0x60] sm:$0xff]  ;;  %v14431_v57 = vld [vmem:[#allocation11 + $0x870] ss:$8 sps:$4 sm:$0xff]   ;;  %v6364_v19 = vld [vmem:[#allocation2 + $0x98] sm:$0x11] }
 0x41b   : > { %10884 = vmatprep.mubr.bf16.mxu1 %v13131_v54  ;;  %11231 = vmatprep.subr.bf16.mxu1 %v14381_v38  ;;  %v19744_v38 = vcombine.high %v19662_v44, %v17732_v37  ;;  %v14415_v37 = vld [vmem:[#allocation11 + $0x840] ss:$8 sps:$4 sm:$0xff]   ;;  %v12714_v44 = vcombine.low %v14502_v6, %v14503_v32  ;;  %v6360_v54 = vld [vmem:[#allocation2 + $0x68] sm:$0xff]  ;;  %v6384_v55 = vshrl.u32 %v6359_v50, 16  ;;  %v6387_v13 = vshll.u32 %v6359_v50, 16 }
 0x41c   : > { %6240 = vmatprep.subr.bf16.mxu0 %v14387_v63  ;;  %v6397_v21 = vshrl.u32 %v6360_v54, 16  ;;  %v6362_v49 = vld [vmem:[#allocation2 + $0x88] sm:$0xff] }
 0x41d   : > { %11232 = vmatpush1.bf16.msra.mxu1 %v14379_v23  ;;  %v14413_v23 = vld [vmem:[#allocation11 + $0x834] ss:$8 sps:$4 sm:$0xff]   ;;  %v6386_v24 = vrot.slane %v6384_v55, 4 }
 0x41e   : > { %6241 = vmatpush1.bf16.msra.mxu0 %v14385_v2  ;;  %11233 = vmatprep.subr.bf16.mxu1 %v14384_v35  ;;  %v14506_v35 = vld [vmem:[#allocation2 + $0x1f0] sm:$0xff] }
 0x41f   : > { %6242 = vmatprep.subr.bf16.mxu0 %v14390_v33  ;;  %v13171_v26 = vcombine.high %v14506_v35, %v14507_v8  ;;  %v13170_v27 = vcombine.low %v14506_v35, %v14507_v8  ;;  %v14516_v35 = vld [vmem:[#allocation2 + $0x270] sm:$0xff]  ;;  %v14517_v8 = vld [vmem:[#allocation2 + $0x268] sm:$0xff] }
 0x420   : > { %10885 = vmatmul.mubr.bf16.gmra.mrb[24].mxu1 %v13130_v45  ;;  %v14512_v45 = vld [vmem:[#allocation2 + $0x128] sm:$0xff] }
 0x421   : > { %5899 = vmatmul.mubr.bf16.gmra.mrb[28].mxu0 %v12676_v34  ;;  %11234 = vmatpush1.bf16.msra.mxu1 %v14382_v60  ;;  %v12719_v60 = vcombine.high %v14508_v58, %v14509_v11  ;;  %v14513_v34 = vld [vmem:[#allocation2 + $0x130] sm:$0xff] }
 0x422   : > { %6243 = vmatpush1.bf16.msra.mxu0 %v14388_v46  ;;  %6246 = vmatprep.mubr.bf16.mxu0 %v19740_v56  ;;  %v6363_v56 = vld [vmem:[#allocation2 + $0x90] sm:$0xff] }
 0x423   : > { %11235 = vmatprep.subr.bf16.mxu1 %v14387_v63  ;;  %6244 = vmatprep.subr.bf16.mxu0 %v14394_v20  ;;  %v14437_v63 = vld [vmem:[#allocation11 + $0x884] ss:$8 sps:$4 sm:$0xff]  }
 0x424   : > { %10894 = vmatprep.mubr.bf16.mxu1 %v13133_v14  ;;  %v14443_v14 = vld [vmem:[#allocation11 + $0x894] ss:$8 sps:$4 sm:$0xff]  }
 0x425   : > { %11236 = vmatpush1.bf16.msra.mxu1 %v14385_v2  ;;  %v13172_v2 = vcombine.low %v14511_v17, %v14510_v43  ;;  %v18790_v43 = vld [vmem:[#allocation11 + $0x8c4] ss:$8 sps:$4 sm:$0xff]  }
 0x426   : > { %6245 = vmatpush1.bf16.msra.mxu0 %v14392_v12  ;;  %11237 = vmatprep.subr.bf16.mxu1 %v14390_v33  ;;  %v6393_v33 = vshll.u32 %v6360_v54, 16 }
 0x427   : > { %6832 = vmatprep.subr.bf16.mxu0 %v14398_v47 }
 0x428   : > { %10895 = vmatmul.mubr.bf16.gmra.mrb[28].mxu1 %v13132_v7  ;;  %v6408_v7 = vshrl.u32 %v6362_v49, 16 }
 0x429   : > { %6247 = vmatmul.mubr.bf16.vlgmr.msra.gmra.mrb[0].mxu0 %v19742_v4  ;;  %11238 = vmatpush1.bf16.msra.mxu1 %v14388_v46  ;;  %v12718_v46 = vcombine.low %v14508_v58, %v14509_v11  ;;  %v6395_v4 = vrot.slane %v6393_v33, 5  ;;  %v18788_v58 = vld [vmem:[#allocation11 + $0x8b0] ss:$8 sps:$4 sm:$0xff]   ;;  %v18798_v33 = vld [vmem:[#allocation11 + $0x8c0] ss:$8 sps:$4 sm:$0xff]  }
 0x42a   : > { %6256 = vmatprep.mubr.bf16.mxu0 %v19743_v59  ;;  %6833 = vmatpush1.bf16.msra.mxu0 %v14396_v61  ;;  %v6399_v59 = vrot.slane %v6397_v21, 4  ;;  %v6410_v6 = vrot.slane %v6408_v7, 4  ;;  %v13176_v21 = vcombine.low %v14517_v8, %v14516_v35 }
 0x42b   : > { %11241 = vmatprep.mubr.bf16.mxu1 %v19744_v38  ;;  %11239 = vmatprep.subr.bf16.mxu1 %v14394_v20  ;;  %v12721_v20 = vcombine.high %v14512_v45, %v14513_v34  ;;  %v6361_v38 = vld [vmem:[#allocation2 + $0x70] sm:$0x11] }
 0x42c   : > { %6834 = vmatprep.subr.bf16.mxu0 %v14403_v1 }
 0x42d   : > { %11240 = vmatpush1.bf16.msra.mxu1 %v14392_v12  ;;  %v14514_v12 = vld [vmem:[#allocation2 + $0x248] sm:$0xff] }
 0x42e   : > { %6835 = vmatpush1.bf16.msra.mxu0 %v14401_v36  ;;  %11826 = vmatprep.subr.bf16.mxu1 %v14398_v47  ;;  %v13175_v15 = vcombine.high %v14515_v41, %v14514_v12  ;;  %v6389_v47 = vrot.slane %v6387_v13, 5 }
 0x42f   : > { %6836 = vmatprep.subr.bf16.mxu0 %v14407_v52 }
 0x430   : > { %11242 = vmatmul.mubr.bf16.vlgmr.msra.gmra.mrb[0].mxu1 %v19745_v51  ;;  %v6390_v51 = vor.u32 %v6389_v47, %v6386_v24 }
 0x431   : > { %6257 = vmatmul.mubr.bf16.gmra.mrb[4].mxu0 %v19746_v10  ;;  %11827 = vmatpush1.bf16.msra.mxu1 %v14396_v61  ;;  %v6411_v61 = vshll.u32 %v6362_v49, 16  ;;  %v13174_v10 = vcombine.low %v14515_v41, %v14514_v12  ;;  %v18807_v12 = vld [vmem:[#allocation11 + $0x8d4] ss:$8 sps:$4 sm:$0xff]  }
 0x432   : > { %6266 = vmatprep.mubr.bf16.mxu0 %v12715_v16  ;;  %6837 = vmatpush1.bf16.msra.mxu0 %v14405_v40  ;;  %v11354_v16 = vld [vmem:[#allocation2 + $0x1a0] sm:$0xff] }
 0x433   : > { %11251 = vmatprep.mubr.bf16.mxu1 %v19747_v30  ;;  %11828 = vmatprep.subr.bf16.mxu1 %v14403_v1  ;;  %v14441_v1 = vld [vmem:[#allocation11 + $0x890] ss:$8 sps:$4 sm:$0xff]   ;;  %v6413_v32 = vrot.slane %v6411_v61, 5  ;;  %v6403_v30 = vshll.u32 %v6361_v38, 16 }
 0x434   : > { %6838 = vmatprep.subr.bf16.mxu0 %v14413_v23  ;;  %v11358_v61 = vld [vmem:[#allocation2 + $0x1d0] sm:$0xff] }
 0x435   : > { %11829 = vmatpush1.bf16.msra.mxu1 %v14401_v36  ;;  %v14447_v36 = vld [vmem:[#allocation11 + $0x8a4] ss:$8 sps:$4 sm:$0xff]  }
 0x436   : > { %6839 = vmatpush1.bf16.msra.mxu0 %v14411_v28  ;;  %11830 = vmatprep.subr.bf16.mxu1 %v14407_v52  ;;  %v6417_v52 = vshll.u32 %v6363_v56, 16 }
 0x437   : > { %6840 = vmatprep.subr.bf16.mxu0 %v14417_v9 }
 0x438   : > { %11252 = vmatmul.mubr.bf16.gmra.mrb[4].mxu1 %v19748_v29  ;;  %v11355_v29 = vld [vmem:[#allocation2 + $0x1a8] sm:$0xff] }
 0x439   : > { %6267 = vmatmul.mubr.bf16.gmra.mrb[8].mxu0 %v12714_v44  ;;  %11831 = vmatpush1.bf16.msra.mxu1 %v14405_v40  ;;  %v6421_v40 = vshrl.u32 %v6363_v56, 16  ;;  %v11388_v50 = vshll.u32 %v11355_v29, 16  ;;  %v11357_v56 = vld [vmem:[#allocation2 + $0x1c8] sm:$0xff] }
 0x43a   : > { %6276 = vmatprep.mubr.bf16.mxu0 %v12717_v31  ;;  %6841 = vmatpush1.bf16.msra.mxu0 %v14415_v37  ;;  %v11379_v31 = vshrl.u32 %v11354_v16, 16 }
 0x43b   : > { %11261 = vmatprep.mubr.bf16.mxu1 %v13171_v26  ;;  %11832 = vmatprep.subr.bf16.mxu1 %v14413_v23  ;;  %v14445_v23 = vld [vmem:[#allocation11 + $0x8a0] ss:$8 sps:$4 sm:$0xff]   ;;  %v6423_v44 = vrot.slane %v6421_v40, 4  ;;  %v13177_v26 = vcombine.high %v14517_v8, %v14516_v35 }
 0x43c   : > { %6842 = vmatprep.subr.bf16.mxu0 %v14423_v48 }
 0x43d   : > { %11833 = vmatpush1.bf16.msra.mxu1 %v14411_v28  ;;  %v6400_v28 = vor.u32 %v6399_v59, %v6395_v4  ;;  %v14519_v59 = vld [vmem:[#allocation2 + $0x298] sm:$0xff] }
 0x43e   : > { %6843 = vmatpush1.bf16.msra.mxu0 %v14421_v22  ;;  %11834 = vmatprep.subr.bf16.mxu1 %v14417_v9  ;;  %v12720_v9 = vcombine.low %v14512_v45, %v14513_v34 }
 0x43f   : > { %6844 = vmatprep.subr.bf16.mxu0 %v14427_v53  ;;  %v6401_v11 = vrot.slane %v6400_v28, 4  ;;  %v11403_v28 = vshrl.u32 %v11357_v56, 16 }
 0x440   : > { %11262 = vmatmul.mubr.bf16.gmra.mrb[8].mxu1 %v13170_v27  ;;  %v19750_v27 = vld [vmem:[#allocation44_spill] sm:$0xff] }
 0x441   : > { %6277 = vmatmul.mubr.bf16.gmra.mrb[12].mxu0 %v12716_v25  ;;  %11835 = vmatpush1.bf16.msra.mxu1 %v14415_v37  ;;  %v6419_v37 = vrot.slane %v6417_v52, 5 }
 0x442   : > { %6286 = vmatprep.mubr.bf16.mxu0 %v12719_v60  ;;  %6845 = vmatpush1.bf16.msra.mxu0 %v14425_v0  ;;  %v6405_v60 = vrot.slane %v6403_v30, 5  ;;  %v11406_v30 = vshll.u32 %v11357_v56, 16 }
 0x443   : > { %11271 = vmatprep.mubr.bf16.mxu1 %v13173_v39  ;;  %11836 = vmatprep.subr.bf16.mxu1 %v14423_v48  ;;  %v11382_v48 = vshll.u32 %v11354_v16, 16  ;;  %v6424_v17 = vor.u32 %v6423_v44, %v6419_v37  ;;  %v6427_v39 = vshll.u32 %v6364_v19, 16  ;;  %v18822_v16 = vld [vmem:[#allocation11 + $0x8d0] ss:$8 sps:$4 sm:$0xff]   ;;  %v11412_v19 = vshll.u32 %v11358_v61, 16 }
 0x444   : > { %6846 = vmatprep.subr.bf16.mxu0 %v14433_v62  ;;  %v18802_v49 = vsel %vm16868_vm2, %v6401_v11, %v6405_v60  ;;  %v18844_v11 = vld [vmem:[#allocation11 + $0x8e0] ss:$8 sps:$4 sm:$0xff]  }
 0x445   : > { %11837 = vmatpush1.bf16.msra.mxu1 %v14421_v22  ;;  %v6391_v22 = vrot.slane %v6390_v51, 4  ;;  %v11384_v54 = vrot.slane %v11382_v48, 5  ;;  %v6425_v34 = vrot.slane %v6424_v17, 4  ;;  %v19753_v51 = vld [vmem:[#allocation41_spill] sm:$0xff]  ;;  %v11405_v17 = vrot.slane %v11403_v28, 4 }
 0x446   : > { %6847 = vmatpush1.bf16.msra.mxu0 %v14431_v57  ;;  %11838 = vmatprep.subr.bf16.mxu1 %v14427_v53  ;;  %v6414_v53 = vor.u32 %v6413_v32, %v6410_v6  ;;  %v19754_v6 = vld [vmem:[#allocation37_spill] sm:$0xff] }
 0x447   : > { %6848 = vmatprep.subr.bf16.mxu0 %v14437_v63  ;;  %v18795_v55 = vsel %vm16868_vm2, %v6391_v22, %v6395_v4  ;;  %v14518_v4 = vld [vmem:[#allocation2 + $0x290] sm:$0xff]  ;;  %v19755_v32 = vcombine.high %v19753_v51, %v19754_v6 }
 0x448   : > { %11272 = vmatmul.mubr.bf16.gmra.mrb[12].mxu1 %v13172_v2  ;;  %v6415_v13 = vrot.slane %v6414_v53, 4  ;;  %v12758_v41 = vcombine.low %v18795_v55, %v18802_v49  ;;  %v13178_v60 = vcombine.low %v14518_v4, %v14519_v59 }
 0x449   : > { %6287 = vmatmul.mubr.bf16.gmra.mrb[16].mxu0 %v12718_v46  ;;  %11839 = vmatpush1.bf16.msra.mxu1 %v14425_v0  ;;  %v19749_v0 = vld [vmem:[#allocation33_spill] sm:$0xff]  ;;  %v11356_v46 = vld [vmem:[#allocation2 + $0x1b0] sm:$0x11] }
 0x44a   : > { %6296 = vmatprep.mubr.bf16.mxu0 %v12721_v20  ;;  %6849 = vmatpush1.bf16.msra.mxu0 %v14435_v18  ;;  %v19751_v25 = vcombine.high %v19749_v0, %v19750_v27  ;;  %v6429_v20 = vrot.slane %v6427_v39, 5  ;;  %v18816_v38 = vsel %vm16868_vm2, %v6415_v13, %v6419_v37  ;;  %v11398_v52 = vshll.u32 %v11356_v46, 16  ;;  %v18827_v37 = vld [vmem:[#allocation11 + $0x8e4] ss:$8 sps:$4 sm:$0xff]  }
 0x44b   : > { %11281 = vmatprep.mubr.bf16.mxu1 %v13175_v15  ;;  %11840 = vmatprep.subr.bf16.mxu1 %v14433_v62  ;;  %v6365_v62 = vld [vmem:[#allocation2 + $0xb0] sm:$0xff]  ;;  %v11408_v39 = vrot.slane %v11406_v30, 5 }
 0x44c   : > { %6850 = vmatprep.subr.bf16.mxu0 %v14443_v14  ;;  %v6432_v2 = vshrl.u32 %v6365_v62, 16  ;;  %v6435_v45 = vshll.u32 %v6365_v62, 16  ;;  %v18831_v44 = vsel %vm16868_vm2, %v6425_v34, %v6429_v20  ;;  %v11400_v22 = vrot.slane %v11398_v52, 5 }
 0x44d   : > { %11841 = vmatpush1.bf16.msra.mxu1 %v14431_v57  ;;  %v11392_v57 = vshrl.u32 %v11355_v29, 16  ;;  %v12761_v48 = vcombine.high %v18816_v38, %v18831_v44  ;;  %v12760_v53 = vcombine.low %v18816_v38, %v18831_v44  ;;  %v19756_v34 = vcombine.low %v19753_v51, %v19754_v6 }
 0x44e   : > { %6851 = vmatpush1.bf16.msra.mxu0 %v14441_v1  ;;  %11842 = vmatprep.subr.bf16.mxu1 %v14437_v63  ;;  %v11381_v63 = vrot.slane %v11379_v31, 4  ;;  %v6434_v40 = vrot.slane %v6432_v2, 4  ;;  %v11416_v31 = vshrl.u32 %v11358_v61, 16  ;;  %v11409_v61 = vor.u32 %v11408_v39, %v11405_v17  ;;  %v6372_v39 = vld [vmem:[#allocation2 + $0x108] sm:$0xff] }
 0x44f   : > { %6852 = vmatprep.subr.bf16.mxu0 %v14447_v36  ;;  %v11394_v24 = vrot.slane %v11392_v57, 4  ;;  %v11361_v57 = vld [vmem:[#allocation2 + $0x1f8] sm:$0xff] }
 0x450   : > { %11282 = vmatmul.mubr.bf16.gmra.mrb[16].mxu1 %v13174_v10  ;;  %v11385_v15 = vor.u32 %v11384_v54, %v11381_v63  ;;  %v6437_v10 = vrot.slane %v6435_v45, 5  ;;  %v18849_v63 = vrot.slane %v11412_v19, 5  ;;  %v11418_v54 = vrot.slane %v11416_v31, 4  ;;  %v11359_v45 = vld [vmem:[#allocation2 + $0x1d8] sm:$0x11] }
 0x451   : > { %6297 = vmatmul.mubr.bf16.gmra.mrb[20].mxu0 %v12720_v9  ;;  %11843 = vmatpush1.bf16.msra.mxu1 %v14435_v18  ;;  %v6366_v18 = vld [vmem:[#allocation2 + $0xb8] sm:$0xff] }
 0x452   : > { %6306 = vmatprep.mubr.bf16.mxu0 %v19751_v25  ;;  %6853 = vmatpush1.bf16.msra.mxu0 %v14445_v23  ;;  %v6441_v47 = vshll.u32 %v6366_v18, 16  ;;  %v6445_v7 = vshrl.u32 %v6366_v18, 16  ;;  %v6368_v9 = vld [vmem:[#allocation2 + $0xd8] sm:$0xff]  ;;  %v11386_v35 = vrot.slane %v11385_v15, 4  ;;  %v6438_v62 = vor.u32 %v6437_v10, %v6434_v40 }
 0x453   : > { %11291 = vmatprep.mubr.bf16.mxu1 %v13177_v26  ;;  %11844 = vmatprep.subr.bf16.mxu1 %v14443_v14  ;;  %v18805_v14 = vrot.slane %v11388_v50, 5  ;;  %v6459_v25 = vshll.u32 %v6368_v9, 16  ;;  %v11360_v50 = vld [vmem:[#allocation2 + $0x1f0] sm:$0xff]  ;;  %v13180_v40 = vcombine.low %v18737_v5, %v18737_v5 }
 0x454   : > { %6854 = vmatprep.subr.bf16.mxu0 %v18783_v42  ;;  %v18837_v8 = vrot.slane %v6441_v47, 5  ;;  %v6447_v26 = vrot.slane %v6445_v7, 4  ;;  %v11427_v56 = vshrl.u32 %v11360_v50, 16  ;;  %v11430_v15 = vshll.u32 %v11360_v50, 16  ;;  %v14469_v47 = vld [vmem:[#allocation11 + $0x8f0] ss:$8 sps:$4 sm:$0xff]  }
 0x455   : > { %11845 = vmatpush1.bf16.msra.mxu1 %v14441_v1  ;;  %v19752_v1 = vcombine.low %v19749_v0, %v19750_v27  ;;  %v11395_v29 = vor.u32 %v11394_v24, %v18805_v14  ;;  %v6367_v0 = vld [vmem:[#allocation2 + $0xc0] sm:$0x11]  ;;  %v6456_v27 = vshrl.u32 %v6368_v9, 16  ;;  %v6461_v24 = vrot.slane %v6459_v25, 5 }
 0x456   : > { %6855 = vmatpush1.bf16.msra.mxu0 %v18788_v58  ;;  %11846 = vmatprep.subr.bf16.mxu1 %v14447_v36  ;;  %v13179_v36 = vcombine.high %v14518_v4, %v14519_v59  ;;  %v6451_v46 = vshll.u32 %v6367_v0, 16  ;;  %v6439_v7 = vrot.slane %v6438_v62, 4  ;;  %v11440_v4 = vshrl.u32 %v11361_v57, 16  ;;  %v11364_v9 = vld [vmem:[#allocation2 + $0x220] sm:$0xff] }
 0x457   : > { %6856 = vmatprep.subr.bf16.mxu0 %v18790_v43  ;;  %v11396_v2 = vrot.slane %v11395_v29, 4  ;;  %v6458_v20 = vrot.slane %v6456_v27, 4  ;;  %v11419_v59 = vor.u32 %v11418_v54, %v18849_v63  ;;  %v18867_v51 = vsel %vm16868_vm2, %v11386_v35, %v18805_v14 }
 0x458   : > { %11292 = vmatmul.mubr.bf16.gmra.mrb[20].mxu1 %v13176_v21  ;;  %v6448_v21 = vor.u32 %v6447_v26, %v18837_v8  ;;  %v11429_v28 = vrot.slane %v11427_v56, 4  ;;  %v11432_v30 = vrot.slane %v11430_v15, 5  ;;  %v11410_v14 = vrot.slane %v11409_v61, 4 }
 0x459   : > { %6307 = vmatmul.mubr.bf16.gmra.mrb[24].mxu0 %v19752_v1  ;;  %11847 = vmatpush1.bf16.msra.mxu1 %v14445_v23  ;;  %v12759_v23 = vcombine.high %v18795_v55, %v18802_v49  ;;  %v11436_v1 = vshll.u32 %v11361_v57, 16  ;;  %v6462_v10 = vor.u32 %v6461_v24, %v6458_v20  ;;  %v11442_v19 = vrot.slane %v11440_v4, 4  ;;  %v6371_v55 = vld [vmem:[#allocation2 + $0x100] sm:$0xff] }
 0x45a   : > { %6316 = vmatprep.mubr.bf16.mxu0 %v19755_v32  ;;  %6857 = vmatpush1.bf16.msra.mxu0 %v18798_v33  ;;  %v6449_v6 = vrot.slane %v6448_v21, 4  ;;  %v6453_v32 = vrot.slane %v6451_v46, 5  ;;  %v11460_v27 = vshll.u32 %v11364_v9, 16  ;;  %v11433_v17 = vor.u32 %v11432_v30, %v11429_v28 }
 0x45b   : > { %11301 = vmatprep.mubr.bf16.mxu1 %v13179_v36  ;;  %11848 = vmatprep.subr.bf16.mxu1 %v18783_v42  ;;  %v6369_v42 = vld [vmem:[#allocation2 + $0xe0] sm:$0xff]  ;;  %v11422_v36 = vshll.u32 %v11359_v45, 16  ;;  %v18878_v29 = vrot.slane %v11436_v1, 5  ;;  %v6463_v62 = vrot.slane %v6462_v10, 4  ;;  %v6480_v45 = vshrl.u32 %v6371_v55, 16 }
 0x45c   : > { %6858 = vmatprep.subr.bf16.mxu0 %v18807_v12  ;;  %v6465_v13 = vshll.u32 %v6369_v42, 16  ;;  %v6469_v18 = vshrl.u32 %v6369_v42, 16  ;;  %v11362_v42 = vld [vmem:[#allocation2 + $0x200] sm:$0x11]  ;;  %v11434_v46 = vrot.slane %v11433_v17, 4 }
 0x45d   : > { %11849 = vmatpush1.bf16.msra.mxu1 %v18788_v58  ;;  %v18847_v58 = vld [vmem:[#allocation11 + $0x8f4] ss:$8 sps:$4 sm:$0xff]   ;;  %v11424_v31 = vrot.slane %v11422_v36, 5  ;;  %v11443_v50 = vor.u32 %v11442_v19, %v18878_v29  ;;  %v11446_v57 = vshll.u32 %v11362_v42, 16 }
 0x45e   : > { %6859 = vmatpush1.bf16.msra.mxu0 %v18822_v16  ;;  %11850 = vmatprep.subr.bf16.mxu1 %v18790_v43  ;;  %v13181_v43 = vcombine.high %v18737_v5, %v18737_v5  ;;  %v6471_v52 = vrot.slane %v6469_v18, 4  ;;  %v18876_v5 = vsel %vm16868_vm2, %v6439_v7, %v18837_v8  ;;  %v11464_v8 = vshrl.u32 %v11364_v9, 16  ;;  %v18912_v7 = vld [vmem:[#allocation2 + $0x150] sm:$0xff] }
 0x45f   : > { %6860 = vmatprep.subr.bf16.mxu0 %v18827_v37  ;;  %v6489_v18 = vshll.u32 %v6372_v39, 16  ;;  %v11444_v20 = vrot.slane %v11443_v50, 4  ;;  %v11448_v24 = vrot.slane %v11446_v57, 5  ;;  %v6528_v10 = vshrl.u32 %v18912_v7, 16  ;;  %v6375_v9 = vld [vmem:[#allocation2 + $0x130] sm:$0xff] }
 0x460   : > { %11302 = vmatmul.mubr.bf16.gmra.mrb[24].mxu1 %v13178_v60  ;;  %v11466_v21 = vrot.slane %v11464_v8, 4  ;;  %v18936_v28 = vsel %vm16868_vm2, %v11434_v46, %v18878_v29 }
 0x461   : > { %6317 = vmatmul.mubr.bf16.gmra.mrb[28].mxu0 %v19756_v34  ;;  %11851 = vmatpush1.bf16.msra.mxu1 %v18798_v33  ;;  %v6467_v33 = vrot.slane %v6465_v13, 5  ;;  %v11365_v34 = vld [vmem:[#allocation2 + $0x228] sm:$0x11]  ;;  %v18940_v30 = vsel %vm16868_vm2, %v11444_v20, %v11448_v24  ;;  %v6376_v20 = vld [vmem:[#allocation2 + $0x138] sm:$0x11] }
 0x462   : > { %6861 = vmatpush1.bf16.msra.mxu0 %v18844_v11  ;;  %6864 = vmatprep.mubr.bf16.mxu0 %v12759_v23  ;;  %v6370_v23 = vld [vmem:[#allocation2 + $0xe8] sm:$0x11] }
 0x463   : > { %11852 = vmatprep.subr.bf16.mxu1 %v18807_v12  ;;  %6862 = vmatprep.subr.bf16.mxu0 %v18847_v58  ;;  %v11401_v12 = vsel %vm16868_vm2, %v11396_v2, %v11400_v22  ;;  %v6472_v35 = vor.u32 %v6471_v52, %v6467_v33  ;;  %v6475_v26 = vshll.u32 %v6370_v23, 16  ;;  %v11363_v22 = vld [vmem:[#allocation2 + $0x218] sm:$0xff]  ;;  %v18906_v2 = vrot.slane %v11460_v27, 5 }
 0x464   : > { %11311 = vmatprep.mubr.bf16.mxu1 %v13181_v43  ;;  %v13215_v0 = vcombine.high %v18867_v51, %v11401_v12  ;;  %v13214_v25 = vcombine.low %v18867_v51, %v11401_v12  ;;  %v11451_v49 = vshrl.u32 %v11363_v22, 16  ;;  %v6493_v43 = vshrl.u32 %v6372_v39, 16  ;;  %v11367_v51 = vld [vmem:[#allocation2 + $0x248] sm:$0xff] }
 0x465   : > { %11853 = vmatpush1.bf16.msra.mxu1 %v18822_v16  ;;  %v11420_v16 = vrot.slane %v11419_v59, 4  ;;  %v6473_v13 = vrot.slane %v6472_v35, 4  ;;  %v18924_v59 = vrot.slane %v6489_v18, 5  ;;  %v11470_v52 = vshll.u32 %v11365_v34, 16 }
 0x466   : > { %6863 = vmatpush1.bf16.msra.mxu0 %v14469_v47  ;;  %11854 = vmatprep.subr.bf16.mxu1 %v18827_v37  ;;  %v18883_v37 = vsel %vm16868_vm2, %v6449_v6, %v6453_v32  ;;  %v11453_v56 = vrot.slane %v11451_v49, 4  ;;  %v6495_v36 = vrot.slane %v6493_v43, 4  ;;  %v6373_v32 = vld [vmem:[#allocation2 + $0x110] sm:$0x11]  ;;  %v6482_v23 = vrot.slane %v6480_v45, 4 }
 0x467   : > { %v12763_v60 = vcombine.high %v18876_v5, %v18883_v37  ;;  %v18904_v54 = vsel %vm16868_vm2, %v11420_v16, %v11424_v31  ;;  %v11484_v19 = vshll.u32 %v11367_v51, 16  ;;  %v11488_v16 = vshrl.u32 %v11367_v51, 16 }
 0x468   : > { %11312 = vmatmul.mubr.bf16.gmra.mrb[28].mxu1 %v13180_v40  ;;  %v6374_v40 = vld [vmem:[#allocation2 + $0x128] sm:$0xff]  ;;  %v6496_v31 = vor.u32 %v6495_v36, %v18924_v59  ;;  %v6499_v35 = vshll.u32 %v6373_v32, 16  ;;  %v11472_v29 = vrot.slane %v11470_v52, 5  ;;  %v13219_v27 = vcombine.high %v18936_v28, %v18940_v30 }
 0x469   : > { %6865 = vmatmul.mubr.bf16.vlgmr.msra.gmra.mrb[0].mxu0 %v12758_v41  ;;  %11855 = vmatpush1.bf16.msra.mxu1 %v18844_v11  ;;  %v11454_v41 = vshll.u32 %v11363_v22, 16  ;;  %v18900_v11 = vsel %vm16868_vm2, %v11410_v14, %v18849_v63  ;;  %v6483_v63 = vshll.u32 %v6371_v55, 16  ;;  %v6507_v14 = vshll.u32 %v6374_v40, 16  ;;  %v6378_v55 = vld [vmem:[#allocation2 + $0x158] sm:$0xff] }
 0x46a   : > { %6874 = vmatprep.mubr.bf16.mxu0 %v12761_v48  ;;  %11858 = vmatprep.mubr.bf16.mxu1 %v13215_v0  ;;  %v6477_v48 = vrot.slane %v6475_v26, 5  ;;  %v13217_v61 = vcombine.high %v18900_v11, %v18904_v54  ;;  %v13216_v1 = vcombine.low %v18900_v11, %v18904_v54  ;;  %v18949_v50 = vrot.slane %v11484_v19, 5  ;;  %v11371_v19 = vld [vmem:[#allocation2 + $0x278] sm:$0x11] }
 0x46b   : > { %11856 = vmatprep.subr.bf16.mxu1 %v18847_v58  ;;  %v18910_v58 = vsel %vm16868_vm2, %v6463_v62, %v6467_v33  ;;  %v11456_v15 = vrot.slane %v11454_v41, 5  ;;  %v11467_v33 = vor.u32 %v11466_v21, %v18906_v2  ;;  %v6485_v12 = vrot.slane %v6483_v63, 5  ;;  %v11368_v62 = vld [vmem:[#allocation2 + $0x250] sm:$0x11] }
 0x46c   : > { %v18922_v4 = vsel %vm16868_vm2, %v6473_v13, %v6477_v48  ;;  %v6509_v39 = vrot.slane %v6507_v14, 5  ;;  %v11490_v57 = vrot.slane %v11488_v16, 4  ;;  %v6497_v49 = vrot.slane %v6496_v31, 4  ;;  %v11370_v13 = vld [vmem:[#allocation2 + $0x270] sm:$0xff] }
 0x46d   : > { %11857 = vmatpush1.bf16.msra.mxu1 %v14469_v47  ;;  %v12762_v47 = vcombine.low %v18876_v5, %v18883_v37  ;;  %v12765_v6 = vcombine.high %v18910_v58, %v18922_v4  ;;  %v12764_v38 = vcombine.low %v18910_v58, %v18922_v4  ;;  %v11457_v44 = vor.u32 %v11456_v15, %v11453_v56  ;;  %v11369_v15 = vld [vmem:[#allocation2 + $0x268] sm:$0xff] }
 0x46e   : > { %v6504_v5 = vshrl.u32 %v6374_v40, 16  ;;  %v11468_v26 = vrot.slane %v11467_v33, 4  ;;  %v6486_v42 = vor.u32 %v6485_v12, %v6482_v23  ;;  %v18945_v37 = vrot.slane %v6528_v10, 4 }
 0x46f   : > { %v11458_v8 = vrot.slane %v11457_v44, 4  ;;  %v6501_v41 = vrot.slane %v6499_v35, 5  ;;  %v6531_v54 = vshll.u32 %v18912_v7, 16  ;;  %v11494_v21 = vshll.u32 %v11368_v62, 16 }
 0x470   : > { %11859 = vmatmul.mubr.bf16.vlgmr.msra.gmra.mrb[0].mxu1 %v13214_v25  ;;  %v6513_v25 = vshll.u32 %v6375_v9, 16  ;;  %v6506_v17 = vrot.slane %v6504_v5, 4  ;;  %v18953_v11 = vsel %vm16868_vm2, %v11468_v26, %v11472_v29  ;;  %v6487_v48 = vrot.slane %v6486_v42, 4  ;;  %v11372_v29 = vld [vmem:[#allocation2 + $0x290] sm:$0xff]  ;;  %v11373_v42 = vld [vmem:[#allocation2 + $0x298] sm:$0xff] }
 0x471   : > { %6875 = vmatmul.mubr.bf16.gmra.mrb[4].mxu0 %v12760_v53  ;;  %11868 = vmatprep.mubr.bf16.mxu1 %v13217_v61  ;;  %v11366_v53 = vld [vmem:[#allocation2 + $0x240] sm:$0xff]  ;;  %v18959_v46 = vsel %vm16868_vm2, %v11458_v8, %v18906_v2  ;;  %v6537_v34 = vshll.u32 %v6378_v55, 16  ;;  %v11491_v56 = vor.u32 %v11490_v57, %v18949_v50  ;;  %v11508_v7 = vshll.u32 %v11370_v13, 16 }
 0x472   : > { %6884 = vmatprep.mubr.bf16.mxu0 %v12763_v60  ;;  %v11475_v22 = vshrl.u32 %v11366_v53, 16  ;;  %v11478_v0 = vshll.u32 %v11366_v53, 16  ;;  %v6517_v60 = vshrl.u32 %v6375_v9, 16  ;;  %v6515_v45 = vrot.slane %v6513_v25, 5  ;;  %v6381_v25 = vld [vmem:[#allocation2 + $0x180] sm:$0xff] }
 0x473   : > { %v6510_v24 = vor.u32 %v6509_v39, %v6506_v17  ;;  %v11512_v61 = vshrl.u32 %v11370_v13, 16  ;;  %v6533_v36 = vrot.slane %v6531_v54, 5  ;;  %v6541_v33 = vshrl.u32 %v6378_v55, 16 }
 0x474   : > { %v11477_v18 = vrot.slane %v11475_v22, 4  ;;  %v11480_v43 = vrot.slane %v11478_v0, 5  ;;  %v6519_v63 = vrot.slane %v6517_v60, 4  ;;  %v6492_v2 = vsel %vm16868_vm2, %v6487_v48, %v18924_v59 }
 0x475   : > { %v6502_v52 = vsel %vm16868_vm2, %v6497_v49, %v6501_v41  ;;  %v11496_v51 = vrot.slane %v11494_v21, 5  ;;  %v6523_v23 = vshll.u32 %v6376_v20, 16  ;;  %v11499_v12 = vshrl.u32 %v11369_v15, 16 }
 0x476   : > { %v11481_v40 = vor.u32 %v11480_v43, %v11477_v18  ;;  %v6520_v32 = vor.u32 %v6519_v63, %v6515_v45  ;;  %v11502_v10 = vshll.u32 %v11369_v15, 16  ;;  %v11492_v44 = vrot.slane %v11491_v56, 4 }
 0x477   : > { %v18975_v53 = vrot.slane %v11508_v7, 5  ;;  %v11514_v9 = vrot.slane %v11512_v61, 4  ;;  %v12767_v59 = vcombine.high %v6492_v2, %v6502_v52  ;;  %v18977_v5 = vrot.slane %v6537_v34, 5  ;;  %v11374_v61 = vld [vmem:[#allocation2 + $0x2a0] sm:$0x11] }
 0x478   : > { %11869 = vmatmul.mubr.bf16.gmra.mrb[4].mxu1 %v13216_v1  ;;  %v13221_v1 = vcombine.high %v18959_v46, %v18953_v11  ;;  %v11482_v16 = vrot.slane %v11481_v40, 4  ;;  %v6534_v31 = vor.u32 %v6533_v36, %v18945_v37  ;;  %v6543_v35 = vrot.slane %v6541_v33, 4 }
 0x479   : > { %6885 = vmatmul.mubr.bf16.gmra.mrb[8].mxu0 %v12762_v47  ;;  %11878 = vmatprep.mubr.bf16.mxu1 %v13219_v27  ;;  %v13218_v47 = vcombine.low %v18936_v28, %v18940_v30  ;;  %v18973_v28 = vld [vmem:[#allocation2 + $0x178] sm:$0xff]  ;;  %v6511_v30 = vrot.slane %v6510_v24, 4  ;;  %v6521_v22 = vrot.slane %v6520_v32, 4  ;;  %v6525_v0 = vrot.slane %v6523_v23, 5 }
 0x47a   : > { %6894 = vmatprep.mubr.bf16.mxu0 %v12765_v6  ;;  %v18971_v6 = vld [vmem:[#allocation2 + $0x160] sm:$0x11]  ;;  %v6552_v26 = vshrl.u32 %v18973_v28, 16  ;;  %v11501_v27 = vrot.slane %v11499_v12, 4  ;;  %v11504_v8 = vrot.slane %v11502_v10, 5  ;;  %v11497_v58 = vsel %vm16868_vm2, %v11492_v44, %v11496_v51 }
 0x47b   : > { %v6547_v14 = vshll.u32 %v18971_v6, 16  ;;  %v6516_v60 = vsel %vm16868_vm2, %v6511_v30, %v6515_v45  ;;  %v11515_v4 = vor.u32 %v11514_v9, %v18975_v53  ;;  %v11523_v37 = vshrl.u32 %v11372_v29, 16 }
 0x47c   : > { %v11526_v62 = vshll.u32 %v11372_v29, 16  ;;  %v11532_v17 = vshll.u32 %v11373_v42, 16  ;;  %v11536_v39 = vshrl.u32 %v11373_v42, 16  ;;  %v13220_v57 = vcombine.low %v18959_v46, %v18953_v11 }
 0x47d   : > { %v6544_v55 = vor.u32 %v6543_v35, %v18977_v5  ;;  %v6561_v49 = vshll.u32 %v6381_v25, 16  ;;  %v6565_v41 = vshrl.u32 %v6381_v25, 16  ;;  %v12766_v54 = vcombine.low %v6492_v2, %v6502_v52  ;;  %v11377_v35 = vld [vmem:[#allocation2 + $0x2c8] sm:$0x11] }
 0x47e   : > { %v6526_v13 = vsel %vm16868_vm2, %v6521_v22, %v6525_v0  ;;  %v11487_v48 = vsel %vm16868_vm2, %v11482_v16, %v18949_v50  ;;  %v11505_v18 = vor.u32 %v11504_v8, %v11501_v27  ;;  %v11516_v45 = vrot.slane %v11515_v4, 4 }
 0x47f   : > { %v12769_v43 = vcombine.high %v6516_v60, %v6526_v13  ;;  %v13223_v21 = vcombine.high %v11487_v48, %v11497_v58  ;;  %v11525_v34 = vrot.slane %v11523_v37, 4  ;;  %v11528_v11 = vrot.slane %v11526_v62, 5 }
 0x480   : > { %11879 = vmatmul.mubr.bf16.gmra.mrb[8].mxu1 %v13218_v47  ;;  %v11534_v46 = vrot.slane %v11532_v17, 5  ;;  %v11538_v20 = vrot.slane %v11536_v39, 4  ;;  %v6535_v24 = vrot.slane %v6534_v31, 4  ;;  %v6555_v56 = vshll.u32 %v18973_v28, 16  ;;  %v6382_v47 = vld [vmem:[#allocation2 + $0x188] sm:$0x11] }
 0x481   : > { %6895 = vmatmul.mubr.bf16.gmra.mrb[12].mxu0 %v12764_v38  ;;  %11888 = vmatprep.mubr.bf16.mxu1 %v13221_v1  ;;  %v11518_v38 = vshll.u32 %v11371_v19, 16  ;;  %v6563_v15 = vrot.slane %v6561_v49, 5  ;;  %v6567_v7 = vrot.slane %v6565_v41, 4  ;;  %v11506_v50 = vrot.slane %v11505_v18, 4  ;;  %v14520_v1 = vld [vmem:[#allocation2 + $0x10] sm:$0xff] }
 0x482   : > { %6904 = vmatprep.mubr.bf16.mxu0 %v12767_v59  ;;  %v11547_v36 = vshrl.u32 %v14520_v1, 16  ;;  %v11550_v33 = vshll.u32 %v14520_v1, 16  ;;  %v6545_v2 = vrot.slane %v6544_v55, 4  ;;  %v6549_v52 = vrot.slane %v6547_v14, 5 }
 0x483   : > { %v11520_v63 = vrot.slane %v11518_v38, 5  ;;  %v6554_v40 = vrot.slane %v6552_v26, 4  ;;  %v11529_v6 = vor.u32 %v11528_v11, %v11525_v34  ;;  %v11539_v32 = vor.u32 %v11538_v20, %v11534_v46 }
 0x484   : > { %v11542_v23 = vshll.u32 %v11374_v61, 16  ;;  %v6540_v12 = vsel %vm16868_vm2, %v6535_v24, %v18977_v5  ;;  %v6557_v10 = vrot.slane %v6555_v56, 5  ;;  %v6568_v28 = vor.u32 %v6567_v7, %v6563_v15 }
 0x485   : > { %v11521_v51 = vsel %vm16868_vm2, %v11516_v45, %v11520_v63  ;;  %v6571_v30 = vshll.u32 %v6382_v47, 16  ;;  %v13222_v44 = vcombine.low %v11487_v48, %v11497_v58  ;;  %v11511_v9 = vsel %vm16868_vm2, %v11506_v50, %v18975_v53 }
 0x486   : > { %v11549_v59 = vrot.slane %v11547_v36, 4  ;;  %v11552_v14 = vrot.slane %v11550_v33, 5  ;;  %v12768_v19 = vcombine.low %v6516_v60, %v6526_v13  ;;  %v6550_v16 = vsel %vm16868_vm2, %v6545_v2, %v6549_v52 }
 0x487   : > { %v13225_v31 = vcombine.high %v11511_v9, %v11521_v51  ;;  %v12771_v26 = vcombine.high %v6540_v12, %v6550_v16  ;;  %v11530_v29 = vrot.slane %v11529_v6, 4  ;;  %v11540_v5 = vrot.slane %v11539_v32, 4 }
 0x488   : > { %11889 = vmatmul.mubr.bf16.gmra.mrb[12].mxu1 %v13220_v57  ;;  %v11544_v42 = vrot.slane %v11542_v23, 5  ;;  %v6558_v22 = vor.u32 %v6557_v10, %v6554_v40  ;;  %v6569_v0 = vrot.slane %v6568_v28, 4  ;;  %v6573_v27 = vrot.slane %v6571_v30, 5 }
 0x489   : > { %6905 = vmatmul.mubr.bf16.gmra.mrb[16].mxu0 %v12766_v54  ;;  %11898 = vmatprep.mubr.bf16.mxu1 %v13223_v21  ;;  %v11553_v53 = vor.u32 %v11552_v14, %v11549_v59  ;;  %v11566_v8 = vshll.u32 %v11377_v35, 16  ;;  %v11535_v25 = vsel %vm16868_vm2, %v11530_v29, %v11534_v46  ;;  %v13224_v38 = vcombine.low %v11511_v9, %v11521_v51 }
 0x48a   : > { %6914 = vmatprep.mubr.bf16.mxu0 %v12769_v43  ;;  %v11545_v60 = vsel %vm16868_vm2, %v11540_v5, %v11544_v42  ;;  %v6559_v58 = vrot.slane %v6558_v22, 4  ;;  %v6574_v4 = vsel %vm16868_vm2, %v6569_v0, %v6573_v27  ;;  %v12770_v17 = vcombine.low %v6540_v12, %v6550_v16 }
 0x48b   : > { %v11554_v37 = vrot.slane %v11553_v53, 4  ;;  %v11568_v62 = vrot.slane %v11566_v8, 5  ;;  %v13227_v57 = vcombine.high %v11535_v25, %v11545_v60  ;;  %v13226_v13 = vcombine.low %v11535_v25, %v11545_v60 }
 0x48c   : > { %v6564_v39 = vsel %vm16868_vm2, %v6559_v58, %v6563_v15 }
 0x48d   : > { %v12773_v55 = vcombine.high %v6564_v39, %v6574_v4  ;;  %v11559_v49 = vsel %vm16868_vm2, %v11554_v37, %v11552_v14  ;;  %v11569_v41 = vsel %vm16868_vm2, %v11554_v37, %v11568_v62  ;;  %v12772_v48 = vcombine.low %v6564_v39, %v6574_v4 }
 0x48e   : > { %v13229_v54 = vcombine.high %v11559_v49, %v11569_v41  ;;  %v13228_v18 = vcombine.low %v11559_v49, %v11569_v41 }
 0x490   : > { %11899 = vmatmul.mubr.bf16.gmra.mrb[16].mxu1 %v13222_v44 }
 0x491   : > { %6915 = vmatmul.mubr.bf16.gmra.mrb[20].mxu0 %v12768_v19  ;;  %11908 = vmatprep.mubr.bf16.mxu1 %v13225_v31 }
 0x492   : > { %6924 = vmatprep.mubr.bf16.mxu0 %v12771_v26 }
 0x498   : > { %11909 = vmatmul.mubr.bf16.gmra.mrb[20].mxu1 %v13224_v38 }
 0x499   : > { %6925 = vmatmul.mubr.bf16.gmra.mrb[24].mxu0 %v12770_v17  ;;  %11918 = vmatprep.mubr.bf16.mxu1 %v13227_v57 }
 0x49a   : > { %6934 = vmatprep.mubr.bf16.mxu0 %v12773_v55 }
 0x4a0   : > { %11919 = vmatmul.mubr.bf16.gmra.mrb[24].mxu1 %v13226_v13 }
 0x4a1   : > { %6935 = vmatmul.mubr.bf16.gmra.mrb[28].mxu0 %v12772_v48  ;;  %11928 = vmatprep.mubr.bf16.mxu1 %v13229_v54 }
 0x4a8   : > { %11929 = vmatmul.mubr.bf16.gmra.mrb[28].mxu1 %v13228_v18 }
 0x4a9   : > { %14758 = shalt.err (!%p14755_p8)
}
 0x4aa   : > { %s14759_s19 = scalar_lea.hbm %s19027_s13, 8192  ;;  %s14763_s21 = scalar_lea.hbm %s19329_s7, 16384 }
 0x4ab   : > { %p14760_p10 = scmp.ne.s32.totalorder %s19027_s13, %s14759_s19  ;;  %p14764_p0 = scmp.lt.u32.totalorder %s19027_s13, %s19329_s7 }
 0x4ac   : > { %p14765_p5 = scmp.lt.u32.totalorder %s14763_s21, %s14759_s19  ;;  %p14767_p6 = scmp.lt.u32.totalorder %s14759_s19, %s19027_s13 }
 0x4ad   : > { %p14761_p4 = pnand %p14760_p10, %p19757_p9 }
 0x4ae   : > { %p14766_p7 = por %p14765_p5, %p14764_p0 }
 0x4af   : > { %p14762_p11 = pneg %p14761_p4 }
 0x4b0   : > { %p14768_p12 = por %p14767_p6, %p14766_p7 }
 0x4b2   : > { %p14769_p13 = pnand %p14768_p12, %p14762_p11 }
 0x4b4   : > { %14772 = shalt.err (!%p14769_p13)
}
 0x4b5   : > { %s14871_s20 = smov 256   ;;  %s14872_s15 = smov 16   ;;  %v2120_v3 = vld [vmem:[#allocation12] sm:$0x3]  ;;  %v2121_v43 = vld [vmem:[#allocation14] sm:$0x3] }
 0x4b6   : > { %13843 = dma.vmem_to_hbm [thread:$0]  (%p19757_p9), %s19030_s14, 8192, %s19027_s13, %s12100_s16, %s14871_s20, %s14871_s20, %s14872_s15   ;;  %v19758_v21 = vld [vmem:[#allocation28_spill] sm:$0xff]  ;;  %v19759_v63 = vld [vmem:[#allocation29_spill] sm:$0xff] }
 0x4b7   : > { %v19060_v45 = vrot.slane %v2120_v3, %v19758_v21  ;;  %v19063_v34 = vrot.slane %v2120_v3, %v19759_v63  ;;  %v19066_v11 = vrot.slane %v2121_v43, %v19758_v21  ;;  %v19069_v20 = vrot.slane %v2121_v43, %v19759_v63  ;;  %s19081_s26 = scalar_lea.vmem [#allocation16], %s12316_s12  ;;  %s19760_s13 = sshll.u32 %s14940_s11, 13 }
 0x4b8   : > { %s12134_s12 = sshll.u32 %s19081_s26, 4  ;;  %s19271_s19 = scalar_lea.hbm %s19330_s8, %s19760_s13  ;;  %s19273_s12 = int_to_ptr.vmem [resolvable:$true] %s12134_s12 }
 0x4b9   : > { %s12105_s10 = scalar_lea.sflag [#allocation17], %s15183_s25  ;;  %s14773_s9 = scalar_lea.vmem %s19273_s12, 8192 }
 0x4ba   : > { %p14774_p1 = scmp.ne.s32.totalorder %s19273_s12, %s14773_s9  ;;  %s14873_s21 = smov [#allocation16]  }
 0x4bb   : > { %s14777_s11 = sshll.u32 %s14873_s21, 4  ;;  %s14778_s11 = int_to_ptr.vmem [resolvable:$false] %s14777_s11 }
 0x4bc   : > { %p14775_p3 = pnand %p14774_p1, %p19757_p9  ;;  %s14779_s24 = scalar_lea.vmem %s14778_s11, 16384 }
 0x4bd   : > { %p14780_p8 = scmp.lt.s32.totalorder %s19273_s12, %s14778_s11  ;;  %p14781_p10 = scmp.lt.s32.totalorder %s14779_s24, %s14773_s9 }
 0x4be   : > { %p14776_p2 = pneg %p14775_p3 }
 0x4bf   : > { %p14782_p4 = por %p14781_p10, %p14780_p8 }
 0x4c1   : > { %p14783_p11 = pnand %p14782_p4, %p14776_p2 }
 0x53c   : > { %v6866_v46 = vpop.f32.mrb[0].mxu0 }
 0x53d   : > { %v6988_v24 = vmul.f32 %v19060_v45, %v6866_v46  ;;  %v6868_v56 = vpop.f32.mrb[1].mxu0 }
 0x53e   : > { %v6989_v15 = vmul.f32 %v19063_v34, %v6868_v56  ;;  %v6870_v7 = vpop.f32.mrb[2].mxu0 }
 0x53f   : > { %v7031_v61 = vadd.f32 %v19066_v11, %v6988_v24  ;;  %v6990_v50 = vmul.f32 %v19060_v45, %v6870_v7  ;;  %v6872_v47 = vpop.f32.mrb[3].mxu0 }
 0x540   : > { %v7032_v1 = vadd.f32 %v19069_v20, %v6989_v15  ;;  %v6991_v36 = vmul.f32 %v19063_v34, %v6872_v47 }
 0x541   : > { %v7063_v33 = vmax.f32 %v7031_v61, 0.0  ;;  %v7033_v2 = vadd.f32 %v19066_v11, %v6990_v50 }
 0x542   : > { %v7064_v52 = vmax.f32 %v7032_v1, 0.0  ;;  %v7034_v40 = vadd.f32 %v19069_v20, %v6991_v36 }
 0x543   : > { %7095 = vst [vmem:[%s19081_s26] sm:$0xff] %v7063_v33  ;;  %v7065_v51 = vmax.f32 %v7033_v2, 0.0  ;;  %v11860_v6 = vpop.f32.mrb[0].mxu1 }
 0x544   : > { %7096 = vst [vmem:[%s19081_s26 + $0x8] sm:$0xff] %v7064_v52  ;;  %v7066_v32 = vmax.f32 %v7034_v40, 0.0  ;;  %v6876_v23 = vpop.f32.mrb[4].mxu0  ;;  %v11971_v12 = vmul.f32 %v11860_v6, %v19060_v45  ;;  %v11862_v10 = vpop.f32.mrb[1].mxu1 }
 0x545   : > { %7097 = vst [vmem:[%s19081_s26 + $0x10] sm:$0xff] %v7065_v51  ;;  %v6992_v28 = vmul.f32 %v19060_v45, %v6876_v23  ;;  %v6878_v30 = vpop.f32.mrb[5].mxu0  ;;  %v11972_v44 = vmul.f32 %v11862_v10, %v19063_v34  ;;  %v11864_v9 = vpop.f32.mrb[2].mxu1 }
 0x546   : > { %7098 = vst [vmem:[%s19081_s26 + $0x18] sm:$0xff] %v7066_v32  ;;  %v12003_v59 = vadd.f32 %v11971_v12, %v19066_v11  ;;  %v6993_v14 = vmul.f32 %v19063_v34, %v6878_v30  ;;  %v6880_v19 = vpop.f32.mrb[6].mxu0  ;;  %v11973_v16 = vmul.f32 %v11864_v9, %v19060_v45  ;;  %v11866_v31 = vpop.f32.mrb[3].mxu1 }
 0x547   : > { %v7035_v35 = vadd.f32 %v19066_v11, %v6992_v28  ;;  %v12004_v26 = vadd.f32 %v11972_v44, %v19069_v20  ;;  %v6994_v29 = vmul.f32 %v19060_v45, %v6880_v19  ;;  %v6882_v5 = vpop.f32.mrb[7].mxu0  ;;  %v11974_v42 = vmul.f32 %v11866_v31, %v19063_v34 }
 0x548   : > { %v12035_v22 = vmax.f32 %v12003_v59, 0.0  ;;  %v7036_v0 = vadd.f32 %v19069_v20, %v6993_v14  ;;  %v12005_v27 = vadd.f32 %v11973_v16, %v19066_v11  ;;  %v6995_v53 = vmul.f32 %v19063_v34, %v6882_v5 }
 0x549   : > { %v7067_v8 = vmax.f32 %v7035_v35, 0.0  ;;  %v12036_v25 = vmax.f32 %v12004_v26, 0.0  ;;  %v7037_v60 = vadd.f32 %v19066_v11, %v6994_v29  ;;  %v12006_v58 = vadd.f32 %v11974_v42, %v19069_v20 }
 0x54a   : > { %12067 = vst [vmem:[%s19081_s26 + $0x100] sm:$0xff] %v12035_v22  ;;  %v7068_v4 = vmax.f32 %v7036_v0, 0.0  ;;  %v12037_v38 = vmax.f32 %v12005_v27, 0.0  ;;  %v7038_v37 = vadd.f32 %v19069_v20, %v6995_v53 }
 0x54b   : > { %7099 = vst [vmem:[%s19081_s26 + $0x20] sm:$0xff] %v7067_v8  ;;  %12068 = vst [vmem:[%s19081_s26 + $0x108] sm:$0xff] %v12036_v25  ;;  %v7069_v62 = vmax.f32 %v7037_v60, 0.0  ;;  %v12038_v17 = vmax.f32 %v12006_v58, 0.0  ;;  %v11870_v39 = vpop.f32.mrb[4].mxu1 }
 0x54c   : > { %7100 = vst [vmem:[%s19081_s26 + $0x28] sm:$0xff] %v7068_v4  ;;  %12069 = vst [vmem:[%s19081_s26 + $0x110] sm:$0xff] %v12037_v38  ;;  %v7070_v57 = vmax.f32 %v7038_v37, 0.0  ;;  %v6886_v55 = vpop.f32.mrb[8].mxu0  ;;  %v11975_v49 = vmul.f32 %v11870_v39, %v19060_v45  ;;  %v11872_v41 = vpop.f32.mrb[5].mxu1 }
 0x54d   : > { %7101 = vst [vmem:[%s19081_s26 + $0x30] sm:$0xff] %v7069_v62  ;;  %12070 = vst [vmem:[%s19081_s26 + $0x118] sm:$0xff] %v12038_v17  ;;  %v6996_v54 = vmul.f32 %v19060_v45, %v6886_v55  ;;  %v6888_v13 = vpop.f32.mrb[9].mxu0  ;;  %v11976_v48 = vmul.f32 %v11872_v41, %v19063_v34  ;;  %v11874_v18 = vpop.f32.mrb[6].mxu1 }
 0x54e   : > { %7102 = vst [vmem:[%s19081_s26 + $0x38] sm:$0xff] %v7070_v57  ;;  %v12007_v3 = vadd.f32 %v11975_v49, %v19066_v11  ;;  %v6997_v43 = vmul.f32 %v19063_v34, %v6888_v13  ;;  %v6890_v21 = vpop.f32.mrb[10].mxu0  ;;  %v11977_v63 = vmul.f32 %v11874_v18, %v19060_v45  ;;  %v11876_v46 = vpop.f32.mrb[7].mxu1 }
 0x54f   : > { %v7039_v24 = vadd.f32 %v19066_v11, %v6996_v54  ;;  %v12008_v56 = vadd.f32 %v11976_v48, %v19069_v20  ;;  %v6998_v15 = vmul.f32 %v19060_v45, %v6890_v21  ;;  %v6892_v7 = vpop.f32.mrb[11].mxu0  ;;  %v11978_v61 = vmul.f32 %v11876_v46, %v19063_v34 }
 0x550   : > { %v12039_v50 = vmax.f32 %v12007_v3, 0.0  ;;  %v7040_v47 = vadd.f32 %v19069_v20, %v6997_v43  ;;  %v12009_v1 = vadd.f32 %v11977_v63, %v19066_v11  ;;  %v6999_v36 = vmul.f32 %v19063_v34, %v6892_v7 }
 0x551   : > { %v7071_v33 = vmax.f32 %v7039_v24, 0.0  ;;  %v12040_v2 = vmax.f32 %v12008_v56, 0.0  ;;  %v7041_v52 = vadd.f32 %v19066_v11, %v6998_v15  ;;  %v12010_v40 = vadd.f32 %v11978_v61, %v19069_v20 }
 0x552   : > { %12071 = vst [vmem:[%s19081_s26 + $0x120] sm:$0xff] %v12039_v50  ;;  %v7072_v51 = vmax.f32 %v7040_v47, 0.0  ;;  %v12041_v6 = vmax.f32 %v12009_v1, 0.0  ;;  %v7042_v32 = vadd.f32 %v19069_v20, %v6999_v36 }
 0x553   : > { %7103 = vst [vmem:[%s19081_s26 + $0x40] sm:$0xff] %v7071_v33  ;;  %12072 = vst [vmem:[%s19081_s26 + $0x128] sm:$0xff] %v12040_v2  ;;  %v7073_v23 = vmax.f32 %v7041_v52, 0.0  ;;  %v12042_v12 = vmax.f32 %v12010_v40, 0.0  ;;  %v11880_v10 = vpop.f32.mrb[8].mxu1 }
 0x554   : > { %7104 = vst [vmem:[%s19081_s26 + $0x48] sm:$0xff] %v7072_v51  ;;  %12073 = vst [vmem:[%s19081_s26 + $0x130] sm:$0xff] %v12041_v6  ;;  %v7074_v28 = vmax.f32 %v7042_v32, 0.0  ;;  %v6896_v30 = vpop.f32.mrb[12].mxu0  ;;  %v11979_v44 = vmul.f32 %v11880_v10, %v19060_v45  ;;  %v11882_v9 = vpop.f32.mrb[9].mxu1 }
 0x555   : > { %7105 = vst [vmem:[%s19081_s26 + $0x50] sm:$0xff] %v7073_v23  ;;  %12074 = vst [vmem:[%s19081_s26 + $0x138] sm:$0xff] %v12042_v12  ;;  %v7000_v59 = vmul.f32 %v19060_v45, %v6896_v30  ;;  %v6898_v14 = vpop.f32.mrb[13].mxu0  ;;  %v11980_v19 = vmul.f32 %v11882_v9, %v19063_v34  ;;  %v11884_v16 = vpop.f32.mrb[10].mxu1 }
 0x556   : > { %7106 = vst [vmem:[%s19081_s26 + $0x58] sm:$0xff] %v7074_v28  ;;  %v12011_v31 = vadd.f32 %v11979_v44, %v19066_v11  ;;  %v7001_v35 = vmul.f32 %v19063_v34, %v6898_v14  ;;  %v6900_v26 = vpop.f32.mrb[14].mxu0  ;;  %v11981_v29 = vmul.f32 %v11884_v16, %v19060_v45  ;;  %v11886_v5 = vpop.f32.mrb[11].mxu1 }
 0x557   : > { %v7043_v42 = vadd.f32 %v19066_v11, %v7000_v59  ;;  %v12012_v22 = vadd.f32 %v11980_v19, %v19069_v20  ;;  %v7002_v0 = vmul.f32 %v19060_v45, %v6900_v26  ;;  %v6902_v27 = vpop.f32.mrb[15].mxu0  ;;  %v11982_v53 = vmul.f32 %v11886_v5, %v19063_v34 }
 0x558   : > { %v12043_v8 = vmax.f32 %v12011_v31, 0.0  ;;  %v7044_v25 = vadd.f32 %v19069_v20, %v7001_v35  ;;  %v12013_v60 = vadd.f32 %v11981_v29, %v19066_v11  ;;  %v7003_v58 = vmul.f32 %v19063_v34, %v6902_v27 }
 0x559   : > { %v7075_v4 = vmax.f32 %v7043_v42, 0.0  ;;  %v12044_v38 = vmax.f32 %v12012_v22, 0.0  ;;  %v7045_v37 = vadd.f32 %v19066_v11, %v7002_v0  ;;  %v12014_v62 = vadd.f32 %v11982_v53, %v19069_v20 }
 0x55a   : > { %12075 = vst [vmem:[%s19081_s26 + $0x140] sm:$0xff] %v12043_v8  ;;  %v7076_v17 = vmax.f32 %v7044_v25, 0.0  ;;  %v12045_v39 = vmax.f32 %v12013_v60, 0.0  ;;  %v7046_v57 = vadd.f32 %v19069_v20, %v7003_v58 }
 0x55b   : > { %7107 = vst [vmem:[%s19081_s26 + $0x60] sm:$0xff] %v7075_v4  ;;  %12076 = vst [vmem:[%s19081_s26 + $0x148] sm:$0xff] %v12044_v38  ;;  %v7077_v55 = vmax.f32 %v7045_v37, 0.0  ;;  %v12046_v49 = vmax.f32 %v12014_v62, 0.0  ;;  %v11890_v41 = vpop.f32.mrb[12].mxu1 }
 0x55c   : > { %7108 = vst [vmem:[%s19081_s26 + $0x68] sm:$0xff] %v7076_v17  ;;  %12077 = vst [vmem:[%s19081_s26 + $0x150] sm:$0xff] %v12045_v39  ;;  %v7078_v54 = vmax.f32 %v7046_v57, 0.0  ;;  %v6906_v13 = vpop.f32.mrb[16].mxu0  ;;  %v11983_v48 = vmul.f32 %v11890_v41, %v19060_v45  ;;  %v11892_v18 = vpop.f32.mrb[13].mxu1 }
 0x55d   : > { %7109 = vst [vmem:[%s19081_s26 + $0x70] sm:$0xff] %v7077_v55  ;;  %12078 = vst [vmem:[%s19081_s26 + $0x158] sm:$0xff] %v12046_v49  ;;  %v7004_v3 = vmul.f32 %v19060_v45, %v6906_v13  ;;  %v6908_v43 = vpop.f32.mrb[17].mxu0  ;;  %v11984_v21 = vmul.f32 %v11892_v18, %v19063_v34  ;;  %v11894_v63 = vpop.f32.mrb[14].mxu1 }
 0x55e   : > { %7110 = vst [vmem:[%s19081_s26 + $0x78] sm:$0xff] %v7078_v54  ;;  %v12015_v46 = vadd.f32 %v11983_v48, %v19066_v11  ;;  %v7005_v24 = vmul.f32 %v19063_v34, %v6908_v43  ;;  %v6910_v56 = vpop.f32.mrb[18].mxu0  ;;  %v11985_v15 = vmul.f32 %v11894_v63, %v19060_v45  ;;  %v11896_v7 = vpop.f32.mrb[15].mxu1 }
 0x55f   : > { %v7047_v61 = vadd.f32 %v19066_v11, %v7004_v3  ;;  %v12016_v50 = vadd.f32 %v11984_v21, %v19069_v20  ;;  %v7006_v47 = vmul.f32 %v19060_v45, %v6910_v56  ;;  %v6912_v1 = vpop.f32.mrb[19].mxu0  ;;  %v11986_v36 = vmul.f32 %v11896_v7, %v19063_v34 }
 0x560   : > { %v12047_v33 = vmax.f32 %v12015_v46, 0.0  ;;  %v7048_v2 = vadd.f32 %v19069_v20, %v7005_v24  ;;  %v12017_v52 = vadd.f32 %v11985_v15, %v19066_v11  ;;  %v7007_v40 = vmul.f32 %v19063_v34, %v6912_v1 }
 0x561   : > { %v7079_v51 = vmax.f32 %v7047_v61, 0.0  ;;  %v12048_v6 = vmax.f32 %v12016_v50, 0.0  ;;  %v7049_v32 = vadd.f32 %v19066_v11, %v7006_v47  ;;  %v12018_v23 = vadd.f32 %v11986_v36, %v19069_v20 }
 0x562   : > { %12079 = vst [vmem:[%s19081_s26 + $0x160] sm:$0xff] %v12047_v33  ;;  %v7080_v12 = vmax.f32 %v7048_v2, 0.0  ;;  %v12049_v10 = vmax.f32 %v12017_v52, 0.0  ;;  %v7050_v28 = vadd.f32 %v19069_v20, %v7007_v40 }
 0x563   : > { %7111 = vst [vmem:[%s19081_s26 + $0x80] sm:$0xff] %v7079_v51  ;;  %12080 = vst [vmem:[%s19081_s26 + $0x168] sm:$0xff] %v12048_v6  ;;  %v7081_v30 = vmax.f32 %v7049_v32, 0.0  ;;  %v12050_v44 = vmax.f32 %v12018_v23, 0.0  ;;  %v11900_v9 = vpop.f32.mrb[16].mxu1 }
 0x564   : > { %7112 = vst [vmem:[%s19081_s26 + $0x88] sm:$0xff] %v7080_v12  ;;  %12081 = vst [vmem:[%s19081_s26 + $0x170] sm:$0xff] %v12049_v10  ;;  %v7082_v59 = vmax.f32 %v7050_v28, 0.0  ;;  %v6916_v14 = vpop.f32.mrb[20].mxu0  ;;  %v11987_v19 = vmul.f32 %v11900_v9, %v19060_v45  ;;  %v11902_v16 = vpop.f32.mrb[17].mxu1 }
 0x565   : > { %7113 = vst [vmem:[%s19081_s26 + $0x90] sm:$0xff] %v7081_v30  ;;  %12082 = vst [vmem:[%s19081_s26 + $0x178] sm:$0xff] %v12050_v44  ;;  %v7008_v31 = vmul.f32 %v19060_v45, %v6916_v14  ;;  %v6918_v35 = vpop.f32.mrb[21].mxu0  ;;  %v11988_v26 = vmul.f32 %v11902_v16, %v19063_v34  ;;  %v11904_v29 = vpop.f32.mrb[18].mxu1 }
 0x566   : > { %7114 = vst [vmem:[%s19081_s26 + $0x98] sm:$0xff] %v7082_v59  ;;  %v12019_v5 = vadd.f32 %v11987_v19, %v19066_v11  ;;  %v7009_v42 = vmul.f32 %v19063_v34, %v6918_v35  ;;  %v6920_v22 = vpop.f32.mrb[22].mxu0  ;;  %v11989_v0 = vmul.f32 %v11904_v29, %v19060_v45  ;;  %v11906_v27 = vpop.f32.mrb[19].mxu1 }
 0x567   : > { %v7051_v53 = vadd.f32 %v19066_v11, %v7008_v31  ;;  %v12020_v8 = vadd.f32 %v11988_v26, %v19069_v20  ;;  %v7010_v25 = vmul.f32 %v19060_v45, %v6920_v22  ;;  %v6922_v60 = vpop.f32.mrb[23].mxu0  ;;  %v11990_v58 = vmul.f32 %v11906_v27, %v19063_v34 }
 0x568   : > { %v12051_v4 = vmax.f32 %v12019_v5, 0.0  ;;  %v7052_v38 = vadd.f32 %v19069_v20, %v7009_v42  ;;  %v12021_v37 = vadd.f32 %v11989_v0, %v19066_v11  ;;  %v7011_v62 = vmul.f32 %v19063_v34, %v6922_v60 }
 0x569   : > { %v7083_v17 = vmax.f32 %v7051_v53, 0.0  ;;  %v12052_v39 = vmax.f32 %v12020_v8, 0.0  ;;  %v7053_v57 = vadd.f32 %v19066_v11, %v7010_v25  ;;  %v12022_v55 = vadd.f32 %v11990_v58, %v19069_v20 }
 0x56a   : > { %12083 = vst [vmem:[%s19081_s26 + $0x180] sm:$0xff] %v12051_v4  ;;  %v7084_v49 = vmax.f32 %v7052_v38, 0.0  ;;  %v12053_v41 = vmax.f32 %v12021_v37, 0.0  ;;  %v7054_v54 = vadd.f32 %v19069_v20, %v7011_v62 }
 0x56b   : > { %7115 = vst [vmem:[%s19081_s26 + $0xa0] sm:$0xff] %v7083_v17  ;;  %12084 = vst [vmem:[%s19081_s26 + $0x188] sm:$0xff] %v12052_v39  ;;  %v7085_v13 = vmax.f32 %v7053_v57, 0.0  ;;  %v12054_v48 = vmax.f32 %v12022_v55, 0.0  ;;  %v11910_v18 = vpop.f32.mrb[20].mxu1 }
 0x56c   : > { %7116 = vst [vmem:[%s19081_s26 + $0xa8] sm:$0xff] %v7084_v49  ;;  %12085 = vst [vmem:[%s19081_s26 + $0x190] sm:$0xff] %v12053_v41  ;;  %v7086_v3 = vmax.f32 %v7054_v54, 0.0  ;;  %v6926_v43 = vpop.f32.mrb[24].mxu0  ;;  %v11991_v21 = vmul.f32 %v11910_v18, %v19060_v45  ;;  %v11912_v63 = vpop.f32.mrb[21].mxu1 }
 0x56d   : > { %7117 = vst [vmem:[%s19081_s26 + $0xb0] sm:$0xff] %v7085_v13  ;;  %12086 = vst [vmem:[%s19081_s26 + $0x198] sm:$0xff] %v12054_v48  ;;  %v7012_v46 = vmul.f32 %v19060_v45, %v6926_v43  ;;  %v6928_v24 = vpop.f32.mrb[25].mxu0  ;;  %v11992_v56 = vmul.f32 %v11912_v63, %v19063_v34  ;;  %v11914_v15 = vpop.f32.mrb[22].mxu1 }
 0x56e   : > { %7118 = vst [vmem:[%s19081_s26 + $0xb8] sm:$0xff] %v7086_v3  ;;  %v12023_v7 = vadd.f32 %v11991_v21, %v19066_v11  ;;  %v7013_v61 = vmul.f32 %v19063_v34, %v6928_v24  ;;  %v6930_v50 = vpop.f32.mrb[26].mxu0  ;;  %v11993_v47 = vmul.f32 %v11914_v15, %v19060_v45  ;;  %v11916_v1 = vpop.f32.mrb[23].mxu1 }
 0x56f   : > { %v7055_v36 = vadd.f32 %v19066_v11, %v7012_v46  ;;  %v12024_v33 = vadd.f32 %v11992_v56, %v19069_v20  ;;  %v7014_v2 = vmul.f32 %v19060_v45, %v6930_v50  ;;  %v6932_v52 = vpop.f32.mrb[27].mxu0  ;;  %v11994_v40 = vmul.f32 %v11916_v1, %v19063_v34 }
 0x570   : > { %v12055_v51 = vmax.f32 %v12023_v7, 0.0  ;;  %v7056_v6 = vadd.f32 %v19069_v20, %v7013_v61  ;;  %v12025_v32 = vadd.f32 %v11993_v47, %v19066_v11  ;;  %v7015_v23 = vmul.f32 %v19063_v34, %v6932_v52 }
 0x571   : > { %v7087_v12 = vmax.f32 %v7055_v36, 0.0  ;;  %v12056_v10 = vmax.f32 %v12024_v33, 0.0  ;;  %v7057_v28 = vadd.f32 %v19066_v11, %v7014_v2  ;;  %v12026_v30 = vadd.f32 %v11994_v40, %v19069_v20 }
 0x572   : > { %12087 = vst [vmem:[%s19081_s26 + $0x1a0] sm:$0xff] %v12055_v51  ;;  %v7088_v44 = vmax.f32 %v7056_v6, 0.0  ;;  %v12057_v9 = vmax.f32 %v12025_v32, 0.0  ;;  %v7058_v59 = vadd.f32 %v19069_v20, %v7015_v23 }
 0x573   : > { %7119 = vst [vmem:[%s19081_s26 + $0xc0] sm:$0xff] %v7087_v12  ;;  %12088 = vst [vmem:[%s19081_s26 + $0x1a8] sm:$0xff] %v12056_v10  ;;  %v7089_v14 = vmax.f32 %v7057_v28, 0.0  ;;  %v12058_v19 = vmax.f32 %v12026_v30, 0.0  ;;  %v11920_v16 = vpop.f32.mrb[24].mxu1 }
 0x574   : > { %7120 = vst [vmem:[%s19081_s26 + $0xc8] sm:$0xff] %v7088_v44  ;;  %12089 = vst [vmem:[%s19081_s26 + $0x1b0] sm:$0xff] %v12057_v9  ;;  %v7090_v31 = vmax.f32 %v7058_v59, 0.0  ;;  %v6936_v35 = vpop.f32.mrb[28].mxu0  ;;  %v11995_v26 = vmul.f32 %v11920_v16, %v19060_v45  ;;  %v11922_v29 = vpop.f32.mrb[25].mxu1 }
 0x575   : > { %7121 = vst [vmem:[%s19081_s26 + $0xd0] sm:$0xff] %v7089_v14  ;;  %12090 = vst [vmem:[%s19081_s26 + $0x1b8] sm:$0xff] %v12058_v19  ;;  %v7016_v5 = vmul.f32 %v19060_v45, %v6936_v35  ;;  %v6938_v42 = vpop.f32.mrb[29].mxu0  ;;  %v11996_v22 = vmul.f32 %v11922_v29, %v19063_v34  ;;  %v11924_v0 = vpop.f32.mrb[26].mxu1 }
 0x576   : > { %7122 = vst [vmem:[%s19081_s26 + $0xd8] sm:$0xff] %v7090_v31  ;;  %v12027_v27 = vadd.f32 %v11995_v26, %v19066_v11  ;;  %v7017_v53 = vmul.f32 %v19063_v34, %v6938_v42  ;;  %v6940_v8 = vpop.f32.mrb[30].mxu0  ;;  %v11997_v25 = vmul.f32 %v11924_v0, %v19060_v45  ;;  %v11926_v60 = vpop.f32.mrb[27].mxu1 }
 0x577   : > { %v7059_v58 = vadd.f32 %v19066_v11, %v7016_v5  ;;  %v12028_v4 = vadd.f32 %v11996_v22, %v19069_v20  ;;  %v7018_v38 = vmul.f32 %v19060_v45, %v6940_v8  ;;  %v6942_v37 = vpop.f32.mrb[31].mxu0  ;;  %v11998_v62 = vmul.f32 %v11926_v60, %v19063_v34 }
 0x578   : > { %v12059_v17 = vmax.f32 %v12027_v27, 0.0  ;;  %v7060_v39 = vadd.f32 %v19069_v20, %v7017_v53  ;;  %v12029_v57 = vadd.f32 %v11997_v25, %v19066_v11  ;;  %v7019_v55 = vmul.f32 %v19063_v34, %v6942_v37 }
 0x579   : > { %v7091_v49 = vmax.f32 %v7059_v58, 0.0  ;;  %v12060_v41 = vmax.f32 %v12028_v4, 0.0  ;;  %v7061_v54 = vadd.f32 %v19066_v11, %v7018_v38  ;;  %v12030_v13 = vadd.f32 %v11998_v62, %v19069_v20 }
 0x57a   : > { %12091 = vst [vmem:[%s19081_s26 + $0x1c0] sm:$0xff] %v12059_v17  ;;  %v7092_v48 = vmax.f32 %v7060_v39, 0.0  ;;  %v12061_v18 = vmax.f32 %v12029_v57, 0.0  ;;  %v7062_v3 = vadd.f32 %v19069_v20, %v7019_v55 }
 0x57b   : > { %7123 = vst [vmem:[%s19081_s26 + $0xe0] sm:$0xff] %v7091_v49  ;;  %12092 = vst [vmem:[%s19081_s26 + $0x1c8] sm:$0xff] %v12060_v41  ;;  %v7093_v43 = vmax.f32 %v7061_v54, 0.0  ;;  %v12062_v21 = vmax.f32 %v12030_v13, 0.0  ;;  %v11930_v63 = vpop.f32.mrb[28].mxu1 }
 0x57c   : > { %7124 = vst [vmem:[%s19081_s26 + $0xe8] sm:$0xff] %v7092_v48  ;;  %12093 = vst [vmem:[%s19081_s26 + $0x1d0] sm:$0xff] %v12061_v18  ;;  %v7094_v46 = vmax.f32 %v7062_v3, 0.0  ;;  %v11999_v24 = vmul.f32 %v11930_v63, %v19060_v45  ;;  %v11932_v56 = vpop.f32.mrb[29].mxu1 }
 0x57d   : > { %7125 = vst [vmem:[%s19081_s26 + $0xf0] sm:$0xff] %v7093_v43  ;;  %12094 = vst [vmem:[%s19081_s26 + $0x1d8] sm:$0xff] %v12062_v21  ;;  %v12000_v15 = vmul.f32 %v11932_v56, %v19063_v34  ;;  %v11934_v7 = vpop.f32.mrb[30].mxu1 }
 0x57e   : > { %7126 = vst [vmem:[%s19081_s26 + $0xf8] sm:$0xff] %v7094_v46  ;;  %v12031_v61 = vadd.f32 %v11999_v24, %v19066_v11  ;;  %v12001_v50 = vmul.f32 %v11934_v7, %v19060_v45  ;;  %v11936_v47 = vpop.f32.mrb[31].mxu1 }
 0x57f   : > { %v12032_v1 = vadd.f32 %v12000_v15, %v19069_v20  ;;  %v12002_v36 = vmul.f32 %v11936_v47, %v19063_v34 }
 0x580   : > { %v12063_v33 = vmax.f32 %v12031_v61, 0.0  ;;  %v12033_v2 = vadd.f32 %v12001_v50, %v19066_v11 }
 0x581   : > { %v12064_v52 = vmax.f32 %v12032_v1, 0.0  ;;  %v12034_v40 = vadd.f32 %v12002_v36, %v19069_v20 }
 0x582   : > { %12095 = vst [vmem:[%s19081_s26 + $0x1e0] sm:$0xff] %v12063_v33  ;;  %v12065_v51 = vmax.f32 %v12033_v2, 0.0 }
 0x583   : > { %12096 = vst [vmem:[%s19081_s26 + $0x1e8] sm:$0xff] %v12064_v52  ;;  %v12066_v6 = vmax.f32 %v12034_v40, 0.0 }
 0x584   : > { %12097 = vst [vmem:[%s19081_s26 + $0x1f0] sm:$0xff] %v12065_v51 }
 0x585   : > { %12098 = vst [vmem:[%s19081_s26 + $0x1f8] sm:$0xff] %v12066_v6 }
 0x586   : > { %14786 = shalt.err (!%p14783_p11)
}
 0x587   : > { %s14787_s26 = scalar_lea.hbm %s19271_s19, 8192  ;;  %s14791_s16 = scalar_lea.hbm %s19330_s8, 16384 }
 0x588   : > { %p14788_p0 = scmp.ne.s32.totalorder %s19271_s19, %s14787_s26  ;;  %p14792_p6 = scmp.lt.u32.totalorder %s19271_s19, %s19330_s8 }
 0x589   : > { %p14793_p12 = scmp.lt.u32.totalorder %s14791_s16, %s14787_s26  ;;  %p14795_p1 = scmp.lt.u32.totalorder %s14787_s26, %s19271_s19 }
 0x58a   : > { %p14789_p5 = pnand %p14788_p0, %p19757_p9 }
 0x58b   : > { %p14794_p13 = por %p14793_p12, %p14792_p6 }
 0x58c   : > { %p14790_p7 = pneg %p14789_p5 }
 0x58d   : > { %p14796_p3 = por %p14795_p1, %p14794_p13 }
 0x58f   : > { %p14797_p2 = pnand %p14796_p3, %p14790_p7 }
 0x591   : > { %14800 = shalt.err (!%p14797_p2)
}
 0x592   : > { %13844 = dma.vmem_to_hbm [thread:$0]  (%p19757_p9), %s19273_s12, 8192, %s19271_s19, %s12105_s10, %s14871_s20, %s14871_s20, %s14872_s15  }
 0x593 PF: > { %s12149_s9 = sand.u32 1, %s14843_s27   ;;  %p19761_p8 = scmp.ne.s32.totalorder %s19477_s23, 0 }
 0x594   : > { %p19762_p10 = scmp.ge.s32.totalorder %s14855_s30, 2  ;;  %s12150_s24 = scalar_lea.sflag [#allocation5], %s12149_s9 }
 0x596   : > { %p13871_p4 = pnand %p19762_p10, %p19761_p8 }
 0x598   : > { %14834 = dma.done.wait (!%p13871_p4), %s12150_s24, 8192  }
 0x599   : > { %14836 = vsyncadd (!%p13871_p4), %s12150_s24, 4294959104  ;;  %s12159_s22 = scalar_lea.sflag [#allocation17], %s12149_s9 }
 0x59a   : > { %14838 = dma.done.wait (!%p13871_p4), %s12159_s22, 8192  }
 0x59b   : > { %14840 = vsyncadd (!%p13871_p4), %s12159_s22, 4294959104  ;;  %p28_p9 = scmp.ge.s32.totalorder %s15101_s17, 4   ;;  %s19763_s27 = smov %s14847_s28 }
 0x59c   : > { %s19764_s28 = smov %s14851_s29  ;;  %s19765_s29 = smov %s15112_s18 }
 0x59d   : > { %s19766_s30 = smov %s15101_s17  ;;  %30 = sbr.rel (!%p28_p9) target bundleno = 10 (0xa), region = 151 }
 0x5a4   :  { %12164 = vsyncpa [#allocation4], 1 }
 0x5a5   :  { %12166 = vsyncpa [#allocation4 + $0x1], 1 }
 0x5a6   :  { %12167 = vsyncpa [#allocation7], 1 }
 0x5a7   :  { %12168 = vsyncpa [#allocation10], 1 }
 0x5a8   :  { %12169 = vsyncpa [#allocation13], 1 }
 0x5a9   :  { %12170 = vsyncpa [#allocation5], 1 }
 0x5aa   :  { %12172 = vsyncpa [#allocation5 + $0x1], 1 }
 0x5ab   :  { %12173 = vsyncpa [#allocation17], 1 }
 0x5ac   :  { %12175 = vsyncpa [#allocation17 + $0x1], 1 }

</bundles_post_ra>
